<compile_context>
chip_gen: v7x
topology: tpu7x:2x2x1
jax: 0.10.0
libtpu: 0.0.40
codegen_flags: <defaults>
</compile_context>

<pallas_src>
import numpy as np

import jax
import jax.numpy as jnp
from jax import lax
from jax.experimental import pallas as pl
from jax.experimental.pallas import tpu as pltpu

# ---- hyperparameters (match the PyTorch module) ----
VOCAB = 65
VOCAB_PAD = 128              # lane-dense logits width (sliced back to 65 outside)
N_EMBD = 32
BLOCK_SIZE = 8               # T
N_LAYER = 6
N_HEAD = 4                   # TransformerBlock is constructed with n_head=4
HEAD_DIM = N_EMBD // N_HEAD  # 8
FF_HIDDEN = 4 * N_EMBD       # 128
LN_EPS = 1e-5
# NOTE: the PyTorch AttentionHead scales scores by the GLOBAL head_size
# (= n_embd = 32), NOT by the per-head dim (8).  Reproduce that quirk exactly.
ATTN_SCALE = float(N_EMBD) ** -0.5

LAYER_KEYS = ("ln1g", "ln1b", "wq", "wk", "wv", "wproj", "bproj",
              "ln2g", "ln2b", "w1", "b1", "w2", "b2")


def _layernorm(x, g, b):
    # x: (N, C), g/b: (1, C); PyTorch LayerNorm (biased variance, eps=1e-5)
    mu = jnp.mean(x, axis=-1, keepdims=True)
    var = jnp.mean(jnp.square(x - mu), axis=-1, keepdims=True)
    return (x - mu) * lax.rsqrt(var + LN_EPS) * g + b


def transformer_kernel(
    idx_ref,                     # (rows, 1) int32   token ids for this slab
    tok_emb_ref,                 # (VOCAB, C)
    pos_ref,                     # (rows, C)         position embeddings, pre-tiled
    mask_ref,                    # (rows, rows)      additive block-diag causal bias
    ln1g_ref, ln1b_ref,          # (L, 1, C)
    wq_ref, wk_ref, wv_ref,      # (L, H, C, D)      per-head projections
    wproj_ref, bproj_ref,        # (L, H, D, C), (L, 1, C)
    ln2g_ref, ln2b_ref,          # (L, 1, C)
    w1_ref, b1_ref,              # (L, C, 4C), (L, 1, 4C)
    w2_ref, b2_ref,              # (L, 4C, C), (L, 1, C)
    lnfg_ref, lnfb_ref,          # (1, C)
    wlm_ref, blm_ref,            # (C, VOCAB_PAD), (1, VOCAB_PAD)  zero-padded
    out_ref,                     # (rows, VOCAB_PAD)
):
    rows = idx_ref.shape[0]

    # ---- in-kernel embedding lookup: one-hot matmul (gather-free, exact) ----
    vocab_iota = lax.broadcasted_iota(jnp.int32, (rows, VOCAB), 1)
    tok_onehot = (idx_ref[...] == vocab_iota).astype(jnp.float32)      # (rows, V)
    x = (jnp.dot(tok_onehot, tok_emb_ref[...],
                 preferred_element_type=jnp.float32)
         + pos_ref[...])                                               # (rows, C)

    mask_bias = mask_ref[...]                                          # (rows, rows)

    for l in range(N_LAYER):
        # ---- multi-headed causal self-attention on layer_norm_1(x) ----
        h_in = _layernorm(x, ln1g_ref[l], ln1b_ref[l])                 # (rows, C)
        # Leading-batch form for head-batched matmuls (per-layer value, so the
        # broadcast is necessary work, not a hoistable constant).
        h_b = jnp.broadcast_to(h_in[None, :, :], (N_HEAD, rows, N_EMBD))
        q = jnp.einsum("hnc,hcd->hnd", h_b, wq_ref[l],
                       preferred_element_type=jnp.float32)             # (H, rows, D)
        k = jnp.einsum("hnc,hcd->hnd", h_b, wk_ref[l],
                       preferred_element_type=jnp.float32)
        v = jnp.einsum("hnc,hcd->hnd", h_b, wv_ref[l],
                       preferred_element_type=jnp.float32)

        s = jnp.einsum("hnd,hmd->hnm", q, k,
                       preferred_element_type=jnp.float32)             # (H, rows, rows)
        s = s * ATTN_SCALE + mask_bias                                 # additive mask
        m = jnp.max(s, axis=-1, keepdims=True)
        e = jnp.exp(s - m)
        denom = jnp.sum(e, axis=-1, keepdims=True)
        # EUP reciprocal; approx=True would also work but is kept exact so the
        # 1e-3 check against the f32 reference stays tight.
        w = e * pl.reciprocal(denom, approx=False)
        # attention dropout: identity in eval mode
        ctx = jnp.einsum("hnm,hmd->hnd", w, v,
                         preferred_element_type=jnp.float32)           # (H, rows, D)
        # concat-heads @ Wproj  ==  sum_h ctx_h @ Wproj_h   (no concatenate)
        sa = jnp.sum(jnp.einsum("hnd,hdc->hnc", ctx, wproj_ref[l],
                                preferred_element_type=jnp.float32), axis=0)
        x = x + sa + bproj_ref[l]                                      # residual

        # ---- feed-forward on layer_norm_2(x) ----
        f_in = _layernorm(x, ln2g_ref[l], ln2b_ref[l])
        hdn = jnp.dot(f_in, w1_ref[l],
                      preferred_element_type=jnp.float32) + b1_ref[l]
        hdn = jnp.maximum(hdn, 0.0)                                    # ReLU
        x = x + jnp.dot(hdn, w2_ref[l],
                        preferred_element_type=jnp.float32) + b2_ref[l]

    x = _layernorm(x, lnfg_ref[...], lnfb_ref[...])
    logits = jnp.dot(x, wlm_ref[...],
                     preferred_element_type=jnp.float32) + blm_ref[...]
    out_ref[...] = logits.astype(out_ref.dtype)                        # lane-dense store


def bigram_lm_forward(idx, params, *, batch_groups=2):
    """Forward pass: idx (B, T) int32 -> (logits (B, T, VOCAB), None).

    batch_groups: number of grid steps the batch is split into (2 keeps both
    v7x TensorCores busy; use 1 for a fully collapsed grid on v5e/v6e).
    """
    B, T = idx.shape
    assert T == BLOCK_SIZE
    if B % batch_groups != 0:
        batch_groups = 1
    b_per_step = B // batch_groups
    rows = b_per_step * T                        # sublanes per grid step

    # token ids as a (B*T, 1) i32 column (compared against an iota in-kernel)
    idx2d = idx.reshape(B * T, 1).astype(jnp.int32)

    # hoisted constants: per-step position rows + additive block-diag causal mask
    pos_rows = jnp.tile(params["pos_emb"], (b_per_step, 1))             # (rows, C)
    n = np.arange(rows)
    allowed = ((n[:, None] // T) == (n[None, :] // T)) & \
              ((n[:, None] % T) >= (n[None, :] % T))
    mask_bias = jnp.asarray(np.where(allowed, 0.0, -np.inf).astype(np.float32))

    # lane-dense lm head: pad 65 -> 128 output lanes with zeros
    wlm_pad = jnp.pad(params["wlm"], ((0, 0), (0, VOCAB_PAD - VOCAB)))
    blm_pad = jnp.pad(params["blm"], ((0, 0), (0, VOCAB_PAD - VOCAB)))

    operands = ([params["tok_emb"], pos_rows, mask_bias]
                + [params[k] for k in LAYER_KEYS]
                + [params["lnfg"], params["lnfb"], wlm_pad, blm_pad])

    def const_spec(a):
        return pl.BlockSpec(a.shape, lambda g, _nd=a.ndim: (0,) * _nd)

    in_specs = ([pl.BlockSpec((rows, 1), lambda g: (g, 0))]
                + [const_spec(a) for a in operands])
    out_spec = pl.BlockSpec((rows, VOCAB_PAD), lambda g: (g, 0))

    logits_pad = pl.pallas_call(
        transformer_kernel,
        out_shape=jax.ShapeDtypeStruct((B * T, VOCAB_PAD), jnp.float32),
        grid=(batch_groups,),
        in_specs=in_specs,
        out_specs=out_spec,
        compiler_params=pltpu.CompilerParams(dimension_semantics=("parallel",)),
    )(idx2d, *operands)

    logits = logits_pad.reshape(B, T, VOCAB_PAD)[..., :VOCAB]
    return logits, None   # targets=None -> loss=None


# ---------------- deterministic parameter init ----------------
def init_params(key):
    ks = iter(jax.random.split(key, 512))

    def lin_w(fan_in, fan_out):
        bound = 1.0 / (fan_in ** 0.5)
        return jax.random.uniform(next(ks), (fan_in, fan_out), jnp.float32,
                                  -bound, bound)

    def lin_b(fan_in, fan_out):
        bound = 1.0 / (fan_in ** 0.5)
        return jax.random.uniform(next(ks), (fan_out,), jnp.float32,
                                  -bound, bound)

    p = {
        "tok_emb": jax.random.normal(next(ks), (VOCAB, N_EMBD), jnp.float32),
        "pos_emb": jax.random.normal(next(ks), (BLOCK_SIZE, N_EMBD), jnp.float32),
    }

    per_layer = {k: [] for k in LAYER_KEYS}
    for _ in range(N_LAYER):
        per_layer["ln1g"].append(jnp.ones((1, N_EMBD), jnp.float32))
        per_layer["ln1b"].append(jnp.zeros((1, N_EMBD), jnp.float32))
        # per-head (32 -> 8, no bias) projections, stacked head-major (H, C, D)
        per_layer["wq"].append(jnp.stack(
            [lin_w(N_EMBD, HEAD_DIM) for _ in range(N_HEAD)], axis=0))
        per_layer["wk"].append(jnp.stack(
            [lin_w(N_EMBD, HEAD_DIM) for _ in range(N_HEAD)], axis=0))
        per_layer["wv"].append(jnp.stack(
            [lin_w(N_EMBD, HEAD_DIM) for _ in range(N_HEAD)], axis=0))
        # output projection stored as (H, D, C) = reshape of the (C, C) matrix
        per_layer["wproj"].append(
            lin_w(N_EMBD, N_EMBD).reshape(N_HEAD, HEAD_DIM, N_EMBD))
        per_layer["bproj"].append(lin_b(N_EMBD, N_EMBD)[None, :])
        per_layer["ln2g"].append(jnp.ones((1, N_EMBD), jnp.float32))
        per_layer["ln2b"].append(jnp.zeros((1, N_EMBD), jnp.float32))
        per_layer["w1"].append(lin_w(N_EMBD, FF_HIDDEN))
        per_layer["b1"].append(lin_b(N_EMBD, FF_HIDDEN)[None, :])
        per_layer["w2"].append(lin_w(FF_HIDDEN, N_EMBD))
        per_layer["b2"].append(lin_b(FF_HIDDEN, N_EMBD)[None, :])
    for k, v in per_layer.items():
        p[k] = jnp.stack(v, axis=0)

    p["lnfg"] = jnp.ones((1, N_EMBD), jnp.float32)
    p["lnfb"] = jnp.zeros((1, N_EMBD), jnp.float32)
    p["wlm"] = lin_w(N_EMBD, VOCAB)
    p["blm"] = lin_b(N_EMBD, VOCAB)[None, :]
    return p


# ---------------- pure-JAX reference (for correctness check) ----------------
def reference_forward(idx, params):
    B, T = idx.shape
    x = params["tok_emb"][idx] + params["pos_emb"][:T]
    causal = jnp.tril(jnp.ones((T, T), bool))

    def ln(x, g, b):
        mu = x.mean(-1, keepdims=True)
        var = ((x - mu) ** 2).mean(-1, keepdims=True)
        return (x - mu) / jnp.sqrt(var + LN_EPS) * g + b

    for l in range(N_LAYER):
        h_in = ln(x, params["ln1g"][l], params["ln1b"][l])
        outs = []
        for h in range(N_HEAD):
            q = h_in @ params["wq"][l, h]
            k = h_in @ params["wk"][l, h]
            v = h_in @ params["wv"][l, h]
            sc = jnp.einsum("btd,bsd->bts", q, k) * ATTN_SCALE
            sc = jnp.where(causal, sc, -jnp.inf)
            w = jax.nn.softmax(sc, axis=-1)
            outs.append(jnp.einsum("bts,bsd->btd", w, v))
        sa = jnp.concatenate(outs, axis=-1)
        wproj2d = params["wproj"][l].reshape(N_EMBD, N_EMBD)
        x = x + sa @ wproj2d + params["bproj"][l]
        f_in = ln(x, params["ln2g"][l], params["ln2b"][l])
        ffh = jax.nn.relu(f_in @ params["w1"][l] + params["b1"][l])
        x = x + ffh @ params["w2"][l] + params["b2"][l]

    x = ln(x, params["lnfg"], params["lnfb"])
    return x @ params["wlm"] + params["blm"]


if __name__ == "__main__":
    key = jax.random.PRNGKey(0)
    kp, ki = jax.random.split(key)
    params = init_params(kp)

    B, T = 4, BLOCK_SIZE
    idx = jax.random.randint(ki, (B, T), 0, VOCAB, dtype=jnp.int32)

    logits, loss = bigram_lm_forward(idx, params)
    logits = jax.block_until_ready(logits)
    assert logits.shape == (B, T, VOCAB) and loss is None

    ref = reference_forward(idx, params)
    assert jnp.allclose(logits, ref, atol=1e-3, rtol=1e-3), "mismatch vs reference"

    # TODO(synk): training loss (cross-entropy) and generate()'s multinomial
    # sampling loop are host-side control flow, left outside the kernel.
    print("KERNEL_OK")
</pallas_src>

<mosaic_0001>
module attributes {stable_mosaic.version = 11 : i64} {
  func.func @transformer_kernel(%arg0: i32, %arg1: memref<16x1xi32, #tpu.memory_space<vmem>>, %arg2: memref<65x32xf32, #tpu.memory_space<vmem>>, %arg3: memref<16x32xf32, #tpu.memory_space<vmem>>, %arg4: memref<16x16xf32, #tpu.memory_space<vmem>>, %arg5: memref<6x1x32xf32, #tpu.memory_space<vmem>>, %arg6: memref<6x1x32xf32, #tpu.memory_space<vmem>>, %arg7: memref<6x4x32x8xf32, #tpu.memory_space<vmem>>, %arg8: memref<6x4x32x8xf32, #tpu.memory_space<vmem>>, %arg9: memref<6x4x32x8xf32, #tpu.memory_space<vmem>>, %arg10: memref<6x4x8x32xf32, #tpu.memory_space<vmem>>, %arg11: memref<6x1x32xf32, #tpu.memory_space<vmem>>, %arg12: memref<6x1x32xf32, #tpu.memory_space<vmem>>, %arg13: memref<6x1x32xf32, #tpu.memory_space<vmem>>, %arg14: memref<6x32x128xf32, #tpu.memory_space<vmem>>, %arg15: memref<6x1x128xf32, #tpu.memory_space<vmem>>, %arg16: memref<6x128x32xf32, #tpu.memory_space<vmem>>, %arg17: memref<6x1x32xf32, #tpu.memory_space<vmem>>, %arg18: memref<1x32xf32, #tpu.memory_space<vmem>>, %arg19: memref<1x32xf32, #tpu.memory_space<vmem>>, %arg20: memref<32x128xf32, #tpu.memory_space<vmem>>, %arg21: memref<1x128xf32, #tpu.memory_space<vmem>>, %arg22: memref<16x128xf32, #tpu.memory_space<vmem>>) attributes {dimension_semantics = [#tpu.dimension_semantics<parallel>], iteration_bounds = array<i64: 2>, scalar_prefetch = 0 : i64, scratch_operands = 0 : i64, tpu.core_type = #tpu.core_type<tc>, window_params = [{transform_indices = @transform_0, window_bounds = array<i64: 16, 1>}, {pipeline_mode = #tpu.pipeline_mode<synchronous>, transform_indices = @transform_1, window_bounds = array<i64: 65, 32>}, {pipeline_mode = #tpu.pipeline_mode<synchronous>, transform_indices = @transform_2, window_bounds = array<i64: 16, 32>}, {pipeline_mode = #tpu.pipeline_mode<synchronous>, transform_indices = @transform_3, window_bounds = array<i64: 16, 16>}, {pipeline_mode = #tpu.pipeline_mode<synchronous>, transform_indices = @transform_4, window_bounds = array<i64: 6, 1, 32>}, {pipeline_mode = #tpu.pipeline_mode<synchronous>, transform_indices = @transform_5, window_bounds = array<i64: 6, 1, 32>}, {pipeline_mode = #tpu.pipeline_mode<synchronous>, transform_indices = @transform_6, window_bounds = array<i64: 6, 4, 32, 8>}, {pipeline_mode = #tpu.pipeline_mode<synchronous>, transform_indices = @transform_7, window_bounds = array<i64: 6, 4, 32, 8>}, {pipeline_mode = #tpu.pipeline_mode<synchronous>, transform_indices = @transform_8, window_bounds = array<i64: 6, 4, 32, 8>}, {pipeline_mode = #tpu.pipeline_mode<synchronous>, transform_indices = @transform_9, window_bounds = array<i64: 6, 4, 8, 32>}, {pipeline_mode = #tpu.pipeline_mode<synchronous>, transform_indices = @transform_10, window_bounds = array<i64: 6, 1, 32>}, {pipeline_mode = #tpu.pipeline_mode<synchronous>, transform_indices = @transform_11, window_bounds = array<i64: 6, 1, 32>}, {pipeline_mode = #tpu.pipeline_mode<synchronous>, transform_indices = @transform_12, window_bounds = array<i64: 6, 1, 32>}, {pipeline_mode = #tpu.pipeline_mode<synchronous>, transform_indices = @transform_13, window_bounds = array<i64: 6, 32, 128>}, {pipeline_mode = #tpu.pipeline_mode<synchronous>, transform_indices = @transform_14, window_bounds = array<i64: 6, 1, 128>}, {pipeline_mode = #tpu.pipeline_mode<synchronous>, transform_indices = @transform_15, window_bounds = array<i64: 6, 128, 32>}, {pipeline_mode = #tpu.pipeline_mode<synchronous>, transform_indices = @transform_16, window_bounds = array<i64: 6, 1, 32>}, {pipeline_mode = #tpu.pipeline_mode<synchronous>, transform_indices = @transform_17, window_bounds = array<i64: 1, 32>}, {pipeline_mode = #tpu.pipeline_mode<synchronous>, transform_indices = @transform_18, window_bounds = array<i64: 1, 32>}, {pipeline_mode = #tpu.pipeline_mode<synchronous>, transform_indices = @transform_19, window_bounds = array<i64: 32, 128>}, {pipeline_mode = #tpu.pipeline_mode<synchronous>, transform_indices = @transform_20, window_bounds = array<i64: 1, 128>}, {transform_indices = @transform_21, window_bounds = array<i64: 16, 128>}]} {
    %0 = tpu.iota {dimensions = array<i32: 1>} : vector<16x65xi32>
    %c0 = arith.constant 0 : index
    %c0_0 = arith.constant 0 : index
    %1 = vector.load %arg1[%c0, %c0_0] : memref<16x1xi32, #tpu.memory_space<vmem>>, vector<16x1xi32>
    %2 = vector.broadcast %1 : vector<16x1xi32> to vector<16x65xi32>
    %3 = arith.cmpi eq, %2, %0 : vector<16x65xi32>
    %4 = arith.extui %3 : vector<16x65xi1> to vector<16x65xi32>
    %5 = arith.sitofp %4 : vector<16x65xi32> to vector<16x65xf32>
    %c0_1 = arith.constant 0 : index
    %c0_2 = arith.constant 0 : index
    %6 = vector.load %arg2[%c0_1, %c0_2] : memref<65x32xf32, #tpu.memory_space<vmem>>, vector<65x32xf32>
    %cst = arith.constant dense<0.000000e+00> : vector<16x32xf32>
    %7 = tpu.matmul %5, %6, %cst {dimension_numbers = #tpu.dot_dimension_numbers<[1], [0], [0], [1], [0, 0, 1, 1], [], []>} : vector<16x65xf32>, vector<65x32xf32>, vector<16x32xf32> -> vector<16x32xf32>
    %c0_3 = arith.constant 0 : index
    %c0_4 = arith.constant 0 : index
    %8 = vector.load %arg3[%c0_3, %c0_4] : memref<16x32xf32, #tpu.memory_space<vmem>>, vector<16x32xf32>
    %9 = arith.addf %7, %8 : vector<16x32xf32>
    %c0_5 = arith.constant 0 : index
    %c0_6 = arith.constant 0 : index
    %10 = vector.load %arg4[%c0_5, %c0_6] : memref<16x16xf32, #tpu.memory_space<vmem>>, vector<16x16xf32>
    %c0_7 = arith.constant 0 : index
    %c0_8 = arith.constant 0 : index
    %c0_9 = arith.constant 0 : index
    %11 = vector.load %arg5[%c0_7, %c0_8, %c0_9] : memref<6x1x32xf32, #tpu.memory_space<vmem>>, vector<1x1x32xf32>
    %12 = vector.shape_cast %11 : vector<1x1x32xf32> to vector<1x32xf32>
    %c0_10 = arith.constant 0 : index
    %c0_11 = arith.constant 0 : index
    %c0_12 = arith.constant 0 : index
    %13 = vector.load %arg6[%c0_10, %c0_11, %c0_12] : memref<6x1x32xf32, #tpu.memory_space<vmem>>, vector<1x1x32xf32>
    %14 = vector.shape_cast %13 : vector<1x1x32xf32> to vector<1x32xf32>
    %cst_13 = arith.constant dense<0.000000e+00> : vector<16xf32>
    %15 = vector.multi_reduction <add>, %9, %cst_13 [1] : vector<16x32xf32> to vector<16xf32>
    %16 = vector.shape_cast %15 : vector<16xf32> to vector<16x1xf32>
    %cst_14 = arith.constant 3.200000e+01 : f32
    %17 = vector.broadcast %cst_14 : f32 to vector<16x1xf32>
    %18 = arith.divf %16, %17 : vector<16x1xf32>
    %19 = vector.broadcast %18 : vector<16x1xf32> to vector<16x32xf32>
    %20 = arith.subf %9, %19 : vector<16x32xf32>
    %21 = arith.mulf %20, %20 : vector<16x32xf32>
    %cst_15 = arith.constant dense<0.000000e+00> : vector<16xf32>
    %22 = vector.multi_reduction <add>, %21, %cst_15 [1] : vector<16x32xf32> to vector<16xf32>
    %23 = vector.shape_cast %22 : vector<16xf32> to vector<16x1xf32>
    %cst_16 = arith.constant 3.200000e+01 : f32
    %24 = vector.broadcast %cst_16 : f32 to vector<16x1xf32>
    %25 = arith.divf %23, %24 : vector<16x1xf32>
    %26 = vector.broadcast %18 : vector<16x1xf32> to vector<16x32xf32>
    %27 = arith.subf %9, %26 : vector<16x32xf32>
    %cst_17 = arith.constant 9.99999974E-6 : f32
    %28 = vector.broadcast %cst_17 : f32 to vector<16x1xf32>
    %29 = arith.addf %25, %28 : vector<16x1xf32>
    %30 = math.rsqrt %29 : vector<16x1xf32>
    %31 = vector.broadcast %30 : vector<16x1xf32> to vector<16x32xf32>
    %32 = arith.mulf %27, %31 : vector<16x32xf32>
    %33 = vector.broadcast %12 : vector<1x32xf32> to vector<16x32xf32>
    %34 = arith.mulf %32, %33 : vector<16x32xf32>
    %35 = vector.broadcast %14 : vector<1x32xf32> to vector<16x32xf32>
    %36 = arith.addf %34, %35 : vector<16x32xf32>
    %37 = vector.shape_cast %36 : vector<16x32xf32> to vector<1x16x32xf32>
    %38 = vector.shape_cast %37 : vector<1x16x32xf32> to vector<1x16x32xf32>
    %39 = vector.broadcast %38 : vector<1x16x32xf32> to vector<4x16x32xf32>
    %c0_18 = arith.constant 0 : index
    %c0_19 = arith.constant 0 : index
    %c0_20 = arith.constant 0 : index
    %c0_21 = arith.constant 0 : index
    %40 = vector.load %arg7[%c0_18, %c0_19, %c0_20, %c0_21] : memref<6x4x32x8xf32, #tpu.memory_space<vmem>>, vector<1x4x32x8xf32>
    %41 = vector.shape_cast %40 : vector<1x4x32x8xf32> to vector<4x32x8xf32>
    "tpu.trace_start"() <{level = 10 : i32, message = "hnc,hcd->hnd"}> : () -> ()
    %cst_22 = arith.constant dense<0.000000e+00> : vector<4x16x8xf32>
    %42 = tpu.matmul %39, %41, %cst_22 {dimension_numbers = #tpu.dot_dimension_numbers<[2], [1], [1], [2], [0, 0, 0, 1, 1, 2], [0], [0]>} : vector<4x16x32xf32>, vector<4x32x8xf32>, vector<4x16x8xf32> -> vector<4x16x8xf32>
    "tpu.trace_stop"() : () -> ()
    %c0_23 = arith.constant 0 : index
    %c0_24 = arith.constant 0 : index
    %c0_25 = arith.constant 0 : index
    %c0_26 = arith.constant 0 : index
    %43 = vector.load %arg8[%c0_23, %c0_24, %c0_25, %c0_26] : memref<6x4x32x8xf32, #tpu.memory_space<vmem>>, vector<1x4x32x8xf32>
    %44 = vector.shape_cast %43 : vector<1x4x32x8xf32> to vector<4x32x8xf32>
    "tpu.trace_start"() <{level = 10 : i32, message = "hnc,hcd->hnd"}> : () -> ()
    %cst_27 = arith.constant dense<0.000000e+00> : vector<4x16x8xf32>
    %45 = tpu.matmul %39, %44, %cst_27 {dimension_numbers = #tpu.dot_dimension_numbers<[2], [1], [1], [2], [0, 0, 0, 1, 1, 2], [0], [0]>} : vector<4x16x32xf32>, vector<4x32x8xf32>, vector<4x16x8xf32> -> vector<4x16x8xf32>
    "tpu.trace_stop"() : () -> ()
    %c0_28 = arith.constant 0 : index
    %c0_29 = arith.constant 0 : index
    %c0_30 = arith.constant 0 : index
    %c0_31 = arith.constant 0 : index
    %46 = vector.load %arg9[%c0_28, %c0_29, %c0_30, %c0_31] : memref<6x4x32x8xf32, #tpu.memory_space<vmem>>, vector<1x4x32x8xf32>
    %47 = vector.shape_cast %46 : vector<1x4x32x8xf32> to vector<4x32x8xf32>
    "tpu.trace_start"() <{level = 10 : i32, message = "hnc,hcd->hnd"}> : () -> ()
    %cst_32 = arith.constant dense<0.000000e+00> : vector<4x16x8xf32>
    %48 = tpu.matmul %39, %47, %cst_32 {dimension_numbers = #tpu.dot_dimension_numbers<[2], [1], [1], [2], [0, 0, 0, 1, 1, 2], [0], [0]>} : vector<4x16x32xf32>, vector<4x32x8xf32>, vector<4x16x8xf32> -> vector<4x16x8xf32>
    "tpu.trace_stop"() : () -> ()
    "tpu.trace_start"() <{level = 10 : i32, message = "hnd,hmd->hnm"}> : () -> ()
    %cst_33 = arith.constant dense<0.000000e+00> : vector<4x16x16xf32>
    %49 = tpu.matmul %42, %45, %cst_33 {dimension_numbers = #tpu.dot_dimension_numbers<[2], [2], [1], [1], [0, 0, 0, 1, 1, 1], [0], [0]>} : vector<4x16x8xf32>, vector<4x16x8xf32>, vector<4x16x16xf32> -> vector<4x16x16xf32>
    "tpu.trace_stop"() : () -> ()
    %cst_34 = arith.constant 0.176776692 : f32
    %50 = vector.broadcast %cst_34 : f32 to vector<4x16x16xf32>
    %51 = arith.mulf %49, %50 : vector<4x16x16xf32>
    %52 = vector.shape_cast %10 : vector<16x16xf32> to vector<1x16x16xf32>
    %53 = vector.broadcast %52 : vector<1x16x16xf32> to vector<4x16x16xf32>
    %54 = arith.addf %51, %53 : vector<4x16x16xf32>
    %cst_35 = arith.constant dense<0xFF800000> : vector<4x16xf32>
    %55 = vector.multi_reduction <maximumf>, %54, %cst_35 [2] : vector<4x16x16xf32> to vector<4x16xf32>
    %56 = vector.shape_cast %55 : vector<4x16xf32> to vector<4x16x1xf32>
    %57 = vector.broadcast %56 : vector<4x16x1xf32> to vector<4x16x16xf32>
    %58 = arith.subf %54, %57 : vector<4x16x16xf32>
    %59 = math.exp %58 : vector<4x16x16xf32>
    %cst_36 = arith.constant dense<0.000000e+00> : vector<4x16xf32>
    %60 = vector.multi_reduction <add>, %59, %cst_36 [2] : vector<4x16x16xf32> to vector<4x16xf32>
    %61 = vector.shape_cast %60 : vector<4x16xf32> to vector<4x16x1xf32>
    %62 = tpu.reciprocal %61 : vector<4x16x1xf32> -> vector<4x16x1xf32>
    %63 = vector.broadcast %62 : vector<4x16x1xf32> to vector<4x16x16xf32>
    %64 = arith.mulf %59, %63 : vector<4x16x16xf32>
    "tpu.trace_start"() <{level = 10 : i32, message = "hnm,hmd->hnd"}> : () -> ()
    %cst_37 = arith.constant dense<0.000000e+00> : vector<4x16x8xf32>
    %65 = tpu.matmul %64, %48, %cst_37 {dimension_numbers = #tpu.dot_dimension_numbers<[2], [1], [1], [2], [0, 0, 0, 1, 1, 2], [0], [0]>} : vector<4x16x16xf32>, vector<4x16x8xf32>, vector<4x16x8xf32> -> vector<4x16x8xf32>
    "tpu.trace_stop"() : () -> ()
    %c0_38 = arith.constant 0 : index
    %c0_39 = arith.constant 0 : index
    %c0_40 = arith.constant 0 : index
    %c0_41 = arith.constant 0 : index
    %66 = vector.load %arg10[%c0_38, %c0_39, %c0_40, %c0_41] : memref<6x4x8x32xf32, #tpu.memory_space<vmem>>, vector<1x4x8x32xf32>
    %67 = vector.shape_cast %66 : vector<1x4x8x32xf32> to vector<4x8x32xf32>
    "tpu.trace_start"() <{level = 10 : i32, message = "hnd,hdc->hnc"}> : () -> ()
    %cst_42 = arith.constant dense<0.000000e+00> : vector<4x16x32xf32>
    %68 = tpu.matmul %65, %67, %cst_42 {dimension_numbers = #tpu.dot_dimension_numbers<[2], [1], [1], [2], [0, 0, 0, 1, 1, 2], [0], [0]>} : vector<4x16x8xf32>, vector<4x8x32xf32>, vector<4x16x32xf32> -> vector<4x16x32xf32>
    "tpu.trace_stop"() : () -> ()
    %cst_43 = arith.constant dense<0.000000e+00> : vector<16x32xf32>
    %69 = vector.multi_reduction <add>, %68, %cst_43 [0] : vector<4x16x32xf32> to vector<16x32xf32>
    %70 = arith.addf %9, %69 : vector<16x32xf32>
    %c0_44 = arith.constant 0 : index
    %c0_45 = arith.constant 0 : index
    %c0_46 = arith.constant 0 : index
    %71 = vector.load %arg11[%c0_44, %c0_45, %c0_46] : memref<6x1x32xf32, #tpu.memory_space<vmem>>, vector<1x1x32xf32>
    %72 = vector.shape_cast %71 : vector<1x1x32xf32> to vector<1x32xf32>
    %73 = vector.broadcast %72 : vector<1x32xf32> to vector<16x32xf32>
    %74 = arith.addf %70, %73 : vector<16x32xf32>
    %c0_47 = arith.constant 0 : index
    %c0_48 = arith.constant 0 : index
    %c0_49 = arith.constant 0 : index
    %75 = vector.load %arg12[%c0_47, %c0_48, %c0_49] : memref<6x1x32xf32, #tpu.memory_space<vmem>>, vector<1x1x32xf32>
    %76 = vector.shape_cast %75 : vector<1x1x32xf32> to vector<1x32xf32>
    %c0_50 = arith.constant 0 : index
    %c0_51 = arith.constant 0 : index
    %c0_52 = arith.constant 0 : index
    %77 = vector.load %arg13[%c0_50, %c0_51, %c0_52] : memref<6x1x32xf32, #tpu.memory_space<vmem>>, vector<1x1x32xf32>
    %78 = vector.shape_cast %77 : vector<1x1x32xf32> to vector<1x32xf32>
    %cst_53 = arith.constant dense<0.000000e+00> : vector<16xf32>
    %79 = vector.multi_reduction <add>, %74, %cst_53 [1] : vector<16x32xf32> to vector<16xf32>
    %80 = vector.shape_cast %79 : vector<16xf32> to vector<16x1xf32>
    %cst_54 = arith.constant 3.200000e+01 : f32
    %81 = vector.broadcast %cst_54 : f32 to vector<16x1xf32>
    %82 = arith.divf %80, %81 : vector<16x1xf32>
    %83 = vector.broadcast %82 : vector<16x1xf32> to vector<16x32xf32>
    %84 = arith.subf %74, %83 : vector<16x32xf32>
    %85 = arith.mulf %84, %84 : vector<16x32xf32>
    %cst_55 = arith.constant dense<0.000000e+00> : vector<16xf32>
    %86 = vector.multi_reduction <add>, %85, %cst_55 [1] : vector<16x32xf32> to vector<16xf32>
    %87 = vector.shape_cast %86 : vector<16xf32> to vector<16x1xf32>
    %cst_56 = arith.constant 3.200000e+01 : f32
    %88 = vector.broadcast %cst_56 : f32 to vector<16x1xf32>
    %89 = arith.divf %87, %88 : vector<16x1xf32>
    %90 = vector.broadcast %82 : vector<16x1xf32> to vector<16x32xf32>
    %91 = arith.subf %74, %90 : vector<16x32xf32>
    %cst_57 = arith.constant 9.99999974E-6 : f32
    %92 = vector.broadcast %cst_57 : f32 to vector<16x1xf32>
    %93 = arith.addf %89, %92 : vector<16x1xf32>
    %94 = math.rsqrt %93 : vector<16x1xf32>
    %95 = vector.broadcast %94 : vector<16x1xf32> to vector<16x32xf32>
    %96 = arith.mulf %91, %95 : vector<16x32xf32>
    %97 = vector.broadcast %76 : vector<1x32xf32> to vector<16x32xf32>
    %98 = arith.mulf %96, %97 : vector<16x32xf32>
    %99 = vector.broadcast %78 : vector<1x32xf32> to vector<16x32xf32>
    %100 = arith.addf %98, %99 : vector<16x32xf32>
    %c0_58 = arith.constant 0 : index
    %c0_59 = arith.constant 0 : index
    %c0_60 = arith.constant 0 : index
    %101 = vector.load %arg14[%c0_58, %c0_59, %c0_60] : memref<6x32x128xf32, #tpu.memory_space<vmem>>, vector<1x32x128xf32>
    %102 = vector.shape_cast %101 : vector<1x32x128xf32> to vector<32x128xf32>
    %cst_61 = arith.constant dense<0.000000e+00> : vector<16x128xf32>
    %103 = tpu.matmul %100, %102, %cst_61 {dimension_numbers = #tpu.dot_dimension_numbers<[1], [0], [0], [1], [0, 0, 1, 1], [], []>} : vector<16x32xf32>, vector<32x128xf32>, vector<16x128xf32> -> vector<16x128xf32>
    %c0_62 = arith.constant 0 : index
    %c0_63 = arith.constant 0 : index
    %c0_64 = arith.constant 0 : index
    %104 = vector.load %arg15[%c0_62, %c0_63, %c0_64] : memref<6x1x128xf32, #tpu.memory_space<vmem>>, vector<1x1x128xf32>
    %105 = vector.shape_cast %104 : vector<1x1x128xf32> to vector<1x128xf32>
    %106 = vector.broadcast %105 : vector<1x128xf32> to vector<16x128xf32>
    %107 = arith.addf %103, %106 : vector<16x128xf32>
    %cst_65 = arith.constant 0.000000e+00 : f32
    %108 = vector.broadcast %cst_65 : f32 to vector<16x128xf32>
    %109 = arith.maximumf %107, %108 : vector<16x128xf32>
    %c0_66 = arith.constant 0 : index
    %c0_67 = arith.constant 0 : index
    %c0_68 = arith.constant 0 : index
    %110 = vector.load %arg16[%c0_66, %c0_67, %c0_68] : memref<6x128x32xf32, #tpu.memory_space<vmem>>, vector<1x128x32xf32>
    %111 = vector.shape_cast %110 : vector<1x128x32xf32> to vector<128x32xf32>
    %cst_69 = arith.constant dense<0.000000e+00> : vector<16x32xf32>
    %112 = tpu.matmul %109, %111, %cst_69 {dimension_numbers = #tpu.dot_dimension_numbers<[1], [0], [0], [1], [0, 0, 1, 1], [], []>} : vector<16x128xf32>, vector<128x32xf32>, vector<16x32xf32> -> vector<16x32xf32>
    %113 = arith.addf %74, %112 : vector<16x32xf32>
    %c0_70 = arith.constant 0 : index
    %c0_71 = arith.constant 0 : index
    %c0_72 = arith.constant 0 : index
    %114 = vector.load %arg17[%c0_70, %c0_71, %c0_72] : memref<6x1x32xf32, #tpu.memory_space<vmem>>, vector<1x1x32xf32>
    %115 = vector.shape_cast %114 : vector<1x1x32xf32> to vector<1x32xf32>
    %116 = vector.broadcast %115 : vector<1x32xf32> to vector<16x32xf32>
    %117 = arith.addf %113, %116 : vector<16x32xf32>
    %c1 = arith.constant 1 : index
    %c0_73 = arith.constant 0 : index
    %c0_74 = arith.constant 0 : index
    %118 = vector.load %arg5[%c1, %c0_73, %c0_74] : memref<6x1x32xf32, #tpu.memory_space<vmem>>, vector<1x1x32xf32>
    %119 = vector.shape_cast %118 : vector<1x1x32xf32> to vector<1x32xf32>
    %c1_75 = arith.constant 1 : index
    %c0_76 = arith.constant 0 : index
    %c0_77 = arith.constant 0 : index
    %120 = vector.load %arg6[%c1_75, %c0_76, %c0_77] : memref<6x1x32xf32, #tpu.memory_space<vmem>>, vector<1x1x32xf32>
    %121 = vector.shape_cast %120 : vector<1x1x32xf32> to vector<1x32xf32>
    %cst_78 = arith.constant dense<0.000000e+00> : vector<16xf32>
    %122 = vector.multi_reduction <add>, %117, %cst_78 [1] : vector<16x32xf32> to vector<16xf32>
    %123 = vector.shape_cast %122 : vector<16xf32> to vector<16x1xf32>
    %cst_79 = arith.constant 3.200000e+01 : f32
    %124 = vector.broadcast %cst_79 : f32 to vector<16x1xf32>
    %125 = arith.divf %123, %124 : vector<16x1xf32>
    %126 = vector.broadcast %125 : vector<16x1xf32> to vector<16x32xf32>
    %127 = arith.subf %117, %126 : vector<16x32xf32>
    %128 = arith.mulf %127, %127 : vector<16x32xf32>
    %cst_80 = arith.constant dense<0.000000e+00> : vector<16xf32>
    %129 = vector.multi_reduction <add>, %128, %cst_80 [1] : vector<16x32xf32> to vector<16xf32>
    %130 = vector.shape_cast %129 : vector<16xf32> to vector<16x1xf32>
    %cst_81 = arith.constant 3.200000e+01 : f32
    %131 = vector.broadcast %cst_81 : f32 to vector<16x1xf32>
    %132 = arith.divf %130, %131 : vector<16x1xf32>
    %133 = vector.broadcast %125 : vector<16x1xf32> to vector<16x32xf32>
    %134 = arith.subf %117, %133 : vector<16x32xf32>
    %cst_82 = arith.constant 9.99999974E-6 : f32
    %135 = vector.broadcast %cst_82 : f32 to vector<16x1xf32>
    %136 = arith.addf %132, %135 : vector<16x1xf32>
    %137 = math.rsqrt %136 : vector<16x1xf32>
    %138 = vector.broadcast %137 : vector<16x1xf32> to vector<16x32xf32>
    %139 = arith.mulf %134, %138 : vector<16x32xf32>
    %140 = vector.broadcast %119 : vector<1x32xf32> to vector<16x32xf32>
    %141 = arith.mulf %139, %140 : vector<16x32xf32>
    %142 = vector.broadcast %121 : vector<1x32xf32> to vector<16x32xf32>
    %143 = arith.addf %141, %142 : vector<16x32xf32>
    %144 = vector.shape_cast %143 : vector<16x32xf32> to vector<1x16x32xf32>
    %145 = vector.shape_cast %144 : vector<1x16x32xf32> to vector<1x16x32xf32>
    %146 = vector.broadcast %145 : vector<1x16x32xf32> to vector<4x16x32xf32>
    %c1_83 = arith.constant 1 : index
    %c0_84 = arith.constant 0 : index
    %c0_85 = arith.constant 0 : index
    %c0_86 = arith.constant 0 : index
    %147 = vector.load %arg7[%c1_83, %c0_84, %c0_85, %c0_86] : memref<6x4x32x8xf32, #tpu.memory_space<vmem>>, vector<1x4x32x8xf32>
    %148 = vector.shape_cast %147 : vector<1x4x32x8xf32> to vector<4x32x8xf32>
    "tpu.trace_start"() <{level = 10 : i32, message = "hnc,hcd->hnd"}> : () -> ()
    %cst_87 = arith.constant dense<0.000000e+00> : vector<4x16x8xf32>
    %149 = tpu.matmul %146, %148, %cst_87 {dimension_numbers = #tpu.dot_dimension_numbers<[2], [1], [1], [2], [0, 0, 0, 1, 1, 2], [0], [0]>} : vector<4x16x32xf32>, vector<4x32x8xf32>, vector<4x16x8xf32> -> vector<4x16x8xf32>
    "tpu.trace_stop"() : () -> ()
    %c1_88 = arith.constant 1 : index
    %c0_89 = arith.constant 0 : index
    %c0_90 = arith.constant 0 : index
    %c0_91 = arith.constant 0 : index
    %150 = vector.load %arg8[%c1_88, %c0_89, %c0_90, %c0_91] : memref<6x4x32x8xf32, #tpu.memory_space<vmem>>, vector<1x4x32x8xf32>
    %151 = vector.shape_cast %150 : vector<1x4x32x8xf32> to vector<4x32x8xf32>
    "tpu.trace_start"() <{level = 10 : i32, message = "hnc,hcd->hnd"}> : () -> ()
    %cst_92 = arith.constant dense<0.000000e+00> : vector<4x16x8xf32>
    %152 = tpu.matmul %146, %151, %cst_92 {dimension_numbers = #tpu.dot_dimension_numbers<[2], [1], [1], [2], [0, 0, 0, 1, 1, 2], [0], [0]>} : vector<4x16x32xf32>, vector<4x32x8xf32>, vector<4x16x8xf32> -> vector<4x16x8xf32>
    "tpu.trace_stop"() : () -> ()
    %c1_93 = arith.constant 1 : index
    %c0_94 = arith.constant 0 : index
    %c0_95 = arith.constant 0 : index
    %c0_96 = arith.constant 0 : index
    %153 = vector.load %arg9[%c1_93, %c0_94, %c0_95, %c0_96] : memref<6x4x32x8xf32, #tpu.memory_space<vmem>>, vector<1x4x32x8xf32>
    %154 = vector.shape_cast %153 : vector<1x4x32x8xf32> to vector<4x32x8xf32>
    "tpu.trace_start"() <{level = 10 : i32, message = "hnc,hcd->hnd"}> : () -> ()
    %cst_97 = arith.constant dense<0.000000e+00> : vector<4x16x8xf32>
    %155 = tpu.matmul %146, %154, %cst_97 {dimension_numbers = #tpu.dot_dimension_numbers<[2], [1], [1], [2], [0, 0, 0, 1, 1, 2], [0], [0]>} : vector<4x16x32xf32>, vector<4x32x8xf32>, vector<4x16x8xf32> -> vector<4x16x8xf32>
    "tpu.trace_stop"() : () -> ()
    "tpu.trace_start"() <{level = 10 : i32, message = "hnd,hmd->hnm"}> : () -> ()
    %cst_98 = arith.constant dense<0.000000e+00> : vector<4x16x16xf32>
    %156 = tpu.matmul %149, %152, %cst_98 {dimension_numbers = #tpu.dot_dimension_numbers<[2], [2], [1], [1], [0, 0, 0, 1, 1, 1], [0], [0]>} : vector<4x16x8xf32>, vector<4x16x8xf32>, vector<4x16x16xf32> -> vector<4x16x16xf32>
    "tpu.trace_stop"() : () -> ()
    %cst_99 = arith.constant 0.176776692 : f32
    %157 = vector.broadcast %cst_99 : f32 to vector<4x16x16xf32>
    %158 = arith.mulf %156, %157 : vector<4x16x16xf32>
    %159 = vector.shape_cast %10 : vector<16x16xf32> to vector<1x16x16xf32>
    %160 = vector.broadcast %159 : vector<1x16x16xf32> to vector<4x16x16xf32>
    %161 = arith.addf %158, %160 : vector<4x16x16xf32>
    %cst_100 = arith.constant dense<0xFF800000> : vector<4x16xf32>
    %162 = vector.multi_reduction <maximumf>, %161, %cst_100 [2] : vector<4x16x16xf32> to vector<4x16xf32>
    %163 = vector.shape_cast %162 : vector<4x16xf32> to vector<4x16x1xf32>
    %164 = vector.broadcast %163 : vector<4x16x1xf32> to vector<4x16x16xf32>
    %165 = arith.subf %161, %164 : vector<4x16x16xf32>
    %166 = math.exp %165 : vector<4x16x16xf32>
    %cst_101 = arith.constant dense<0.000000e+00> : vector<4x16xf32>
    %167 = vector.multi_reduction <add>, %166, %cst_101 [2] : vector<4x16x16xf32> to vector<4x16xf32>
    %168 = vector.shape_cast %167 : vector<4x16xf32> to vector<4x16x1xf32>
    %169 = tpu.reciprocal %168 : vector<4x16x1xf32> -> vector<4x16x1xf32>
    %170 = vector.broadcast %169 : vector<4x16x1xf32> to vector<4x16x16xf32>
    %171 = arith.mulf %166, %170 : vector<4x16x16xf32>
    "tpu.trace_start"() <{level = 10 : i32, message = "hnm,hmd->hnd"}> : () -> ()
    %cst_102 = arith.constant dense<0.000000e+00> : vector<4x16x8xf32>
    %172 = tpu.matmul %171, %155, %cst_102 {dimension_numbers = #tpu.dot_dimension_numbers<[2], [1], [1], [2], [0, 0, 0, 1, 1, 2], [0], [0]>} : vector<4x16x16xf32>, vector<4x16x8xf32>, vector<4x16x8xf32> -> vector<4x16x8xf32>
    "tpu.trace_stop"() : () -> ()
    %c1_103 = arith.constant 1 : index
    %c0_104 = arith.constant 0 : index
    %c0_105 = arith.constant 0 : index
    %c0_106 = arith.constant 0 : index
    %173 = vector.load %arg10[%c1_103, %c0_104, %c0_105, %c0_106] : memref<6x4x8x32xf32, #tpu.memory_space<vmem>>, vector<1x4x8x32xf32>
    %174 = vector.shape_cast %173 : vector<1x4x8x32xf32> to vector<4x8x32xf32>
    "tpu.trace_start"() <{level = 10 : i32, message = "hnd,hdc->hnc"}> : () -> ()
    %cst_107 = arith.constant dense<0.000000e+00> : vector<4x16x32xf32>
    %175 = tpu.matmul %172, %174, %cst_107 {dimension_numbers = #tpu.dot_dimension_numbers<[2], [1], [1], [2], [0, 0, 0, 1, 1, 2], [0], [0]>} : vector<4x16x8xf32>, vector<4x8x32xf32>, vector<4x16x32xf32> -> vector<4x16x32xf32>
    "tpu.trace_stop"() : () -> ()
    %cst_108 = arith.constant dense<0.000000e+00> : vector<16x32xf32>
    %176 = vector.multi_reduction <add>, %175, %cst_108 [0] : vector<4x16x32xf32> to vector<16x32xf32>
    %177 = arith.addf %117, %176 : vector<16x32xf32>
    %c1_109 = arith.constant 1 : index
    %c0_110 = arith.constant 0 : index
    %c0_111 = arith.constant 0 : index
    %178 = vector.load %arg11[%c1_109, %c0_110, %c0_111] : memref<6x1x32xf32, #tpu.memory_space<vmem>>, vector<1x1x32xf32>
    %179 = vector.shape_cast %178 : vector<1x1x32xf32> to vector<1x32xf32>
    %180 = vector.broadcast %179 : vector<1x32xf32> to vector<16x32xf32>
    %181 = arith.addf %177, %180 : vector<16x32xf32>
    %c1_112 = arith.constant 1 : index
    %c0_113 = arith.constant 0 : index
    %c0_114 = arith.constant 0 : index
    %182 = vector.load %arg12[%c1_112, %c0_113, %c0_114] : memref<6x1x32xf32, #tpu.memory_space<vmem>>, vector<1x1x32xf32>
    %183 = vector.shape_cast %182 : vector<1x1x32xf32> to vector<1x32xf32>
    %c1_115 = arith.constant 1 : index
    %c0_116 = arith.constant 0 : index
    %c0_117 = arith.constant 0 : index
    %184 = vector.load %arg13[%c1_115, %c0_116, %c0_117] : memref<6x1x32xf32, #tpu.memory_space<vmem>>, vector<1x1x32xf32>
    %185 = vector.shape_cast %184 : vector<1x1x32xf32> to vector<1x32xf32>
    %cst_118 = arith.constant dense<0.000000e+00> : vector<16xf32>
    %186 = vector.multi_reduction <add>, %181, %cst_118 [1] : vector<16x32xf32> to vector<16xf32>
    %187 = vector.shape_cast %186 : vector<16xf32> to vector<16x1xf32>
    %cst_119 = arith.constant 3.200000e+01 : f32
    %188 = vector.broadcast %cst_119 : f32 to vector<16x1xf32>
    %189 = arith.divf %187, %188 : vector<16x1xf32>
    %190 = vector.broadcast %189 : vector<16x1xf32> to vector<16x32xf32>
    %191 = arith.subf %181, %190 : vector<16x32xf32>
    %192 = arith.mulf %191, %191 : vector<16x32xf32>
    %cst_120 = arith.constant dense<0.000000e+00> : vector<16xf32>
    %193 = vector.multi_reduction <add>, %192, %cst_120 [1] : vector<16x32xf32> to vector<16xf32>
    %194 = vector.shape_cast %193 : vector<16xf32> to vector<16x1xf32>
    %cst_121 = arith.constant 3.200000e+01 : f32
    %195 = vector.broadcast %cst_121 : f32 to vector<16x1xf32>
    %196 = arith.divf %194, %195 : vector<16x1xf32>
    %197 = vector.broadcast %189 : vector<16x1xf32> to vector<16x32xf32>
    %198 = arith.subf %181, %197 : vector<16x32xf32>
    %cst_122 = arith.constant 9.99999974E-6 : f32
    %199 = vector.broadcast %cst_122 : f32 to vector<16x1xf32>
    %200 = arith.addf %196, %199 : vector<16x1xf32>
    %201 = math.rsqrt %200 : vector<16x1xf32>
    %202 = vector.broadcast %201 : vector<16x1xf32> to vector<16x32xf32>
    %203 = arith.mulf %198, %202 : vector<16x32xf32>
    %204 = vector.broadcast %183 : vector<1x32xf32> to vector<16x32xf32>
    %205 = arith.mulf %203, %204 : vector<16x32xf32>
    %206 = vector.broadcast %185 : vector<1x32xf32> to vector<16x32xf32>
    %207 = arith.addf %205, %206 : vector<16x32xf32>
    %c1_123 = arith.constant 1 : index
    %c0_124 = arith.constant 0 : index
    %c0_125 = arith.constant 0 : index
    %208 = vector.load %arg14[%c1_123, %c0_124, %c0_125] : memref<6x32x128xf32, #tpu.memory_space<vmem>>, vector<1x32x128xf32>
    %209 = vector.shape_cast %208 : vector<1x32x128xf32> to vector<32x128xf32>
    %cst_126 = arith.constant dense<0.000000e+00> : vector<16x128xf32>
    %210 = tpu.matmul %207, %209, %cst_126 {dimension_numbers = #tpu.dot_dimension_numbers<[1], [0], [0], [1], [0, 0, 1, 1], [], []>} : vector<16x32xf32>, vector<32x128xf32>, vector<16x128xf32> -> vector<16x128xf32>
    %c1_127 = arith.constant 1 : index
    %c0_128 = arith.constant 0 : index
    %c0_129 = arith.constant 0 : index
    %211 = vector.load %arg15[%c1_127, %c0_128, %c0_129] : memref<6x1x128xf32, #tpu.memory_space<vmem>>, vector<1x1x128xf32>
    %212 = vector.shape_cast %211 : vector<1x1x128xf32> to vector<1x128xf32>
    %213 = vector.broadcast %212 : vector<1x128xf32> to vector<16x128xf32>
    %214 = arith.addf %210, %213 : vector<16x128xf32>
    %cst_130 = arith.constant 0.000000e+00 : f32
    %215 = vector.broadcast %cst_130 : f32 to vector<16x128xf32>
    %216 = arith.maximumf %214, %215 : vector<16x128xf32>
    %c1_131 = arith.constant 1 : index
    %c0_132 = arith.constant 0 : index
    %c0_133 = arith.constant 0 : index
    %217 = vector.load %arg16[%c1_131, %c0_132, %c0_133] : memref<6x128x32xf32, #tpu.memory_space<vmem>>, vector<1x128x32xf32>
    %218 = vector.shape_cast %217 : vector<1x128x32xf32> to vector<128x32xf32>
    %cst_134 = arith.constant dense<0.000000e+00> : vector<16x32xf32>
    %219 = tpu.matmul %216, %218, %cst_134 {dimension_numbers = #tpu.dot_dimension_numbers<[1], [0], [0], [1], [0, 0, 1, 1], [], []>} : vector<16x128xf32>, vector<128x32xf32>, vector<16x32xf32> -> vector<16x32xf32>
    %220 = arith.addf %181, %219 : vector<16x32xf32>
    %c1_135 = arith.constant 1 : index
    %c0_136 = arith.constant 0 : index
    %c0_137 = arith.constant 0 : index
    %221 = vector.load %arg17[%c1_135, %c0_136, %c0_137] : memref<6x1x32xf32, #tpu.memory_space<vmem>>, vector<1x1x32xf32>
    %222 = vector.shape_cast %221 : vector<1x1x32xf32> to vector<1x32xf32>
    %223 = vector.broadcast %222 : vector<1x32xf32> to vector<16x32xf32>
    %224 = arith.addf %220, %223 : vector<16x32xf32>
    %c2 = arith.constant 2 : index
    %c0_138 = arith.constant 0 : index
    %c0_139 = arith.constant 0 : index
    %225 = vector.load %arg5[%c2, %c0_138, %c0_139] : memref<6x1x32xf32, #tpu.memory_space<vmem>>, vector<1x1x32xf32>
    %226 = vector.shape_cast %225 : vector<1x1x32xf32> to vector<1x32xf32>
    %c2_140 = arith.constant 2 : index
    %c0_141 = arith.constant 0 : index
    %c0_142 = arith.constant 0 : index
    %227 = vector.load %arg6[%c2_140, %c0_141, %c0_142] : memref<6x1x32xf32, #tpu.memory_space<vmem>>, vector<1x1x32xf32>
    %228 = vector.shape_cast %227 : vector<1x1x32xf32> to vector<1x32xf32>
    %cst_143 = arith.constant dense<0.000000e+00> : vector<16xf32>
    %229 = vector.multi_reduction <add>, %224, %cst_143 [1] : vector<16x32xf32> to vector<16xf32>
    %230 = vector.shape_cast %229 : vector<16xf32> to vector<16x1xf32>
    %cst_144 = arith.constant 3.200000e+01 : f32
    %231 = vector.broadcast %cst_144 : f32 to vector<16x1xf32>
    %232 = arith.divf %230, %231 : vector<16x1xf32>
    %233 = vector.broadcast %232 : vector<16x1xf32> to vector<16x32xf32>
    %234 = arith.subf %224, %233 : vector<16x32xf32>
    %235 = arith.mulf %234, %234 : vector<16x32xf32>
    %cst_145 = arith.constant dense<0.000000e+00> : vector<16xf32>
    %236 = vector.multi_reduction <add>, %235, %cst_145 [1] : vector<16x32xf32> to vector<16xf32>
    %237 = vector.shape_cast %236 : vector<16xf32> to vector<16x1xf32>
    %cst_146 = arith.constant 3.200000e+01 : f32
    %238 = vector.broadcast %cst_146 : f32 to vector<16x1xf32>
    %239 = arith.divf %237, %238 : vector<16x1xf32>
    %240 = vector.broadcast %232 : vector<16x1xf32> to vector<16x32xf32>
    %241 = arith.subf %224, %240 : vector<16x32xf32>
    %cst_147 = arith.constant 9.99999974E-6 : f32
    %242 = vector.broadcast %cst_147 : f32 to vector<16x1xf32>
    %243 = arith.addf %239, %242 : vector<16x1xf32>
    %244 = math.rsqrt %243 : vector<16x1xf32>
    %245 = vector.broadcast %244 : vector<16x1xf32> to vector<16x32xf32>
    %246 = arith.mulf %241, %245 : vector<16x32xf32>
    %247 = vector.broadcast %226 : vector<1x32xf32> to vector<16x32xf32>
    %248 = arith.mulf %246, %247 : vector<16x32xf32>
    %249 = vector.broadcast %228 : vector<1x32xf32> to vector<16x32xf32>
    %250 = arith.addf %248, %249 : vector<16x32xf32>
    %251 = vector.shape_cast %250 : vector<16x32xf32> to vector<1x16x32xf32>
    %252 = vector.shape_cast %251 : vector<1x16x32xf32> to vector<1x16x32xf32>
    %253 = vector.broadcast %252 : vector<1x16x32xf32> to vector<4x16x32xf32>
    %c2_148 = arith.constant 2 : index
    %c0_149 = arith.constant 0 : index
    %c0_150 = arith.constant 0 : index
    %c0_151 = arith.constant 0 : index
    %254 = vector.load %arg7[%c2_148, %c0_149, %c0_150, %c0_151] : memref<6x4x32x8xf32, #tpu.memory_space<vmem>>, vector<1x4x32x8xf32>
    %255 = vector.shape_cast %254 : vector<1x4x32x8xf32> to vector<4x32x8xf32>
    "tpu.trace_start"() <{level = 10 : i32, message = "hnc,hcd->hnd"}> : () -> ()
    %cst_152 = arith.constant dense<0.000000e+00> : vector<4x16x8xf32>
    %256 = tpu.matmul %253, %255, %cst_152 {dimension_numbers = #tpu.dot_dimension_numbers<[2], [1], [1], [2], [0, 0, 0, 1, 1, 2], [0], [0]>} : vector<4x16x32xf32>, vector<4x32x8xf32>, vector<4x16x8xf32> -> vector<4x16x8xf32>
    "tpu.trace_stop"() : () -> ()
    %c2_153 = arith.constant 2 : index
    %c0_154 = arith.constant 0 : index
    %c0_155 = arith.constant 0 : index
    %c0_156 = arith.constant 0 : index
    %257 = vector.load %arg8[%c2_153, %c0_154, %c0_155, %c0_156] : memref<6x4x32x8xf32, #tpu.memory_space<vmem>>, vector<1x4x32x8xf32>
    %258 = vector.shape_cast %257 : vector<1x4x32x8xf32> to vector<4x32x8xf32>
    "tpu.trace_start"() <{level = 10 : i32, message = "hnc,hcd->hnd"}> : () -> ()
    %cst_157 = arith.constant dense<0.000000e+00> : vector<4x16x8xf32>
    %259 = tpu.matmul %253, %258, %cst_157 {dimension_numbers = #tpu.dot_dimension_numbers<[2], [1], [1], [2], [0, 0, 0, 1, 1, 2], [0], [0]>} : vector<4x16x32xf32>, vector<4x32x8xf32>, vector<4x16x8xf32> -> vector<4x16x8xf32>
    "tpu.trace_stop"() : () -> ()
    %c2_158 = arith.constant 2 : index
    %c0_159 = arith.constant 0 : index
    %c0_160 = arith.constant 0 : index
    %c0_161 = arith.constant 0 : index
    %260 = vector.load %arg9[%c2_158, %c0_159, %c0_160, %c0_161] : memref<6x4x32x8xf32, #tpu.memory_space<vmem>>, vector<1x4x32x8xf32>
    %261 = vector.shape_cast %260 : vector<1x4x32x8xf32> to vector<4x32x8xf32>
    "tpu.trace_start"() <{level = 10 : i32, message = "hnc,hcd->hnd"}> : () -> ()
    %cst_162 = arith.constant dense<0.000000e+00> : vector<4x16x8xf32>
    %262 = tpu.matmul %253, %261, %cst_162 {dimension_numbers = #tpu.dot_dimension_numbers<[2], [1], [1], [2], [0, 0, 0, 1, 1, 2], [0], [0]>} : vector<4x16x32xf32>, vector<4x32x8xf32>, vector<4x16x8xf32> -> vector<4x16x8xf32>
    "tpu.trace_stop"() : () -> ()
    "tpu.trace_start"() <{level = 10 : i32, message = "hnd,hmd->hnm"}> : () -> ()
    %cst_163 = arith.constant dense<0.000000e+00> : vector<4x16x16xf32>
    %263 = tpu.matmul %256, %259, %cst_163 {dimension_numbers = #tpu.dot_dimension_numbers<[2], [2], [1], [1], [0, 0, 0, 1, 1, 1], [0], [0]>} : vector<4x16x8xf32>, vector<4x16x8xf32>, vector<4x16x16xf32> -> vector<4x16x16xf32>
    "tpu.trace_stop"() : () -> ()
    %cst_164 = arith.constant 0.176776692 : f32
    %264 = vector.broadcast %cst_164 : f32 to vector<4x16x16xf32>
    %265 = arith.mulf %263, %264 : vector<4x16x16xf32>
    %266 = vector.shape_cast %10 : vector<16x16xf32> to vector<1x16x16xf32>
    %267 = vector.broadcast %266 : vector<1x16x16xf32> to vector<4x16x16xf32>
    %268 = arith.addf %265, %267 : vector<4x16x16xf32>
    %cst_165 = arith.constant dense<0xFF800000> : vector<4x16xf32>
    %269 = vector.multi_reduction <maximumf>, %268, %cst_165 [2] : vector<4x16x16xf32> to vector<4x16xf32>
    %270 = vector.shape_cast %269 : vector<4x16xf32> to vector<4x16x1xf32>
    %271 = vector.broadcast %270 : vector<4x16x1xf32> to vector<4x16x16xf32>
    %272 = arith.subf %268, %271 : vector<4x16x16xf32>
    %273 = math.exp %272 : vector<4x16x16xf32>
    %cst_166 = arith.constant dense<0.000000e+00> : vector<4x16xf32>
    %274 = vector.multi_reduction <add>, %273, %cst_166 [2] : vector<4x16x16xf32> to vector<4x16xf32>
    %275 = vector.shape_cast %274 : vector<4x16xf32> to vector<4x16x1xf32>
    %276 = tpu.reciprocal %275 : vector<4x16x1xf32> -> vector<4x16x1xf32>
    %277 = vector.broadcast %276 : vector<4x16x1xf32> to vector<4x16x16xf32>
    %278 = arith.mulf %273, %277 : vector<4x16x16xf32>
    "tpu.trace_start"() <{level = 10 : i32, message = "hnm,hmd->hnd"}> : () -> ()
    %cst_167 = arith.constant dense<0.000000e+00> : vector<4x16x8xf32>
    %279 = tpu.matmul %278, %262, %cst_167 {dimension_numbers = #tpu.dot_dimension_numbers<[2], [1], [1], [2], [0, 0, 0, 1, 1, 2], [0], [0]>} : vector<4x16x16xf32>, vector<4x16x8xf32>, vector<4x16x8xf32> -> vector<4x16x8xf32>
    "tpu.trace_stop"() : () -> ()
    %c2_168 = arith.constant 2 : index
    %c0_169 = arith.constant 0 : index
    %c0_170 = arith.constant 0 : index
    %c0_171 = arith.constant 0 : index
    %280 = vector.load %arg10[%c2_168, %c0_169, %c0_170, %c0_171] : memref<6x4x8x32xf32, #tpu.memory_space<vmem>>, vector<1x4x8x32xf32>
    %281 = vector.shape_cast %280 : vector<1x4x8x32xf32> to vector<4x8x32xf32>
    "tpu.trace_start"() <{level = 10 : i32, message = "hnd,hdc->hnc"}> : () -> ()
    %cst_172 = arith.constant dense<0.000000e+00> : vector<4x16x32xf32>
    %282 = tpu.matmul %279, %281, %cst_172 {dimension_numbers = #tpu.dot_dimension_numbers<[2], [1], [1], [2], [0, 0, 0, 1, 1, 2], [0], [0]>} : vector<4x16x8xf32>, vector<4x8x32xf32>, vector<4x16x32xf32> -> vector<4x16x32xf32>
    "tpu.trace_stop"() : () -> ()
    %cst_173 = arith.constant dense<0.000000e+00> : vector<16x32xf32>
    %283 = vector.multi_reduction <add>, %282, %cst_173 [0] : vector<4x16x32xf32> to vector<16x32xf32>
    %284 = arith.addf %224, %283 : vector<16x32xf32>
    %c2_174 = arith.constant 2 : index
    %c0_175 = arith.constant 0 : index
    %c0_176 = arith.constant 0 : index
    %285 = vector.load %arg11[%c2_174, %c0_175, %c0_176] : memref<6x1x32xf32, #tpu.memory_space<vmem>>, vector<1x1x32xf32>
    %286 = vector.shape_cast %285 : vector<1x1x32xf32> to vector<1x32xf32>
    %287 = vector.broadcast %286 : vector<1x32xf32> to vector<16x32xf32>
    %288 = arith.addf %284, %287 : vector<16x32xf32>
    %c2_177 = arith.constant 2 : index
    %c0_178 = arith.constant 0 : index
    %c0_179 = arith.constant 0 : index
    %289 = vector.load %arg12[%c2_177, %c0_178, %c0_179] : memref<6x1x32xf32, #tpu.memory_space<vmem>>, vector<1x1x32xf32>
    %290 = vector.shape_cast %289 : vector<1x1x32xf32> to vector<1x32xf32>
    %c2_180 = arith.constant 2 : index
    %c0_181 = arith.constant 0 : index
    %c0_182 = arith.constant 0 : index
    %291 = vector.load %arg13[%c2_180, %c0_181, %c0_182] : memref<6x1x32xf32, #tpu.memory_space<vmem>>, vector<1x1x32xf32>
    %292 = vector.shape_cast %291 : vector<1x1x32xf32> to vector<1x32xf32>
    %cst_183 = arith.constant dense<0.000000e+00> : vector<16xf32>
    %293 = vector.multi_reduction <add>, %288, %cst_183 [1] : vector<16x32xf32> to vector<16xf32>
    %294 = vector.shape_cast %293 : vector<16xf32> to vector<16x1xf32>
    %cst_184 = arith.constant 3.200000e+01 : f32
    %295 = vector.broadcast %cst_184 : f32 to vector<16x1xf32>
    %296 = arith.divf %294, %295 : vector<16x1xf32>
    %297 = vector.broadcast %296 : vector<16x1xf32> to vector<16x32xf32>
    %298 = arith.subf %288, %297 : vector<16x32xf32>
    %299 = arith.mulf %298, %298 : vector<16x32xf32>
    %cst_185 = arith.constant dense<0.000000e+00> : vector<16xf32>
    %300 = vector.multi_reduction <add>, %299, %cst_185 [1] : vector<16x32xf32> to vector<16xf32>
    %301 = vector.shape_cast %300 : vector<16xf32> to vector<16x1xf32>
    %cst_186 = arith.constant 3.200000e+01 : f32
    %302 = vector.broadcast %cst_186 : f32 to vector<16x1xf32>
    %303 = arith.divf %301, %302 : vector<16x1xf32>
    %304 = vector.broadcast %296 : vector<16x1xf32> to vector<16x32xf32>
    %305 = arith.subf %288, %304 : vector<16x32xf32>
    %cst_187 = arith.constant 9.99999974E-6 : f32
    %306 = vector.broadcast %cst_187 : f32 to vector<16x1xf32>
    %307 = arith.addf %303, %306 : vector<16x1xf32>
    %308 = math.rsqrt %307 : vector<16x1xf32>
    %309 = vector.broadcast %308 : vector<16x1xf32> to vector<16x32xf32>
    %310 = arith.mulf %305, %309 : vector<16x32xf32>
    %311 = vector.broadcast %290 : vector<1x32xf32> to vector<16x32xf32>
    %312 = arith.mulf %310, %311 : vector<16x32xf32>
    %313 = vector.broadcast %292 : vector<1x32xf32> to vector<16x32xf32>
    %314 = arith.addf %312, %313 : vector<16x32xf32>
    %c2_188 = arith.constant 2 : index
    %c0_189 = arith.constant 0 : index
    %c0_190 = arith.constant 0 : index
    %315 = vector.load %arg14[%c2_188, %c0_189, %c0_190] : memref<6x32x128xf32, #tpu.memory_space<vmem>>, vector<1x32x128xf32>
    %316 = vector.shape_cast %315 : vector<1x32x128xf32> to vector<32x128xf32>
    %cst_191 = arith.constant dense<0.000000e+00> : vector<16x128xf32>
    %317 = tpu.matmul %314, %316, %cst_191 {dimension_numbers = #tpu.dot_dimension_numbers<[1], [0], [0], [1], [0, 0, 1, 1], [], []>} : vector<16x32xf32>, vector<32x128xf32>, vector<16x128xf32> -> vector<16x128xf32>
    %c2_192 = arith.constant 2 : index
    %c0_193 = arith.constant 0 : index
    %c0_194 = arith.constant 0 : index
    %318 = vector.load %arg15[%c2_192, %c0_193, %c0_194] : memref<6x1x128xf32, #tpu.memory_space<vmem>>, vector<1x1x128xf32>
    %319 = vector.shape_cast %318 : vector<1x1x128xf32> to vector<1x128xf32>
    %320 = vector.broadcast %319 : vector<1x128xf32> to vector<16x128xf32>
    %321 = arith.addf %317, %320 : vector<16x128xf32>
    %cst_195 = arith.constant 0.000000e+00 : f32
    %322 = vector.broadcast %cst_195 : f32 to vector<16x128xf32>
    %323 = arith.maximumf %321, %322 : vector<16x128xf32>
    %c2_196 = arith.constant 2 : index
    %c0_197 = arith.constant 0 : index
    %c0_198 = arith.constant 0 : index
    %324 = vector.load %arg16[%c2_196, %c0_197, %c0_198] : memref<6x128x32xf32, #tpu.memory_space<vmem>>, vector<1x128x32xf32>
    %325 = vector.shape_cast %324 : vector<1x128x32xf32> to vector<128x32xf32>
    %cst_199 = arith.constant dense<0.000000e+00> : vector<16x32xf32>
    %326 = tpu.matmul %323, %325, %cst_199 {dimension_numbers = #tpu.dot_dimension_numbers<[1], [0], [0], [1], [0, 0, 1, 1], [], []>} : vector<16x128xf32>, vector<128x32xf32>, vector<16x32xf32> -> vector<16x32xf32>
    %327 = arith.addf %288, %326 : vector<16x32xf32>
    %c2_200 = arith.constant 2 : index
    %c0_201 = arith.constant 0 : index
    %c0_202 = arith.constant 0 : index
    %328 = vector.load %arg17[%c2_200, %c0_201, %c0_202] : memref<6x1x32xf32, #tpu.memory_space<vmem>>, vector<1x1x32xf32>
    %329 = vector.shape_cast %328 : vector<1x1x32xf32> to vector<1x32xf32>
    %330 = vector.broadcast %329 : vector<1x32xf32> to vector<16x32xf32>
    %331 = arith.addf %327, %330 : vector<16x32xf32>
    %c3 = arith.constant 3 : index
    %c0_203 = arith.constant 0 : index
    %c0_204 = arith.constant 0 : index
    %332 = vector.load %arg5[%c3, %c0_203, %c0_204] : memref<6x1x32xf32, #tpu.memory_space<vmem>>, vector<1x1x32xf32>
    %333 = vector.shape_cast %332 : vector<1x1x32xf32> to vector<1x32xf32>
    %c3_205 = arith.constant 3 : index
    %c0_206 = arith.constant 0 : index
    %c0_207 = arith.constant 0 : index
    %334 = vector.load %arg6[%c3_205, %c0_206, %c0_207] : memref<6x1x32xf32, #tpu.memory_space<vmem>>, vector<1x1x32xf32>
    %335 = vector.shape_cast %334 : vector<1x1x32xf32> to vector<1x32xf32>
    %cst_208 = arith.constant dense<0.000000e+00> : vector<16xf32>
    %336 = vector.multi_reduction <add>, %331, %cst_208 [1] : vector<16x32xf32> to vector<16xf32>
    %337 = vector.shape_cast %336 : vector<16xf32> to vector<16x1xf32>
    %cst_209 = arith.constant 3.200000e+01 : f32
    %338 = vector.broadcast %cst_209 : f32 to vector<16x1xf32>
    %339 = arith.divf %337, %338 : vector<16x1xf32>
    %340 = vector.broadcast %339 : vector<16x1xf32> to vector<16x32xf32>
    %341 = arith.subf %331, %340 : vector<16x32xf32>
    %342 = arith.mulf %341, %341 : vector<16x32xf32>
    %cst_210 = arith.constant dense<0.000000e+00> : vector<16xf32>
    %343 = vector.multi_reduction <add>, %342, %cst_210 [1] : vector<16x32xf32> to vector<16xf32>
    %344 = vector.shape_cast %343 : vector<16xf32> to vector<16x1xf32>
    %cst_211 = arith.constant 3.200000e+01 : f32
    %345 = vector.broadcast %cst_211 : f32 to vector<16x1xf32>
    %346 = arith.divf %344, %345 : vector<16x1xf32>
    %347 = vector.broadcast %339 : vector<16x1xf32> to vector<16x32xf32>
    %348 = arith.subf %331, %347 : vector<16x32xf32>
    %cst_212 = arith.constant 9.99999974E-6 : f32
    %349 = vector.broadcast %cst_212 : f32 to vector<16x1xf32>
    %350 = arith.addf %346, %349 : vector<16x1xf32>
    %351 = math.rsqrt %350 : vector<16x1xf32>
    %352 = vector.broadcast %351 : vector<16x1xf32> to vector<16x32xf32>
    %353 = arith.mulf %348, %352 : vector<16x32xf32>
    %354 = vector.broadcast %333 : vector<1x32xf32> to vector<16x32xf32>
    %355 = arith.mulf %353, %354 : vector<16x32xf32>
    %356 = vector.broadcast %335 : vector<1x32xf32> to vector<16x32xf32>
    %357 = arith.addf %355, %356 : vector<16x32xf32>
    %358 = vector.shape_cast %357 : vector<16x32xf32> to vector<1x16x32xf32>
    %359 = vector.shape_cast %358 : vector<1x16x32xf32> to vector<1x16x32xf32>
    %360 = vector.broadcast %359 : vector<1x16x32xf32> to vector<4x16x32xf32>
    %c3_213 = arith.constant 3 : index
    %c0_214 = arith.constant 0 : index
    %c0_215 = arith.constant 0 : index
    %c0_216 = arith.constant 0 : index
    %361 = vector.load %arg7[%c3_213, %c0_214, %c0_215, %c0_216] : memref<6x4x32x8xf32, #tpu.memory_space<vmem>>, vector<1x4x32x8xf32>
    %362 = vector.shape_cast %361 : vector<1x4x32x8xf32> to vector<4x32x8xf32>
    "tpu.trace_start"() <{level = 10 : i32, message = "hnc,hcd->hnd"}> : () -> ()
    %cst_217 = arith.constant dense<0.000000e+00> : vector<4x16x8xf32>
    %363 = tpu.matmul %360, %362, %cst_217 {dimension_numbers = #tpu.dot_dimension_numbers<[2], [1], [1], [2], [0, 0, 0, 1, 1, 2], [0], [0]>} : vector<4x16x32xf32>, vector<4x32x8xf32>, vector<4x16x8xf32> -> vector<4x16x8xf32>
    "tpu.trace_stop"() : () -> ()
    %c3_218 = arith.constant 3 : index
    %c0_219 = arith.constant 0 : index
    %c0_220 = arith.constant 0 : index
    %c0_221 = arith.constant 0 : index
    %364 = vector.load %arg8[%c3_218, %c0_219, %c0_220, %c0_221] : memref<6x4x32x8xf32, #tpu.memory_space<vmem>>, vector<1x4x32x8xf32>
    %365 = vector.shape_cast %364 : vector<1x4x32x8xf32> to vector<4x32x8xf32>
    "tpu.trace_start"() <{level = 10 : i32, message = "hnc,hcd->hnd"}> : () -> ()
    %cst_222 = arith.constant dense<0.000000e+00> : vector<4x16x8xf32>
    %366 = tpu.matmul %360, %365, %cst_222 {dimension_numbers = #tpu.dot_dimension_numbers<[2], [1], [1], [2], [0, 0, 0, 1, 1, 2], [0], [0]>} : vector<4x16x32xf32>, vector<4x32x8xf32>, vector<4x16x8xf32> -> vector<4x16x8xf32>
    "tpu.trace_stop"() : () -> ()
    %c3_223 = arith.constant 3 : index
    %c0_224 = arith.constant 0 : index
    %c0_225 = arith.constant 0 : index
    %c0_226 = arith.constant 0 : index
    %367 = vector.load %arg9[%c3_223, %c0_224, %c0_225, %c0_226] : memref<6x4x32x8xf32, #tpu.memory_space<vmem>>, vector<1x4x32x8xf32>
    %368 = vector.shape_cast %367 : vector<1x4x32x8xf32> to vector<4x32x8xf32>
    "tpu.trace_start"() <{level = 10 : i32, message = "hnc,hcd->hnd"}> : () -> ()
    %cst_227 = arith.constant dense<0.000000e+00> : vector<4x16x8xf32>
    %369 = tpu.matmul %360, %368, %cst_227 {dimension_numbers = #tpu.dot_dimension_numbers<[2], [1], [1], [2], [0, 0, 0, 1, 1, 2], [0], [0]>} : vector<4x16x32xf32>, vector<4x32x8xf32>, vector<4x16x8xf32> -> vector<4x16x8xf32>
    "tpu.trace_stop"() : () -> ()
    "tpu.trace_start"() <{level = 10 : i32, message = "hnd,hmd->hnm"}> : () -> ()
    %cst_228 = arith.constant dense<0.000000e+00> : vector<4x16x16xf32>
    %370 = tpu.matmul %363, %366, %cst_228 {dimension_numbers = #tpu.dot_dimension_numbers<[2], [2], [1], [1], [0, 0, 0, 1, 1, 1], [0], [0]>} : vector<4x16x8xf32>, vector<4x16x8xf32>, vector<4x16x16xf32> -> vector<4x16x16xf32>
    "tpu.trace_stop"() : () -> ()
    %cst_229 = arith.constant 0.176776692 : f32
    %371 = vector.broadcast %cst_229 : f32 to vector<4x16x16xf32>
    %372 = arith.mulf %370, %371 : vector<4x16x16xf32>
    %373 = vector.shape_cast %10 : vector<16x16xf32> to vector<1x16x16xf32>
    %374 = vector.broadcast %373 : vector<1x16x16xf32> to vector<4x16x16xf32>
    %375 = arith.addf %372, %374 : vector<4x16x16xf32>
    %cst_230 = arith.constant dense<0xFF800000> : vector<4x16xf32>
    %376 = vector.multi_reduction <maximumf>, %375, %cst_230 [2] : vector<4x16x16xf32> to vector<4x16xf32>
    %377 = vector.shape_cast %376 : vector<4x16xf32> to vector<4x16x1xf32>
    %378 = vector.broadcast %377 : vector<4x16x1xf32> to vector<4x16x16xf32>
    %379 = arith.subf %375, %378 : vector<4x16x16xf32>
    %380 = math.exp %379 : vector<4x16x16xf32>
    %cst_231 = arith.constant dense<0.000000e+00> : vector<4x16xf32>
    %381 = vector.multi_reduction <add>, %380, %cst_231 [2] : vector<4x16x16xf32> to vector<4x16xf32>
    %382 = vector.shape_cast %381 : vector<4x16xf32> to vector<4x16x1xf32>
    %383 = tpu.reciprocal %382 : vector<4x16x1xf32> -> vector<4x16x1xf32>
    %384 = vector.broadcast %383 : vector<4x16x1xf32> to vector<4x16x16xf32>
    %385 = arith.mulf %380, %384 : vector<4x16x16xf32>
    "tpu.trace_start"() <{level = 10 : i32, message = "hnm,hmd->hnd"}> : () -> ()
    %cst_232 = arith.constant dense<0.000000e+00> : vector<4x16x8xf32>
    %386 = tpu.matmul %385, %369, %cst_232 {dimension_numbers = #tpu.dot_dimension_numbers<[2], [1], [1], [2], [0, 0, 0, 1, 1, 2], [0], [0]>} : vector<4x16x16xf32>, vector<4x16x8xf32>, vector<4x16x8xf32> -> vector<4x16x8xf32>
    "tpu.trace_stop"() : () -> ()
    %c3_233 = arith.constant 3 : index
    %c0_234 = arith.constant 0 : index
    %c0_235 = arith.constant 0 : index
    %c0_236 = arith.constant 0 : index
    %387 = vector.load %arg10[%c3_233, %c0_234, %c0_235, %c0_236] : memref<6x4x8x32xf32, #tpu.memory_space<vmem>>, vector<1x4x8x32xf32>
    %388 = vector.shape_cast %387 : vector<1x4x8x32xf32> to vector<4x8x32xf32>
    "tpu.trace_start"() <{level = 10 : i32, message = "hnd,hdc->hnc"}> : () -> ()
    %cst_237 = arith.constant dense<0.000000e+00> : vector<4x16x32xf32>
    %389 = tpu.matmul %386, %388, %cst_237 {dimension_numbers = #tpu.dot_dimension_numbers<[2], [1], [1], [2], [0, 0, 0, 1, 1, 2], [0], [0]>} : vector<4x16x8xf32>, vector<4x8x32xf32>, vector<4x16x32xf32> -> vector<4x16x32xf32>
    "tpu.trace_stop"() : () -> ()
    %cst_238 = arith.constant dense<0.000000e+00> : vector<16x32xf32>
    %390 = vector.multi_reduction <add>, %389, %cst_238 [0] : vector<4x16x32xf32> to vector<16x32xf32>
    %391 = arith.addf %331, %390 : vector<16x32xf32>
    %c3_239 = arith.constant 3 : index
    %c0_240 = arith.constant 0 : index
    %c0_241 = arith.constant 0 : index
    %392 = vector.load %arg11[%c3_239, %c0_240, %c0_241] : memref<6x1x32xf32, #tpu.memory_space<vmem>>, vector<1x1x32xf32>
    %393 = vector.shape_cast %392 : vector<1x1x32xf32> to vector<1x32xf32>
    %394 = vector.broadcast %393 : vector<1x32xf32> to vector<16x32xf32>
    %395 = arith.addf %391, %394 : vector<16x32xf32>
    %c3_242 = arith.constant 3 : index
    %c0_243 = arith.constant 0 : index
    %c0_244 = arith.constant 0 : index
    %396 = vector.load %arg12[%c3_242, %c0_243, %c0_244] : memref<6x1x32xf32, #tpu.memory_space<vmem>>, vector<1x1x32xf32>
    %397 = vector.shape_cast %396 : vector<1x1x32xf32> to vector<1x32xf32>
    %c3_245 = arith.constant 3 : index
    %c0_246 = arith.constant 0 : index
    %c0_247 = arith.constant 0 : index
    %398 = vector.load %arg13[%c3_245, %c0_246, %c0_247] : memref<6x1x32xf32, #tpu.memory_space<vmem>>, vector<1x1x32xf32>
    %399 = vector.shape_cast %398 : vector<1x1x32xf32> to vector<1x32xf32>
    %cst_248 = arith.constant dense<0.000000e+00> : vector<16xf32>
    %400 = vector.multi_reduction <add>, %395, %cst_248 [1] : vector<16x32xf32> to vector<16xf32>
    %401 = vector.shape_cast %400 : vector<16xf32> to vector<16x1xf32>
    %cst_249 = arith.constant 3.200000e+01 : f32
    %402 = vector.broadcast %cst_249 : f32 to vector<16x1xf32>
    %403 = arith.divf %401, %402 : vector<16x1xf32>
    %404 = vector.broadcast %403 : vector<16x1xf32> to vector<16x32xf32>
    %405 = arith.subf %395, %404 : vector<16x32xf32>
    %406 = arith.mulf %405, %405 : vector<16x32xf32>
    %cst_250 = arith.constant dense<0.000000e+00> : vector<16xf32>
    %407 = vector.multi_reduction <add>, %406, %cst_250 [1] : vector<16x32xf32> to vector<16xf32>
    %408 = vector.shape_cast %407 : vector<16xf32> to vector<16x1xf32>
    %cst_251 = arith.constant 3.200000e+01 : f32
    %409 = vector.broadcast %cst_251 : f32 to vector<16x1xf32>
    %410 = arith.divf %408, %409 : vector<16x1xf32>
    %411 = vector.broadcast %403 : vector<16x1xf32> to vector<16x32xf32>
    %412 = arith.subf %395, %411 : vector<16x32xf32>
    %cst_252 = arith.constant 9.99999974E-6 : f32
    %413 = vector.broadcast %cst_252 : f32 to vector<16x1xf32>
    %414 = arith.addf %410, %413 : vector<16x1xf32>
    %415 = math.rsqrt %414 : vector<16x1xf32>
    %416 = vector.broadcast %415 : vector<16x1xf32> to vector<16x32xf32>
    %417 = arith.mulf %412, %416 : vector<16x32xf32>
    %418 = vector.broadcast %397 : vector<1x32xf32> to vector<16x32xf32>
    %419 = arith.mulf %417, %418 : vector<16x32xf32>
    %420 = vector.broadcast %399 : vector<1x32xf32> to vector<16x32xf32>
    %421 = arith.addf %419, %420 : vector<16x32xf32>
    %c3_253 = arith.constant 3 : index
    %c0_254 = arith.constant 0 : index
    %c0_255 = arith.constant 0 : index
    %422 = vector.load %arg14[%c3_253, %c0_254, %c0_255] : memref<6x32x128xf32, #tpu.memory_space<vmem>>, vector<1x32x128xf32>
    %423 = vector.shape_cast %422 : vector<1x32x128xf32> to vector<32x128xf32>
    %cst_256 = arith.constant dense<0.000000e+00> : vector<16x128xf32>
    %424 = tpu.matmul %421, %423, %cst_256 {dimension_numbers = #tpu.dot_dimension_numbers<[1], [0], [0], [1], [0, 0, 1, 1], [], []>} : vector<16x32xf32>, vector<32x128xf32>, vector<16x128xf32> -> vector<16x128xf32>
    %c3_257 = arith.constant 3 : index
    %c0_258 = arith.constant 0 : index
    %c0_259 = arith.constant 0 : index
    %425 = vector.load %arg15[%c3_257, %c0_258, %c0_259] : memref<6x1x128xf32, #tpu.memory_space<vmem>>, vector<1x1x128xf32>
    %426 = vector.shape_cast %425 : vector<1x1x128xf32> to vector<1x128xf32>
    %427 = vector.broadcast %426 : vector<1x128xf32> to vector<16x128xf32>
    %428 = arith.addf %424, %427 : vector<16x128xf32>
    %cst_260 = arith.constant 0.000000e+00 : f32
    %429 = vector.broadcast %cst_260 : f32 to vector<16x128xf32>
    %430 = arith.maximumf %428, %429 : vector<16x128xf32>
    %c3_261 = arith.constant 3 : index
    %c0_262 = arith.constant 0 : index
    %c0_263 = arith.constant 0 : index
    %431 = vector.load %arg16[%c3_261, %c0_262, %c0_263] : memref<6x128x32xf32, #tpu.memory_space<vmem>>, vector<1x128x32xf32>
    %432 = vector.shape_cast %431 : vector<1x128x32xf32> to vector<128x32xf32>
    %cst_264 = arith.constant dense<0.000000e+00> : vector<16x32xf32>
    %433 = tpu.matmul %430, %432, %cst_264 {dimension_numbers = #tpu.dot_dimension_numbers<[1], [0], [0], [1], [0, 0, 1, 1], [], []>} : vector<16x128xf32>, vector<128x32xf32>, vector<16x32xf32> -> vector<16x32xf32>
    %434 = arith.addf %395, %433 : vector<16x32xf32>
    %c3_265 = arith.constant 3 : index
    %c0_266 = arith.constant 0 : index
    %c0_267 = arith.constant 0 : index
    %435 = vector.load %arg17[%c3_265, %c0_266, %c0_267] : memref<6x1x32xf32, #tpu.memory_space<vmem>>, vector<1x1x32xf32>
    %436 = vector.shape_cast %435 : vector<1x1x32xf32> to vector<1x32xf32>
    %437 = vector.broadcast %436 : vector<1x32xf32> to vector<16x32xf32>
    %438 = arith.addf %434, %437 : vector<16x32xf32>
    %c4 = arith.constant 4 : index
    %c0_268 = arith.constant 0 : index
    %c0_269 = arith.constant 0 : index
    %439 = vector.load %arg5[%c4, %c0_268, %c0_269] : memref<6x1x32xf32, #tpu.memory_space<vmem>>, vector<1x1x32xf32>
    %440 = vector.shape_cast %439 : vector<1x1x32xf32> to vector<1x32xf32>
    %c4_270 = arith.constant 4 : index
    %c0_271 = arith.constant 0 : index
    %c0_272 = arith.constant 0 : index
    %441 = vector.load %arg6[%c4_270, %c0_271, %c0_272] : memref<6x1x32xf32, #tpu.memory_space<vmem>>, vector<1x1x32xf32>
    %442 = vector.shape_cast %441 : vector<1x1x32xf32> to vector<1x32xf32>
    %cst_273 = arith.constant dense<0.000000e+00> : vector<16xf32>
    %443 = vector.multi_reduction <add>, %438, %cst_273 [1] : vector<16x32xf32> to vector<16xf32>
    %444 = vector.shape_cast %443 : vector<16xf32> to vector<16x1xf32>
    %cst_274 = arith.constant 3.200000e+01 : f32
    %445 = vector.broadcast %cst_274 : f32 to vector<16x1xf32>
    %446 = arith.divf %444, %445 : vector<16x1xf32>
    %447 = vector.broadcast %446 : vector<16x1xf32> to vector<16x32xf32>
    %448 = arith.subf %438, %447 : vector<16x32xf32>
    %449 = arith.mulf %448, %448 : vector<16x32xf32>
    %cst_275 = arith.constant dense<0.000000e+00> : vector<16xf32>
    %450 = vector.multi_reduction <add>, %449, %cst_275 [1] : vector<16x32xf32> to vector<16xf32>
    %451 = vector.shape_cast %450 : vector<16xf32> to vector<16x1xf32>
    %cst_276 = arith.constant 3.200000e+01 : f32
    %452 = vector.broadcast %cst_276 : f32 to vector<16x1xf32>
    %453 = arith.divf %451, %452 : vector<16x1xf32>
    %454 = vector.broadcast %446 : vector<16x1xf32> to vector<16x32xf32>
    %455 = arith.subf %438, %454 : vector<16x32xf32>
    %cst_277 = arith.constant 9.99999974E-6 : f32
    %456 = vector.broadcast %cst_277 : f32 to vector<16x1xf32>
    %457 = arith.addf %453, %456 : vector<16x1xf32>
    %458 = math.rsqrt %457 : vector<16x1xf32>
    %459 = vector.broadcast %458 : vector<16x1xf32> to vector<16x32xf32>
    %460 = arith.mulf %455, %459 : vector<16x32xf32>
    %461 = vector.broadcast %440 : vector<1x32xf32> to vector<16x32xf32>
    %462 = arith.mulf %460, %461 : vector<16x32xf32>
    %463 = vector.broadcast %442 : vector<1x32xf32> to vector<16x32xf32>
    %464 = arith.addf %462, %463 : vector<16x32xf32>
    %465 = vector.shape_cast %464 : vector<16x32xf32> to vector<1x16x32xf32>
    %466 = vector.shape_cast %465 : vector<1x16x32xf32> to vector<1x16x32xf32>
    %467 = vector.broadcast %466 : vector<1x16x32xf32> to vector<4x16x32xf32>
    %c4_278 = arith.constant 4 : index
    %c0_279 = arith.constant 0 : index
    %c0_280 = arith.constant 0 : index
    %c0_281 = arith.constant 0 : index
    %468 = vector.load %arg7[%c4_278, %c0_279, %c0_280, %c0_281] : memref<6x4x32x8xf32, #tpu.memory_space<vmem>>, vector<1x4x32x8xf32>
    %469 = vector.shape_cast %468 : vector<1x4x32x8xf32> to vector<4x32x8xf32>
    "tpu.trace_start"() <{level = 10 : i32, message = "hnc,hcd->hnd"}> : () -> ()
    %cst_282 = arith.constant dense<0.000000e+00> : vector<4x16x8xf32>
    %470 = tpu.matmul %467, %469, %cst_282 {dimension_numbers = #tpu.dot_dimension_numbers<[2], [1], [1], [2], [0, 0, 0, 1, 1, 2], [0], [0]>} : vector<4x16x32xf32>, vector<4x32x8xf32>, vector<4x16x8xf32> -> vector<4x16x8xf32>
    "tpu.trace_stop"() : () -> ()
    %c4_283 = arith.constant 4 : index
    %c0_284 = arith.constant 0 : index
    %c0_285 = arith.constant 0 : index
    %c0_286 = arith.constant 0 : index
    %471 = vector.load %arg8[%c4_283, %c0_284, %c0_285, %c0_286] : memref<6x4x32x8xf32, #tpu.memory_space<vmem>>, vector<1x4x32x8xf32>
    %472 = vector.shape_cast %471 : vector<1x4x32x8xf32> to vector<4x32x8xf32>
    "tpu.trace_start"() <{level = 10 : i32, message = "hnc,hcd->hnd"}> : () -> ()
    %cst_287 = arith.constant dense<0.000000e+00> : vector<4x16x8xf32>
    %473 = tpu.matmul %467, %472, %cst_287 {dimension_numbers = #tpu.dot_dimension_numbers<[2], [1], [1], [2], [0, 0, 0, 1, 1, 2], [0], [0]>} : vector<4x16x32xf32>, vector<4x32x8xf32>, vector<4x16x8xf32> -> vector<4x16x8xf32>
    "tpu.trace_stop"() : () -> ()
    %c4_288 = arith.constant 4 : index
    %c0_289 = arith.constant 0 : index
    %c0_290 = arith.constant 0 : index
    %c0_291 = arith.constant 0 : index
    %474 = vector.load %arg9[%c4_288, %c0_289, %c0_290, %c0_291] : memref<6x4x32x8xf32, #tpu.memory_space<vmem>>, vector<1x4x32x8xf32>
    %475 = vector.shape_cast %474 : vector<1x4x32x8xf32> to vector<4x32x8xf32>
    "tpu.trace_start"() <{level = 10 : i32, message = "hnc,hcd->hnd"}> : () -> ()
    %cst_292 = arith.constant dense<0.000000e+00> : vector<4x16x8xf32>
    %476 = tpu.matmul %467, %475, %cst_292 {dimension_numbers = #tpu.dot_dimension_numbers<[2], [1], [1], [2], [0, 0, 0, 1, 1, 2], [0], [0]>} : vector<4x16x32xf32>, vector<4x32x8xf32>, vector<4x16x8xf32> -> vector<4x16x8xf32>
    "tpu.trace_stop"() : () -> ()
    "tpu.trace_start"() <{level = 10 : i32, message = "hnd,hmd->hnm"}> : () -> ()
    %cst_293 = arith.constant dense<0.000000e+00> : vector<4x16x16xf32>
    %477 = tpu.matmul %470, %473, %cst_293 {dimension_numbers = #tpu.dot_dimension_numbers<[2], [2], [1], [1], [0, 0, 0, 1, 1, 1], [0], [0]>} : vector<4x16x8xf32>, vector<4x16x8xf32>, vector<4x16x16xf32> -> vector<4x16x16xf32>
    "tpu.trace_stop"() : () -> ()
    %cst_294 = arith.constant 0.176776692 : f32
    %478 = vector.broadcast %cst_294 : f32 to vector<4x16x16xf32>
    %479 = arith.mulf %477, %478 : vector<4x16x16xf32>
    %480 = vector.shape_cast %10 : vector<16x16xf32> to vector<1x16x16xf32>
    %481 = vector.broadcast %480 : vector<1x16x16xf32> to vector<4x16x16xf32>
    %482 = arith.addf %479, %481 : vector<4x16x16xf32>
    %cst_295 = arith.constant dense<0xFF800000> : vector<4x16xf32>
    %483 = vector.multi_reduction <maximumf>, %482, %cst_295 [2] : vector<4x16x16xf32> to vector<4x16xf32>
    %484 = vector.shape_cast %483 : vector<4x16xf32> to vector<4x16x1xf32>
    %485 = vector.broadcast %484 : vector<4x16x1xf32> to vector<4x16x16xf32>
    %486 = arith.subf %482, %485 : vector<4x16x16xf32>
    %487 = math.exp %486 : vector<4x16x16xf32>
    %cst_296 = arith.constant dense<0.000000e+00> : vector<4x16xf32>
    %488 = vector.multi_reduction <add>, %487, %cst_296 [2] : vector<4x16x16xf32> to vector<4x16xf32>
    %489 = vector.shape_cast %488 : vector<4x16xf32> to vector<4x16x1xf32>
    %490 = tpu.reciprocal %489 : vector<4x16x1xf32> -> vector<4x16x1xf32>
    %491 = vector.broadcast %490 : vector<4x16x1xf32> to vector<4x16x16xf32>
    %492 = arith.mulf %487, %491 : vector<4x16x16xf32>
    "tpu.trace_start"() <{level = 10 : i32, message = "hnm,hmd->hnd"}> : () -> ()
    %cst_297 = arith.constant dense<0.000000e+00> : vector<4x16x8xf32>
    %493 = tpu.matmul %492, %476, %cst_297 {dimension_numbers = #tpu.dot_dimension_numbers<[2], [1], [1], [2], [0, 0, 0, 1, 1, 2], [0], [0]>} : vector<4x16x16xf32>, vector<4x16x8xf32>, vector<4x16x8xf32> -> vector<4x16x8xf32>
    "tpu.trace_stop"() : () -> ()
    %c4_298 = arith.constant 4 : index
    %c0_299 = arith.constant 0 : index
    %c0_300 = arith.constant 0 : index
    %c0_301 = arith.constant 0 : index
    %494 = vector.load %arg10[%c4_298, %c0_299, %c0_300, %c0_301] : memref<6x4x8x32xf32, #tpu.memory_space<vmem>>, vector<1x4x8x32xf32>
    %495 = vector.shape_cast %494 : vector<1x4x8x32xf32> to vector<4x8x32xf32>
    "tpu.trace_start"() <{level = 10 : i32, message = "hnd,hdc->hnc"}> : () -> ()
    %cst_302 = arith.constant dense<0.000000e+00> : vector<4x16x32xf32>
    %496 = tpu.matmul %493, %495, %cst_302 {dimension_numbers = #tpu.dot_dimension_numbers<[2], [1], [1], [2], [0, 0, 0, 1, 1, 2], [0], [0]>} : vector<4x16x8xf32>, vector<4x8x32xf32>, vector<4x16x32xf32> -> vector<4x16x32xf32>
    "tpu.trace_stop"() : () -> ()
    %cst_303 = arith.constant dense<0.000000e+00> : vector<16x32xf32>
    %497 = vector.multi_reduction <add>, %496, %cst_303 [0] : vector<4x16x32xf32> to vector<16x32xf32>
    %498 = arith.addf %438, %497 : vector<16x32xf32>
    %c4_304 = arith.constant 4 : index
    %c0_305 = arith.constant 0 : index
    %c0_306 = arith.constant 0 : index
    %499 = vector.load %arg11[%c4_304, %c0_305, %c0_306] : memref<6x1x32xf32, #tpu.memory_space<vmem>>, vector<1x1x32xf32>
    %500 = vector.shape_cast %499 : vector<1x1x32xf32> to vector<1x32xf32>
    %501 = vector.broadcast %500 : vector<1x32xf32> to vector<16x32xf32>
    %502 = arith.addf %498, %501 : vector<16x32xf32>
    %c4_307 = arith.constant 4 : index
    %c0_308 = arith.constant 0 : index
    %c0_309 = arith.constant 0 : index
    %503 = vector.load %arg12[%c4_307, %c0_308, %c0_309] : memref<6x1x32xf32, #tpu.memory_space<vmem>>, vector<1x1x32xf32>
    %504 = vector.shape_cast %503 : vector<1x1x32xf32> to vector<1x32xf32>
    %c4_310 = arith.constant 4 : index
    %c0_311 = arith.constant 0 : index
    %c0_312 = arith.constant 0 : index
    %505 = vector.load %arg13[%c4_310, %c0_311, %c0_312] : memref<6x1x32xf32, #tpu.memory_space<vmem>>, vector<1x1x32xf32>
    %506 = vector.shape_cast %505 : vector<1x1x32xf32> to vector<1x32xf32>
    %cst_313 = arith.constant dense<0.000000e+00> : vector<16xf32>
    %507 = vector.multi_reduction <add>, %502, %cst_313 [1] : vector<16x32xf32> to vector<16xf32>
    %508 = vector.shape_cast %507 : vector<16xf32> to vector<16x1xf32>
    %cst_314 = arith.constant 3.200000e+01 : f32
    %509 = vector.broadcast %cst_314 : f32 to vector<16x1xf32>
    %510 = arith.divf %508, %509 : vector<16x1xf32>
    %511 = vector.broadcast %510 : vector<16x1xf32> to vector<16x32xf32>
    %512 = arith.subf %502, %511 : vector<16x32xf32>
    %513 = arith.mulf %512, %512 : vector<16x32xf32>
    %cst_315 = arith.constant dense<0.000000e+00> : vector<16xf32>
    %514 = vector.multi_reduction <add>, %513, %cst_315 [1] : vector<16x32xf32> to vector<16xf32>
    %515 = vector.shape_cast %514 : vector<16xf32> to vector<16x1xf32>
    %cst_316 = arith.constant 3.200000e+01 : f32
    %516 = vector.broadcast %cst_316 : f32 to vector<16x1xf32>
    %517 = arith.divf %515, %516 : vector<16x1xf32>
    %518 = vector.broadcast %510 : vector<16x1xf32> to vector<16x32xf32>
    %519 = arith.subf %502, %518 : vector<16x32xf32>
    %cst_317 = arith.constant 9.99999974E-6 : f32
    %520 = vector.broadcast %cst_317 : f32 to vector<16x1xf32>
    %521 = arith.addf %517, %520 : vector<16x1xf32>
    %522 = math.rsqrt %521 : vector<16x1xf32>
    %523 = vector.broadcast %522 : vector<16x1xf32> to vector<16x32xf32>
    %524 = arith.mulf %519, %523 : vector<16x32xf32>
    %525 = vector.broadcast %504 : vector<1x32xf32> to vector<16x32xf32>
    %526 = arith.mulf %524, %525 : vector<16x32xf32>
    %527 = vector.broadcast %506 : vector<1x32xf32> to vector<16x32xf32>
    %528 = arith.addf %526, %527 : vector<16x32xf32>
    %c4_318 = arith.constant 4 : index
    %c0_319 = arith.constant 0 : index
    %c0_320 = arith.constant 0 : index
    %529 = vector.load %arg14[%c4_318, %c0_319, %c0_320] : memref<6x32x128xf32, #tpu.memory_space<vmem>>, vector<1x32x128xf32>
    %530 = vector.shape_cast %529 : vector<1x32x128xf32> to vector<32x128xf32>
    %cst_321 = arith.constant dense<0.000000e+00> : vector<16x128xf32>
    %531 = tpu.matmul %528, %530, %cst_321 {dimension_numbers = #tpu.dot_dimension_numbers<[1], [0], [0], [1], [0, 0, 1, 1], [], []>} : vector<16x32xf32>, vector<32x128xf32>, vector<16x128xf32> -> vector<16x128xf32>
    %c4_322 = arith.constant 4 : index
    %c0_323 = arith.constant 0 : index
    %c0_324 = arith.constant 0 : index
    %532 = vector.load %arg15[%c4_322, %c0_323, %c0_324] : memref<6x1x128xf32, #tpu.memory_space<vmem>>, vector<1x1x128xf32>
    %533 = vector.shape_cast %532 : vector<1x1x128xf32> to vector<1x128xf32>
    %534 = vector.broadcast %533 : vector<1x128xf32> to vector<16x128xf32>
    %535 = arith.addf %531, %534 : vector<16x128xf32>
    %cst_325 = arith.constant 0.000000e+00 : f32
    %536 = vector.broadcast %cst_325 : f32 to vector<16x128xf32>
    %537 = arith.maximumf %535, %536 : vector<16x128xf32>
    %c4_326 = arith.constant 4 : index
    %c0_327 = arith.constant 0 : index
    %c0_328 = arith.constant 0 : index
    %538 = vector.load %arg16[%c4_326, %c0_327, %c0_328] : memref<6x128x32xf32, #tpu.memory_space<vmem>>, vector<1x128x32xf32>
    %539 = vector.shape_cast %538 : vector<1x128x32xf32> to vector<128x32xf32>
    %cst_329 = arith.constant dense<0.000000e+00> : vector<16x32xf32>
    %540 = tpu.matmul %537, %539, %cst_329 {dimension_numbers = #tpu.dot_dimension_numbers<[1], [0], [0], [1], [0, 0, 1, 1], [], []>} : vector<16x128xf32>, vector<128x32xf32>, vector<16x32xf32> -> vector<16x32xf32>
    %541 = arith.addf %502, %540 : vector<16x32xf32>
    %c4_330 = arith.constant 4 : index
    %c0_331 = arith.constant 0 : index
    %c0_332 = arith.constant 0 : index
    %542 = vector.load %arg17[%c4_330, %c0_331, %c0_332] : memref<6x1x32xf32, #tpu.memory_space<vmem>>, vector<1x1x32xf32>
    %543 = vector.shape_cast %542 : vector<1x1x32xf32> to vector<1x32xf32>
    %544 = vector.broadcast %543 : vector<1x32xf32> to vector<16x32xf32>
    %545 = arith.addf %541, %544 : vector<16x32xf32>
    %c5 = arith.constant 5 : index
    %c0_333 = arith.constant 0 : index
    %c0_334 = arith.constant 0 : index
    %546 = vector.load %arg5[%c5, %c0_333, %c0_334] : memref<6x1x32xf32, #tpu.memory_space<vmem>>, vector<1x1x32xf32>
    %547 = vector.shape_cast %546 : vector<1x1x32xf32> to vector<1x32xf32>
    %c5_335 = arith.constant 5 : index
    %c0_336 = arith.constant 0 : index
    %c0_337 = arith.constant 0 : index
    %548 = vector.load %arg6[%c5_335, %c0_336, %c0_337] : memref<6x1x32xf32, #tpu.memory_space<vmem>>, vector<1x1x32xf32>
    %549 = vector.shape_cast %548 : vector<1x1x32xf32> to vector<1x32xf32>
    %cst_338 = arith.constant dense<0.000000e+00> : vector<16xf32>
    %550 = vector.multi_reduction <add>, %545, %cst_338 [1] : vector<16x32xf32> to vector<16xf32>
    %551 = vector.shape_cast %550 : vector<16xf32> to vector<16x1xf32>
    %cst_339 = arith.constant 3.200000e+01 : f32
    %552 = vector.broadcast %cst_339 : f32 to vector<16x1xf32>
    %553 = arith.divf %551, %552 : vector<16x1xf32>
    %554 = vector.broadcast %553 : vector<16x1xf32> to vector<16x32xf32>
    %555 = arith.subf %545, %554 : vector<16x32xf32>
    %556 = arith.mulf %555, %555 : vector<16x32xf32>
    %cst_340 = arith.constant dense<0.000000e+00> : vector<16xf32>
    %557 = vector.multi_reduction <add>, %556, %cst_340 [1] : vector<16x32xf32> to vector<16xf32>
    %558 = vector.shape_cast %557 : vector<16xf32> to vector<16x1xf32>
    %cst_341 = arith.constant 3.200000e+01 : f32
    %559 = vector.broadcast %cst_341 : f32 to vector<16x1xf32>
    %560 = arith.divf %558, %559 : vector<16x1xf32>
    %561 = vector.broadcast %553 : vector<16x1xf32> to vector<16x32xf32>
    %562 = arith.subf %545, %561 : vector<16x32xf32>
    %cst_342 = arith.constant 9.99999974E-6 : f32
    %563 = vector.broadcast %cst_342 : f32 to vector<16x1xf32>
    %564 = arith.addf %560, %563 : vector<16x1xf32>
    %565 = math.rsqrt %564 : vector<16x1xf32>
    %566 = vector.broadcast %565 : vector<16x1xf32> to vector<16x32xf32>
    %567 = arith.mulf %562, %566 : vector<16x32xf32>
    %568 = vector.broadcast %547 : vector<1x32xf32> to vector<16x32xf32>
    %569 = arith.mulf %567, %568 : vector<16x32xf32>
    %570 = vector.broadcast %549 : vector<1x32xf32> to vector<16x32xf32>
    %571 = arith.addf %569, %570 : vector<16x32xf32>
    %572 = vector.shape_cast %571 : vector<16x32xf32> to vector<1x16x32xf32>
    %573 = vector.shape_cast %572 : vector<1x16x32xf32> to vector<1x16x32xf32>
    %574 = vector.broadcast %573 : vector<1x16x32xf32> to vector<4x16x32xf32>
    %c5_343 = arith.constant 5 : index
    %c0_344 = arith.constant 0 : index
    %c0_345 = arith.constant 0 : index
    %c0_346 = arith.constant 0 : index
    %575 = vector.load %arg7[%c5_343, %c0_344, %c0_345, %c0_346] : memref<6x4x32x8xf32, #tpu.memory_space<vmem>>, vector<1x4x32x8xf32>
    %576 = vector.shape_cast %575 : vector<1x4x32x8xf32> to vector<4x32x8xf32>
    "tpu.trace_start"() <{level = 10 : i32, message = "hnc,hcd->hnd"}> : () -> ()
    %cst_347 = arith.constant dense<0.000000e+00> : vector<4x16x8xf32>
    %577 = tpu.matmul %574, %576, %cst_347 {dimension_numbers = #tpu.dot_dimension_numbers<[2], [1], [1], [2], [0, 0, 0, 1, 1, 2], [0], [0]>} : vector<4x16x32xf32>, vector<4x32x8xf32>, vector<4x16x8xf32> -> vector<4x16x8xf32>
    "tpu.trace_stop"() : () -> ()
    %c5_348 = arith.constant 5 : index
    %c0_349 = arith.constant 0 : index
    %c0_350 = arith.constant 0 : index
    %c0_351 = arith.constant 0 : index
    %578 = vector.load %arg8[%c5_348, %c0_349, %c0_350, %c0_351] : memref<6x4x32x8xf32, #tpu.memory_space<vmem>>, vector<1x4x32x8xf32>
    %579 = vector.shape_cast %578 : vector<1x4x32x8xf32> to vector<4x32x8xf32>
    "tpu.trace_start"() <{level = 10 : i32, message = "hnc,hcd->hnd"}> : () -> ()
    %cst_352 = arith.constant dense<0.000000e+00> : vector<4x16x8xf32>
    %580 = tpu.matmul %574, %579, %cst_352 {dimension_numbers = #tpu.dot_dimension_numbers<[2], [1], [1], [2], [0, 0, 0, 1, 1, 2], [0], [0]>} : vector<4x16x32xf32>, vector<4x32x8xf32>, vector<4x16x8xf32> -> vector<4x16x8xf32>
    "tpu.trace_stop"() : () -> ()
    %c5_353 = arith.constant 5 : index
    %c0_354 = arith.constant 0 : index
    %c0_355 = arith.constant 0 : index
    %c0_356 = arith.constant 0 : index
    %581 = vector.load %arg9[%c5_353, %c0_354, %c0_355, %c0_356] : memref<6x4x32x8xf32, #tpu.memory_space<vmem>>, vector<1x4x32x8xf32>
    %582 = vector.shape_cast %581 : vector<1x4x32x8xf32> to vector<4x32x8xf32>
    "tpu.trace_start"() <{level = 10 : i32, message = "hnc,hcd->hnd"}> : () -> ()
    %cst_357 = arith.constant dense<0.000000e+00> : vector<4x16x8xf32>
    %583 = tpu.matmul %574, %582, %cst_357 {dimension_numbers = #tpu.dot_dimension_numbers<[2], [1], [1], [2], [0, 0, 0, 1, 1, 2], [0], [0]>} : vector<4x16x32xf32>, vector<4x32x8xf32>, vector<4x16x8xf32> -> vector<4x16x8xf32>
    "tpu.trace_stop"() : () -> ()
    "tpu.trace_start"() <{level = 10 : i32, message = "hnd,hmd->hnm"}> : () -> ()
    %cst_358 = arith.constant dense<0.000000e+00> : vector<4x16x16xf32>
    %584 = tpu.matmul %577, %580, %cst_358 {dimension_numbers = #tpu.dot_dimension_numbers<[2], [2], [1], [1], [0, 0, 0, 1, 1, 1], [0], [0]>} : vector<4x16x8xf32>, vector<4x16x8xf32>, vector<4x16x16xf32> -> vector<4x16x16xf32>
    "tpu.trace_stop"() : () -> ()
    %cst_359 = arith.constant 0.176776692 : f32
    %585 = vector.broadcast %cst_359 : f32 to vector<4x16x16xf32>
    %586 = arith.mulf %584, %585 : vector<4x16x16xf32>
    %587 = vector.shape_cast %10 : vector<16x16xf32> to vector<1x16x16xf32>
    %588 = vector.broadcast %587 : vector<1x16x16xf32> to vector<4x16x16xf32>
    %589 = arith.addf %586, %588 : vector<4x16x16xf32>
    %cst_360 = arith.constant dense<0xFF800000> : vector<4x16xf32>
    %590 = vector.multi_reduction <maximumf>, %589, %cst_360 [2] : vector<4x16x16xf32> to vector<4x16xf32>
    %591 = vector.shape_cast %590 : vector<4x16xf32> to vector<4x16x1xf32>
    %592 = vector.broadcast %591 : vector<4x16x1xf32> to vector<4x16x16xf32>
    %593 = arith.subf %589, %592 : vector<4x16x16xf32>
    %594 = math.exp %593 : vector<4x16x16xf32>
    %cst_361 = arith.constant dense<0.000000e+00> : vector<4x16xf32>
    %595 = vector.multi_reduction <add>, %594, %cst_361 [2] : vector<4x16x16xf32> to vector<4x16xf32>
    %596 = vector.shape_cast %595 : vector<4x16xf32> to vector<4x16x1xf32>
    %597 = tpu.reciprocal %596 : vector<4x16x1xf32> -> vector<4x16x1xf32>
    %598 = vector.broadcast %597 : vector<4x16x1xf32> to vector<4x16x16xf32>
    %599 = arith.mulf %594, %598 : vector<4x16x16xf32>
    "tpu.trace_start"() <{level = 10 : i32, message = "hnm,hmd->hnd"}> : () -> ()
    %cst_362 = arith.constant dense<0.000000e+00> : vector<4x16x8xf32>
    %600 = tpu.matmul %599, %583, %cst_362 {dimension_numbers = #tpu.dot_dimension_numbers<[2], [1], [1], [2], [0, 0, 0, 1, 1, 2], [0], [0]>} : vector<4x16x16xf32>, vector<4x16x8xf32>, vector<4x16x8xf32> -> vector<4x16x8xf32>
    "tpu.trace_stop"() : () -> ()
    %c5_363 = arith.constant 5 : index
    %c0_364 = arith.constant 0 : index
    %c0_365 = arith.constant 0 : index
    %c0_366 = arith.constant 0 : index
    %601 = vector.load %arg10[%c5_363, %c0_364, %c0_365, %c0_366] : memref<6x4x8x32xf32, #tpu.memory_space<vmem>>, vector<1x4x8x32xf32>
    %602 = vector.shape_cast %601 : vector<1x4x8x32xf32> to vector<4x8x32xf32>
    "tpu.trace_start"() <{level = 10 : i32, message = "hnd,hdc->hnc"}> : () -> ()
    %cst_367 = arith.constant dense<0.000000e+00> : vector<4x16x32xf32>
    %603 = tpu.matmul %600, %602, %cst_367 {dimension_numbers = #tpu.dot_dimension_numbers<[2], [1], [1], [2], [0, 0, 0, 1, 1, 2], [0], [0]>} : vector<4x16x8xf32>, vector<4x8x32xf32>, vector<4x16x32xf32> -> vector<4x16x32xf32>
    "tpu.trace_stop"() : () -> ()
    %cst_368 = arith.constant dense<0.000000e+00> : vector<16x32xf32>
    %604 = vector.multi_reduction <add>, %603, %cst_368 [0] : vector<4x16x32xf32> to vector<16x32xf32>
    %605 = arith.addf %545, %604 : vector<16x32xf32>
    %c5_369 = arith.constant 5 : index
    %c0_370 = arith.constant 0 : index
    %c0_371 = arith.constant 0 : index
    %606 = vector.load %arg11[%c5_369, %c0_370, %c0_371] : memref<6x1x32xf32, #tpu.memory_space<vmem>>, vector<1x1x32xf32>
    %607 = vector.shape_cast %606 : vector<1x1x32xf32> to vector<1x32xf32>
    %608 = vector.broadcast %607 : vector<1x32xf32> to vector<16x32xf32>
    %609 = arith.addf %605, %608 : vector<16x32xf32>
    %c5_372 = arith.constant 5 : index
    %c0_373 = arith.constant 0 : index
    %c0_374 = arith.constant 0 : index
    %610 = vector.load %arg12[%c5_372, %c0_373, %c0_374] : memref<6x1x32xf32, #tpu.memory_space<vmem>>, vector<1x1x32xf32>
    %611 = vector.shape_cast %610 : vector<1x1x32xf32> to vector<1x32xf32>
    %c5_375 = arith.constant 5 : index
    %c0_376 = arith.constant 0 : index
    %c0_377 = arith.constant 0 : index
    %612 = vector.load %arg13[%c5_375, %c0_376, %c0_377] : memref<6x1x32xf32, #tpu.memory_space<vmem>>, vector<1x1x32xf32>
    %613 = vector.shape_cast %612 : vector<1x1x32xf32> to vector<1x32xf32>
    %cst_378 = arith.constant dense<0.000000e+00> : vector<16xf32>
    %614 = vector.multi_reduction <add>, %609, %cst_378 [1] : vector<16x32xf32> to vector<16xf32>
    %615 = vector.shape_cast %614 : vector<16xf32> to vector<16x1xf32>
    %cst_379 = arith.constant 3.200000e+01 : f32
    %616 = vector.broadcast %cst_379 : f32 to vector<16x1xf32>
    %617 = arith.divf %615, %616 : vector<16x1xf32>
    %618 = vector.broadcast %617 : vector<16x1xf32> to vector<16x32xf32>
    %619 = arith.subf %609, %618 : vector<16x32xf32>
    %620 = arith.mulf %619, %619 : vector<16x32xf32>
    %cst_380 = arith.constant dense<0.000000e+00> : vector<16xf32>
    %621 = vector.multi_reduction <add>, %620, %cst_380 [1] : vector<16x32xf32> to vector<16xf32>
    %622 = vector.shape_cast %621 : vector<16xf32> to vector<16x1xf32>
    %cst_381 = arith.constant 3.200000e+01 : f32
    %623 = vector.broadcast %cst_381 : f32 to vector<16x1xf32>
    %624 = arith.divf %622, %623 : vector<16x1xf32>
    %625 = vector.broadcast %617 : vector<16x1xf32> to vector<16x32xf32>
    %626 = arith.subf %609, %625 : vector<16x32xf32>
    %cst_382 = arith.constant 9.99999974E-6 : f32
    %627 = vector.broadcast %cst_382 : f32 to vector<16x1xf32>
    %628 = arith.addf %624, %627 : vector<16x1xf32>
    %629 = math.rsqrt %628 : vector<16x1xf32>
    %630 = vector.broadcast %629 : vector<16x1xf32> to vector<16x32xf32>
    %631 = arith.mulf %626, %630 : vector<16x32xf32>
    %632 = vector.broadcast %611 : vector<1x32xf32> to vector<16x32xf32>
    %633 = arith.mulf %631, %632 : vector<16x32xf32>
    %634 = vector.broadcast %613 : vector<1x32xf32> to vector<16x32xf32>
    %635 = arith.addf %633, %634 : vector<16x32xf32>
    %c5_383 = arith.constant 5 : index
    %c0_384 = arith.constant 0 : index
    %c0_385 = arith.constant 0 : index
    %636 = vector.load %arg14[%c5_383, %c0_384, %c0_385] : memref<6x32x128xf32, #tpu.memory_space<vmem>>, vector<1x32x128xf32>
    %637 = vector.shape_cast %636 : vector<1x32x128xf32> to vector<32x128xf32>
    %cst_386 = arith.constant dense<0.000000e+00> : vector<16x128xf32>
    %638 = tpu.matmul %635, %637, %cst_386 {dimension_numbers = #tpu.dot_dimension_numbers<[1], [0], [0], [1], [0, 0, 1, 1], [], []>} : vector<16x32xf32>, vector<32x128xf32>, vector<16x128xf32> -> vector<16x128xf32>
    %c5_387 = arith.constant 5 : index
    %c0_388 = arith.constant 0 : index
    %c0_389 = arith.constant 0 : index
    %639 = vector.load %arg15[%c5_387, %c0_388, %c0_389] : memref<6x1x128xf32, #tpu.memory_space<vmem>>, vector<1x1x128xf32>
    %640 = vector.shape_cast %639 : vector<1x1x128xf32> to vector<1x128xf32>
    %641 = vector.broadcast %640 : vector<1x128xf32> to vector<16x128xf32>
    %642 = arith.addf %638, %641 : vector<16x128xf32>
    %cst_390 = arith.constant 0.000000e+00 : f32
    %643 = vector.broadcast %cst_390 : f32 to vector<16x128xf32>
    %644 = arith.maximumf %642, %643 : vector<16x128xf32>
    %c5_391 = arith.constant 5 : index
    %c0_392 = arith.constant 0 : index
    %c0_393 = arith.constant 0 : index
    %645 = vector.load %arg16[%c5_391, %c0_392, %c0_393] : memref<6x128x32xf32, #tpu.memory_space<vmem>>, vector<1x128x32xf32>
    %646 = vector.shape_cast %645 : vector<1x128x32xf32> to vector<128x32xf32>
    %cst_394 = arith.constant dense<0.000000e+00> : vector<16x32xf32>
    %647 = tpu.matmul %644, %646, %cst_394 {dimension_numbers = #tpu.dot_dimension_numbers<[1], [0], [0], [1], [0, 0, 1, 1], [], []>} : vector<16x128xf32>, vector<128x32xf32>, vector<16x32xf32> -> vector<16x32xf32>
    %648 = arith.addf %609, %647 : vector<16x32xf32>
    %c5_395 = arith.constant 5 : index
    %c0_396 = arith.constant 0 : index
    %c0_397 = arith.constant 0 : index
    %649 = vector.load %arg17[%c5_395, %c0_396, %c0_397] : memref<6x1x32xf32, #tpu.memory_space<vmem>>, vector<1x1x32xf32>
    %650 = vector.shape_cast %649 : vector<1x1x32xf32> to vector<1x32xf32>
    %651 = vector.broadcast %650 : vector<1x32xf32> to vector<16x32xf32>
    %652 = arith.addf %648, %651 : vector<16x32xf32>
    %c0_398 = arith.constant 0 : index
    %c0_399 = arith.constant 0 : index
    %653 = vector.load %arg18[%c0_398, %c0_399] : memref<1x32xf32, #tpu.memory_space<vmem>>, vector<1x32xf32>
    %c0_400 = arith.constant 0 : index
    %c0_401 = arith.constant 0 : index
    %654 = vector.load %arg19[%c0_400, %c0_401] : memref<1x32xf32, #tpu.memory_space<vmem>>, vector<1x32xf32>
    %cst_402 = arith.constant dense<0.000000e+00> : vector<16xf32>
    %655 = vector.multi_reduction <add>, %652, %cst_402 [1] : vector<16x32xf32> to vector<16xf32>
    %656 = vector.shape_cast %655 : vector<16xf32> to vector<16x1xf32>
    %cst_403 = arith.constant 3.200000e+01 : f32
    %657 = vector.broadcast %cst_403 : f32 to vector<16x1xf32>
    %658 = arith.divf %656, %657 : vector<16x1xf32>
    %659 = vector.broadcast %658 : vector<16x1xf32> to vector<16x32xf32>
    %660 = arith.subf %652, %659 : vector<16x32xf32>
    %661 = arith.mulf %660, %660 : vector<16x32xf32>
    %cst_404 = arith.constant dense<0.000000e+00> : vector<16xf32>
    %662 = vector.multi_reduction <add>, %661, %cst_404 [1] : vector<16x32xf32> to vector<16xf32>
    %663 = vector.shape_cast %662 : vector<16xf32> to vector<16x1xf32>
    %cst_405 = arith.constant 3.200000e+01 : f32
    %664 = vector.broadcast %cst_405 : f32 to vector<16x1xf32>
    %665 = arith.divf %663, %664 : vector<16x1xf32>
    %666 = vector.broadcast %658 : vector<16x1xf32> to vector<16x32xf32>
    %667 = arith.subf %652, %666 : vector<16x32xf32>
    %cst_406 = arith.constant 9.99999974E-6 : f32
    %668 = vector.broadcast %cst_406 : f32 to vector<16x1xf32>
    %669 = arith.addf %665, %668 : vector<16x1xf32>
    %670 = math.rsqrt %669 : vector<16x1xf32>
    %671 = vector.broadcast %670 : vector<16x1xf32> to vector<16x32xf32>
    %672 = arith.mulf %667, %671 : vector<16x32xf32>
    %673 = vector.broadcast %653 : vector<1x32xf32> to vector<16x32xf32>
    %674 = arith.mulf %672, %673 : vector<16x32xf32>
    %675 = vector.broadcast %654 : vector<1x32xf32> to vector<16x32xf32>
    %676 = arith.addf %674, %675 : vector<16x32xf32>
    %c0_407 = arith.constant 0 : index
    %c0_408 = arith.constant 0 : index
    %677 = vector.load %arg20[%c0_407, %c0_408] : memref<32x128xf32, #tpu.memory_space<vmem>>, vector<32x128xf32>
    %cst_409 = arith.constant dense<0.000000e+00> : vector<16x128xf32>
    %678 = tpu.matmul %676, %677, %cst_409 {dimension_numbers = #tpu.dot_dimension_numbers<[1], [0], [0], [1], [0, 0, 1, 1], [], []>} : vector<16x32xf32>, vector<32x128xf32>, vector<16x128xf32> -> vector<16x128xf32>
    %c0_410 = arith.constant 0 : index
    %c0_411 = arith.constant 0 : index
    %679 = vector.load %arg21[%c0_410, %c0_411] : memref<1x128xf32, #tpu.memory_space<vmem>>, vector<1x128xf32>
    %680 = vector.broadcast %679 : vector<1x128xf32> to vector<16x128xf32>
    %681 = arith.addf %678, %680 : vector<16x128xf32>
    %c0_412 = arith.constant 0 : index
    %c0_413 = arith.constant 0 : index
    %682 = vector.load %arg22[%c0_412, %c0_413] : memref<16x128xf32, #tpu.memory_space<vmem>>, vector<16x128xf32>
    tpu.vector_store %arg22[%c0_412, %c0_413], %681 {strides = array<i32>} : memref<16x128xf32, #tpu.memory_space<vmem>>, vector<16x128xf32>,
    return
  }
  func.func @transform_0(%arg0: i32) -> (i32, i32) {
    %c0_i32 = arith.constant 0 : i32
    %c0_i32_0 = arith.constant 0 : i32
    return %arg0, %c0_i32 : i32, i32
  }
  func.func @transform_1(%arg0: i32) -> (i32, i32) {
    %c0_i32 = arith.constant 0 : i32
    %c0_i32_0 = arith.constant 0 : i32
    %c0_i32_1 = arith.constant 0 : i32
    return %c0_i32, %c0_i32_0 : i32, i32
  }
  func.func @transform_2(%arg0: i32) -> (i32, i32) {
    %c0_i32 = arith.constant 0 : i32
    %c0_i32_0 = arith.constant 0 : i32
    %c0_i32_1 = arith.constant 0 : i32
    return %c0_i32, %c0_i32_0 : i32, i32
  }
  func.func @transform_3(%arg0: i32) -> (i32, i32) {
    %c0_i32 = arith.constant 0 : i32
    %c0_i32_0 = arith.constant 0 : i32
    %c0_i32_1 = arith.constant 0 : i32
    return %c0_i32, %c0_i32_0 : i32, i32
  }
  func.func @transform_4(%arg0: i32) -> (i32, i32, i32) {
    %c0_i32 = arith.constant 0 : i32
    %c0_i32_0 = arith.constant 0 : i32
    %c0_i32_1 = arith.constant 0 : i32
    %c0_i32_2 = arith.constant 0 : i32
    return %c0_i32, %c0_i32_0, %c0_i32_1 : i32, i32, i32
  }
  func.func @transform_5(%arg0: i32) -> (i32, i32, i32) {
    %c0_i32 = arith.constant 0 : i32
    %c0_i32_0 = arith.constant 0 : i32
    %c0_i32_1 = arith.constant 0 : i32
    %c0_i32_2 = arith.constant 0 : i32
    return %c0_i32, %c0_i32_0, %c0_i32_1 : i32, i32, i32
  }
  func.func @transform_6(%arg0: i32) -> (i32, i32, i32, i32) {
    %c0_i32 = arith.constant 0 : i32
    %c0_i32_0 = arith.constant 0 : i32
    %c0_i32_1 = arith.constant 0 : i32
    %c0_i32_2 = arith.constant 0 : i32
    %c0_i32_3 = arith.constant 0 : i32
    return %c0_i32, %c0_i32_0, %c0_i32_1, %c0_i32_2 : i32, i32, i32, i32
  }
  func.func @transform_7(%arg0: i32) -> (i32, i32, i32, i32) {
    %c0_i32 = arith.constant 0 : i32
    %c0_i32_0 = arith.constant 0 : i32
    %c0_i32_1 = arith.constant 0 : i32
    %c0_i32_2 = arith.constant 0 : i32
    %c0_i32_3 = arith.constant 0 : i32
    return %c0_i32, %c0_i32_0, %c0_i32_1, %c0_i32_2 : i32, i32, i32, i32
  }
  func.func @transform_8(%arg0: i32) -> (i32, i32, i32, i32) {
    %c0_i32 = arith.constant 0 : i32
    %c0_i32_0 = arith.constant 0 : i32
    %c0_i32_1 = arith.constant 0 : i32
    %c0_i32_2 = arith.constant 0 : i32
    %c0_i32_3 = arith.constant 0 : i32
    return %c0_i32, %c0_i32_0, %c0_i32_1, %c0_i32_2 : i32, i32, i32, i32
  }
  func.func @transform_9(%arg0: i32) -> (i32, i32, i32, i32) {
    %c0_i32 = arith.constant 0 : i32
    %c0_i32_0 = arith.constant 0 : i32
    %c0_i32_1 = arith.constant 0 : i32
    %c0_i32_2 = arith.constant 0 : i32
    %c0_i32_3 = arith.constant 0 : i32
    return %c0_i32, %c0_i32_0, %c0_i32_1, %c0_i32_2 : i32, i32, i32, i32
  }
  func.func @transform_10(%arg0: i32) -> (i32, i32, i32) {
    %c0_i32 = arith.constant 0 : i32
    %c0_i32_0 = arith.constant 0 : i32
    %c0_i32_1 = arith.constant 0 : i32
    %c0_i32_2 = arith.constant 0 : i32
    return %c0_i32, %c0_i32_0, %c0_i32_1 : i32, i32, i32
  }
  func.func @transform_11(%arg0: i32) -> (i32, i32, i32) {
    %c0_i32 = arith.constant 0 : i32
    %c0_i32_0 = arith.constant 0 : i32
    %c0_i32_1 = arith.constant 0 : i32
    %c0_i32_2 = arith.constant 0 : i32
    return %c0_i32, %c0_i32_0, %c0_i32_1 : i32, i32, i32
  }
  func.func @transform_12(%arg0: i32) -> (i32, i32, i32) {
    %c0_i32 = arith.constant 0 : i32
    %c0_i32_0 = arith.constant 0 : i32
    %c0_i32_1 = arith.constant 0 : i32
    %c0_i32_2 = arith.constant 0 : i32
    return %c0_i32, %c0_i32_0, %c0_i32_1 : i32, i32, i32
  }
  func.func @transform_13(%arg0: i32) -> (i32, i32, i32) {
    %c0_i32 = arith.constant 0 : i32
    %c0_i32_0 = arith.constant 0 : i32
    %c0_i32_1 = arith.constant 0 : i32
    %c0_i32_2 = arith.constant 0 : i32
    return %c0_i32, %c0_i32_0, %c0_i32_1 : i32, i32, i32
  }
  func.func @transform_14(%arg0: i32) -> (i32, i32, i32) {
    %c0_i32 = arith.constant 0 : i32
    %c0_i32_0 = arith.constant 0 : i32
    %c0_i32_1 = arith.constant 0 : i32
    %c0_i32_2 = arith.constant 0 : i32
    return %c0_i32, %c0_i32_0, %c0_i32_1 : i32, i32, i32
  }
  func.func @transform_15(%arg0: i32) -> (i32, i32, i32) {
    %c0_i32 = arith.constant 0 : i32
    %c0_i32_0 = arith.constant 0 : i32
    %c0_i32_1 = arith.constant 0 : i32
    %c0_i32_2 = arith.constant 0 : i32
    return %c0_i32, %c0_i32_0, %c0_i32_1 : i32, i32, i32
  }
  func.func @transform_16(%arg0: i32) -> (i32, i32, i32) {
    %c0_i32 = arith.constant 0 : i32
    %c0_i32_0 = arith.constant 0 : i32
    %c0_i32_1 = arith.constant 0 : i32
    %c0_i32_2 = arith.constant 0 : i32
    return %c0_i32, %c0_i32_0, %c0_i32_1 : i32, i32, i32
  }
  func.func @transform_17(%arg0: i32) -> (i32, i32) {
    %c0_i32 = arith.constant 0 : i32
    %c0_i32_0 = arith.constant 0 : i32
    %c0_i32_1 = arith.constant 0 : i32
    return %c0_i32, %c0_i32_0 : i32, i32
  }
  func.func @transform_18(%arg0: i32) -> (i32, i32) {
    %c0_i32 = arith.constant 0 : i32
    %c0_i32_0 = arith.constant 0 : i32
    %c0_i32_1 = arith.constant 0 : i32
    return %c0_i32, %c0_i32_0 : i32, i32
  }
  func.func @transform_19(%arg0: i32) -> (i32, i32) {
    %c0_i32 = arith.constant 0 : i32
    %c0_i32_0 = arith.constant 0 : i32
    %c0_i32_1 = arith.constant 0 : i32
    return %c0_i32, %c0_i32_0 : i32, i32
  }
  func.func @transform_20(%arg0: i32) -> (i32, i32) {
    %c0_i32 = arith.constant 0 : i32
    %c0_i32_0 = arith.constant 0 : i32
    %c0_i32_1 = arith.constant 0 : i32
    return %c0_i32, %c0_i32_0 : i32, i32
  }
  func.func @transform_21(%arg0: i32) -> (i32, i32) {
    %c0_i32 = arith.constant 0 : i32
    %c0_i32_0 = arith.constant 0 : i32
    return %arg0, %c0_i32 : i32, i32
  }
}

</mosaic_0001>

<bundles_post_ra>
// kernel: tpu_custom_call.1
= control target key start
LH: loop header
LB: loop body
LE: loop exit
PB: predicated region body
PF: predicated region fallthrough
CT: control target
= control target key end

     0   :  { %s22646_s0 = inlined_call_operand.vmem [shape: s32[32,1], index: 0, kind: input, shape index: {}]   ;;  %s22647_s1 = inlined_call_operand.vmem [shape: f32[65,32], index: 1, kind: input, shape index: {}]   ;;  %s22648_s2 = inlined_call_operand.vmem [shape: f32[16,32], index: 2, kind: input, shape index: {}]   ;;  %s22649_s3 = inlined_call_operand.vmem [shape: f32[16,16], index: 3, kind: input, shape index: {}]   ;;  %s22650_s4 = inlined_call_operand.vmem [shape: f32[6,1,32], index: 4, kind: input, shape index: {}]   ;;  %s22651_s5 = inlined_call_operand.vmem [shape: f32[6,1,32], index: 5, kind: input, shape index: {}]   ;;  %s22652_s6 = inlined_call_operand.vmem [shape: f32[6,4,32,8], index: 6, kind: input, shape index: {}]   ;;  %s22653_s7 = inlined_call_operand.vmem [shape: f32[6,4,32,8], index: 7, kind: input, shape index: {}]   ;;  %s22654_s8 = inlined_call_operand.vmem [shape: f32[6,4,32,8], index: 8, kind: input, shape index: {}]   ;;  %s22655_s9 = inlined_call_operand.vmem [shape: f32[6,4,8,32], index: 9, kind: input, shape index: {}]   ;;  %s22656_s10 = inlined_call_operand.vmem [shape: f32[6,1,32], index: 10, kind: input, shape index: {}]   ;;  %s22657_s11 = inlined_call_operand.vmem [shape: f32[6,1,32], index: 11, kind: input, shape index: {}]   ;;  %s22658_s12 = inlined_call_operand.vmem [shape: f32[6,1,32], index: 12, kind: input, shape index: {}]   ;;  %s22659_s13 = inlined_call_operand.vmem [shape: f32[6,32,128], index: 13, kind: input, shape index: {}]   ;;  %s22660_s14 = inlined_call_operand.vmem [shape: f32[6,1,128], index: 14, kind: input, shape index: {}]   ;;  %s22661_s15 = inlined_call_operand.vmem [shape: f32[6,128,32], index: 15, kind: input, shape index: {}]   ;;  %s22662_s16 = inlined_call_operand.vmem [shape: f32[6,1,32], index: 16, kind: input, shape index: {}]   ;;  %s22663_s17 = inlined_call_operand.vmem [shape: f32[1,32], index: 17, kind: input, shape index: {}]   ;;  %s22664_s18 = inlined_call_operand.vmem [shape: f32[1,32], index: 18, kind: input, shape index: {}]   ;;  %s22665_s19 = inlined_call_operand.vmem [shape: f32[32,128], index: 19, kind: input, shape index: {}]   ;;  %s22666_s20 = inlined_call_operand.vmem [shape: f32[1,128], index: 20, kind: input, shape index: {}]   ;;  %s22667_s21 = inlined_call_operand.hbm [shape: f32[32,128], index: 21, kind: output, shape index: {}]  }
   0x1   :  { %22683 = sst [smem:[#allocation11_spill]] %s22646_s0 }
   0x2   :  { %22684 = sst [smem:[#allocation12_spill]] %s22647_s1 }
   0x3   :  { %22685 = sst [smem:[#allocation13_spill]] %s22648_s2 }
   0x4   :  { %22686 = sst [smem:[#allocation14_spill]] %s22649_s3 }
   0x5   :  { %22687 = sst [smem:[#allocation15_spill]] %s22650_s4 }
   0x6   :  { %22688 = sst [smem:[#allocation16_spill]] %s22651_s5 }
   0x7   :  { %22689 = sst [smem:[#allocation17_spill]] %s22652_s6 }
   0x8   :  { %22690 = sst [smem:[#allocation18_spill]] %s22667_s21 }
   0x9   :  { %26 = vsyncpa [#allocation3], 0 }
   0xa   :  { %28 = vsyncpa [#allocation3 + $0x1], 0  ;;  %s20036_s2 = smov 0   ;;  %s20038_s25 = smov 0  }
   0xb   :  { %s20040_s26 = smov 0   ;;  %s20042_s27 = smov 0  }
   0xc LB: > { %22691 = sst [smem:[#allocation5_spill]] %s19907_s2  ;;  %s20057_s3 = sadd.s32 4294967295, %s19919_s27   ;;  %s19919_s27 = sphi %s20042_s27, %s22712_s27   ;;  %s19915_s26 = sphi %s20040_s26, %s22714_s26   ;;  %s19911_s25 = sphi %s20038_s25, %s22716_s25   ;;  %s19907_s2 = sphi %s20036_s2, %s22715_s2  }
   0xd   : > { %22692 = sst [smem:[#allocation6_spill]] %s19915_s26  ;;  %s15258_s28 = sadd.s32 4294967294, %s19919_s27  }
   0xe   : > { %22693 = sst [smem:[#allocation7_spill]] %s19919_s27  ;;  %s20061_s29 = sadd.s32 1, %s19919_s27  }
   0xf   : > { %22694 = sst [smem:[#allocation8_spill]] %s20061_s29  ;;  %s487_s0 = sadd.s32 1, %s19915_s26 }
  0x10   : > { %s484_s4 = ssub.s32 %s19919_s27, %s20061_s29  ;;  %p497_p0 = scmp.ne.s32.totalorder %s19915_s26, %s19911_s25 }
  0x11   : > { %p485_p1 = scmp.eq.s32.totalorder %s484_s4, 0  ;;  %p498_p2 = scmp.eq.s32.totalorder %s20057_s3, 1 }
  0x12   : > { %p503_p3 = scmp.ne.s32.totalorder %s19911_s25, %s19907_s2  ;;  %p504_p4 = scmp.eq.s32.totalorder %s15258_s28, 1 }
  0x13   : > { %s20072_s30 = scalar_select %p485_p1, %s19915_s26, %s487_s0  }
  0x14   : > { %p20074_p5 = por %p498_p2, %p497_p0  ;;  %p20078_p6 = por %p504_p4, %p503_p3 }
  0x15   : > { %22695 = sst [smem:[#allocation9_spill]] %s20072_s30  ;;  %p15261_p7 = scmp.ge.s32.totalorder %s19919_s27, 1 }
  0x16   : > { %s22697_s22 = scalar_select %p20078_p6, 1, 0 }
  0x17   : > { %p591_p8 = scmp.lt.s32.totalorder %s19919_s27, 3 }
  0x18   : > { %22698 = sst [smem:[#allocation10_spill]] %s22697_s22 }
  0x19   : > { %p592_p9 = pnand %p15261_p7, %p591_p8 }
  0x1a   : > { %s15263_s23 = sshll.u32 (!%p592_p9), %s20057_s3, 1  ;;  %s22699_s4 = sld [smem:[#allocation12_spill]] (!%p592_p9)  ;;  %v19921_v3 = vmov (!%p592_p9), 0   ;;  %vm692_vm0 = vcmask (!%p592_p9), 1040384   ;;  %v658_v16 = vlaneseq (!%p592_p9)  ;;  %vm685_vm1 = vcmask (!%p592_p9), 531456   ;;  %v1145_v43 = vld [vmem:[%s22653_s7 + $0x20] sm:$0xff] (!%p592_p9) }
  0x1b   : > { %595 = sbr.rel (%p592_p9) target bundleno = 14693 (0x3965), region = 104  ;;  %19602 = vset.pattern.permute.xlu0 (!%p592_p9), %v19921_v3  ;;  %p652_p10 = scmp.lt.s32.totalorder (!%p592_p9), %s15263_s23, 3  ;;  %v19922_v19 = vmov (!%p592_p9), 0.0   ;;  %vm775_vm4 = vcmask (!%p592_p9), 261120   ;;  %v1146_v45 = vld [vmem:[%s22653_s7 + $0x28] sm:$0xff] (!%p592_p9)  ;;  %v1147_v49 = vld [vmem:[%s22653_s7 + $0x30] sm:$0xff] (!%p592_p9) }
  0x1c   : > { %s22700_s27 = sld [smem:[#allocation11_spill]] (!%p592_p9)  ;;  %v659_v17 = vand.u32 (!%p592_p9), 127, %v658_v16  ;;  %s22701_s28 = sld [smem:[#allocation13_spill]] (!%p592_p9)  ;;  %v18535_v46 = vpack.c.bf16 (!%p592_p9), %v1146_v45, %v1145_v43  ;;  %v1148_v51 = vld [vmem:[%s22653_s7 + $0x38] sm:$0xff] (!%p592_p9)  ;;  %v1153_v55 = vld [vmem:[%s22653_s7 + $0x60] sm:$0xff] (!%p592_p9)  ;;  %v1154_v57 = vld [vmem:[%s22653_s7 + $0x68] sm:$0xff] (!%p592_p9) }
  0x1d   : > { %s22702_s6 = sld [smem:[#allocation17_spill]] (!%p592_p9)  ;;  %v18539_v52 = vpack.c.bf16 (!%p592_p9), %v1148_v51, %v1147_v49  ;;  %v18551_v58 = vpack.c.bf16 (!%p592_p9), %v1154_v57, %v1153_v55  ;;  %s22703_s1 = sld [smem:[#allocation15_spill]] (!%p592_p9)  ;;  %v1142_v43 = vld [vmem:[%s22653_s7 + $0x8] sm:$0xff] (!%p592_p9)  ;;  %v1149_v49 = vld [vmem:[%s22653_s7 + $0x40] sm:$0xff] (!%p592_p9)  ;;  %vm1773_vm5 = vcmask (!%p592_p9), 64512   ;;  %vm2138_vm7 = vcmask (!%p592_p9), 130048  }
  0x1e   : > { %s22704_s21 = sld [smem:[#allocation16_spill]] (!%p592_p9)  ;;  %v1457_v55 = vld [vmem:[%s22654_s8] sm:$0xff] (!%p592_p9)  ;;  %vm20337_vm6 = vmpackc.low (!%p592_p9), %vm1773_vm5, %vm1773_vm5  ;;  %s648_s24 = sand.u32 (!%p592_p9), 1, %s19911_s25  }
  0x1f   : > { %s16065_s22 = sshll.u32 (!%p592_p9), %s20057_s3, 8  ;;  %s19923_s3 = smov (!%p592_p9), [#allocation2]  }
  0x20   : > { %v674_v0 = vld [vmem:[%s22699_s4] sm:$0xff] (!%p592_p9)  ;;  %v675_v1 = vld [vmem:[%s22699_s4 + $0x8] sm:$0xff] (!%p592_p9)  ;;  %v676_v2 = vld [vmem:[%s22699_s4 + $0x10] sm:$0xff] (!%p592_p9)  ;;  %s19861_s30 = sshll.u32 (!%p592_p9), %s19923_s3, 4  ;;  %s19862_s30 = int_to_ptr.vmem [resolvable:$false] %s19861_s30 }
  0x21   : > { %v18479_v4 = vpack.c.bf16 (!%p592_p9), %v675_v1, %v674_v0  ;;  %v677_v5 = vld [vmem:[%s22699_s4 + $0x18] sm:$0xff] (!%p592_p9)  ;;  %v678_v7 = vld [vmem:[%s22699_s4 + $0x20] sm:$0xff] (!%p592_p9)  ;;  %v679_v8 = vld [vmem:[%s22699_s4 + $0x28] sm:$0xff] (!%p592_p9) }
  0x22   : > { %v18483_v6 = vpack.c.bf16 %v677_v5, %v676_v2  ;;  %s22718_s23 = smov (!%p652_p10, %s15263_s23), 3  ;;  %v18487_v9 = vpack.c.bf16 %v679_v8, %v678_v7  ;;  %v680_v10 = vld [vmem:[%s22699_s4 + $0x30] sm:$0xff]  ;;  %v681_v11 = vld [vmem:[%s22699_s4 + $0x38] sm:$0xff]  ;;  %v682_v15 = vld [vmem:[%s22699_s4 + $0x40] sm:$0x1] }
  0x23   : > { %18480 = vmatprep.subr.bf16.mxu0 %v18479_v4  ;;  %s15264_s26 = sshll.u32 %s22718_s23, 3  ;;  %v18491_v14 = vpack.c.bf16 %v681_v11, %v680_v10  ;;  %v683_v23 = vld [vmem:[%s22701_s28] sm:$0xff]  ;;  %v684_v25 = vld [vmem:[%s22701_s28 + $0x8] sm:$0xff]  ;;  %v821_v47 = vld [vmem:[%s22702_s6 + $0x10] sm:$0xff]  ;;  %s22708_s23 = sld [smem:[#allocation18_spill]] }
  0x24   : > { %18482 = vmatpush3.bf16.msra.mxu0 %v18479_v4  ;;  %s655_s29 = scalar_lea.vmem %s22700_s27, %s15264_s26  ;;  %v819_v41 = vld [vmem:[%s22702_s6] sm:$0xff]  ;;  %v820_v42 = vld [vmem:[%s22702_s6 + $0x8] sm:$0xff]  ;;  %v822_v48 = vld [vmem:[%s22702_s6 + $0x18] sm:$0xff]  ;;  %s15262_s27 = sshll.u32 %s648_s24, 4 }
  0x25   : > { %18484 = vmatprep.subr.bf16.mxu0 %v18483_v6  ;;  %v660_v12 = vld [vmem:[%s655_s29] sm:$0xff]  ;;  %v661_v13 = vld [vmem:[%s655_s29 + $0x8] sm:$0xff]  ;;  %v18495_v44 = vpack.c.bf16 %v820_v42, %v819_v41  ;;  %v18499_v50 = vpack.c.bf16 %v822_v48, %v821_v47  ;;  %v826_v11 = vld [vmem:[%s22702_s6 + $0x38] sm:$0xff]  ;;  %s22707_s29 = sld [smem:[#allocation14_spill]]  ;;  %s650_s28 = scalar_lea.vmem [#allocation2], %s15262_s27 }
  0x26   : > { %663 = vperm.xlu0 %19602, %v660_v12   ;;  %v823_v53 = vld [vmem:[%s22702_s6 + $0x20] sm:$0xff]  ;;  %v824_v54 = vld [vmem:[%s22702_s6 + $0x28] sm:$0xff]  ;;  %v1155_v12 = vld [vmem:[%s22653_s7 + $0x70] sm:$0xff]  ;;  %s15196_s0 = sshll.u32 %s650_s28, 4  ;;  %s22605_s26 = scalar_lea.sflag [#allocation3], %s648_s24  ;;  %s22598_s0 = int_to_ptr.vmem [resolvable:$true] %s15196_s0 }
  0x27   : > { %18496 = vmatprep.subr.bf16.mxu1 %v18495_v44  ;;  %v18503_v56 = vpack.c.bf16 %v824_v54, %v823_v53  ;;  %v15270_v2 = vld [vmem:[%s22703_s1] ss:$0 sm:$0xff]  ;;  %v1144_v47 = vld [vmem:[%s22653_s7 + $0x18] sm:$0xff]  ;;  %s19857_s27 = scalar_lea.vmem %s22598_s0, 256  ;;  %p19864_p0 = scmp.lt.s32.totalorder %s22598_s0, %s19862_s30 }
  0x28   : > { %18486 = vmatpush3.bf16.msra.mxu0 %v18483_v6  ;;  %18498 = vmatpush3.bf16.msra.mxu1 %v18495_v44  ;;  %v15271_v4 = vld [vmem:[%s22704_s21] ss:$0 sm:$0xff]  ;;  %v1152_v53 = vld [vmem:[%s22653_s7 + $0x58] sm:$0xff]  ;;  %p19858_p11 = scmp.ne.s32.totalorder %s22598_s0, %s19857_s27 }
  0x29   : > { %18488 = vmatprep.subr.bf16.mxu0 %v18487_v9  ;;  %18500 = vmatprep.subr.bf16.mxu1 %v18499_v50  ;;  %v1141_v42 = vld [vmem:[%s22653_s7] sm:$0xff] }
  0x2a   : > { %666 = vperm.xlu0 %19602, %v661_v13   ;;  %v1156_v13 = vld [vmem:[%s22653_s7 + $0x78] sm:$0xff]  ;;  %v18527_v45 = vpack.c.bf16 %v1142_v43, %v1141_v42  ;;  %p19859_p12 = pnand %p19858_p11, %p20074_p5 }
  0x2b   : > { %v771_v43 = vld [vmem:[%s22707_s29] sm:$0xff] }
  0x2c   : > { %18490 = vmatpush3.bf16.msra.mxu0 %v18487_v9  ;;  %18502 = vmatpush3.bf16.msra.mxu1 %v18499_v50  ;;  %v825_v9 = vld [vmem:[%s22702_s6 + $0x30] sm:$0xff]  ;;  %v1150_v50 = vld [vmem:[%s22653_s7 + $0x48] sm:$0xff]  ;;  %p19860_p13 = pneg %p19859_p12 }
  0x2d   : > { %18492 = vmatprep.subr.bf16.mxu0 %v18491_v14  ;;  %18504 = vmatprep.subr.bf16.mxu1 %v18503_v56  ;;  %v18507_v16 = vpack.c.bf16 %v826_v11, %v825_v9  ;;  %v18543_v51 = vpack.c.bf16 %v1150_v50, %v1149_v49 }
  0x30   : > { %18494 = vmatpush3.bf16.msra.mxu0 %v18491_v14 }
  0x31   : > { %16939 = vmatprep.subr.msk.mxu0 %vm692_vm0, %v682_v15 }
  0x34   : > { %16940 = vmatpush3.msk.msra.mxu0 %vm692_vm0, %v682_v15  ;;  %v827_v15 = vld [vmem:[%s22702_s6 + $0x40] sm:$0xff] }
  0x35   : > { %18536 = vmatprep.subr.bf16.mxu0 %v18535_v46 }
  0xa5   : > { %v664_v18 = vpop.permute.xlu0 %663 }
  0xa6   : > { %vm668_vm2 = vcmp.eq.s32.totalorder %v664_v18, %v659_v17  ;;  %v828_v18 = vld [vmem:[%s22702_s6 + $0x48] sm:$0xff] }
  0xa7   : > { %v15265_v20 = vsel %vm668_vm2, 1.0, %v19922_v19 }
  0xa8   : > { %16941 = vmatprep.mubr.msk.f32.mxu0 %vm685_vm1, %v15265_v20  ;;  %v1462_v20 = vld [vmem:[%s22654_s8 + $0x28] sm:$0xff] }
  0xa9   : > { %v667_v21 = vpop.permute.xlu0 %666 }
  0xaa   : > { %vm669_vm3 = vcmp.eq.s32.totalorder %v667_v21, %v659_v17  ;;  %v18555_v17 = vpack.c.bf16 %v1156_v13, %v1155_v12  ;;  %v18511_v21 = vpack.c.bf16 %v828_v18, %v827_v15 }
  0xab   : > { %v15266_v22 = vsel %vm669_vm3, 1.0, %v19922_v19  ;;  %v1461_v19 = vld [vmem:[%s22654_s8 + $0x20] sm:$0xff] }
  0xac   : > { %16942 = vmatmul.mubr.msk.f32.vlgmr.msra.gmra.mrb[0].mxu0 %vm685_vm1, %v15266_v22  ;;  %v18567_v22 = vpack.c.bf16 %v1462_v20, %v1461_v19 }
  0xad   : > { %18538 = vmatpush3.bf16.msra.mxu0 %v18535_v46  ;;  %v1143_v46 = vld [vmem:[%s22653_s7 + $0x10] sm:$0xff] }
  0xae   : > { %18540 = vmatprep.subr.bf16.mxu0 %v18539_v52  ;;  %v18531_v48 = vpack.c.bf16 %v1144_v47, %v1143_v46 }
  0xb1   : > { %18542 = vmatpush3.bf16.msra.mxu0 %v18539_v52  ;;  %v1151_v52 = vld [vmem:[%s22653_s7 + $0x50] sm:$0xff] }
  0xb2   : > { %18552 = vmatprep.subr.bf16.mxu0 %v18551_v58  ;;  %v18547_v54 = vpack.c.bf16 %v1152_v53, %v1151_v52 }
 0x17f   : > { %v16943_v24 = vpop.f32.mrb[0].mxu0 }
 0x180   : > { %v762_v26 = vpop.f32.mrb[1].mxu0  ;;  %v20123_v28 = vadd.f32 %v16943_v24, %v684_v25  ;;  %v830_v24 = vld [vmem:[%s22702_s6 + $0x58] sm:$0xff]  ;;  %v1463_v25 = vld [vmem:[%s22654_s8 + $0x30] sm:$0xff] }
 0x181   : > { %v20121_v27 = vadd.f32 %v762_v26, %v683_v23  ;;  %v829_v23 = vld [vmem:[%s22702_s6 + $0x50] sm:$0xff]  ;;  %v1464_v26 = vld [vmem:[%s22654_s8 + $0x38] sm:$0xff] }
 0x182   : > { %v779_v30 = vsel %vm775_vm4, %v20123_v28, 0.0 }
 0x183   : > { %v776_v29 = vsel %vm775_vm4, %v20121_v27, 0.0 }
 0x184   : > { %777 = vadd.xlane.f32.xlu1 %v776_v29  ;;  %v18515_v29 = vpack.c.bf16 %v830_v24, %v829_v23 }
 0x188   : > { %780 = vadd.xlane.f32.xlu1 %v779_v30  ;;  %v18571_v30 = vpack.c.bf16 %v1464_v26, %v1463_v25 }
 0x211   : > { %v778_v31 = vpop.xlane.xlu1 %777 }
 0x212   : > { %v783_v32 = vmul.f32 0.03125, %v778_v31  ;;  %v831_v31 = vld [vmem:[%s22702_s6 + $0x60] sm:$0xff] }
 0x214   : > { %v785_v33 = vsub.f32 %v20121_v27, %v783_v32  ;;  %v832_v32 = vld [vmem:[%s22702_s6 + $0x68] sm:$0xff] }
 0x215   : > { %v781_v34 = vpop.xlane.xlu1 %780 }
 0x216   : > { %v784_v35 = vmul.f32 0.03125, %v781_v34  ;;  %v787_v36 = vmul.f32 %v785_v33, %v785_v33  ;;  %v1470_v34 = vld [vmem:[%s22654_s8 + $0x68] sm:$0xff] }
 0x218   : > { %v786_v37 = vsub.f32 %v20123_v28, %v784_v35  ;;  %v789_v38 = vsel %vm775_vm4, %v787_v36, 0.0  ;;  %v18519_v35 = vpack.c.bf16 %v832_v32, %v831_v31 }
 0x219   : > { %790 = vadd.xlane.f32.xlu0 %v789_v38  ;;  %v834_v38 = vld [vmem:[%s22702_s6 + $0x78] sm:$0xff] }
 0x21a   : > { %v788_v39 = vmul.f32 %v786_v37, %v786_v37 }
 0x21c   : > { %v792_v40 = vsel %vm775_vm4, %v788_v39, 0.0  ;;  %v1471_v39 = vld [vmem:[%s22654_s8 + $0x70] sm:$0xff] }
 0x21d   : > { %793 = vadd.xlane.f32.xlu1 %v792_v40  ;;  %v1472_v40 = vld [vmem:[%s22654_s8 + $0x78] sm:$0xff] }
 0x21e   : > { %v18587_v44 = vpack.c.bf16 %v1472_v40, %v1471_v39  ;;  %v772_v39 = vld [vmem:[%s22707_s29 + $0x8] sm:$0xff] }
 0x2a6   : > { %v791_v59 = vpop.xlane.xlu0 %790 }
 0x2a7   : > { %v795_v60 = vmul.f32 0.03125, %v791_v59  ;;  %v1460_v59 = vld [vmem:[%s22654_s8 + $0x18] sm:$0xff] }
 0x2a9   : > { %v797_v61 = vadd.f32 1e-05, %v795_v60 }
 0x2aa   : > { %v794_v62 = vpop.xlane.xlu1 %793 }
 0x2ab   : > { %19603 = vrsqrt.f32 %v797_v61  ;;  %v796_v63 = vmul.f32 0.03125, %v794_v62  ;;  %v1465_v61 = vld [vmem:[%s22654_s8 + $0x40] sm:$0xff]  ;;  %v1466_v62 = vld [vmem:[%s22654_s8 + $0x48] sm:$0xff] }
 0x2ad   : > { %v798_v0 = vadd.f32 1e-05, %v796_v63  ;;  %v18575_v63 = vpack.c.bf16 %v1466_v62, %v1465_v61 }
 0x2af   : > { %19605 = vrsqrt.f32 %v798_v0  ;;  %v1467_v0 = vld [vmem:[%s22654_s8 + $0x50] sm:$0xff] }
 0x2b5   : > { %v19604_v1 = vpop.eup %19603 }
 0x2b6   : > { %v801_v3 = vmul.f32 %v19604_v1, %v785_v33  ;;  %v1469_v33 = vld [vmem:[%s22654_s8 + $0x60] sm:$0xff]  ;;  %v1468_v1 = vld [vmem:[%s22654_s8 + $0x58] sm:$0xff] }
 0x2b7   : > { %v18583_v36 = vpack.c.bf16 %v1470_v34, %v1469_v33 }
 0x2b8   : > { %v809_v5 = vmul.f32 %v15270_v2, %v801_v3 }
 0x2b9   : > { %v19606_v6 = vpop.eup %19605 }
 0x2ba   : > { %v20175_v7 = vadd.f32 %v15271_v4, %v809_v5  ;;  %v802_v8 = vmul.f32 %v19606_v6, %v786_v37  ;;  %v833_v37 = vld [vmem:[%s22702_s6 + $0x70] sm:$0xff] }
 0x2bb   : > { %v18523_v41 = vpack.c.bf16 %v834_v38, %v833_v37 }
 0x2bc   : > { %v810_v10 = vmul.f32 %v15270_v2, %v802_v8  ;;  %16952 = vmatprep.mubr.msk.f32.mxu1 %vm775_vm4, %v20175_v7  ;;  %17007 = vmatprep.mubr.msk.f32.mxu0 %vm775_vm4, %v20175_v7  ;;  %v18579_v2 = vpack.c.bf16 %v1468_v1, %v1467_v0 }
 0x2be   : > { %v20193_v14 = vadd.f32 %v15271_v4, %v810_v10 }
 0x2c0   : > { %16953 = vmatmul.mubr.msk.f32.vlgmr.msra.gmra.mrb[0].mxu1 %vm775_vm4, %v20193_v14  ;;  %17008 = vmatmul.mubr.msk.f32.vlgmr.msra.gmra.mrb[2].mxu0 %vm775_vm4, %v20193_v14 }
 0x2c1   : > { %18506 = vmatpush3.bf16.msra.mxu1 %v18503_v56  ;;  %18554 = vmatpush3.bf16.msra.mxu0 %v18551_v58  ;;  %v1458_v56 = vld [vmem:[%s22654_s8 + $0x8] sm:$0xff]  ;;  %v1459_v58 = vld [vmem:[%s22654_s8 + $0x10] sm:$0xff] }
 0x2c2   : > { %16963 = vmatprep.mubr.msk.f32.mxu1 %vm775_vm4, %v20175_v7  ;;  %17029 = vmatprep.mubr.msk.f32.mxu0 %vm775_vm4, %v20175_v7  ;;  %v18559_v57 = vpack.c.bf16 %v1458_v56, %v1457_v55  ;;  %v18563_v60 = vpack.c.bf16 %v1460_v59, %v1459_v58 }
 0x2c3   : > { %18508 = vmatprep.subr.bf16.mxu1 %v18507_v16  ;;  %18556 = vmatprep.subr.bf16.mxu0 %v18555_v17 }
 0x2c5   : > { %18510 = vmatpush3.bf16.msra.mxu1 %v18507_v16  ;;  %18558 = vmatpush3.bf16.msra.mxu0 %v18555_v17 }
 0x2c6   : > { %18512 = vmatprep.subr.bf16.mxu1 %v18511_v21  ;;  %18568 = vmatprep.subr.bf16.mxu0 %v18567_v22 }
 0x2c8   : > { %16964 = vmatmul.mubr.msk.f32.vlgmr.msra.gmra.mrb[2].mxu1 %vm775_vm4, %v20193_v14  ;;  %17030 = vmatmul.mubr.msk.f32.vlgmr.msra.gmra.mrb[4].mxu0 %vm775_vm4, %v20193_v14 }
 0x2c9   : > { %18514 = vmatpush3.bf16.msra.mxu1 %v18511_v21  ;;  %16974 = vmatprep.mubr.msk.f32.mxu1 %vm775_vm4, %v20175_v7 }
 0x2ca   : > { %18570 = vmatpush3.bf16.msra.mxu0 %v18567_v22  ;;  %17051 = vmatprep.mubr.msk.f32.mxu0 %vm775_vm4, %v20175_v7 }
 0x2cb   : > { %18516 = vmatprep.subr.bf16.mxu1 %v18515_v29  ;;  %18572 = vmatprep.subr.bf16.mxu0 %v18571_v30 }
 0x2cd   : > { %18518 = vmatpush3.bf16.msra.mxu1 %v18515_v29 }
 0x2ce   : > { %18574 = vmatpush3.bf16.msra.mxu0 %v18571_v30  ;;  %18520 = vmatprep.subr.bf16.mxu1 %v18519_v35 }
 0x2cf   : > { %18584 = vmatprep.subr.bf16.mxu0 %v18583_v36 }
 0x2d0   : > { %16975 = vmatmul.mubr.msk.f32.vlgmr.msra.gmra.mrb[4].mxu1 %vm775_vm4, %v20193_v14 }
 0x2d1   : > { %17052 = vmatmul.mubr.msk.f32.vlgmr.msra.gmra.mrb[6].mxu0 %vm775_vm4, %v20193_v14  ;;  %18522 = vmatpush3.bf16.msra.mxu1 %v18519_v35 }
 0x2d2   : > { %16985 = vmatprep.mubr.msk.f32.mxu1 %vm775_vm4, %v20175_v7  ;;  %18586 = vmatpush3.bf16.msra.mxu0 %v18583_v36 }
 0x2d3   : > { %17073 = vmatprep.mubr.msk.f32.mxu0 %vm775_vm4, %v20175_v7  ;;  %18524 = vmatprep.subr.bf16.mxu1 %v18523_v41 }
 0x2d4   : > { %18588 = vmatprep.subr.bf16.mxu0 %v18587_v44 }
 0x2d5   : > { %18526 = vmatpush3.bf16.msra.mxu1 %v18523_v41 }
 0x2d6   : > { %18590 = vmatpush3.bf16.msra.mxu0 %v18587_v44  ;;  %18528 = vmatprep.subr.bf16.mxu1 %v18527_v45 }
 0x2d8   : > { %16986 = vmatmul.mubr.msk.f32.vlgmr.msra.gmra.mrb[6].mxu1 %vm775_vm4, %v20193_v14 }
 0x2d9   : > { %17074 = vmatmul.mubr.msk.f32.vlgmr.msra.gmra.mrb[8].mxu0 %vm775_vm4, %v20193_v14  ;;  %18530 = vmatpush3.bf16.msra.mxu1 %v18527_v45 }
 0x2da   : > { %16996 = vmatprep.mubr.msk.f32.mxu1 %vm775_vm4, %v20175_v7  ;;  %18532 = vmatprep.subr.bf16.mxu1 %v18531_v48 }
 0x2dd   : > { %18534 = vmatpush3.bf16.msra.mxu1 %v18531_v48 }
 0x2de   : > { %18544 = vmatprep.subr.bf16.mxu1 %v18543_v51 }
 0x2e0   : > { %16997 = vmatmul.mubr.msk.f32.vlgmr.msra.gmra.mrb[8].mxu1 %vm775_vm4, %v20193_v14 }
 0x2e1   : > { %18546 = vmatpush3.bf16.msra.mxu1 %v18543_v51  ;;  %17018 = vmatprep.mubr.msk.f32.mxu1 %vm775_vm4, %v20175_v7 }
 0x2e2   : > { %18548 = vmatprep.subr.bf16.mxu1 %v18547_v54 }
 0x2e5   : > { %18550 = vmatpush3.bf16.msra.mxu1 %v18547_v54 }
 0x2e6   : > { %18560 = vmatprep.subr.bf16.mxu1 %v18559_v57 }
 0x2e8   : > { %17019 = vmatmul.mubr.msk.f32.vlgmr.msra.gmra.mrb[10].mxu1 %vm775_vm4, %v20193_v14 }
 0x2e9   : > { %18562 = vmatpush3.bf16.msra.mxu1 %v18559_v57  ;;  %17040 = vmatprep.mubr.msk.f32.mxu1 %vm775_vm4, %v20175_v7 }
 0x2ea   : > { %18564 = vmatprep.subr.bf16.mxu1 %v18563_v60 }
 0x2ed   : > { %18566 = vmatpush3.bf16.msra.mxu1 %v18563_v60 }
 0x2ee   : > { %18576 = vmatprep.subr.bf16.mxu1 %v18575_v63 }
 0x2f0   : > { %17041 = vmatmul.mubr.msk.f32.vlgmr.msra.gmra.mrb[12].mxu1 %vm775_vm4, %v20193_v14 }
 0x2f1   : > { %18578 = vmatpush3.bf16.msra.mxu1 %v18575_v63  ;;  %17062 = vmatprep.mubr.msk.f32.mxu1 %vm775_vm4, %v20175_v7 }
 0x2f2   : > { %18580 = vmatprep.subr.bf16.mxu1 %v18579_v2 }
 0x2f5   : > { %18582 = vmatpush3.bf16.msra.mxu1 %v18579_v2 }
 0x2f8   : > { %17063 = vmatmul.mubr.msk.f32.vlgmr.msra.gmra.mrb[14].mxu1 %vm775_vm4, %v20193_v14 }
 0x393   : > { %v16954_v3 = vpop.f32.mrb[0].mxu1  ;;  %v17009_v4 = vpop.f32.mrb[2].mxu0 }
 0x394   : > { %v907_v5 = vpop.f32.mrb[1].mxu1  ;;  %v1298_v6 = vpop.f32.mrb[3].mxu0 }
 0x395   : > { %v18597_v9 = vpack.c.bf16 %v17009_v4, %v1298_v6  ;;  %17080 = vmatprep.mubr.msk.f32.mxu1 %vm1773_vm5, %v907_v5 }
 0x397   : > { %18599 = vmatprep.subr.msk.bf16.mxu0 %vm20337_vm6, %v18597_v9 }
 0x398   : > { %18602 = vmatpush3.bf16.xpose.msk.msra.mxu0 %vm20337_vm6, %v18597_v9 }
 0x39b   : > { %v16965_v7 = vpop.f32.mrb[2].mxu1  ;;  %v17031_v10 = vpop.f32.mrb[4].mxu0 }
 0x39c   : > { %v982_v11 = vpop.f32.mrb[3].mxu1  ;;  %v1448_v12 = vpop.f32.mrb[5].mxu0 }
 0x39d   : > { %v18609_v13 = vpack.c.bf16 %v17031_v10, %v1448_v12  ;;  %17087 = vmatprep.mubr.msk.f32.mxu0 %vm1773_vm5, %v982_v11 }
 0x39f   : > { %18611 = vmatprep.subr.msk.bf16.mxu0 %vm20337_vm6, %v18609_v13  ;;  %17088 = vmatmul.mubr.msk.f32.vlgmr.msra.gmra.mrb[10].mxu0 %vm1773_vm5, %v16965_v7 }
 0x3a0   : > { %18614 = vmatpush3.bf16.xpose.msk.msra.mxu0 %vm20337_vm6, %v18609_v13 }
 0x3a3   : > { %v16976_v14 = vpop.f32.mrb[4].mxu1 }
 0x3a4   : > { %v17053_v15 = vpop.f32.mrb[6].mxu0  ;;  %v1057_v16 = vpop.f32.mrb[5].mxu1 }
 0x3a5   : > { %v1614_v17 = vpop.f32.mrb[7].mxu0 }
 0x3a6   : > { %v18619_v18 = vpack.c.bf16 %v17053_v15, %v1614_v17 }
 0x3a8   : > { %18620 = vmatprep.subr.bf16.mxu0 %v18619_v18 }
 0x3ab   : > { %v16987_v19 = vpop.f32.mrb[6].mxu1 }
 0x3ac   : > { %v17075_v20 = vpop.f32.mrb[8].mxu0  ;;  %v1132_v21 = vpop.f32.mrb[7].mxu1 }
 0x3ad   : > { %v1764_v22 = vpop.f32.mrb[9].mxu0  ;;  %17101 = vmatprep.mubr.msk.f32.mxu0 %vm1773_vm5, %v1132_v21 }
 0x3ae   : > { %v20353_v23 = vpack.c.bf16 %v17075_v20, %v1764_v22  ;;  %17102 = vmatmul.mubr.msk.f32.vlgmr.msra.gmra.mrb[12].mxu0 %vm1773_vm5, %v16987_v19 }
 0x3af   : > { %18622 = vmatpush3.bf16.msra.mxu0 %v18619_v18 }
 0x3b0   : > { %18628 = vmatprep.subr.bf16.mxu0 %v20353_v23 }
 0x3b3   : > { %v16998_v24 = vpop.f32.mrb[8].mxu1 }
 0x3b4   : > { %v1223_v25 = vpop.f32.mrb[9].mxu1 }
 0x3b5   : > { %v18591_v26 = vpack.c.bf16 %v16998_v24, %v1223_v25 }
 0x3b7   : > { %18593 = vmatprep.subr.msk.bf16.mxu1 %vm20337_vm6, %v18591_v26 }
 0x3b8   : > { %18596 = vmatpush3.bf16.xpose.msk.msra.mxu1 %vm20337_vm6, %v18591_v26 }
 0x3bb   : > { %v17020_v29 = vpop.f32.mrb[10].mxu1 }
 0x3bc   : > { %v1373_v30 = vpop.f32.mrb[11].mxu1 }
 0x3bd   : > { %v18603_v31 = vpack.c.bf16 %v17020_v29, %v1373_v30 }
 0x3bf   : > { %17081 = vmatmul.mubr.msk.f32.vlgmr.msra.gmra.mrb[16].mxu1 %vm1773_vm5, %v16954_v3  ;;  %18605 = vmatprep.subr.msk.bf16.mxu1 %vm20337_vm6, %v18603_v31 }
 0x3c0   : > { %18608 = vmatpush3.bf16.xpose.msk.msra.mxu1 %vm20337_vm6, %v18603_v31  ;;  %17094 = vmatprep.mubr.msk.f32.mxu1 %vm1773_vm5, %v1057_v16 }
 0x3c3   : > { %v17042_v32 = vpop.f32.mrb[12].mxu1 }
 0x3c4   : > { %v1539_v33 = vpop.f32.mrb[13].mxu1 }
 0x3c5   : > { %v18615_v34 = vpack.c.bf16 %v17042_v32, %v1539_v33 }
 0x3c7   : > { %17095 = vmatmul.mubr.msk.f32.vlgmr.msra.gmra.mrb[18].mxu1 %vm1773_vm5, %v16976_v14  ;;  %18616 = vmatprep.subr.bf16.mxu1 %v18615_v34 }
 0x3c8   : > { %18618 = vmatpush3.bf16.msra.mxu1 %v18615_v34 }
 0x3cb   : > { %v17064_v35 = vpop.f32.mrb[14].mxu1 }
 0x3cc   : > { %v1689_v36 = vpop.f32.mrb[15].mxu1 }
 0x3cd   : > { %v20368_v37 = vpack.c.bf16 %v17064_v35, %v1689_v36 }
 0x3cf   : > { %18624 = vmatprep.subr.bf16.mxu1 %v20368_v37 }
 0x472   : > { %v17089_v38 = vpop.f32.mrb[10].mxu0 }
 0x473   : > { %v2125_v40 = vmul.f32 0.17677669, %v17089_v38  ;;  %v1939_v41 = vpop.f32.mrb[11].mxu0 }
 0x474   : > { %v2124_v42 = vmul.f32 0.17677669, %v1939_v41 }
 0x475   : > { %v2133_v44 = vadd.f32 %v2125_v40, %v772_v39 }
 0x476   : > { %v2132_v46 = vadd.f32 %v2124_v42, %v771_v43 }
 0x477   : > { %v2148_v45 = vsel %vm2138_vm7, %v2133_v44, -inf }
 0x478   : > { %2149 = vmax.xlane.f32.xlu1 %v2148_v45  ;;  %v2145_v47 = vsel %vm2138_vm7, %v2132_v46, -inf }
 0x47c   : > { %2146 = vmax.xlane.f32.xlu1 %v2145_v47 }
 0x481   : > { %v17103_v48 = vpop.f32.mrb[12].mxu0 }
 0x482   : > { %v2129_v49 = vmul.f32 0.17677669, %v17103_v48  ;;  %v2113_v50 = vpop.f32.mrb[13].mxu0 }
 0x483   : > { %v2128_v2 = vmul.f32 0.17677669, %v2113_v50 }
 0x484   : > { %v2137_v51 = vadd.f32 %v2129_v49, %v772_v39 }
 0x485   : > { %v2136_v6 = vadd.f32 %v2128_v2, %v771_v43 }
 0x486   : > { %v2160_v52 = vsel %vm2138_vm7, %v2137_v51, -inf }
 0x487   : > { %2161 = vmax.xlane.f32.xlu0 %v2160_v52  ;;  %v2157_v9 = vsel %vm2138_vm7, %v2136_v6, -inf }
 0x492   : > { %v17082_v53 = vpop.f32.mrb[16].mxu1 }
 0x493   : > { %v2123_v54 = vmul.f32 0.17677669, %v17082_v53  ;;  %v1852_v55 = vpop.f32.mrb[17].mxu1 }
 0x494   : > { %v2122_v56 = vmul.f32 0.17677669, %v1852_v55 }
 0x495   : > { %v2131_v57 = vadd.f32 %v2123_v54, %v772_v39 }
 0x496   : > { %v2130_v59 = vadd.f32 %v2122_v56, %v771_v43 }
 0x497   : > { %v2142_v58 = vsel %vm2138_vm7, %v2131_v57, -inf }
 0x498   : > { %2143 = vmax.xlane.f32.xlu1 %v2142_v58  ;;  %v2139_v63 = vsel %vm2138_vm7, %v2130_v59, -inf }
 0x49a   : > { %v17096_v60 = vpop.f32.mrb[18].mxu1 }
 0x49b   : > { %v2127_v61 = vmul.f32 0.17677669, %v17096_v60  ;;  %v2026_v62 = vpop.f32.mrb[19].mxu1 }
 0x49c   : > { %v2126_v0 = vmul.f32 0.17677669, %v2026_v62  ;;  %2140 = vmax.xlane.f32.xlu1 %v2139_v63 }
 0x49d   : > { %v2135_v1 = vadd.f32 %v2127_v61, %v772_v39 }
 0x49e   : > { %v2134_v4 = vadd.f32 %v2126_v0, %v771_v43 }
 0x49f   : > { %v2154_v3 = vsel %vm2138_vm7, %v2135_v1, -inf }
 0x4a0   : > { %2155 = vmax.xlane.f32.xlu1 %v2154_v3  ;;  %v2151_v5 = vsel %vm2138_vm7, %v2134_v4, -inf }
 0x4a4   : > { %2152 = vmax.xlane.f32.xlu1 %v2151_v5 }
 0x4a8   : > { %2158 = vmax.xlane.f32.xlu1 %v2157_v9 }
 0x505   : > { %v2150_v7 = vpop.xlane.xlu1 %2149 }
 0x506   : > { %v2166_v10 = vsub.f32 %v2133_v44, %v2150_v7 }
 0x508   : > { %v2177_v11 = vmul.f32 1.442695, %v2166_v10 }
 0x509   : > { %v2147_v12 = vpop.xlane.xlu1 %2146 }
 0x50a   : > { %19607 = vpow2.f32 %v2177_v11  ;;  %v2165_v13 = vsub.f32 %v2132_v46, %v2147_v12 }
 0x50c   : > { %v2175_v14 = vmul.f32 1.442695, %v2165_v13  ;;  %v2551_v13 = vld [vmem:[%s22655_s9] sm:$0xff] }
 0x50e   : > { %19609 = vpow2.f32 %v2175_v14  ;;  %v2553_v14 = vld [vmem:[%s22655_s9 + $0x10] sm:$0xff] }
 0x514   : > { %v19608_v15 = vpop.eup %19607  ;;  %v2162_v22 = vpop.xlane.xlu0 %2161 }
 0x515   : > { %v2196_v16 = vsel %vm2138_vm7, %v19608_v15, 0.0  ;;  %v2170_v26 = vsub.f32 %v2137_v51, %v2162_v22 }
 0x516   : > { %2197 = vadd.xlane.f32.xlu0 %v2196_v16 }
 0x517   : > { %v2185_v32 = vmul.f32 1.442695, %v2170_v26 }
 0x518   : > { %v19610_v17 = vpop.eup %19609 }
 0x519   : > { %v2193_v18 = vsel %vm2138_vm7, %v19610_v17, 0.0 }
 0x51a   : > { %2194 = vadd.xlane.f32.xlu1 %v2193_v18 }
 0x525   : > { %v2144_v19 = vpop.xlane.xlu1 %2143 }
 0x526   : > { %v2164_v20 = vsub.f32 %v2131_v57, %v2144_v19 }
 0x528   : > { %v2173_v21 = vmul.f32 1.442695, %v2164_v20 }
 0x529   : > { %v2141_v24 = vpop.xlane.xlu1 %2140 }
 0x52a   : > { %19611 = vpow2.f32 %v2173_v21  ;;  %v2163_v25 = vsub.f32 %v2130_v59, %v2141_v24 }
 0x52c   : > { %v2171_v29 = vmul.f32 1.442695, %v2163_v25 }
 0x52d   : > { %v2156_v30 = vpop.xlane.xlu1 %2155 }
 0x52e   : > { %19613 = vpow2.f32 %v2171_v29  ;;  %v2168_v31 = vsub.f32 %v2135_v1, %v2156_v30 }
 0x530   : > { %v2181_v33 = vmul.f32 1.442695, %v2168_v31 }
 0x531   : > { %v2153_v34 = vpop.xlane.xlu1 %2152 }
 0x532   : > { %19615 = vpow2.f32 %v2181_v33  ;;  %v2167_v35 = vsub.f32 %v2134_v4, %v2153_v34 }
 0x533   : > { %19617 = vpow2.f32 %v2185_v32 }
 0x534   : > { %v19612_v36 = vpop.eup %19611  ;;  %v2179_v38 = vmul.f32 1.442695, %v2167_v35 }
 0x535   : > { %v2159_v39 = vpop.xlane.xlu1 %2158  ;;  %v2190_v40 = vsel %vm2138_vm7, %v19612_v36, 0.0 }
 0x536   : > { %19619 = vpow2.f32 %v2179_v38  ;;  %v2169_v41 = vsub.f32 %v2136_v6, %v2159_v39  ;;  %2191 = vadd.xlane.f32.xlu0 %v2190_v40 }
 0x538   : > { %v19614_v42 = vpop.eup %19613  ;;  %v2183_v43 = vmul.f32 1.442695, %v2169_v41 }
 0x539   : > { %v2187_v44 = vsel %vm2138_vm7, %v19614_v42, 0.0 }
 0x53a   : > { %19621 = vpow2.f32 %v2183_v43  ;;  %2188 = vadd.xlane.f32.xlu1 %v2187_v44 }
 0x53c   : > { %v19616_v45 = vpop.eup %19615 }
 0x53d   : > { %v2202_v46 = vsel %vm2138_vm7, %v19616_v45, 0.0  ;;  %v19618_v47 = vpop.eup %19617 }
 0x53e   : > { %2203 = vadd.xlane.f32.xlu0 %v2202_v46  ;;  %v2208_v49 = vsel %vm2138_vm7, %v19618_v47, 0.0 }
 0x540   : > { %v19620_v48 = vpop.eup %19619 }
 0x541   : > { %v2199_v50 = vsel %vm2138_vm7, %v19620_v48, 0.0 }
 0x542   : > { %2209 = vadd.xlane.f32.xlu0 %v2208_v49  ;;  %2200 = vadd.xlane.f32.xlu1 %v2199_v50  ;;  %v15328_v50 = vld [vmem:[%s22656_s10] ss:$0 sm:$0xff] }
 0x544   : > { %v19622_v51 = vpop.eup %19621 }
 0x545   : > { %v2205_v52 = vsel %vm2138_vm7, %v19622_v51, 0.0 }
 0x546   : > { %2206 = vadd.xlane.f32.xlu1 %v2205_v52 }
 0x5a3   : > { %v2198_v53 = vpop.xlane.xlu0 %2197 }
 0x5a4   : > { %19623 = vrcp.f32 %v2198_v53 }
 0x5a7   : > { %v2195_v54 = vpop.xlane.xlu1 %2194 }
 0x5a8   : > { %19625 = vrcp.f32 %v2195_v54 }
 0x5ae   : > { %v19624_v55 = vpop.eup %19623 }
 0x5af   : > { %v2222_v58 = vmul.f32 %v19624_v55, %v19608_v15  ;;  %v2554_v15 = vld [vmem:[%s22655_s9 + $0x18] sm:$0xff] }
 0x5b2   : > { %v19626_v56 = vpop.eup %19625 }
 0x5b3   : > { %v2221_v57 = vmul.f32 %v19626_v56, %v19610_v17 }
 0x5b5   : > { %17115 = vmatprep.mubr.msk.f32.mxu0 %vm2138_vm7, %v2221_v57 }
 0x5b6   : > { %17116 = vmatmul.mubr.msk.f32.vlgmr.msra.gmra.mrb[14].mxu0 %vm2138_vm7, %v2222_v58 }
 0x5b7   : > { %18630 = vmatpush3.bf16.msra.mxu0 %v20353_v23 }
 0x5c3   : > { %v2192_v59 = vpop.xlane.xlu0 %2191 }
 0x5c4   : > { %19627 = vrcp.f32 %v2192_v59 }
 0x5c7   : > { %v2189_v60 = vpop.xlane.xlu1 %2188 }
 0x5c8   : > { %19629 = vrcp.f32 %v2189_v60 }
 0x5cb   : > { %v2204_v61 = vpop.xlane.xlu0 %2203 }
 0x5cc   : > { %19631 = vrcp.f32 %v2204_v61 }
 0x5ce   : > { %v19628_v0 = vpop.eup %19627 }
 0x5cf   : > { %v2201_v62 = vpop.xlane.xlu1 %2200  ;;  %v2210_v63 = vpop.xlane.xlu0 %2209  ;;  %v2220_v4 = vmul.f32 %v19628_v0, %v19612_v36 }
 0x5d0   : > { %19633 = vrcp.f32 %v2201_v62 }
 0x5d1   : > { %19635 = vrcp.f32 %v2210_v63 }
 0x5d2   : > { %v19630_v1 = vpop.eup %19629 }
 0x5d3   : > { %v2207_v2 = vpop.xlane.xlu1 %2206  ;;  %v2219_v3 = vmul.f32 %v19630_v1, %v19614_v42  ;;  %v2948_v1 = vld [vmem:[%s22659_s13] sm:$0xff] }
 0x5d4   : > { %19637 = vrcp.f32 %v2207_v2  ;;  %v2949_v2 = vld [vmem:[%s22659_s13 + $0x8] sm:$0xff] }
 0x5d5   : > { %17108 = vmatprep.mubr.msk.f32.mxu1 %vm2138_vm7, %v2219_v3  ;;  %v2950_v3 = vld [vmem:[%s22659_s13 + $0x10] sm:$0xff] }
 0x5d6   : > { %17109 = vmatmul.mubr.msk.f32.vlgmr.msra.gmra.mrb[20].mxu1 %vm2138_vm7, %v2220_v4  ;;  %v19632_v23 = vpop.eup %19631  ;;  %v18631_v4 = vpack.c.bf16 %v2949_v2, %v2948_v1 }
 0x5d7   : > { %18626 = vmatpush3.bf16.msra.mxu1 %v20368_v37  ;;  %v2224_v7 = vmul.f32 %v19632_v23, %v19616_v45  ;;  %v2552_v37 = vld [vmem:[%s22655_s9 + $0x8] sm:$0xff]  ;;  %v2951_v23 = vld [vmem:[%s22659_s13 + $0x18] sm:$0xff] }
 0x5d8   : > { %17137 = vmatprep.subr.mxu0 %v2552_v37  ;;  %17132 = vmatprep.subr.mxu1 %v2551_v13 }
 0x5da   : > { %v19634_v5 = vpop.eup %19633 }
 0x5db   : > { %v2223_v6 = vmul.f32 %v19634_v5, %v19620_v48  ;;  %v19636_v9 = vpop.eup %19635  ;;  %v18635_v5 = vpack.c.bf16 %v2951_v23, %v2950_v3 }
 0x5dc   : > { %v2226_v12 = vmul.f32 %v19636_v9, %v19618_v47  ;;  %v3043_v9 = vld [vmem:[%s22661_s15 + $0x8] sm:$0xff] }
 0x5dd   : > { %17122 = vmatprep.mubr.msk.f32.mxu1 %vm2138_vm7, %v2223_v6  ;;  %v3042_v6 = vld [vmem:[%s22661_s15] sm:$0xff] }
 0x5de   : > { %v19638_v10 = vpop.eup %19637  ;;  %17123 = vmatmul.mubr.msk.f32.vlgmr.msra.gmra.mrb[22].mxu1 %vm2138_vm7, %v2224_v7  ;;  %v3044_v7 = vld [vmem:[%s22661_s15 + $0x10] sm:$0xff] }
 0x5df   : > { %v2225_v11 = vmul.f32 %v19638_v10, %v19622_v51  ;;  %17133 = vmatpush3.msra.mxu1 %v2551_v13  ;;  %v18639_v10 = vpack.c.bf16 %v3043_v9, %v3042_v6  ;;  %v3047_v13 = vld [vmem:[%s22661_s15 + $0x28] sm:$0xff] }
 0x5e0   : > { %17142 = vmatprep.subr.mxu1 %v2553_v14 }
 0x5e1   : > { %17129 = vmatprep.mubr.msk.f32.mxu0 %vm2138_vm7, %v2225_v11  ;;  %v3045_v11 = vld [vmem:[%s22661_s15 + $0x18] sm:$0xff] }
 0x5e2   : > { %17130 = vmatmul.mubr.msk.f32.vlgmr.msra.gmra.mrb[16].mxu0 %vm2138_vm7, %v2226_v12  ;;  %v18643_v12 = vpack.c.bf16 %v3045_v11, %v3044_v7  ;;  %v15340_v11 = vld [vmem:[%s22702_s6 + $0x88] sm:$0xff] }
 0x5e3   : > { %17138 = vmatpush3.msra.mxu0 %v2552_v37  ;;  %v3046_v37 = vld [vmem:[%s22661_s15 + $0x20] sm:$0xff] }
 0x5e4   : > { %17147 = vmatprep.subr.mxu0 %v2554_v15 }
 0x689   : > { %v17117_v16 = vpop.f32.mrb[14].mxu0 }
 0x68a   : > { %v2380_v17 = vpop.f32.mrb[15].mxu0 }
 0x68b   : > { %17139 = vmatprep.mubr.msk.f32.mxu0 %vm1773_vm5, %v2380_v17 }
 0x68c   : > { %17140 = vmatmul.mubr.msk.f32.vlgmr.msra.gmra.mrb[18].mxu0 %vm1773_vm5, %v17117_v16  ;;  %v3049_v16 = vld [vmem:[%s22661_s15 + $0x38] sm:$0xff] }
 0x68d   : > { %17148 = vmatpush3.msra.mxu0 %v2554_v15  ;;  %v3048_v15 = vld [vmem:[%s22661_s15 + $0x30] sm:$0xff] }
 0x68e   : > { %18640 = vmatprep.subr.bf16.mxu0 %v18639_v10  ;;  %v18651_v17 = vpack.c.bf16 %v3049_v16, %v3048_v15  ;;  %v15341_v15 = vld [vmem:[%s22702_s6 + $0x90] sm:$0xff]  ;;  %v15342_v16 = vld [vmem:[%s22702_s6 + $0x98] sm:$0xff] }
 0x6a9   : > { %v17110_v18 = vpop.f32.mrb[20].mxu1 }
 0x6aa   : > { %v2299_v19 = vpop.f32.mrb[21].mxu1 }
 0x6ab   : > { %17134 = vmatprep.mubr.msk.f32.mxu1 %vm1773_vm5, %v2299_v19  ;;  %v3051_v19 = vld [vmem:[%s22661_s15 + $0x48] sm:$0xff] }
 0x6ac   : > { %17135 = vmatmul.mubr.msk.f32.vlgmr.msra.gmra.mrb[24].mxu1 %vm1773_vm5, %v17110_v18  ;;  %v3050_v18 = vld [vmem:[%s22661_s15 + $0x40] sm:$0xff] }
 0x6ad   : > { %17143 = vmatpush3.msra.mxu1 %v2553_v14  ;;  %v18647_v14 = vpack.c.bf16 %v3047_v13, %v3046_v37  ;;  %v15364_v13 = vld [vmem:[%s22653_s7 + $0x88] sm:$0xff] }
 0x6ae   : > { %18632 = vmatprep.subr.bf16.mxu1 %v18631_v4 }
 0x6b1   : > { %v17124_v20 = vpop.f32.mrb[22].mxu1 }
 0x6b2   : > { %v2461_v21 = vpop.f32.mrb[23].mxu1 }
 0x6b3   : > { %17144 = vmatprep.mubr.msk.f32.mxu1 %vm1773_vm5, %v2461_v21  ;;  %v3052_v21 = vld [vmem:[%s22661_s15 + $0x50] sm:$0xff] }
 0x6b4   : > { %17145 = vmatmul.mubr.msk.f32.vlgmr.msra.gmra.mrb[26].mxu1 %vm1773_vm5, %v17124_v20  ;;  %v18655_v20 = vpack.c.bf16 %v3051_v19, %v3050_v18  ;;  %v18675_v18 = vpack.c.bf16 %v15342_v16, %v15341_v15  ;;  %v15366_v19 = vld [vmem:[%s22653_s7 + $0x98] sm:$0xff]  ;;  %v15369_v15 = vld [vmem:[%s22653_s7 + $0xb0] sm:$0xff] }
 0x6b5   : > { %v17131_v22 = vpop.f32.mrb[16].mxu0  ;;  %18634 = vmatpush3.bf16.msra.mxu1 %v18631_v4  ;;  %v15370_v16 = vld [vmem:[%s22653_s7 + $0xb8] sm:$0xff] }
 0x6b6   : > { %v2542_v24 = vpop.f32.mrb[17].mxu0  ;;  %18636 = vmatprep.subr.bf16.mxu1 %v18635_v5 }
 0x6b7   : > { %17149 = vmatprep.mubr.msk.f32.mxu0 %vm1773_vm5, %v2542_v24 }
 0x6b8   : > { %17150 = vmatmul.mubr.msk.f32.vlgmr.msra.gmra.mrb[20].mxu0 %vm1773_vm5, %v17131_v22  ;;  %v3053_v22 = vld [vmem:[%s22661_s15 + $0x58] sm:$0xff] }
 0x6b9   : > { %18638 = vmatpush3.bf16.msra.mxu1 %v18635_v5  ;;  %18642 = vmatpush3.bf16.msra.mxu0 %v18639_v10  ;;  %v18659_v24 = vpack.c.bf16 %v3053_v22, %v3052_v21  ;;  %v15339_v10 = vld [vmem:[%s22702_s6 + $0x80] sm:$0xff]  ;;  %v15344_v22 = vld [vmem:[%s22702_s6 + $0xa8] sm:$0xff] }
 0x6ba   : > { %18644 = vmatprep.subr.bf16.mxu0 %v18643_v12  ;;  %v18671_v37 = vpack.c.bf16 %v15340_v11, %v15339_v10  ;;  %v15343_v21 = vld [vmem:[%s22702_s6 + $0xa0] sm:$0xff]  ;;  %v15398_v10 = vld [vmem:[%s22654_s8 + $0xd8] sm:$0xff] }
 0x6bc   : > { %18672 = vmatprep.subr.bf16.mxu1 %v18671_v37 }
 0x6bd   : > { %18646 = vmatpush3.bf16.msra.mxu0 %v18643_v12  ;;  %v15363_v12 = vld [vmem:[%s22653_s7 + $0x80] sm:$0xff] }
 0x6be   : > { %18648 = vmatprep.subr.bf16.mxu0 %v18647_v14 }
 0x6c1   : > { %18650 = vmatpush3.bf16.msra.mxu0 %v18647_v14  ;;  %v18703_v14 = vpack.c.bf16 %v15364_v13, %v15363_v12  ;;  %v15367_v12 = vld [vmem:[%s22653_s7 + $0xa0] sm:$0xff] }
 0x6c2   : > { %18652 = vmatprep.subr.bf16.mxu0 %v18651_v17 }
 0x6c5   : > { %18654 = vmatpush3.bf16.msra.mxu0 %v18651_v17  ;;  %v15365_v17 = vld [vmem:[%s22653_s7 + $0x90] sm:$0xff] }
 0x6c6   : > { %18656 = vmatprep.subr.bf16.mxu0 %v18655_v20 }
 0x6c9   : > { %18658 = vmatpush3.bf16.msra.mxu0 %v18655_v20  ;;  %v18707_v20 = vpack.c.bf16 %v15366_v19, %v15365_v17  ;;  %v18715_v17 = vpack.c.bf16 %v15370_v16, %v15369_v15  ;;  %v15376_v19 = vld [vmem:[%s22653_s7 + $0xe8] sm:$0xff] }
 0x6ca   : > { %18660 = vmatprep.subr.bf16.mxu0 %v18659_v24 }
 0x6cd   : > { %18662 = vmatpush3.bf16.msra.mxu0 %v18659_v24  ;;  %v15371_v24 = vld [vmem:[%s22653_s7 + $0xc0] sm:$0xff] }
 0x75f   : > { %v17141_v25 = vpop.f32.mrb[18].mxu0 }
 0x760   : > { %v2708_v26 = vpop.f32.mrb[19].mxu0  ;;  %v2887_v30 = vsel %vm775_vm4, %v17141_v25, 0.0  ;;  %v3054_v25 = vld [vmem:[%s22661_s15 + $0x60] sm:$0xff] }
 0x761   : > { %v2880_v33 = vsel %vm775_vm4, %v2708_v26, 0.0  ;;  %v3055_v26 = vld [vmem:[%s22661_s15 + $0x68] sm:$0xff] }
 0x77f   : > { %v17136_v29 = vpop.f32.mrb[24].mxu1 }
 0x780   : > { %v2886_v31 = vsel %vm775_vm4, %v17136_v29, 0.0  ;;  %v2627_v32 = vpop.f32.mrb[25].mxu1  ;;  %v18663_v29 = vpack.c.bf16 %v3055_v26, %v3054_v25  ;;  %v18679_v25 = vpack.c.bf16 %v15344_v22, %v15343_v21  ;;  %v15372_v26 = vld [vmem:[%s22653_s7 + $0xc8] sm:$0xff]  ;;  %v15377_v21 = vld [vmem:[%s22653_s7 + $0xf0] sm:$0xff]  ;;  %v15378_v22 = vld [vmem:[%s22653_s7 + $0xf8] sm:$0xff] }
 0x781   : > { %v2888_v34 = vadd.f32 %v2887_v30, %v2886_v31  ;;  %v2879_v35 = vsel %vm775_vm4, %v2627_v32, 0.0 }
 0x782   : > { %v2881_v36 = vadd.f32 %v2880_v33, %v2879_v35  ;;  %18664 = vmatprep.subr.bf16.mxu0 %v18663_v29 }
 0x783   : > { %18666 = vmatpush3.bf16.msra.mxu0 %v18663_v29  ;;  %v18719_v29 = vpack.c.bf16 %v15372_v26, %v15371_v24  ;;  %v18731_v24 = vpack.c.bf16 %v15378_v22, %v15377_v21  ;;  %v15392_v26 = vld [vmem:[%s22654_s8 + $0xa8] sm:$0xff] }
 0x787   : > { %v17146_v38 = vpop.f32.mrb[26].mxu1 }
 0x788   : > { %v2889_v39 = vsel %vm775_vm4, %v17146_v38, 0.0  ;;  %v2789_v40 = vpop.f32.mrb[27].mxu1  ;;  %v15329_v38 = vld [vmem:[%s22657_s11] ss:$0 sm:$0xff] }
 0x789   : > { %v2890_v41 = vadd.f32 %v2889_v39, %v2888_v34  ;;  %v2882_v42 = vsel %vm775_vm4, %v2789_v40, 0.0 }
 0x78a   : > { %v2883_v43 = vadd.f32 %v2882_v42, %v2881_v36  ;;  %v15330_v42 = vld [vmem:[%s22658_s12] ss:$0 sm:$0xff] }
 0x78b   : > { %v17151_v44 = vpop.f32.mrb[20].mxu0 }
 0x78c   : > { %v2891_v45 = vsel %vm775_vm4, %v17151_v44, 0.0  ;;  %v2870_v46 = vpop.f32.mrb[21].mxu0 }
 0x78d   : > { %v2892_v47 = vadd.f32 %v2891_v45, %v2890_v41  ;;  %v2884_v48 = vsel %vm775_vm4, %v2870_v46, 0.0 }
 0x78e   : > { %v2885_v49 = vadd.f32 %v2884_v48, %v2883_v43  ;;  %v3057_v48 = vld [vmem:[%s22661_s15 + $0x78] sm:$0xff] }
 0x78f   : > { %v2894_v51 = vadd.f32 %v2892_v47, %v20123_v28  ;;  %v3056_v47 = vld [vmem:[%s22661_s15 + $0x70] sm:$0xff] }
 0x790   : > { %v2893_v52 = vadd.f32 %v2885_v49, %v20121_v27  ;;  %v18667_v49 = vpack.c.bf16 %v3057_v48, %v3056_v47  ;;  %v15373_v47 = vld [vmem:[%s22653_s7 + $0xd0] sm:$0xff]  ;;  %v15374_v48 = vld [vmem:[%s22653_s7 + $0xd8] sm:$0xff] }
 0x791   : > { %v20436_v53 = vadd.f32 %v15328_v50, %v2894_v51 }
 0x792   : > { %v20438_v54 = vadd.f32 %v15328_v50, %v2893_v52  ;;  %18668 = vmatprep.subr.bf16.mxu0 %v18667_v49  ;;  %v15331_v50 = vld [vmem:[%s22660_s14] ss:$0 sm:$0xff] }
 0x793   : > { %v2909_v55 = vsel %vm775_vm4, %v20436_v53, 0.0  ;;  %18670 = vmatpush3.bf16.msra.mxu0 %v18667_v49 }
 0x794   : > { %2910 = vadd.xlane.f32.xlu0 %v2909_v55  ;;  %v2906_v56 = vsel %vm775_vm4, %v20438_v54, 0.0  ;;  %18704 = vmatprep.subr.bf16.mxu0 %v18703_v14 }
 0x795   : > { %2907 = vadd.xlane.f32.xlu1 %v2906_v56 }
 0x821   : > { %v2911_v57 = vpop.xlane.xlu0 %2910 }
 0x822   : > { %v2913_v58 = vmul.f32 0.03125, %v2911_v57  ;;  %v2908_v59 = vpop.xlane.xlu1 %2907 }
 0x823   : > { %v2912_v60 = vmul.f32 0.03125, %v2908_v59 }
 0x824   : > { %v20445_v28 = vsub.f32 %v20436_v53, %v2913_v58 }
 0x825   : > { %v20448_v27 = vsub.f32 %v20438_v54, %v2912_v60  ;;  %v15334_v60 = vld [vmem:[%s22662_s16] ss:$0 sm:$0xff] }
 0x826   : > { %v2917_v61 = vmul.f32 %v20445_v28, %v20445_v28 }
 0x827   : > { %v2916_v62 = vmul.f32 %v20448_v27, %v20448_v27 }
 0x828   : > { %v2921_v63 = vsel %vm775_vm4, %v2917_v61, 0.0 }
 0x829   : > { %2922 = vadd.xlane.f32.xlu0 %v2921_v63  ;;  %v2918_v0 = vsel %vm775_vm4, %v2916_v62, 0.0 }
 0x82a   : > { %2919 = vadd.xlane.f32.xlu1 %v2918_v0 }
 0x8b6   : > { %v2923_v30 = vpop.xlane.xlu0 %2922 }
 0x8b7   : > { %v2925_v31 = vmul.f32 0.03125, %v2923_v30  ;;  %v2920_v32 = vpop.xlane.xlu1 %2919 }
 0x8b8   : > { %v2924_v33 = vmul.f32 0.03125, %v2920_v32 }
 0x8b9   : > { %v2927_v34 = vadd.f32 1e-05, %v2925_v31 }
 0x8ba   : > { %v2926_v35 = vadd.f32 1e-05, %v2924_v33 }
 0x8bb   : > { %19639 = vrsqrt.f32 %v2927_v34 }
 0x8bc   : > { %19641 = vrsqrt.f32 %v2926_v35 }
 0x8c5   : > { %v19640_v36 = vpop.eup %19639 }
 0x8c6   : > { %v19642_v39 = vpop.eup %19641  ;;  %v2931_v40 = vmul.f32 %v19640_v36, %v20445_v28 }
 0x8c7   : > { %v2930_v41 = vmul.f32 %v19642_v39, %v20448_v27 }
 0x8c8   : > { %v2939_v43 = vmul.f32 %v15329_v38, %v2931_v40 }
 0x8c9   : > { %v2938_v44 = vmul.f32 %v15329_v38, %v2930_v41  ;;  %v15337_v38 = vld [vmem:[%s22703_s1 + $0x1] ss:$0 sm:$0xff] }
 0x8ca   : > { %v2947_v46 = vadd.f32 %v15330_v42, %v2939_v43 }
 0x8cb   : > { %v2946_v45 = vadd.f32 %v15330_v42, %v2938_v44  ;;  %v15338_v42 = vld [vmem:[%s22704_s21 + $0x1] ss:$0 sm:$0xff] }
 0x8cd   : > { %17160 = vmatprep.mubr.msk.f32.mxu1 %vm775_vm4, %v2946_v45  ;;  %v15345_v45 = vld [vmem:[%s22702_s6 + $0xb0] sm:$0xff] }
 0x8ce   : > { %17161 = vmatmul.mubr.msk.f32.vlgmr.msra.gmra.mrb[28].mxu1 %vm775_vm4, %v2947_v46  ;;  %v15346_v46 = vld [vmem:[%s22702_s6 + $0xb8] sm:$0xff] }
 0x8cf   : > { %18674 = vmatpush3.bf16.msra.mxu1 %v18671_v37  ;;  %v15368_v37 = vld [vmem:[%s22653_s7 + $0xa8] sm:$0xff] }
 0x8d0   : > { %18676 = vmatprep.subr.bf16.mxu1 %v18675_v18 }
 0x8d3   : > { %18678 = vmatpush3.bf16.msra.mxu1 %v18675_v18  ;;  %v15375_v18 = vld [vmem:[%s22653_s7 + $0xe0] sm:$0xff] }
 0x8d4   : > { %18680 = vmatprep.subr.bf16.mxu1 %v18679_v25 }
 0x9a1   : > { %v17162_v51 = vpop.f32.mrb[28].mxu1 }
 0x9a2   : > { %v3037_v52 = vadd.f32 %v17162_v51, %v15331_v50  ;;  %v3031_v55 = vpop.f32.mrb[29].mxu1  ;;  %v15347_v51 = vld [vmem:[%s22702_s6 + $0xc0] sm:$0xff] }
 0x9a3   : > { %v3032_v56 = vadd.f32 %v15331_v50, %v3031_v55  ;;  %v18723_v55 = vpack.c.bf16 %v15374_v48, %v15373_v47 }
 0x9a4   : > { %v3041_v58 = vmax.f32 %v3037_v52, 0.0  ;;  %v18683_v52 = vpack.c.bf16 %v15346_v46, %v15345_v45 }
 0x9a5   : > { %v3040_v57 = vmax.f32 %v3032_v56, 0.0  ;;  %v15348_v56 = vld [vmem:[%s22702_s6 + $0xc8] sm:$0xff] }
 0x9a7   : > { %17195 = vmatprep.mubr.f32.mxu0 %v3040_v57  ;;  %v15387_v57 = vld [vmem:[%s22654_s8 + $0x80] sm:$0xff] }
 0x9a8   : > { %17196 = vmatmul.mubr.f32.vlgmr.msra.gmra.mrb[22].mxu0 %v3041_v58  ;;  %v15388_v58 = vld [vmem:[%s22654_s8 + $0x88] sm:$0xff] }
 0x9a9   : > { %18706 = vmatpush3.bf16.msra.mxu0 %v18703_v14  ;;  %v18711_v14 = vpack.c.bf16 %v15368_v37, %v15367_v12  ;;  %v19847_v12 = vld [vmem:[%s22707_s29 + $0x8] sm:$0xff] }
 0x9aa   : > { %18708 = vmatprep.subr.bf16.mxu0 %v18707_v20 }
 0x9ad   : > { %18710 = vmatpush3.bf16.msra.mxu0 %v18707_v20  ;;  %v18727_v20 = vpack.c.bf16 %v15376_v19, %v15375_v18 }
 0x9ae   : > { %18720 = vmatprep.subr.bf16.mxu0 %v18719_v29 }
 0xa7b   : > { %v17197_v59 = vpop.f32.mrb[22].mxu0 }
 0xa7c   : > { %v3134_v28 = vadd.f32 %v17197_v59, %v20436_v53  ;;  %v3124_v27 = vpop.f32.mrb[23].mxu0  ;;  %v18687_v59 = vpack.c.bf16 %v15348_v56, %v15347_v51 }
 0xa7d   : > { %v3133_v61 = vadd.f32 %v3124_v27, %v20438_v54  ;;  %v15350_v27 = vld [vmem:[%s22702_s6 + $0xd8] sm:$0xff] }
 0xa7e   : > { %v20534_v62 = vadd.f32 %v15334_v60, %v3134_v28  ;;  %v15349_v28 = vld [vmem:[%s22702_s6 + $0xd0] sm:$0xff] }
 0xa7f   : > { %v20536_v63 = vadd.f32 %v15334_v60, %v3133_v61  ;;  %v18735_v60 = vpack.c.bf16 %v15388_v58, %v15387_v57  ;;  %v15389_v61 = vld [vmem:[%s22654_s8 + $0x90] sm:$0xff] }
 0xa80   : > { %v3151_v0 = vsel %vm775_vm4, %v20534_v62, 0.0 }
 0xa81   : > { %3152 = vadd.xlane.f32.xlu0 %v3151_v0  ;;  %v3148_v1 = vsel %vm775_vm4, %v20536_v63, 0.0  ;;  %v15390_v0 = vld [vmem:[%s22654_s8 + $0x98] sm:$0xff] }
 0xa82   : > { %3149 = vadd.xlane.f32.xlu1 %v3148_v1  ;;  %v18691_v1 = vpack.c.bf16 %v15350_v27, %v15349_v28 }
 0xb0e   : > { %v3153_v2 = vpop.xlane.xlu0 %3152 }
 0xb0f   : > { %v3155_v3 = vmul.f32 0.03125, %v3153_v2  ;;  %v3150_v4 = vpop.xlane.xlu1 %3149  ;;  %v18739_v2 = vpack.c.bf16 %v15390_v0, %v15389_v61 }
 0xb10   : > { %v3154_v23 = vmul.f32 0.03125, %v3150_v4  ;;  %v15352_v4 = vld [vmem:[%s22702_s6 + $0xe8] sm:$0xff] }
 0xb11   : > { %v3157_v53 = vsub.f32 %v20534_v62, %v3155_v3  ;;  %v15351_v3 = vld [vmem:[%s22702_s6 + $0xe0] sm:$0xff] }
 0xb12   : > { %v3156_v54 = vsub.f32 %v20536_v63, %v3154_v23  ;;  %v15395_v23 = vld [vmem:[%s22654_s8 + $0xc0] sm:$0xff] }
 0xb13   : > { %v3159_v5 = vmul.f32 %v3157_v53, %v3157_v53 }
 0xb14   : > { %v3158_v6 = vmul.f32 %v3156_v54, %v3156_v54 }
 0xb15   : > { %v3163_v9 = vsel %vm775_vm4, %v3159_v5, 0.0 }
 0xb16   : > { %3164 = vadd.xlane.f32.xlu0 %v3163_v9  ;;  %v3160_v7 = vsel %vm775_vm4, %v3158_v6, 0.0  ;;  %v15353_v6 = vld [vmem:[%s22702_s6 + $0xf0] sm:$0xff]  ;;  %v15354_v9 = vld [vmem:[%s22702_s6 + $0xf8] sm:$0xff] }
 0xb17   : > { %3161 = vadd.xlane.f32.xlu1 %v3160_v7  ;;  %v15397_v7 = vld [vmem:[%s22654_s8 + $0xd0] sm:$0xff]  ;;  %v18699_v11 = vpack.c.bf16 %v15354_v9, %v15353_v6 }
 0xb18   : > { %v18755_v13 = vpack.c.bf16 %v15398_v10, %v15397_v7 }
 0xba3   : > { %v3165_v30 = vpop.xlane.xlu0 %3164 }
 0xba4   : > { %v3167_v31 = vmul.f32 0.03125, %v3165_v30  ;;  %v3162_v32 = vpop.xlane.xlu1 %3161  ;;  %v15393_v30 = vld [vmem:[%s22654_s8 + $0xb0] sm:$0xff] }
 0xba5   : > { %v3166_v33 = vmul.f32 0.03125, %v3162_v32 }
 0xba6   : > { %v3169_v34 = vadd.f32 1e-05, %v3167_v31  ;;  %v15394_v31 = vld [vmem:[%s22654_s8 + $0xb8] sm:$0xff] }
 0xba7   : > { %v3168_v35 = vadd.f32 1e-05, %v3166_v33  ;;  %v18747_v32 = vpack.c.bf16 %v15394_v31, %v15393_v30  ;;  %v15399_v33 = vld [vmem:[%s22654_s8 + $0xe0] sm:$0xff] }
 0xba8   : > { %19643 = vrsqrt.f32 %v3169_v34  ;;  %v15400_v34 = vld [vmem:[%s22654_s8 + $0xe8] sm:$0xff] }
 0xba9   : > { %19645 = vrsqrt.f32 %v3168_v35  ;;  %v18759_v35 = vpack.c.bf16 %v15400_v34, %v15399_v33 }
 0xbb2   : > { %v19644_v36 = vpop.eup %19643 }
 0xbb3   : > { %v19646_v39 = vpop.eup %19645  ;;  %v3173_v40 = vmul.f32 %v19644_v36, %v3157_v53  ;;  %v15396_v53 = vld [vmem:[%s22654_s8 + $0xc8] sm:$0xff]  ;;  %v15401_v36 = vld [vmem:[%s22654_s8 + $0xf0] sm:$0xff] }
 0xbb4   : > { %v3172_v41 = vmul.f32 %v19646_v39, %v3156_v54  ;;  %v18695_v54 = vpack.c.bf16 %v15352_v4, %v15351_v3  ;;  %v18751_v5 = vpack.c.bf16 %v15396_v53, %v15395_v23 }
 0xbb5   : > { %v3181_v43 = vmul.f32 %v15337_v38, %v3173_v40 }
 0xbb6   : > { %v3180_v44 = vmul.f32 %v15337_v38, %v3172_v41  ;;  %v15402_v38 = vld [vmem:[%s22654_s8 + $0xf8] sm:$0xff] }
 0xbb7   : > { %v20602_v50 = vadd.f32 %v15338_v42, %v3181_v43  ;;  %v18763_v39 = vpack.c.bf16 %v15402_v38, %v15401_v36 }
 0xbb8   : > { %v20600_v49 = vadd.f32 %v15338_v42, %v3180_v44 }
 0xbba   : > { %17206 = vmatprep.mubr.msk.f32.mxu1 %vm775_vm4, %v20600_v49  ;;  %17250 = vmatprep.mubr.msk.f32.mxu0 %vm775_vm4, %v20600_v49 }
 0xbbb   : > { %17207 = vmatmul.mubr.msk.f32.vlgmr.msra.gmra.mrb[30].mxu1 %vm775_vm4, %v20602_v50  ;;  %17251 = vmatmul.mubr.msk.f32.vlgmr.msra.gmra.mrb[24].mxu0 %vm775_vm4, %v20602_v50 }
 0xbbc   : > { %18682 = vmatpush3.bf16.msra.mxu1 %v18679_v25  ;;  %18722 = vmatpush3.bf16.msra.mxu0 %v18719_v29  ;;  %v15391_v25 = vld [vmem:[%s22654_s8 + $0xa0] sm:$0xff] }
 0xbbd   : > { %17217 = vmatprep.mubr.msk.f32.mxu1 %vm775_vm4, %v20600_v49  ;;  %17272 = vmatprep.mubr.msk.f32.mxu0 %vm775_vm4, %v20600_v49  ;;  %v18743_v29 = vpack.c.bf16 %v15392_v26, %v15391_v25 }
 0xbbe   : > { %18684 = vmatprep.subr.bf16.mxu1 %v18683_v52  ;;  %18724 = vmatprep.subr.bf16.mxu0 %v18723_v55 }
 0xbc0   : > { %18686 = vmatpush3.bf16.msra.mxu1 %v18683_v52  ;;  %18726 = vmatpush3.bf16.msra.mxu0 %v18723_v55 }
 0xbc1   : > { %18688 = vmatprep.subr.bf16.mxu1 %v18687_v59  ;;  %18736 = vmatprep.subr.bf16.mxu0 %v18735_v60 }
 0xbc3   : > { %17218 = vmatmul.mubr.msk.f32.vlgmr.msra.gmra.mrb[32].mxu1 %vm775_vm4, %v20602_v50  ;;  %17273 = vmatmul.mubr.msk.f32.vlgmr.msra.gmra.mrb[26].mxu0 %vm775_vm4, %v20602_v50 }
 0xbc4   : > { %18690 = vmatpush3.bf16.msra.mxu1 %v18687_v59  ;;  %17228 = vmatprep.mubr.msk.f32.mxu1 %vm775_vm4, %v20600_v49 }
 0xbc5   : > { %18738 = vmatpush3.bf16.msra.mxu0 %v18735_v60  ;;  %17294 = vmatprep.mubr.msk.f32.mxu0 %vm775_vm4, %v20600_v49 }
 0xbc6   : > { %18692 = vmatprep.subr.bf16.mxu1 %v18691_v1  ;;  %18740 = vmatprep.subr.bf16.mxu0 %v18739_v2 }
 0xbc8   : > { %18694 = vmatpush3.bf16.msra.mxu1 %v18691_v1 }
 0xbc9   : > { %18742 = vmatpush3.bf16.msra.mxu0 %v18739_v2  ;;  %18696 = vmatprep.subr.bf16.mxu1 %v18695_v54 }
 0xbca   : > { %18752 = vmatprep.subr.bf16.mxu0 %v18751_v5 }
 0xbcb   : > { %17229 = vmatmul.mubr.msk.f32.vlgmr.msra.gmra.mrb[34].mxu1 %vm775_vm4, %v20602_v50 }
 0xbcc   : > { %17295 = vmatmul.mubr.msk.f32.vlgmr.msra.gmra.mrb[28].mxu0 %vm775_vm4, %v20602_v50  ;;  %18698 = vmatpush3.bf16.msra.mxu1 %v18695_v54 }
 0xbcd   : > { %17239 = vmatprep.mubr.msk.f32.mxu1 %vm775_vm4, %v20600_v49  ;;  %18754 = vmatpush3.bf16.msra.mxu0 %v18751_v5 }
 0xbce   : > { %17316 = vmatprep.mubr.msk.f32.mxu0 %vm775_vm4, %v20600_v49  ;;  %18700 = vmatprep.subr.bf16.mxu1 %v18699_v11 }
 0xbcf   : > { %18756 = vmatprep.subr.bf16.mxu0 %v18755_v13 }
 0xbd0   : > { %18702 = vmatpush3.bf16.msra.mxu1 %v18699_v11 }
 0xbd1   : > { %18758 = vmatpush3.bf16.msra.mxu0 %v18755_v13  ;;  %18712 = vmatprep.subr.bf16.mxu1 %v18711_v14  ;;  %v19848_v13 = vld [vmem:[%s22707_s29] sm:$0xff] }
 0xbd3   : > { %17240 = vmatmul.mubr.msk.f32.vlgmr.msra.gmra.mrb[36].mxu1 %vm775_vm4, %v20602_v50 }
 0xbd4   : > { %17317 = vmatmul.mubr.msk.f32.vlgmr.msra.gmra.mrb[30].mxu0 %vm775_vm4, %v20602_v50  ;;  %18714 = vmatpush3.bf16.msra.mxu1 %v18711_v14 }
 0xbd5   : > { %17261 = vmatprep.mubr.msk.f32.mxu1 %vm775_vm4, %v20600_v49  ;;  %18716 = vmatprep.subr.bf16.mxu1 %v18715_v17 }
 0xbd8   : > { %18718 = vmatpush3.bf16.msra.mxu1 %v18715_v17 }
 0xbd9   : > { %18728 = vmatprep.subr.bf16.mxu1 %v18727_v20 }
 0xbdb   : > { %17262 = vmatmul.mubr.msk.f32.vlgmr.msra.gmra.mrb[38].mxu1 %vm775_vm4, %v20602_v50 }
 0xbdc   : > { %18730 = vmatpush3.bf16.msra.mxu1 %v18727_v20  ;;  %17283 = vmatprep.mubr.msk.f32.mxu1 %vm775_vm4, %v20600_v49 }
 0xbdd   : > { %18732 = vmatprep.subr.bf16.mxu1 %v18731_v24 }
 0xbe0   : > { %18734 = vmatpush3.bf16.msra.mxu1 %v18731_v24 }
 0xbe1   : > { %18744 = vmatprep.subr.bf16.mxu1 %v18743_v29 }
 0xbe3   : > { %17284 = vmatmul.mubr.msk.f32.vlgmr.msra.gmra.mrb[40].mxu1 %vm775_vm4, %v20602_v50 }
 0xbe4   : > { %18746 = vmatpush3.bf16.msra.mxu1 %v18743_v29  ;;  %17305 = vmatprep.mubr.msk.f32.mxu1 %vm775_vm4, %v20600_v49 }
 0xbe5   : > { %18748 = vmatprep.subr.bf16.mxu1 %v18747_v32 }
 0xbe8   : > { %18750 = vmatpush3.bf16.msra.mxu1 %v18747_v32 }
 0xbe9   : > { %18760 = vmatprep.subr.bf16.mxu1 %v18759_v35 }
 0xbeb   : > { %17306 = vmatmul.mubr.msk.f32.vlgmr.msra.gmra.mrb[42].mxu1 %vm775_vm4, %v20602_v50 }
 0xbec   : > { %18762 = vmatpush3.bf16.msra.mxu1 %v18759_v35  ;;  %17327 = vmatprep.mubr.msk.f32.mxu1 %vm775_vm4, %v20600_v49 }
 0xbed   : > { %18764 = vmatprep.subr.bf16.mxu1 %v18763_v39 }
 0xbf0   : > { %18766 = vmatpush3.bf16.msra.mxu1 %v18763_v39 }
 0xbf3   : > { %17328 = vmatmul.mubr.msk.f32.vlgmr.msra.gmra.mrb[44].mxu1 %vm775_vm4, %v20602_v50 }
 0xc8e   : > { %v17208_v40 = vpop.f32.mrb[30].mxu1  ;;  %v17252_v41 = vpop.f32.mrb[24].mxu0 }
 0xc8f   : > { %v3279_v42 = vpop.f32.mrb[31].mxu1  ;;  %v3596_v43 = vpop.f32.mrb[25].mxu0 }
 0xc90   : > { %v18767_v44 = vpack.c.bf16 %v17252_v41, %v3596_v43  ;;  %17334 = vmatprep.mubr.msk.f32.mxu0 %vm1773_vm5, %v3279_v42 }
 0xc92   : > { %18769 = vmatprep.subr.msk.bf16.mxu0 %vm20337_vm6, %v18767_v44 }
 0xc93   : > { %18772 = vmatpush3.bf16.xpose.msk.msra.mxu0 %vm20337_vm6, %v18767_v44 }
 0xc96   : > { %v17219_v45 = vpop.f32.mrb[32].mxu1  ;;  %v17274_v46 = vpop.f32.mrb[26].mxu0 }
 0xc97   : > { %v3354_v47 = vpop.f32.mrb[33].mxu1  ;;  %v3746_v48 = vpop.f32.mrb[27].mxu0 }
 0xc98   : > { %v18779_v49 = vpack.c.bf16 %v17274_v46, %v3746_v48  ;;  %17341 = vmatprep.mubr.msk.f32.mxu1 %vm1773_vm5, %v3354_v47 }
 0xc9a   : > { %18781 = vmatprep.subr.msk.bf16.mxu0 %vm20337_vm6, %v18779_v49  ;;  %17335 = vmatmul.mubr.msk.f32.vlgmr.msra.gmra.mrb[32].mxu0 %vm1773_vm5, %v17208_v40 }
 0xc9b   : > { %18784 = vmatpush3.bf16.xpose.msk.msra.mxu0 %vm20337_vm6, %v18779_v49 }
 0xc9e   : > { %v17230_v50 = vpop.f32.mrb[34].mxu1 }
 0xc9f   : > { %v17296_v51 = vpop.f32.mrb[28].mxu0  ;;  %v3429_v52 = vpop.f32.mrb[35].mxu1 }
 0xca0   : > { %v3913_v55 = vpop.f32.mrb[29].mxu0  ;;  %17348 = vmatprep.mubr.msk.f32.mxu0 %vm1773_vm5, %v3429_v52 }
 0xca1   : > { %v18791_v56 = vpack.c.bf16 %v17296_v51, %v3913_v55 }
 0xca2   : > { %17349 = vmatmul.mubr.msk.f32.vlgmr.msra.gmra.mrb[34].mxu0 %vm1773_vm5, %v17230_v50 }
 0xca3   : > { %18792 = vmatprep.subr.bf16.mxu0 %v18791_v56 }
 0xca4   : > { %18794 = vmatpush3.bf16.msra.mxu0 %v18791_v56 }
 0xca6   : > { %v17241_v57 = vpop.f32.mrb[36].mxu1 }
 0xca7   : > { %v17318_v58 = vpop.f32.mrb[30].mxu0  ;;  %v3504_v59 = vpop.f32.mrb[37].mxu1 }
 0xca8   : > { %v4063_v60 = vpop.f32.mrb[31].mxu0 }
 0xca9   : > { %v18799_v28 = vpack.c.bf16 %v17318_v58, %v4063_v60 }
 0xcae   : > { %v17263_v27 = vpop.f32.mrb[38].mxu1 }
 0xcaf   : > { %v3671_v61 = vpop.f32.mrb[39].mxu1 }
 0xcb0   : > { %v18773_v0 = vpack.c.bf16 %v17263_v27, %v3671_v61 }
 0xcb2   : > { %18775 = vmatprep.subr.msk.bf16.mxu1 %vm20337_vm6, %v18773_v0 }
 0xcb3   : > { %18778 = vmatpush3.bf16.xpose.msk.msra.mxu1 %vm20337_vm6, %v18773_v0 }
 0xcb6   : > { %v17285_v1 = vpop.f32.mrb[40].mxu1 }
 0xcb7   : > { %v3821_v2 = vpop.f32.mrb[41].mxu1 }
 0xcb8   : > { %v18785_v3 = vpack.c.bf16 %v17285_v1, %v3821_v2 }
 0xcba   : > { %17342 = vmatmul.mubr.msk.f32.vlgmr.msra.gmra.mrb[46].mxu1 %vm1773_vm5, %v17219_v45  ;;  %18787 = vmatprep.subr.msk.bf16.mxu1 %vm20337_vm6, %v18785_v3 }
 0xcbb   : > { %18790 = vmatpush3.bf16.xpose.msk.msra.mxu1 %vm20337_vm6, %v18785_v3  ;;  %17355 = vmatprep.mubr.msk.f32.mxu1 %vm1773_vm5, %v3504_v59 }
 0xcbc   : > { %18800 = vmatprep.subr.bf16.mxu1 %v18799_v28 }
 0xcbe   : > { %v17307_v4 = vpop.f32.mrb[42].mxu1 }
 0xcbf   : > { %v3988_v23 = vpop.f32.mrb[43].mxu1 }
 0xcc0   : > { %v20771_v53 = vpack.c.bf16 %v17307_v4, %v3988_v23 }
 0xcc2   : > { %17356 = vmatmul.mubr.msk.f32.vlgmr.msra.gmra.mrb[48].mxu1 %vm1773_vm5, %v17241_v57  ;;  %18796 = vmatprep.subr.bf16.mxu0 %v20771_v53 }
 0xcc3   : > { %18802 = vmatpush3.bf16.msra.mxu1 %v18799_v28 }
 0xcc6   : > { %v17329_v54 = vpop.f32.mrb[44].mxu1 }
 0xcc7   : > { %v4138_v5 = vpop.f32.mrb[45].mxu1 }
 0xcc8   : > { %v20775_v6 = vpack.c.bf16 %v17329_v54, %v4138_v5 }
 0xd6d   : > { %v17336_v9 = vpop.f32.mrb[32].mxu0 }
 0xd6e   : > { %v4496_v7 = vmul.f32 0.17677669, %v17336_v9  ;;  %v4225_v10 = vpop.f32.mrb[33].mxu0 }
 0xd6f   : > { %v4495_v11 = vmul.f32 0.17677669, %v4225_v10 }
 0xd70   : > { %v4504_v37 = vadd.f32 %v19847_v12, %v4496_v7 }
 0xd71   : > { %v4503_v14 = vadd.f32 %v19848_v13, %v4495_v11 }
 0xd72   : > { %v4514_v15 = vsel %vm2138_vm7, %v4504_v37, -inf }
 0xd73   : > { %4515 = vmax.xlane.f32.xlu0 %v4514_v15  ;;  %v4511_v16 = vsel %vm2138_vm7, %v4503_v14, -inf }
 0xd74   : > { %4512 = vmax.xlane.f32.xlu1 %v4511_v16 }
 0xd75   : > { %v17350_v17 = vpop.f32.mrb[34].mxu0 }
 0xd76   : > { %v4500_v18 = vmul.f32 0.17677669, %v17350_v17  ;;  %v4399_v19 = vpop.f32.mrb[35].mxu0 }
 0xd77   : > { %v4499_v20 = vmul.f32 0.17677669, %v4399_v19 }
 0xd78   : > { %v4508_v21 = vadd.f32 %v19847_v12, %v4500_v18 }
 0xd79   : > { %v4507_v22 = vadd.f32 %v19848_v13, %v4499_v20 }
 0xd7a   : > { %v4526_v24 = vsel %vm2138_vm7, %v4508_v21, -inf }
 0xd7b   : > { %4527 = vmax.xlane.f32.xlu0 %v4526_v24  ;;  %v4523_v25 = vsel %vm2138_vm7, %v4507_v22, -inf }
 0xd7c   : > { %4524 = vmax.xlane.f32.xlu1 %v4523_v25 }
 0xd8d   : > { %v17343_v26 = vpop.f32.mrb[46].mxu1 }
 0xd8e   : > { %v4498_v29 = vmul.f32 0.17677669, %v17343_v26  ;;  %v4312_v30 = vpop.f32.mrb[47].mxu1 }
 0xd8f   : > { %v4497_v31 = vmul.f32 0.17677669, %v4312_v30 }
 0xd90   : > { %v4506_v32 = vadd.f32 %v19847_v12, %v4498_v29 }
 0xd91   : > { %v4505_v33 = vadd.f32 %v19848_v13, %v4497_v31 }
 0xd92   : > { %v4520_v34 = vsel %vm2138_vm7, %v4506_v32, -inf }
 0xd93   : > { %4521 = vmax.xlane.f32.xlu0 %v4520_v34  ;;  %v4517_v35 = vsel %vm2138_vm7, %v4505_v33, -inf }
 0xd94   : > { %4518 = vmax.xlane.f32.xlu1 %v4517_v35 }
 0xd95   : > { %v17357_v36 = vpop.f32.mrb[48].mxu1 }
 0xd96   : > { %v4502_v38 = vmul.f32 0.17677669, %v17357_v36  ;;  %v4486_v39 = vpop.f32.mrb[49].mxu1 }
 0xd97   : > { %v4501_v40 = vmul.f32 0.17677669, %v4486_v39 }
 0xd98   : > { %v4510_v41 = vadd.f32 %v19847_v12, %v4502_v38 }
 0xd99   : > { %v4509_v42 = vadd.f32 %v19848_v13, %v4501_v40 }
 0xd9a   : > { %v4532_v43 = vsel %vm2138_vm7, %v4510_v41, -inf }
 0xd9b   : > { %4533 = vmax.xlane.f32.xlu0 %v4532_v43  ;;  %v4529_v44 = vsel %vm2138_vm7, %v4509_v42, -inf }
 0xd9c   : > { %4530 = vmax.xlane.f32.xlu1 %v4529_v44 }
 0xe00   : > { %v4516_v45 = vpop.xlane.xlu0 %4515 }
 0xe01   : > { %v4536_v46 = vsub.f32 %v4504_v37, %v4516_v45  ;;  %v4513_v47 = vpop.xlane.xlu1 %4512 }
 0xe02   : > { %v4535_v48 = vsub.f32 %v4503_v14, %v4513_v47 }
 0xe03   : > { %v4545_v49 = vmul.f32 1.442695, %v4536_v46 }
 0xe04   : > { %v4543_v50 = vmul.f32 1.442695, %v4535_v48 }
 0xe05   : > { %19647 = vpow2.f32 %v4545_v49  ;;  %v15435_v49 = vld [vmem:[%s22655_s9 + $0x20] sm:$0xff] }
 0xe06   : > { %19649 = vpow2.f32 %v4543_v50  ;;  %17386 = vmatprep.subr.mxu1 %v15435_v49  ;;  %v15437_v50 = vld [vmem:[%s22655_s9 + $0x30] sm:$0xff] }
 0xe08   : > { %v4528_v51 = vpop.xlane.xlu0 %4527 }
 0xe09   : > { %v4540_v52 = vsub.f32 %v4508_v21, %v4528_v51  ;;  %v4525_v55 = vpop.xlane.xlu1 %4524  ;;  %v15438_v51 = vld [vmem:[%s22655_s9 + $0x38] sm:$0xff] }
 0xe0a   : > { %v4539_v56 = vsub.f32 %v4507_v22, %v4525_v55 }
 0xe0b   : > { %v4553_v57 = vmul.f32 1.442695, %v4540_v52 }
 0xe0c   : > { %v4551_v58 = vmul.f32 1.442695, %v4539_v56 }
 0xe0d   : > { %19651 = vpow2.f32 %v4553_v57 }
 0xe0e   : > { %19653 = vpow2.f32 %v4551_v58 }
 0xe0f   : > { %v19648_v59 = vpop.eup %19647 }
 0xe10   : > { %v19650_v60 = vpop.eup %19649  ;;  %v4562_v28 = vsel %vm2138_vm7, %v19648_v59, 0.0 }
 0xe11   : > { %4563 = vadd.xlane.f32.xlu0 %v4562_v28  ;;  %v4559_v27 = vsel %vm2138_vm7, %v19650_v60, 0.0 }
 0xe12   : > { %4560 = vadd.xlane.f32.xlu1 %v4559_v27 }
 0xe17   : > { %v19652_v61 = vpop.eup %19651 }
 0xe18   : > { %v19654_v0 = vpop.eup %19653  ;;  %v4574_v1 = vsel %vm2138_vm7, %v19652_v61, 0.0 }
 0xe19   : > { %4575 = vadd.xlane.f32.xlu0 %v4574_v1  ;;  %v4571_v2 = vsel %vm2138_vm7, %v19654_v0, 0.0 }
 0xe1a   : > { %4572 = vadd.xlane.f32.xlu1 %v4571_v2 }
 0xe20   : > { %v4522_v3 = vpop.xlane.xlu0 %4521 }
 0xe21   : > { %v4538_v4 = vsub.f32 %v4506_v32, %v4522_v3  ;;  %v4519_v23 = vpop.xlane.xlu1 %4518 }
 0xe22   : > { %v4537_v54 = vsub.f32 %v4505_v33, %v4519_v23 }
 0xe23   : > { %v4549_v5 = vmul.f32 1.442695, %v4538_v4 }
 0xe24   : > { %v4547_v9 = vmul.f32 1.442695, %v4537_v54 }
 0xe25   : > { %19655 = vpow2.f32 %v4549_v5 }
 0xe26   : > { %19657 = vpow2.f32 %v4547_v9 }
 0xe28   : > { %v4534_v7 = vpop.xlane.xlu0 %4533 }
 0xe29   : > { %v4542_v10 = vsub.f32 %v4510_v41, %v4534_v7  ;;  %v4531_v11 = vpop.xlane.xlu1 %4530 }
 0xe2a   : > { %v4541_v12 = vsub.f32 %v4509_v42, %v4531_v11 }
 0xe2b   : > { %v4557_v37 = vmul.f32 1.442695, %v4542_v10 }
 0xe2c   : > { %v4555_v13 = vmul.f32 1.442695, %v4541_v12 }
 0xe2d   : > { %19659 = vpow2.f32 %v4557_v37 }
 0xe2e   : > { %19661 = vpow2.f32 %v4555_v13 }
 0xe2f   : > { %v19656_v14 = vpop.eup %19655 }
 0xe30   : > { %v19658_v15 = vpop.eup %19657  ;;  %v4568_v16 = vsel %vm2138_vm7, %v19656_v14, 0.0 }
 0xe31   : > { %4569 = vadd.xlane.f32.xlu0 %v4568_v16  ;;  %v4565_v17 = vsel %vm2138_vm7, %v19658_v15, 0.0 }
 0xe32   : > { %4566 = vadd.xlane.f32.xlu1 %v4565_v17 }
 0xe37   : > { %v19660_v18 = vpop.eup %19659 }
 0xe38   : > { %v19662_v19 = vpop.eup %19661  ;;  %v4580_v20 = vsel %vm2138_vm7, %v19660_v18, 0.0 }
 0xe39   : > { %4581 = vadd.xlane.f32.xlu0 %v4580_v20  ;;  %v4577_v21 = vsel %vm2138_vm7, %v19662_v19, 0.0 }
 0xe3a   : > { %4578 = vadd.xlane.f32.xlu1 %v4577_v21 }
 0xe9e   : > { %v4564_v22 = vpop.xlane.xlu0 %4563 }
 0xe9f   : > { %19663 = vrcp.f32 %v4564_v22  ;;  %v4561_v24 = vpop.xlane.xlu1 %4560 }
 0xea0   : > { %19665 = vrcp.f32 %v4561_v24 }
 0xea6   : > { %v4576_v25 = vpop.xlane.xlu0 %4575 }
 0xea7   : > { %19667 = vrcp.f32 %v4576_v25  ;;  %v4573_v26 = vpop.xlane.xlu1 %4572 }
 0xea8   : > { %19669 = vrcp.f32 %v4573_v26 }
 0xea9   : > { %v19664_v29 = vpop.eup %19663 }
 0xeaa   : > { %v19666_v30 = vpop.eup %19665  ;;  %v4592_v32 = vmul.f32 %v19664_v29, %v19648_v59 }
 0xeab   : > { %v4591_v31 = vmul.f32 %v19666_v30, %v19650_v60 }
 0xead   : > { %17362 = vmatprep.mubr.msk.f32.mxu0 %vm2138_vm7, %v4591_v31 }
 0xeae   : > { %17363 = vmatmul.mubr.msk.f32.vlgmr.msra.gmra.mrb[36].mxu0 %vm2138_vm7, %v4592_v32 }
 0xeaf   : > { %18798 = vmatpush3.bf16.msra.mxu0 %v20771_v53 }
 0xeb0   : > { %18804 = vmatprep.subr.bf16.mxu0 %v20775_v6 }
 0xeb1   : > { %v19668_v33 = vpop.eup %19667 }
 0xeb2   : > { %v19670_v34 = vpop.eup %19669  ;;  %v4596_v36 = vmul.f32 %v19668_v33, %v19652_v61 }
 0xeb3   : > { %v4595_v35 = vmul.f32 %v19670_v34, %v19654_v0 }
 0xeb5   : > { %17376 = vmatprep.mubr.msk.f32.mxu1 %vm2138_vm7, %v4595_v35 }
 0xeb6   : > { %17377 = vmatmul.mubr.msk.f32.vlgmr.msra.gmra.mrb[50].mxu1 %vm2138_vm7, %v4596_v36 }
 0xeb7   : > { %17387 = vmatpush3.msra.mxu1 %v15435_v49  ;;  %v15465_v49 = vld [vmem:[%s22661_s15 + $0xa0] sm:$0xff] }
 0xeb8   : > { %17396 = vmatprep.subr.mxu1 %v15437_v50 }
 0xebe   : > { %v4570_v38 = vpop.xlane.xlu0 %4569 }
 0xebf   : > { %19671 = vrcp.f32 %v4570_v38  ;;  %v4567_v39 = vpop.xlane.xlu1 %4566  ;;  %v15453_v38 = vld [vmem:[%s22659_s13 + $0x20] sm:$0xff] }
 0xec0   : > { %19673 = vrcp.f32 %v4567_v39  ;;  %v15454_v39 = vld [vmem:[%s22659_s13 + $0x28] sm:$0xff] }
 0xec6   : > { %v4582_v40 = vpop.xlane.xlu0 %4581 }
 0xec7   : > { %19675 = vrcp.f32 %v4582_v40  ;;  %v4579_v41 = vpop.xlane.xlu1 %4578  ;;  %v15455_v40 = vld [vmem:[%s22659_s13 + $0x30] sm:$0xff] }
 0xec8   : > { %19677 = vrcp.f32 %v4579_v41  ;;  %v18807_v41 = vpack.c.bf16 %v15454_v39, %v15453_v38 }
 0xec9   : > { %v19672_v42 = vpop.eup %19671 }
 0xeca   : > { %v19674_v53 = vpop.eup %19673  ;;  %v4594_v44 = vmul.f32 %v19672_v42, %v19656_v14  ;;  %v15456_v42 = vld [vmem:[%s22659_s13 + $0x38] sm:$0xff] }
 0xecb   : > { %v4593_v43 = vmul.f32 %v19674_v53, %v19658_v15  ;;  %v18811_v53 = vpack.c.bf16 %v15456_v42, %v15455_v40 }
 0xecd   : > { %17369 = vmatprep.mubr.msk.f32.mxu0 %vm2138_vm7, %v4593_v43  ;;  %v15461_v43 = vld [vmem:[%s22661_s15 + $0x80] sm:$0xff] }
 0xece   : > { %17370 = vmatmul.mubr.msk.f32.vlgmr.msra.gmra.mrb[38].mxu0 %vm2138_vm7, %v4594_v44  ;;  %v15462_v44 = vld [vmem:[%s22661_s15 + $0x88] sm:$0xff] }
 0xecf   : > { %18806 = vmatpush3.bf16.msra.mxu0 %v20775_v6  ;;  %v15436_v6 = vld [vmem:[%s22655_s9 + $0x28] sm:$0xff] }
 0xed0   : > { %17391 = vmatprep.subr.mxu0 %v15436_v6 }
 0xed1   : > { %v19676_v45 = vpop.eup %19675 }
 0xed2   : > { %v19678_v46 = vpop.eup %19677  ;;  %v4598_v48 = vmul.f32 %v19676_v45, %v19660_v18  ;;  %v15463_v45 = vld [vmem:[%s22661_s15 + $0x90] sm:$0xff] }
 0xed3   : > { %v4597_v47 = vmul.f32 %v19678_v46, %v19662_v19  ;;  %v15448_v19 = vld [vmem:[%s22656_s10 + $0x1] ss:$0 sm:$0xff]  ;;  %v18815_v46 = vpack.c.bf16 %v15462_v44, %v15461_v43 }
 0xed5   : > { %17383 = vmatprep.mubr.msk.f32.mxu0 %vm2138_vm7, %v4597_v47  ;;  %v15464_v47 = vld [vmem:[%s22661_s15 + $0x98] sm:$0xff] }
 0xed6   : > { %17384 = vmatmul.mubr.msk.f32.vlgmr.msra.gmra.mrb[40].mxu0 %vm2138_vm7, %v4598_v48  ;;  %v18819_v48 = vpack.c.bf16 %v15464_v47, %v15463_v45  ;;  %v15484_v47 = vld [vmem:[%s22702_s6 + $0x108] sm:$0xff] }
 0xed7   : > { %17392 = vmatpush3.msra.mxu0 %v15436_v6 }
 0xed8   : > { %17401 = vmatprep.subr.mxu0 %v15438_v51 }
 0xf81   : > { %v17364_v52 = vpop.f32.mrb[36].mxu0 }
 0xf82   : > { %v4671_v55 = vpop.f32.mrb[37].mxu0 }
 0xf83   : > { %17388 = vmatprep.mubr.msk.f32.mxu1 %vm1773_vm5, %v4671_v55 }
 0xf84   : > { %17389 = vmatmul.mubr.msk.f32.vlgmr.msra.gmra.mrb[52].mxu1 %vm1773_vm5, %v17364_v52  ;;  %v15468_v52 = vld [vmem:[%s22661_s15 + $0xb8] sm:$0xff] }
 0xf85   : > { %17397 = vmatpush3.msra.mxu1 %v15437_v50  ;;  %v15466_v50 = vld [vmem:[%s22661_s15 + $0xa8] sm:$0xff] }
 0xf86   : > { %18808 = vmatprep.subr.bf16.mxu1 %v18807_v41  ;;  %v18823_v6 = vpack.c.bf16 %v15466_v50, %v15465_v49  ;;  %v15508_v50 = vld [vmem:[%s22653_s7 + $0x108] sm:$0xff] }
 0xf89   : > { %v17378_v56 = vpop.f32.mrb[50].mxu1 }
 0xf8a   : > { %v4833_v57 = vpop.f32.mrb[51].mxu1 }
 0xf8b   : > { %17398 = vmatprep.mubr.msk.f32.mxu1 %vm1773_vm5, %v4833_v57  ;;  %v15470_v57 = vld [vmem:[%s22661_s15 + $0xc8] sm:$0xff] }
 0xf8c   : > { %17399 = vmatmul.mubr.msk.f32.vlgmr.msra.gmra.mrb[54].mxu1 %vm1773_vm5, %v17378_v56  ;;  %v15469_v56 = vld [vmem:[%s22661_s15 + $0xc0] sm:$0xff] }
 0xf8d   : > { %18810 = vmatpush3.bf16.msra.mxu1 %v18807_v41 }
 0xf8e   : > { %18812 = vmatprep.subr.bf16.mxu1 %v18811_v53 }
 0xf91   : > { %18814 = vmatpush3.bf16.msra.mxu1 %v18811_v53 }
 0xfa1   : > { %v17371_v58 = vpop.f32.mrb[38].mxu0 }
 0xfa2   : > { %v4752_v59 = vpop.f32.mrb[39].mxu0 }
 0xfa3   : > { %17393 = vmatprep.mubr.msk.f32.mxu0 %vm1773_vm5, %v4752_v59  ;;  %v15471_v59 = vld [vmem:[%s22661_s15 + $0xd0] sm:$0xff] }
 0xfa4   : > { %17394 = vmatmul.mubr.msk.f32.vlgmr.msra.gmra.mrb[42].mxu0 %vm1773_vm5, %v17371_v58  ;;  %v18831_v58 = vpack.c.bf16 %v15470_v57, %v15469_v56  ;;  %v15510_v57 = vld [vmem:[%s22653_s7 + $0x118] sm:$0xff] }
 0xfa5   : > { %17402 = vmatpush3.msra.mxu0 %v15438_v51  ;;  %v15467_v51 = vld [vmem:[%s22661_s15 + $0xb0] sm:$0xff] }
 0xfa6   : > { %18816 = vmatprep.subr.bf16.mxu0 %v18815_v46  ;;  %v18827_v55 = vpack.c.bf16 %v15468_v52, %v15467_v51  ;;  %v15485_v51 = vld [vmem:[%s22702_s6 + $0x110] sm:$0xff]  ;;  %v15486_v52 = vld [vmem:[%s22702_s6 + $0x118] sm:$0xff] }
 0xfa7   : > { %v18851_v56 = vpack.c.bf16 %v15486_v52, %v15485_v51  ;;  %v15513_v51 = vld [vmem:[%s22653_s7 + $0x130] sm:$0xff]  ;;  %v15514_v52 = vld [vmem:[%s22653_s7 + $0x138] sm:$0xff] }
 0xfa9   : > { %v17385_v60 = vpop.f32.mrb[40].mxu0 }
 0xfaa   : > { %v4914_v28 = vpop.f32.mrb[41].mxu0 }
 0xfab   : > { %17403 = vmatprep.mubr.msk.f32.mxu0 %vm1773_vm5, %v4914_v28 }
 0xfac   : > { %17404 = vmatmul.mubr.msk.f32.vlgmr.msra.gmra.mrb[44].mxu0 %vm1773_vm5, %v17385_v60  ;;  %v15472_v60 = vld [vmem:[%s22661_s15 + $0xd8] sm:$0xff] }
 0xfad   : > { %18818 = vmatpush3.bf16.msra.mxu0 %v18815_v46  ;;  %v18835_v28 = vpack.c.bf16 %v15472_v60, %v15471_v59  ;;  %v15483_v46 = vld [vmem:[%s22702_s6 + $0x100] sm:$0xff]  ;;  %v15488_v60 = vld [vmem:[%s22702_s6 + $0x128] sm:$0xff] }
 0xfae   : > { %18820 = vmatprep.subr.bf16.mxu0 %v18819_v48  ;;  %v18847_v49 = vpack.c.bf16 %v15484_v47, %v15483_v46  ;;  %v15487_v59 = vld [vmem:[%s22702_s6 + $0x120] sm:$0xff]  ;;  %v15542_v46 = vld [vmem:[%s22654_s8 + $0x158] sm:$0xff] }
 0xfb0   : > { %18848 = vmatprep.subr.bf16.mxu1 %v18847_v49 }
 0xfb1   : > { %18822 = vmatpush3.bf16.msra.mxu0 %v18819_v48  ;;  %v15507_v48 = vld [vmem:[%s22653_s7 + $0x100] sm:$0xff] }
 0xfb2   : > { %18824 = vmatprep.subr.bf16.mxu0 %v18823_v6 }
 0xfb5   : > { %18826 = vmatpush3.bf16.msra.mxu0 %v18823_v6  ;;  %v18879_v6 = vpack.c.bf16 %v15508_v50, %v15507_v48  ;;  %v15511_v48 = vld [vmem:[%s22653_s7 + $0x120] sm:$0xff] }
 0xfb6   : > { %18828 = vmatprep.subr.bf16.mxu0 %v18827_v55 }
 0xfb9   : > { %18830 = vmatpush3.bf16.msra.mxu0 %v18827_v55  ;;  %v15509_v55 = vld [vmem:[%s22653_s7 + $0x110] sm:$0xff] }
 0xfba   : > { %18832 = vmatprep.subr.bf16.mxu0 %v18831_v58 }
 0xfbd   : > { %18834 = vmatpush3.bf16.msra.mxu0 %v18831_v58  ;;  %v18883_v58 = vpack.c.bf16 %v15510_v57, %v15509_v55  ;;  %v18891_v55 = vpack.c.bf16 %v15514_v52, %v15513_v51  ;;  %v15520_v57 = vld [vmem:[%s22653_s7 + $0x168] sm:$0xff] }
 0xfbe   : > { %18836 = vmatprep.subr.bf16.mxu0 %v18835_v28 }
 0xfc1   : > { %18838 = vmatpush3.bf16.msra.mxu0 %v18835_v28  ;;  %v15515_v28 = vld [vmem:[%s22653_s7 + $0x140] sm:$0xff] }
0x1057   : > { %v17390_v27 = vpop.f32.mrb[52].mxu1 }
0x1058   : > { %v5000_v61 = vpop.f32.mrb[53].mxu1  ;;  %v5259_v3 = vsel %vm775_vm4, %v17390_v27, 0.0  ;;  %v15473_v27 = vld [vmem:[%s22661_s15 + $0xe0] sm:$0xff] }
0x1059   : > { %v5252_v54 = vsel %vm775_vm4, %v5000_v61, 0.0  ;;  %v15474_v61 = vld [vmem:[%s22661_s15 + $0xe8] sm:$0xff] }
0x105f   : > { %v17400_v0 = vpop.f32.mrb[54].mxu1 }
0x1060   : > { %v5162_v1 = vpop.f32.mrb[55].mxu1  ;;  %v5262_v7 = vsel %vm775_vm4, %v17400_v0, 0.0  ;;  %v18839_v0 = vpack.c.bf16 %v15474_v61, %v15473_v27  ;;  %v18855_v27 = vpack.c.bf16 %v15488_v60, %v15487_v59  ;;  %v15516_v61 = vld [vmem:[%s22653_s7 + $0x148] sm:$0xff]  ;;  %v15521_v59 = vld [vmem:[%s22653_s7 + $0x170] sm:$0xff]  ;;  %v15522_v60 = vld [vmem:[%s22653_s7 + $0x178] sm:$0xff] }
0x1061   : > { %v5255_v11 = vsel %vm775_vm4, %v5162_v1, 0.0 }
0x1062   : > { %18840 = vmatprep.subr.bf16.mxu0 %v18839_v0 }
0x1063   : > { %18842 = vmatpush3.bf16.msra.mxu0 %v18839_v0  ;;  %v18895_v0 = vpack.c.bf16 %v15516_v61, %v15515_v28  ;;  %v18907_v28 = vpack.c.bf16 %v15522_v60, %v15521_v59  ;;  %v15536_v61 = vld [vmem:[%s22654_s8 + $0x128] sm:$0xff] }
0x1077   : > { %v17395_v2 = vpop.f32.mrb[42].mxu0 }
0x1078   : > { %v5260_v4 = vsel %vm775_vm4, %v17395_v2, 0.0  ;;  %v5081_v23 = vpop.f32.mrb[43].mxu0 }
0x1079   : > { %v5261_v5 = vadd.f32 %v5260_v4, %v5259_v3  ;;  %v5253_v9 = vsel %vm775_vm4, %v5081_v23, 0.0 }
0x107a   : > { %v5254_v10 = vadd.f32 %v5253_v9, %v5252_v54  ;;  %v15451_v9 = vld [vmem:[%s22657_s11 + $0x1] ss:$0 sm:$0xff] }
0x107b   : > { %v5263_v12 = vadd.f32 %v5262_v7, %v5261_v5 }
0x107c   : > { %v5256_v37 = vadd.f32 %v5255_v11, %v5254_v10 }
0x107f   : > { %v17405_v13 = vpop.f32.mrb[44].mxu0 }
0x1080   : > { %v5264_v14 = vsel %vm775_vm4, %v17405_v13, 0.0  ;;  %v5243_v15 = vpop.f32.mrb[45].mxu0 }
0x1081   : > { %v5265_v16 = vadd.f32 %v5264_v14, %v5263_v12  ;;  %v5257_v17 = vsel %vm775_vm4, %v5243_v15, 0.0  ;;  %v15452_v12 = vld [vmem:[%s22658_s12 + $0x1] ss:$0 sm:$0xff] }
0x1082   : > { %v5258_v18 = vadd.f32 %v5257_v17, %v5256_v37  ;;  %v15476_v17 = vld [vmem:[%s22661_s15 + $0xf8] sm:$0xff] }
0x1083   : > { %v5267_v20 = vadd.f32 %v5265_v16, %v20534_v62  ;;  %v15475_v16 = vld [vmem:[%s22661_s15 + $0xf0] sm:$0xff] }
0x1084   : > { %v5266_v21 = vadd.f32 %v5258_v18, %v20536_v63  ;;  %v18843_v18 = vpack.c.bf16 %v15476_v17, %v15475_v16  ;;  %v15517_v16 = vld [vmem:[%s22653_s7 + $0x150] sm:$0xff]  ;;  %v15518_v17 = vld [vmem:[%s22653_s7 + $0x158] sm:$0xff] }
0x1085   : > { %v20843_v22 = vadd.f32 %v15448_v19, %v5267_v20 }
0x1086   : > { %v20845_v24 = vadd.f32 %v15448_v19, %v5266_v21  ;;  %18844 = vmatprep.subr.bf16.mxu0 %v18843_v18  ;;  %v15458_v19 = vld [vmem:[%s22660_s14 + $0x1] ss:$0 sm:$0xff] }
0x1087   : > { %v5285_v25 = vsel %vm775_vm4, %v20843_v22, 0.0  ;;  %18846 = vmatpush3.bf16.msra.mxu0 %v18843_v18 }
0x1088   : > { %5286 = vadd.xlane.f32.xlu0 %v5285_v25  ;;  %v5282_v26 = vsel %vm775_vm4, %v20845_v24, 0.0  ;;  %18880 = vmatprep.subr.bf16.mxu0 %v18879_v6 }
0x1089   : > { %5283 = vadd.xlane.f32.xlu1 %v5282_v26 }
0x1115   : > { %v5287_v29 = vpop.xlane.xlu0 %5286 }
0x1116   : > { %v5289_v30 = vmul.f32 0.03125, %v5287_v29  ;;  %v5284_v31 = vpop.xlane.xlu1 %5283 }
0x1117   : > { %v5288_v32 = vmul.f32 0.03125, %v5284_v31 }
0x1118   : > { %v20852_v62 = vsub.f32 %v20843_v22, %v5289_v30 }
0x1119   : > { %v20855_v63 = vsub.f32 %v20845_v24, %v5288_v32  ;;  %v15478_v32 = vld [vmem:[%s22662_s16 + $0x1] ss:$0 sm:$0xff] }
0x111a   : > { %v5293_v33 = vmul.f32 %v20852_v62, %v20852_v62 }
0x111b   : > { %v5292_v34 = vmul.f32 %v20855_v63, %v20855_v63 }
0x111c   : > { %v5297_v35 = vsel %vm775_vm4, %v5293_v33, 0.0 }
0x111d   : > { %5298 = vadd.xlane.f32.xlu0 %v5297_v35  ;;  %v5294_v36 = vsel %vm775_vm4, %v5292_v34, 0.0 }
0x111e   : > { %5295 = vadd.xlane.f32.xlu1 %v5294_v36 }
0x11aa   : > { %v5299_v1 = vpop.xlane.xlu0 %5298 }
0x11ab   : > { %v5301_v2 = vmul.f32 0.03125, %v5299_v1  ;;  %v5296_v3 = vpop.xlane.xlu1 %5295 }
0x11ac   : > { %v5300_v4 = vmul.f32 0.03125, %v5296_v3 }
0x11ad   : > { %v5303_v23 = vadd.f32 1e-05, %v5301_v2 }
0x11ae   : > { %v5302_v54 = vadd.f32 1e-05, %v5300_v4 }
0x11af   : > { %19679 = vrsqrt.f32 %v5303_v23 }
0x11b0   : > { %19681 = vrsqrt.f32 %v5302_v54 }
0x11b9   : > { %v19680_v5 = vpop.eup %19679 }
0x11ba   : > { %v19682_v7 = vpop.eup %19681  ;;  %v5307_v10 = vmul.f32 %v19680_v5, %v20852_v62 }
0x11bb   : > { %v5306_v11 = vmul.f32 %v19682_v7, %v20855_v63 }
0x11bc   : > { %v5315_v37 = vmul.f32 %v15451_v9, %v5307_v10 }
0x11bd   : > { %v5314_v13 = vmul.f32 %v15451_v9, %v5306_v11  ;;  %v15481_v9 = vld [vmem:[%s22703_s1 + $0x2] ss:$0 sm:$0xff] }
0x11be   : > { %v5323_v15 = vadd.f32 %v15452_v12, %v5315_v37 }
0x11bf   : > { %v5322_v14 = vadd.f32 %v15452_v12, %v5314_v13  ;;  %v15482_v12 = vld [vmem:[%s22704_s21 + $0x2] ss:$0 sm:$0xff] }
0x11c1   : > { %17414 = vmatprep.mubr.msk.f32.mxu1 %vm775_vm4, %v5322_v14  ;;  %v15489_v14 = vld [vmem:[%s22702_s6 + $0x130] sm:$0xff] }
0x11c2   : > { %17415 = vmatmul.mubr.msk.f32.vlgmr.msra.gmra.mrb[56].mxu1 %vm775_vm4, %v5323_v15  ;;  %v15490_v15 = vld [vmem:[%s22702_s6 + $0x138] sm:$0xff] }
0x11c3   : > { %18850 = vmatpush3.bf16.msra.mxu1 %v18847_v49  ;;  %v15512_v49 = vld [vmem:[%s22653_s7 + $0x128] sm:$0xff] }
0x11c4   : > { %18852 = vmatprep.subr.bf16.mxu1 %v18851_v56 }
0x11c7   : > { %18854 = vmatpush3.bf16.msra.mxu1 %v18851_v56  ;;  %v15519_v56 = vld [vmem:[%s22653_s7 + $0x160] sm:$0xff] }
0x11c8   : > { %18856 = vmatprep.subr.bf16.mxu1 %v18855_v27 }
0x1295   : > { %v17416_v20 = vpop.f32.mrb[56].mxu1 }
0x1296   : > { %v5415_v21 = vadd.f32 %v17416_v20, %v15458_v19  ;;  %v5409_v25 = vpop.f32.mrb[57].mxu1  ;;  %v15491_v20 = vld [vmem:[%s22702_s6 + $0x140] sm:$0xff] }
0x1297   : > { %v5410_v26 = vadd.f32 %v15458_v19, %v5409_v25  ;;  %v18899_v25 = vpack.c.bf16 %v15518_v17, %v15517_v16 }
0x1298   : > { %v5419_v30 = vmax.f32 %v5415_v21, 0.0  ;;  %v18859_v21 = vpack.c.bf16 %v15490_v15, %v15489_v14 }
0x1299   : > { %v5418_v29 = vmax.f32 %v5410_v26, 0.0  ;;  %v15492_v26 = vld [vmem:[%s22702_s6 + $0x148] sm:$0xff] }
0x129b   : > { %17449 = vmatprep.mubr.f32.mxu0 %v5418_v29  ;;  %v15531_v29 = vld [vmem:[%s22654_s8 + $0x100] sm:$0xff] }
0x129c   : > { %17450 = vmatmul.mubr.f32.vlgmr.msra.gmra.mrb[46].mxu0 %v5419_v30  ;;  %v15532_v30 = vld [vmem:[%s22654_s8 + $0x108] sm:$0xff] }
0x129d   : > { %18882 = vmatpush3.bf16.msra.mxu0 %v18879_v6  ;;  %v18887_v6 = vpack.c.bf16 %v15512_v49, %v15511_v48  ;;  %v19849_v48 = vld [vmem:[%s22707_s29 + $0x8] sm:$0xff] }
0x129e   : > { %18884 = vmatprep.subr.bf16.mxu0 %v18883_v58 }
0x12a1   : > { %18886 = vmatpush3.bf16.msra.mxu0 %v18883_v58  ;;  %v18903_v58 = vpack.c.bf16 %v15520_v57, %v15519_v56 }
0x12a2   : > { %18896 = vmatprep.subr.bf16.mxu0 %v18895_v0 }
0x136f   : > { %v17451_v31 = vpop.f32.mrb[46].mxu0 }
0x1370   : > { %v5513_v62 = vadd.f32 %v17451_v31, %v20843_v22  ;;  %v5503_v63 = vpop.f32.mrb[47].mxu0  ;;  %v18863_v31 = vpack.c.bf16 %v15492_v26, %v15491_v20 }
0x1371   : > { %v5512_v33 = vadd.f32 %v5503_v63, %v20845_v24  ;;  %v15494_v63 = vld [vmem:[%s22702_s6 + $0x158] sm:$0xff] }
0x1372   : > { %v20941_v34 = vadd.f32 %v15478_v32, %v5513_v62  ;;  %v15493_v62 = vld [vmem:[%s22702_s6 + $0x150] sm:$0xff] }
0x1373   : > { %v20943_v35 = vadd.f32 %v15478_v32, %v5512_v33  ;;  %v18911_v32 = vpack.c.bf16 %v15532_v30, %v15531_v29  ;;  %v15533_v33 = vld [vmem:[%s22654_s8 + $0x110] sm:$0xff] }
0x1374   : > { %v5531_v36 = vsel %vm775_vm4, %v20941_v34, 0.0 }
0x1375   : > { %5532 = vadd.xlane.f32.xlu0 %v5531_v36  ;;  %v5528_v38 = vsel %vm775_vm4, %v20943_v35, 0.0  ;;  %v15534_v36 = vld [vmem:[%s22654_s8 + $0x118] sm:$0xff] }
0x1376   : > { %5529 = vadd.xlane.f32.xlu1 %v5528_v38  ;;  %v18867_v38 = vpack.c.bf16 %v15494_v63, %v15493_v62 }
0x1402   : > { %v5533_v39 = vpop.xlane.xlu0 %5532 }
0x1403   : > { %v5535_v40 = vmul.f32 0.03125, %v5533_v39  ;;  %v5530_v41 = vpop.xlane.xlu1 %5529  ;;  %v18915_v39 = vpack.c.bf16 %v15534_v36, %v15533_v33 }
0x1404   : > { %v5534_v42 = vmul.f32 0.03125, %v5530_v41  ;;  %v15496_v41 = vld [vmem:[%s22702_s6 + $0x168] sm:$0xff] }
0x1405   : > { %v5537_v22 = vsub.f32 %v20941_v34, %v5535_v40  ;;  %v15495_v40 = vld [vmem:[%s22702_s6 + $0x160] sm:$0xff] }
0x1406   : > { %v5536_v24 = vsub.f32 %v20943_v35, %v5534_v42  ;;  %v15539_v42 = vld [vmem:[%s22654_s8 + $0x140] sm:$0xff] }
0x1407   : > { %v5539_v53 = vmul.f32 %v5537_v22, %v5537_v22 }
0x1408   : > { %v5538_v43 = vmul.f32 %v5536_v24, %v5536_v24 }
0x1409   : > { %v5543_v44 = vsel %vm775_vm4, %v5539_v53, 0.0 }
0x140a   : > { %5544 = vadd.xlane.f32.xlu0 %v5543_v44  ;;  %v5540_v45 = vsel %vm775_vm4, %v5538_v43, 0.0  ;;  %v15497_v43 = vld [vmem:[%s22702_s6 + $0x170] sm:$0xff]  ;;  %v15498_v44 = vld [vmem:[%s22702_s6 + $0x178] sm:$0xff] }
0x140b   : > { %5541 = vadd.xlane.f32.xlu1 %v5540_v45  ;;  %v15541_v45 = vld [vmem:[%s22654_s8 + $0x150] sm:$0xff]  ;;  %v18875_v47 = vpack.c.bf16 %v15498_v44, %v15497_v43 }
0x140c   : > { %v18931_v50 = vpack.c.bf16 %v15542_v46, %v15541_v45 }
0x1497   : > { %v5545_v1 = vpop.xlane.xlu0 %5544 }
0x1498   : > { %v5547_v2 = vmul.f32 0.03125, %v5545_v1  ;;  %v5542_v3 = vpop.xlane.xlu1 %5541  ;;  %v15537_v1 = vld [vmem:[%s22654_s8 + $0x130] sm:$0xff] }
0x1499   : > { %v5546_v4 = vmul.f32 0.03125, %v5542_v3 }
0x149a   : > { %v5549_v23 = vadd.f32 1e-05, %v5547_v2  ;;  %v15538_v2 = vld [vmem:[%s22654_s8 + $0x138] sm:$0xff] }
0x149b   : > { %v5548_v54 = vadd.f32 1e-05, %v5546_v4  ;;  %v18923_v3 = vpack.c.bf16 %v15538_v2, %v15537_v1  ;;  %v15543_v4 = vld [vmem:[%s22654_s8 + $0x160] sm:$0xff] }
0x149c   : > { %19683 = vrsqrt.f32 %v5549_v23  ;;  %v15544_v23 = vld [vmem:[%s22654_s8 + $0x168] sm:$0xff] }
0x149d   : > { %19685 = vrsqrt.f32 %v5548_v54  ;;  %v18935_v54 = vpack.c.bf16 %v15544_v23, %v15543_v4 }
0x14a6   : > { %v19684_v5 = vpop.eup %19683 }
0x14a7   : > { %v19686_v7 = vpop.eup %19685  ;;  %v5553_v10 = vmul.f32 %v19684_v5, %v5537_v22  ;;  %v15540_v22 = vld [vmem:[%s22654_s8 + $0x148] sm:$0xff]  ;;  %v15545_v5 = vld [vmem:[%s22654_s8 + $0x170] sm:$0xff] }
0x14a8   : > { %v5552_v11 = vmul.f32 %v19686_v7, %v5536_v24  ;;  %v18871_v24 = vpack.c.bf16 %v15496_v41, %v15495_v40  ;;  %v18927_v53 = vpack.c.bf16 %v15540_v22, %v15539_v42 }
0x14a9   : > { %v5561_v37 = vmul.f32 %v15481_v9, %v5553_v10 }
0x14aa   : > { %v5560_v13 = vmul.f32 %v15481_v9, %v5552_v11  ;;  %v15546_v9 = vld [vmem:[%s22654_s8 + $0x178] sm:$0xff] }
0x14ab   : > { %v21009_v19 = vadd.f32 %v15482_v12, %v5561_v37  ;;  %v18939_v7 = vpack.c.bf16 %v15546_v9, %v15545_v5 }
0x14ac   : > { %v21007_v18 = vadd.f32 %v15482_v12, %v5560_v13 }
0x14ae   : > { %17460 = vmatprep.mubr.msk.f32.mxu1 %vm775_vm4, %v21007_v18  ;;  %17504 = vmatprep.mubr.msk.f32.mxu0 %vm775_vm4, %v21007_v18 }
0x14af   : > { %17461 = vmatmul.mubr.msk.f32.vlgmr.msra.gmra.mrb[58].mxu1 %vm775_vm4, %v21009_v19  ;;  %17505 = vmatmul.mubr.msk.f32.vlgmr.msra.gmra.mrb[48].mxu0 %vm775_vm4, %v21009_v19 }
0x14b0   : > { %18858 = vmatpush3.bf16.msra.mxu1 %v18855_v27  ;;  %18898 = vmatpush3.bf16.msra.mxu0 %v18895_v0  ;;  %v15535_v27 = vld [vmem:[%s22654_s8 + $0x120] sm:$0xff] }
0x14b1   : > { %17471 = vmatprep.mubr.msk.f32.mxu1 %vm775_vm4, %v21007_v18  ;;  %17526 = vmatprep.mubr.msk.f32.mxu0 %vm775_vm4, %v21007_v18  ;;  %v18919_v0 = vpack.c.bf16 %v15536_v61, %v15535_v27 }
0x14b2   : > { %18860 = vmatprep.subr.bf16.mxu1 %v18859_v21  ;;  %18900 = vmatprep.subr.bf16.mxu0 %v18899_v25 }
0x14b4   : > { %18862 = vmatpush3.bf16.msra.mxu1 %v18859_v21  ;;  %18902 = vmatpush3.bf16.msra.mxu0 %v18899_v25 }
0x14b5   : > { %18864 = vmatprep.subr.bf16.mxu1 %v18863_v31  ;;  %18912 = vmatprep.subr.bf16.mxu0 %v18911_v32 }
0x14b7   : > { %17472 = vmatmul.mubr.msk.f32.vlgmr.msra.gmra.mrb[60].mxu1 %vm775_vm4, %v21009_v19  ;;  %17527 = vmatmul.mubr.msk.f32.vlgmr.msra.gmra.mrb[50].mxu0 %vm775_vm4, %v21009_v19 }
0x14b8   : > { %18866 = vmatpush3.bf16.msra.mxu1 %v18863_v31  ;;  %17482 = vmatprep.mubr.msk.f32.mxu1 %vm775_vm4, %v21007_v18 }
0x14b9   : > { %18914 = vmatpush3.bf16.msra.mxu0 %v18911_v32  ;;  %17548 = vmatprep.mubr.msk.f32.mxu0 %vm775_vm4, %v21007_v18 }
0x14ba   : > { %18868 = vmatprep.subr.bf16.mxu1 %v18867_v38  ;;  %18916 = vmatprep.subr.bf16.mxu0 %v18915_v39 }
0x14bc   : > { %18870 = vmatpush3.bf16.msra.mxu1 %v18867_v38 }
0x14bd   : > { %18918 = vmatpush3.bf16.msra.mxu0 %v18915_v39  ;;  %18872 = vmatprep.subr.bf16.mxu1 %v18871_v24 }
0x14be   : > { %18928 = vmatprep.subr.bf16.mxu0 %v18927_v53 }
0x14bf   : > { %17483 = vmatmul.mubr.msk.f32.vlgmr.msra.gmra.mrb[62].mxu1 %vm775_vm4, %v21009_v19 }
0x14c0   : > { %17549 = vmatmul.mubr.msk.f32.vlgmr.msra.gmra.mrb[52].mxu0 %vm775_vm4, %v21009_v19  ;;  %18874 = vmatpush3.bf16.msra.mxu1 %v18871_v24 }
0x14c1   : > { %17493 = vmatprep.mubr.msk.f32.mxu1 %vm775_vm4, %v21007_v18  ;;  %18930 = vmatpush3.bf16.msra.mxu0 %v18927_v53 }
0x14c2   : > { %17570 = vmatprep.mubr.msk.f32.mxu0 %vm775_vm4, %v21007_v18  ;;  %18876 = vmatprep.subr.bf16.mxu1 %v18875_v47 }
0x14c3   : > { %18932 = vmatprep.subr.bf16.mxu0 %v18931_v50 }
0x14c4   : > { %18878 = vmatpush3.bf16.msra.mxu1 %v18875_v47 }
0x14c5   : > { %18934 = vmatpush3.bf16.msra.mxu0 %v18931_v50  ;;  %18888 = vmatprep.subr.bf16.mxu1 %v18887_v6  ;;  %v19850_v50 = vld [vmem:[%s22707_s29] sm:$0xff] }
0x14c7   : > { %17494 = vmatmul.mubr.msk.f32.vlgmr.msra.gmra.mrb[64].mxu1 %vm775_vm4, %v21009_v19 }
0x14c8   : > { %17571 = vmatmul.mubr.msk.f32.vlgmr.msra.gmra.mrb[54].mxu0 %vm775_vm4, %v21009_v19  ;;  %18890 = vmatpush3.bf16.msra.mxu1 %v18887_v6 }
0x14c9   : > { %17515 = vmatprep.mubr.msk.f32.mxu1 %vm775_vm4, %v21007_v18  ;;  %18892 = vmatprep.subr.bf16.mxu1 %v18891_v55 }
0x14cc   : > { %18894 = vmatpush3.bf16.msra.mxu1 %v18891_v55 }
0x14cd   : > { %18904 = vmatprep.subr.bf16.mxu1 %v18903_v58 }
0x14cf   : > { %17516 = vmatmul.mubr.msk.f32.vlgmr.msra.gmra.mrb[66].mxu1 %vm775_vm4, %v21009_v19 }
0x14d0   : > { %18906 = vmatpush3.bf16.msra.mxu1 %v18903_v58  ;;  %17537 = vmatprep.mubr.msk.f32.mxu1 %vm775_vm4, %v21007_v18 }
0x14d1   : > { %18908 = vmatprep.subr.bf16.mxu1 %v18907_v28 }
0x14d4   : > { %18910 = vmatpush3.bf16.msra.mxu1 %v18907_v28 }
0x14d5   : > { %18920 = vmatprep.subr.bf16.mxu1 %v18919_v0 }
0x14d7   : > { %17538 = vmatmul.mubr.msk.f32.vlgmr.msra.gmra.mrb[68].mxu1 %vm775_vm4, %v21009_v19 }
0x14d8   : > { %18922 = vmatpush3.bf16.msra.mxu1 %v18919_v0  ;;  %17559 = vmatprep.mubr.msk.f32.mxu1 %vm775_vm4, %v21007_v18 }
0x14d9   : > { %18924 = vmatprep.subr.bf16.mxu1 %v18923_v3 }
0x14dc   : > { %18926 = vmatpush3.bf16.msra.mxu1 %v18923_v3 }
0x14dd   : > { %18936 = vmatprep.subr.bf16.mxu1 %v18935_v54 }
0x14df   : > { %17560 = vmatmul.mubr.msk.f32.vlgmr.msra.gmra.mrb[70].mxu1 %vm775_vm4, %v21009_v19 }
0x14e0   : > { %18938 = vmatpush3.bf16.msra.mxu1 %v18935_v54  ;;  %17581 = vmatprep.mubr.msk.f32.mxu1 %vm775_vm4, %v21007_v18 }
0x14e1   : > { %18940 = vmatprep.subr.bf16.mxu1 %v18939_v7 }
0x14e4   : > { %18942 = vmatpush3.bf16.msra.mxu1 %v18939_v7 }
0x14e7   : > { %17582 = vmatmul.mubr.msk.f32.vlgmr.msra.gmra.mrb[72].mxu1 %vm775_vm4, %v21009_v19 }
0x1582   : > { %v17462_v10 = vpop.f32.mrb[58].mxu1  ;;  %v17506_v11 = vpop.f32.mrb[48].mxu0 }
0x1583   : > { %v5659_v12 = vpop.f32.mrb[59].mxu1  ;;  %v5976_v37 = vpop.f32.mrb[49].mxu0 }
0x1584   : > { %v18943_v13 = vpack.c.bf16 %v17506_v11, %v5976_v37  ;;  %17588 = vmatprep.mubr.msk.f32.mxu0 %vm1773_vm5, %v5659_v12 }
0x1586   : > { %18945 = vmatprep.subr.msk.bf16.mxu0 %vm20337_vm6, %v18943_v13 }
0x1587   : > { %18948 = vmatpush3.bf16.xpose.msk.msra.mxu0 %vm20337_vm6, %v18943_v13 }
0x158a   : > { %v17473_v14 = vpop.f32.mrb[60].mxu1  ;;  %v17528_v15 = vpop.f32.mrb[50].mxu0 }
0x158b   : > { %v5734_v16 = vpop.f32.mrb[61].mxu1  ;;  %v6126_v17 = vpop.f32.mrb[51].mxu0 }
0x158c   : > { %v18955_v18 = vpack.c.bf16 %v17528_v15, %v6126_v17  ;;  %17595 = vmatprep.mubr.msk.f32.mxu1 %vm1773_vm5, %v5734_v16 }
0x158e   : > { %18957 = vmatprep.subr.msk.bf16.mxu0 %vm20337_vm6, %v18955_v18  ;;  %17589 = vmatmul.mubr.msk.f32.vlgmr.msra.gmra.mrb[56].mxu0 %vm1773_vm5, %v17462_v10 }
0x158f   : > { %18960 = vmatpush3.bf16.xpose.msk.msra.mxu0 %vm20337_vm6, %v18955_v18 }
0x1592   : > { %v17484_v19 = vpop.f32.mrb[62].mxu1 }
0x1593   : > { %v17550_v20 = vpop.f32.mrb[52].mxu0  ;;  %v5809_v21 = vpop.f32.mrb[63].mxu1 }
0x1594   : > { %v6293_v25 = vpop.f32.mrb[53].mxu0  ;;  %17602 = vmatprep.mubr.msk.f32.mxu0 %vm1773_vm5, %v5809_v21 }
0x1595   : > { %v18967_v26 = vpack.c.bf16 %v17550_v20, %v6293_v25 }
0x1596   : > { %17603 = vmatmul.mubr.msk.f32.vlgmr.msra.gmra.mrb[58].mxu0 %vm1773_vm5, %v17484_v19 }
0x1597   : > { %18968 = vmatprep.subr.bf16.mxu0 %v18967_v26 }
0x1598   : > { %18970 = vmatpush3.bf16.msra.mxu0 %v18967_v26 }
0x159a   : > { %v17495_v29 = vpop.f32.mrb[64].mxu1 }
0x159b   : > { %v17572_v30 = vpop.f32.mrb[54].mxu0  ;;  %v5884_v31 = vpop.f32.mrb[65].mxu1 }
0x159c   : > { %v6443_v32 = vpop.f32.mrb[55].mxu0 }
0x159d   : > { %v18975_v62 = vpack.c.bf16 %v17572_v30, %v6443_v32 }
0x15a2   : > { %v17517_v63 = vpop.f32.mrb[66].mxu1 }
0x15a3   : > { %v6051_v33 = vpop.f32.mrb[67].mxu1 }
0x15a4   : > { %v18949_v36 = vpack.c.bf16 %v17517_v63, %v6051_v33 }
0x15a6   : > { %18951 = vmatprep.subr.msk.bf16.mxu1 %vm20337_vm6, %v18949_v36 }
0x15a7   : > { %18954 = vmatpush3.bf16.xpose.msk.msra.mxu1 %vm20337_vm6, %v18949_v36 }
0x15aa   : > { %v17539_v38 = vpop.f32.mrb[68].mxu1 }
0x15ab   : > { %v6201_v39 = vpop.f32.mrb[69].mxu1 }
0x15ac   : > { %v18961_v40 = vpack.c.bf16 %v17539_v38, %v6201_v39 }
0x15ae   : > { %17596 = vmatmul.mubr.msk.f32.vlgmr.msra.gmra.mrb[74].mxu1 %vm1773_vm5, %v17473_v14  ;;  %18963 = vmatprep.subr.msk.bf16.mxu1 %vm20337_vm6, %v18961_v40 }
0x15af   : > { %18966 = vmatpush3.bf16.xpose.msk.msra.mxu1 %vm20337_vm6, %v18961_v40  ;;  %17609 = vmatprep.mubr.msk.f32.mxu1 %vm1773_vm5, %v5884_v31 }
0x15b0   : > { %18976 = vmatprep.subr.bf16.mxu1 %v18975_v62 }
0x15b2   : > { %v17561_v41 = vpop.f32.mrb[70].mxu1 }
0x15b3   : > { %v6368_v42 = vpop.f32.mrb[71].mxu1 }
0x15b4   : > { %v21178_v22 = vpack.c.bf16 %v17561_v41, %v6368_v42 }
0x15b6   : > { %17610 = vmatmul.mubr.msk.f32.vlgmr.msra.gmra.mrb[76].mxu1 %vm1773_vm5, %v17495_v29  ;;  %18972 = vmatprep.subr.bf16.mxu0 %v21178_v22 }
0x15b7   : > { %18978 = vmatpush3.bf16.msra.mxu1 %v18975_v62 }
0x15ba   : > { %v17583_v24 = vpop.f32.mrb[72].mxu1 }
0x15bb   : > { %v6518_v53 = vpop.f32.mrb[73].mxu1 }
0x15bc   : > { %v21182_v43 = vpack.c.bf16 %v17583_v24, %v6518_v53 }
0x1661   : > { %v17590_v44 = vpop.f32.mrb[56].mxu0 }
0x1662   : > { %v6876_v45 = vmul.f32 0.17677669, %v17590_v44  ;;  %v6605_v46 = vpop.f32.mrb[57].mxu0 }
0x1663   : > { %v6875_v47 = vmul.f32 0.17677669, %v6605_v46 }
0x1664   : > { %v6884_v49 = vadd.f32 %v19849_v48, %v6876_v45 }
0x1665   : > { %v6883_v6 = vadd.f32 %v19850_v50, %v6875_v47 }
0x1666   : > { %v6894_v51 = vsel %vm2138_vm7, %v6884_v49, -inf }
0x1667   : > { %6895 = vmax.xlane.f32.xlu0 %v6894_v51  ;;  %v6891_v52 = vsel %vm2138_vm7, %v6883_v6, -inf }
0x1668   : > { %6892 = vmax.xlane.f32.xlu1 %v6891_v52 }
0x1669   : > { %v17604_v55 = vpop.f32.mrb[58].mxu0 }
0x166a   : > { %v6880_v56 = vmul.f32 0.17677669, %v17604_v55  ;;  %v6779_v57 = vpop.f32.mrb[59].mxu0 }
0x166b   : > { %v6879_v58 = vmul.f32 0.17677669, %v6779_v57 }
0x166c   : > { %v6888_v59 = vadd.f32 %v19849_v48, %v6880_v56 }
0x166d   : > { %v6887_v60 = vadd.f32 %v19850_v50, %v6879_v58 }
0x166e   : > { %v6906_v28 = vsel %vm2138_vm7, %v6888_v59, -inf }
0x166f   : > { %6907 = vmax.xlane.f32.xlu0 %v6906_v28  ;;  %v6903_v27 = vsel %vm2138_vm7, %v6887_v60, -inf }
0x1670   : > { %6904 = vmax.xlane.f32.xlu1 %v6903_v27 }
0x1681   : > { %v17597_v61 = vpop.f32.mrb[74].mxu1 }
0x1682   : > { %v6878_v0 = vmul.f32 0.17677669, %v17597_v61  ;;  %v6692_v1 = vpop.f32.mrb[75].mxu1 }
0x1683   : > { %v6877_v2 = vmul.f32 0.17677669, %v6692_v1 }
0x1684   : > { %v6886_v3 = vadd.f32 %v19849_v48, %v6878_v0 }
0x1685   : > { %v6885_v4 = vadd.f32 %v19850_v50, %v6877_v2 }
0x1686   : > { %v6900_v23 = vsel %vm2138_vm7, %v6886_v3, -inf }
0x1687   : > { %6901 = vmax.xlane.f32.xlu0 %v6900_v23  ;;  %v6897_v54 = vsel %vm2138_vm7, %v6885_v4, -inf }
0x1688   : > { %6898 = vmax.xlane.f32.xlu1 %v6897_v54 }
0x1689   : > { %v17611_v5 = vpop.f32.mrb[76].mxu1 }
0x168a   : > { %v6882_v9 = vmul.f32 0.17677669, %v17611_v5  ;;  %v6866_v7 = vpop.f32.mrb[77].mxu1 }
0x168b   : > { %v6881_v10 = vmul.f32 0.17677669, %v6866_v7 }
0x168c   : > { %v6890_v11 = vadd.f32 %v19849_v48, %v6882_v9 }
0x168d   : > { %v6889_v12 = vadd.f32 %v19850_v50, %v6881_v10 }
0x168e   : > { %v6912_v37 = vsel %vm2138_vm7, %v6890_v11, -inf }
0x168f   : > { %6913 = vmax.xlane.f32.xlu0 %v6912_v37  ;;  %v6909_v13 = vsel %vm2138_vm7, %v6889_v12, -inf }
0x1690   : > { %6910 = vmax.xlane.f32.xlu1 %v6909_v13 }
0x16f4   : > { %v6896_v14 = vpop.xlane.xlu0 %6895 }
0x16f5   : > { %v6916_v15 = vsub.f32 %v6884_v49, %v6896_v14  ;;  %v6893_v16 = vpop.xlane.xlu1 %6892 }
0x16f6   : > { %v6915_v17 = vsub.f32 %v6883_v6, %v6893_v16 }
0x16f7   : > { %v6925_v18 = vmul.f32 1.442695, %v6916_v15 }
0x16f8   : > { %v6923_v19 = vmul.f32 1.442695, %v6915_v17 }
0x16f9   : > { %19687 = vpow2.f32 %v6925_v18  ;;  %v15579_v18 = vld [vmem:[%s22655_s9 + $0x40] sm:$0xff] }
0x16fa   : > { %19689 = vpow2.f32 %v6923_v19  ;;  %17640 = vmatprep.subr.mxu1 %v15579_v18  ;;  %v15581_v19 = vld [vmem:[%s22655_s9 + $0x50] sm:$0xff] }
0x16fc   : > { %v6908_v20 = vpop.xlane.xlu0 %6907 }
0x16fd   : > { %v6920_v21 = vsub.f32 %v6888_v59, %v6908_v20  ;;  %v6905_v25 = vpop.xlane.xlu1 %6904  ;;  %v15582_v20 = vld [vmem:[%s22655_s9 + $0x58] sm:$0xff] }
0x16fe   : > { %v6919_v26 = vsub.f32 %v6887_v60, %v6905_v25 }
0x16ff   : > { %v6933_v29 = vmul.f32 1.442695, %v6920_v21 }
0x1700   : > { %v6931_v30 = vmul.f32 1.442695, %v6919_v26 }
0x1701   : > { %19691 = vpow2.f32 %v6933_v29 }
0x1702   : > { %19693 = vpow2.f32 %v6931_v30 }
0x1703   : > { %v19688_v31 = vpop.eup %19687 }
0x1704   : > { %v19690_v32 = vpop.eup %19689  ;;  %v6942_v62 = vsel %vm2138_vm7, %v19688_v31, 0.0 }
0x1705   : > { %6943 = vadd.xlane.f32.xlu0 %v6942_v62  ;;  %v6939_v63 = vsel %vm2138_vm7, %v19690_v32, 0.0 }
0x1706   : > { %6940 = vadd.xlane.f32.xlu1 %v6939_v63 }
0x170b   : > { %v19692_v33 = vpop.eup %19691 }
0x170c   : > { %v19694_v36 = vpop.eup %19693  ;;  %v6954_v38 = vsel %vm2138_vm7, %v19692_v33, 0.0 }
0x170d   : > { %6955 = vadd.xlane.f32.xlu0 %v6954_v38  ;;  %v6951_v39 = vsel %vm2138_vm7, %v19694_v36, 0.0 }
0x170e   : > { %6952 = vadd.xlane.f32.xlu1 %v6951_v39 }
0x1714   : > { %v6902_v40 = vpop.xlane.xlu0 %6901 }
0x1715   : > { %v6918_v41 = vsub.f32 %v6886_v3, %v6902_v40  ;;  %v6899_v42 = vpop.xlane.xlu1 %6898 }
0x1716   : > { %v6917_v24 = vsub.f32 %v6885_v4, %v6899_v42 }
0x1717   : > { %v6929_v53 = vmul.f32 1.442695, %v6918_v41 }
0x1718   : > { %v6927_v44 = vmul.f32 1.442695, %v6917_v24 }
0x1719   : > { %19695 = vpow2.f32 %v6929_v53 }
0x171a   : > { %19697 = vpow2.f32 %v6927_v44 }
0x171c   : > { %v6914_v45 = vpop.xlane.xlu0 %6913 }
0x171d   : > { %v6922_v46 = vsub.f32 %v6890_v11, %v6914_v45  ;;  %v6911_v47 = vpop.xlane.xlu1 %6910 }
0x171e   : > { %v6921_v48 = vsub.f32 %v6889_v12, %v6911_v47 }
0x171f   : > { %v6937_v49 = vmul.f32 1.442695, %v6922_v46 }
0x1720   : > { %v6935_v50 = vmul.f32 1.442695, %v6921_v48 }
0x1721   : > { %19699 = vpow2.f32 %v6937_v49 }
0x1722   : > { %19701 = vpow2.f32 %v6935_v50 }
0x1723   : > { %v19696_v6 = vpop.eup %19695 }
0x1724   : > { %v19698_v51 = vpop.eup %19697  ;;  %v6948_v52 = vsel %vm2138_vm7, %v19696_v6, 0.0 }
0x1725   : > { %6949 = vadd.xlane.f32.xlu0 %v6948_v52  ;;  %v6945_v55 = vsel %vm2138_vm7, %v19698_v51, 0.0 }
0x1726   : > { %6946 = vadd.xlane.f32.xlu1 %v6945_v55 }
0x172b   : > { %v19700_v56 = vpop.eup %19699 }
0x172c   : > { %v19702_v57 = vpop.eup %19701  ;;  %v6960_v58 = vsel %vm2138_vm7, %v19700_v56, 0.0 }
0x172d   : > { %6961 = vadd.xlane.f32.xlu0 %v6960_v58  ;;  %v6957_v59 = vsel %vm2138_vm7, %v19702_v57, 0.0 }
0x172e   : > { %6958 = vadd.xlane.f32.xlu1 %v6957_v59 }
0x1792   : > { %v6944_v60 = vpop.xlane.xlu0 %6943 }
0x1793   : > { %19703 = vrcp.f32 %v6944_v60  ;;  %v6941_v28 = vpop.xlane.xlu1 %6940 }
0x1794   : > { %19705 = vrcp.f32 %v6941_v28 }
0x179a   : > { %v6956_v27 = vpop.xlane.xlu0 %6955 }
0x179b   : > { %19707 = vrcp.f32 %v6956_v27  ;;  %v6953_v61 = vpop.xlane.xlu1 %6952 }
0x179c   : > { %19709 = vrcp.f32 %v6953_v61 }
0x179d   : > { %v19704_v0 = vpop.eup %19703 }
0x179e   : > { %v19706_v1 = vpop.eup %19705  ;;  %v6972_v3 = vmul.f32 %v19704_v0, %v19688_v31 }
0x179f   : > { %v6971_v2 = vmul.f32 %v19706_v1, %v19690_v32 }
0x17a1   : > { %17616 = vmatprep.mubr.msk.f32.mxu0 %vm2138_vm7, %v6971_v2 }
0x17a2   : > { %17617 = vmatmul.mubr.msk.f32.vlgmr.msra.gmra.mrb[60].mxu0 %vm2138_vm7, %v6972_v3 }
0x17a3   : > { %18974 = vmatpush3.bf16.msra.mxu0 %v21178_v22 }
0x17a4   : > { %18980 = vmatprep.subr.bf16.mxu0 %v21182_v43 }
0x17a5   : > { %v19708_v4 = vpop.eup %19707 }
0x17a6   : > { %v19710_v23 = vpop.eup %19709  ;;  %v6976_v5 = vmul.f32 %v19708_v4, %v19692_v33 }
0x17a7   : > { %v6975_v54 = vmul.f32 %v19710_v23, %v19694_v36 }
0x17a9   : > { %17630 = vmatprep.mubr.msk.f32.mxu1 %vm2138_vm7, %v6975_v54 }
0x17aa   : > { %17631 = vmatmul.mubr.msk.f32.vlgmr.msra.gmra.mrb[78].mxu1 %vm2138_vm7, %v6976_v5 }
0x17ab   : > { %17641 = vmatpush3.msra.mxu1 %v15579_v18  ;;  %v15609_v18 = vld [vmem:[%s22661_s15 + $0x120] sm:$0xff] }
0x17ac   : > { %17650 = vmatprep.subr.mxu1 %v15581_v19 }
0x17b2   : > { %v6950_v9 = vpop.xlane.xlu0 %6949 }
0x17b3   : > { %19711 = vrcp.f32 %v6950_v9  ;;  %v6947_v7 = vpop.xlane.xlu1 %6946  ;;  %v15597_v9 = vld [vmem:[%s22659_s13 + $0x40] sm:$0xff] }
0x17b4   : > { %19713 = vrcp.f32 %v6947_v7  ;;  %v15598_v7 = vld [vmem:[%s22659_s13 + $0x48] sm:$0xff] }
0x17ba   : > { %v6962_v10 = vpop.xlane.xlu0 %6961 }
0x17bb   : > { %19715 = vrcp.f32 %v6962_v10  ;;  %v6959_v11 = vpop.xlane.xlu1 %6958  ;;  %v18983_v10 = vpack.c.bf16 %v15598_v7, %v15597_v9 }
0x17bc   : > { %19717 = vrcp.f32 %v6959_v11  ;;  %v15599_v11 = vld [vmem:[%s22659_s13 + $0x50] sm:$0xff] }
0x17bd   : > { %v19712_v12 = vpop.eup %19711 }
0x17be   : > { %v19714_v22 = vpop.eup %19713  ;;  %v6974_v13 = vmul.f32 %v19712_v12, %v19696_v6  ;;  %v15600_v12 = vld [vmem:[%s22659_s13 + $0x58] sm:$0xff] }
0x17bf   : > { %v6973_v37 = vmul.f32 %v19714_v22, %v19698_v51  ;;  %v18987_v22 = vpack.c.bf16 %v15600_v12, %v15599_v11 }
0x17c1   : > { %17623 = vmatprep.mubr.msk.f32.mxu0 %vm2138_vm7, %v6973_v37  ;;  %v15605_v37 = vld [vmem:[%s22661_s15 + $0x100] sm:$0xff] }
0x17c2   : > { %17624 = vmatmul.mubr.msk.f32.vlgmr.msra.gmra.mrb[62].mxu0 %vm2138_vm7, %v6974_v13  ;;  %v15606_v13 = vld [vmem:[%s22661_s15 + $0x108] sm:$0xff] }
0x17c3   : > { %18982 = vmatpush3.bf16.msra.mxu0 %v21182_v43  ;;  %v15580_v43 = vld [vmem:[%s22655_s9 + $0x48] sm:$0xff] }
0x17c4   : > { %17645 = vmatprep.subr.mxu0 %v15580_v43 }
0x17c5   : > { %v19716_v14 = vpop.eup %19715 }
0x17c6   : > { %v19718_v15 = vpop.eup %19717  ;;  %v6978_v17 = vmul.f32 %v19716_v14, %v19700_v56  ;;  %v15607_v14 = vld [vmem:[%s22661_s15 + $0x110] sm:$0xff] }
0x17c7   : > { %v6977_v16 = vmul.f32 %v19718_v15, %v19702_v57  ;;  %v15592_v57 = vld [vmem:[%s22656_s10 + $0x2] ss:$0 sm:$0xff]  ;;  %v18991_v15 = vpack.c.bf16 %v15606_v13, %v15605_v37 }
0x17c9   : > { %17637 = vmatprep.mubr.msk.f32.mxu0 %vm2138_vm7, %v6977_v16  ;;  %v15608_v16 = vld [vmem:[%s22661_s15 + $0x118] sm:$0xff] }
0x17ca   : > { %17638 = vmatmul.mubr.msk.f32.vlgmr.msra.gmra.mrb[64].mxu0 %vm2138_vm7, %v6978_v17  ;;  %v18995_v17 = vpack.c.bf16 %v15608_v16, %v15607_v14  ;;  %v15628_v16 = vld [vmem:[%s22702_s6 + $0x188] sm:$0xff] }
0x17cb   : > { %17646 = vmatpush3.msra.mxu0 %v15580_v43 }
0x17cc   : > { %17655 = vmatprep.subr.mxu0 %v15582_v20 }
0x1875   : > { %v17618_v21 = vpop.f32.mrb[60].mxu0 }
0x1876   : > { %v7051_v25 = vpop.f32.mrb[61].mxu0 }
0x1877   : > { %17642 = vmatprep.mubr.msk.f32.mxu1 %vm1773_vm5, %v7051_v25 }
0x1878   : > { %17643 = vmatmul.mubr.msk.f32.vlgmr.msra.gmra.mrb[80].mxu1 %vm1773_vm5, %v17618_v21  ;;  %v15612_v21 = vld [vmem:[%s22661_s15 + $0x138] sm:$0xff] }
0x1879   : > { %17651 = vmatpush3.msra.mxu1 %v15581_v19  ;;  %v15610_v19 = vld [vmem:[%s22661_s15 + $0x128] sm:$0xff] }
0x187a   : > { %18984 = vmatprep.subr.bf16.mxu1 %v18983_v10  ;;  %v18999_v43 = vpack.c.bf16 %v15610_v19, %v15609_v18  ;;  %v15652_v19 = vld [vmem:[%s22653_s7 + $0x188] sm:$0xff] }
0x187d   : > { %v17632_v26 = vpop.f32.mrb[78].mxu1 }
0x187e   : > { %v7213_v29 = vpop.f32.mrb[79].mxu1 }
0x187f   : > { %17652 = vmatprep.mubr.msk.f32.mxu1 %vm1773_vm5, %v7213_v29  ;;  %v15614_v29 = vld [vmem:[%s22661_s15 + $0x148] sm:$0xff] }
0x1880   : > { %17653 = vmatmul.mubr.msk.f32.vlgmr.msra.gmra.mrb[82].mxu1 %vm1773_vm5, %v17632_v26  ;;  %v15613_v26 = vld [vmem:[%s22661_s15 + $0x140] sm:$0xff] }
0x1881   : > { %18986 = vmatpush3.bf16.msra.mxu1 %v18983_v10 }
0x1882   : > { %18988 = vmatprep.subr.bf16.mxu1 %v18987_v22 }
0x1885   : > { %18990 = vmatpush3.bf16.msra.mxu1 %v18987_v22 }
0x1895   : > { %v17625_v30 = vpop.f32.mrb[62].mxu0 }
0x1896   : > { %v7132_v31 = vpop.f32.mrb[63].mxu0 }
0x1897   : > { %17647 = vmatprep.mubr.msk.f32.mxu0 %vm1773_vm5, %v7132_v31  ;;  %v15615_v31 = vld [vmem:[%s22661_s15 + $0x150] sm:$0xff] }
0x1898   : > { %17648 = vmatmul.mubr.msk.f32.vlgmr.msra.gmra.mrb[66].mxu0 %vm1773_vm5, %v17625_v30  ;;  %v19007_v30 = vpack.c.bf16 %v15614_v29, %v15613_v26  ;;  %v15654_v29 = vld [vmem:[%s22653_s7 + $0x198] sm:$0xff] }
0x1899   : > { %17656 = vmatpush3.msra.mxu0 %v15582_v20  ;;  %v15611_v20 = vld [vmem:[%s22661_s15 + $0x130] sm:$0xff] }
0x189a   : > { %18992 = vmatprep.subr.bf16.mxu0 %v18991_v15  ;;  %v19003_v25 = vpack.c.bf16 %v15612_v21, %v15611_v20  ;;  %v15629_v20 = vld [vmem:[%s22702_s6 + $0x190] sm:$0xff]  ;;  %v15630_v21 = vld [vmem:[%s22702_s6 + $0x198] sm:$0xff] }
0x189b   : > { %v19027_v26 = vpack.c.bf16 %v15630_v21, %v15629_v20  ;;  %v15657_v20 = vld [vmem:[%s22653_s7 + $0x1b0] sm:$0xff]  ;;  %v15658_v21 = vld [vmem:[%s22653_s7 + $0x1b8] sm:$0xff] }
0x189d   : > { %v17639_v32 = vpop.f32.mrb[64].mxu0 }
0x189e   : > { %v7294_v62 = vpop.f32.mrb[65].mxu0 }
0x189f   : > { %17657 = vmatprep.mubr.msk.f32.mxu0 %vm1773_vm5, %v7294_v62 }
0x18a0   : > { %17658 = vmatmul.mubr.msk.f32.vlgmr.msra.gmra.mrb[68].mxu0 %vm1773_vm5, %v17639_v32  ;;  %v15616_v32 = vld [vmem:[%s22661_s15 + $0x158] sm:$0xff] }
0x18a1   : > { %18994 = vmatpush3.bf16.msra.mxu0 %v18991_v15  ;;  %v19011_v62 = vpack.c.bf16 %v15616_v32, %v15615_v31  ;;  %v15627_v15 = vld [vmem:[%s22702_s6 + $0x180] sm:$0xff]  ;;  %v15632_v32 = vld [vmem:[%s22702_s6 + $0x1a8] sm:$0xff] }
0x18a2   : > { %18996 = vmatprep.subr.bf16.mxu0 %v18995_v17  ;;  %v19023_v18 = vpack.c.bf16 %v15628_v16, %v15627_v15  ;;  %v15631_v31 = vld [vmem:[%s22702_s6 + $0x1a0] sm:$0xff]  ;;  %v15686_v15 = vld [vmem:[%s22654_s8 + $0x1d8] sm:$0xff] }
0x18a4   : > { %19024 = vmatprep.subr.bf16.mxu1 %v19023_v18 }
0x18a5   : > { %18998 = vmatpush3.bf16.msra.mxu0 %v18995_v17  ;;  %v15651_v17 = vld [vmem:[%s22653_s7 + $0x180] sm:$0xff] }
0x18a6   : > { %19000 = vmatprep.subr.bf16.mxu0 %v18999_v43 }
0x18a9   : > { %19002 = vmatpush3.bf16.msra.mxu0 %v18999_v43  ;;  %v19055_v43 = vpack.c.bf16 %v15652_v19, %v15651_v17  ;;  %v15655_v17 = vld [vmem:[%s22653_s7 + $0x1a0] sm:$0xff] }
0x18aa   : > { %19004 = vmatprep.subr.bf16.mxu0 %v19003_v25 }
0x18ad   : > { %19006 = vmatpush3.bf16.msra.mxu0 %v19003_v25  ;;  %v15653_v25 = vld [vmem:[%s22653_s7 + $0x190] sm:$0xff] }
0x18ae   : > { %19008 = vmatprep.subr.bf16.mxu0 %v19007_v30 }
0x18b1   : > { %19010 = vmatpush3.bf16.msra.mxu0 %v19007_v30  ;;  %v19059_v30 = vpack.c.bf16 %v15654_v29, %v15653_v25  ;;  %v19067_v25 = vpack.c.bf16 %v15658_v21, %v15657_v20  ;;  %v15664_v29 = vld [vmem:[%s22653_s7 + $0x1e8] sm:$0xff] }
0x18b2   : > { %19012 = vmatprep.subr.bf16.mxu0 %v19011_v62 }
0x18b5   : > { %19014 = vmatpush3.bf16.msra.mxu0 %v19011_v62  ;;  %v15659_v62 = vld [vmem:[%s22653_s7 + $0x1c0] sm:$0xff] }
0x194b   : > { %v17644_v63 = vpop.f32.mrb[80].mxu1 }
0x194c   : > { %v7380_v33 = vpop.f32.mrb[81].mxu1  ;;  %v7639_v40 = vsel %vm775_vm4, %v17644_v63, 0.0  ;;  %v15617_v63 = vld [vmem:[%s22661_s15 + $0x160] sm:$0xff] }
0x194d   : > { %v7632_v24 = vsel %vm775_vm4, %v7380_v33, 0.0  ;;  %v15618_v33 = vld [vmem:[%s22661_s15 + $0x168] sm:$0xff] }
0x1953   : > { %v17654_v36 = vpop.f32.mrb[82].mxu1 }
0x1954   : > { %v7542_v38 = vpop.f32.mrb[83].mxu1  ;;  %v7642_v45 = vsel %vm775_vm4, %v17654_v36, 0.0  ;;  %v19015_v36 = vpack.c.bf16 %v15618_v33, %v15617_v63  ;;  %v19031_v63 = vpack.c.bf16 %v15632_v32, %v15631_v31  ;;  %v15660_v33 = vld [vmem:[%s22653_s7 + $0x1c8] sm:$0xff]  ;;  %v15665_v31 = vld [vmem:[%s22653_s7 + $0x1f0] sm:$0xff]  ;;  %v15666_v32 = vld [vmem:[%s22653_s7 + $0x1f8] sm:$0xff] }
0x1955   : > { %v7635_v47 = vsel %vm775_vm4, %v7542_v38, 0.0 }
0x1956   : > { %19016 = vmatprep.subr.bf16.mxu0 %v19015_v36 }
0x1957   : > { %19018 = vmatpush3.bf16.msra.mxu0 %v19015_v36  ;;  %v19071_v36 = vpack.c.bf16 %v15660_v33, %v15659_v62  ;;  %v19083_v62 = vpack.c.bf16 %v15666_v32, %v15665_v31  ;;  %v15680_v33 = vld [vmem:[%s22654_s8 + $0x1a8] sm:$0xff] }
0x196b   : > { %v17649_v39 = vpop.f32.mrb[66].mxu0 }
0x196c   : > { %v7640_v41 = vsel %vm775_vm4, %v17649_v39, 0.0  ;;  %v7461_v42 = vpop.f32.mrb[67].mxu0 }
0x196d   : > { %v7641_v53 = vadd.f32 %v7640_v41, %v7639_v40  ;;  %v7633_v44 = vsel %vm775_vm4, %v7461_v42, 0.0 }
0x196e   : > { %v7634_v46 = vadd.f32 %v7633_v44, %v7632_v24  ;;  %v15595_v44 = vld [vmem:[%s22657_s11 + $0x2] ss:$0 sm:$0xff] }
0x196f   : > { %v7643_v48 = vadd.f32 %v7642_v45, %v7641_v53 }
0x1970   : > { %v7636_v49 = vadd.f32 %v7635_v47, %v7634_v46 }
0x1973   : > { %v17659_v50 = vpop.f32.mrb[68].mxu0 }
0x1974   : > { %v7644_v6 = vsel %vm775_vm4, %v17659_v50, 0.0  ;;  %v7623_v51 = vpop.f32.mrb[69].mxu0 }
0x1975   : > { %v7645_v52 = vadd.f32 %v7644_v6, %v7643_v48  ;;  %v7637_v55 = vsel %vm775_vm4, %v7623_v51, 0.0  ;;  %v15596_v48 = vld [vmem:[%s22658_s12 + $0x2] ss:$0 sm:$0xff] }
0x1976   : > { %v7638_v56 = vadd.f32 %v7637_v55, %v7636_v49  ;;  %v15620_v55 = vld [vmem:[%s22661_s15 + $0x178] sm:$0xff] }
0x1977   : > { %v7647_v58 = vadd.f32 %v7645_v52, %v20941_v34  ;;  %v15619_v52 = vld [vmem:[%s22661_s15 + $0x170] sm:$0xff] }
0x1978   : > { %v7646_v59 = vadd.f32 %v7638_v56, %v20943_v35  ;;  %v19019_v56 = vpack.c.bf16 %v15620_v55, %v15619_v52  ;;  %v15661_v52 = vld [vmem:[%s22653_s7 + $0x1d0] sm:$0xff]  ;;  %v15662_v55 = vld [vmem:[%s22653_s7 + $0x1d8] sm:$0xff] }
0x1979   : > { %v21250_v60 = vadd.f32 %v15592_v57, %v7647_v58 }
0x197a   : > { %v21252_v28 = vadd.f32 %v15592_v57, %v7646_v59  ;;  %19020 = vmatprep.subr.bf16.mxu0 %v19019_v56  ;;  %v15602_v57 = vld [vmem:[%s22660_s14 + $0x2] ss:$0 sm:$0xff] }
0x197b   : > { %v7665_v27 = vsel %vm775_vm4, %v21250_v60, 0.0  ;;  %19022 = vmatpush3.bf16.msra.mxu0 %v19019_v56 }
0x197c   : > { %7666 = vadd.xlane.f32.xlu0 %v7665_v27  ;;  %v7662_v61 = vsel %vm775_vm4, %v21252_v28, 0.0  ;;  %19056 = vmatprep.subr.bf16.mxu0 %v19055_v43 }
0x197d   : > { %7663 = vadd.xlane.f32.xlu1 %v7662_v61 }
0x1a09   : > { %v7667_v0 = vpop.xlane.xlu0 %7666 }
0x1a0a   : > { %v7669_v1 = vmul.f32 0.03125, %v7667_v0  ;;  %v7664_v2 = vpop.xlane.xlu1 %7663 }
0x1a0b   : > { %v7668_v3 = vmul.f32 0.03125, %v7664_v2 }
0x1a0c   : > { %v21259_v34 = vsub.f32 %v21250_v60, %v7669_v1 }
0x1a0d   : > { %v21262_v35 = vsub.f32 %v21252_v28, %v7668_v3  ;;  %v15622_v3 = vld [vmem:[%s22662_s16 + $0x2] ss:$0 sm:$0xff] }
0x1a0e   : > { %v7673_v4 = vmul.f32 %v21259_v34, %v21259_v34 }
0x1a0f   : > { %v7672_v23 = vmul.f32 %v21262_v35, %v21262_v35 }
0x1a10   : > { %v7677_v54 = vsel %vm775_vm4, %v7673_v4, 0.0 }
0x1a11   : > { %7678 = vadd.xlane.f32.xlu0 %v7677_v54  ;;  %v7674_v5 = vsel %vm775_vm4, %v7672_v23, 0.0 }
0x1a12   : > { %7675 = vadd.xlane.f32.xlu1 %v7674_v5 }
0x1a9e   : > { %v7679_v38 = vpop.xlane.xlu0 %7678 }
0x1a9f   : > { %v7681_v39 = vmul.f32 0.03125, %v7679_v38  ;;  %v7676_v40 = vpop.xlane.xlu1 %7675 }
0x1aa0   : > { %v7680_v41 = vmul.f32 0.03125, %v7676_v40 }
0x1aa1   : > { %v7683_v42 = vadd.f32 1e-05, %v7681_v39 }
0x1aa2   : > { %v7682_v24 = vadd.f32 1e-05, %v7680_v41 }
0x1aa3   : > { %19719 = vrsqrt.f32 %v7683_v42 }
0x1aa4   : > { %19721 = vrsqrt.f32 %v7682_v24 }
0x1aad   : > { %v19720_v53 = vpop.eup %19719 }
0x1aae   : > { %v19722_v45 = vpop.eup %19721  ;;  %v7687_v46 = vmul.f32 %v19720_v53, %v21259_v34 }
0x1aaf   : > { %v7686_v47 = vmul.f32 %v19722_v45, %v21262_v35 }
0x1ab0   : > { %v7695_v49 = vmul.f32 %v15595_v44, %v7687_v46 }
0x1ab1   : > { %v7694_v50 = vmul.f32 %v15595_v44, %v7686_v47  ;;  %v15625_v44 = vld [vmem:[%s22703_s1 + $0x3] ss:$0 sm:$0xff] }
0x1ab2   : > { %v7703_v51 = vadd.f32 %v15596_v48, %v7695_v49 }
0x1ab3   : > { %v7702_v6 = vadd.f32 %v15596_v48, %v7694_v50  ;;  %v15626_v48 = vld [vmem:[%s22704_s21 + $0x3] ss:$0 sm:$0xff] }
0x1ab5   : > { %17668 = vmatprep.mubr.msk.f32.mxu1 %vm775_vm4, %v7702_v6  ;;  %v15633_v6 = vld [vmem:[%s22702_s6 + $0x1b0] sm:$0xff] }
0x1ab6   : > { %17669 = vmatmul.mubr.msk.f32.vlgmr.msra.gmra.mrb[84].mxu1 %vm775_vm4, %v7703_v51  ;;  %v15634_v51 = vld [vmem:[%s22702_s6 + $0x1b8] sm:$0xff] }
0x1ab7   : > { %19026 = vmatpush3.bf16.msra.mxu1 %v19023_v18  ;;  %v15656_v18 = vld [vmem:[%s22653_s7 + $0x1a8] sm:$0xff] }
0x1ab8   : > { %19028 = vmatprep.subr.bf16.mxu1 %v19027_v26 }
0x1abb   : > { %19030 = vmatpush3.bf16.msra.mxu1 %v19027_v26  ;;  %v15663_v26 = vld [vmem:[%s22653_s7 + $0x1e0] sm:$0xff] }
0x1abc   : > { %19032 = vmatprep.subr.bf16.mxu1 %v19031_v63 }
0x1b89   : > { %v17670_v58 = vpop.f32.mrb[84].mxu1 }
0x1b8a   : > { %v7795_v59 = vadd.f32 %v17670_v58, %v15602_v57  ;;  %v7789_v27 = vpop.f32.mrb[85].mxu1  ;;  %v15635_v58 = vld [vmem:[%s22702_s6 + $0x1c0] sm:$0xff] }
0x1b8b   : > { %v7790_v61 = vadd.f32 %v15602_v57, %v7789_v27  ;;  %v19075_v27 = vpack.c.bf16 %v15662_v55, %v15661_v52 }
0x1b8c   : > { %v7799_v1 = vmax.f32 %v7795_v59, 0.0  ;;  %v19035_v59 = vpack.c.bf16 %v15634_v51, %v15633_v6 }
0x1b8d   : > { %v7798_v0 = vmax.f32 %v7790_v61, 0.0  ;;  %v15636_v61 = vld [vmem:[%s22702_s6 + $0x1c8] sm:$0xff] }
0x1b8f   : > { %17703 = vmatprep.mubr.f32.mxu0 %v7798_v0  ;;  %v15675_v0 = vld [vmem:[%s22654_s8 + $0x180] sm:$0xff] }
0x1b90   : > { %17704 = vmatmul.mubr.f32.vlgmr.msra.gmra.mrb[70].mxu0 %v7799_v1  ;;  %v15676_v1 = vld [vmem:[%s22654_s8 + $0x188] sm:$0xff] }
0x1b91   : > { %19058 = vmatpush3.bf16.msra.mxu0 %v19055_v43  ;;  %v19063_v43 = vpack.c.bf16 %v15656_v18, %v15655_v17  ;;  %v19851_v17 = vld [vmem:[%s22707_s29 + $0x8] sm:$0xff] }
0x1b92   : > { %19060 = vmatprep.subr.bf16.mxu0 %v19059_v30 }
0x1b95   : > { %19062 = vmatpush3.bf16.msra.mxu0 %v19059_v30  ;;  %v19079_v30 = vpack.c.bf16 %v15664_v29, %v15663_v26 }
0x1b96   : > { %19072 = vmatprep.subr.bf16.mxu0 %v19071_v36 }
0x1c63   : > { %v17705_v2 = vpop.f32.mrb[70].mxu0 }
0x1c64   : > { %v7893_v34 = vadd.f32 %v17705_v2, %v21250_v60  ;;  %v7883_v35 = vpop.f32.mrb[71].mxu0  ;;  %v19039_v2 = vpack.c.bf16 %v15636_v61, %v15635_v58 }
0x1c65   : > { %v7892_v4 = vadd.f32 %v7883_v35, %v21252_v28  ;;  %v15638_v35 = vld [vmem:[%s22702_s6 + $0x1d8] sm:$0xff] }
0x1c66   : > { %v21348_v23 = vadd.f32 %v15622_v3, %v7893_v34  ;;  %v15637_v34 = vld [vmem:[%s22702_s6 + $0x1d0] sm:$0xff] }
0x1c67   : > { %v21350_v54 = vadd.f32 %v15622_v3, %v7892_v4  ;;  %v19087_v3 = vpack.c.bf16 %v15676_v1, %v15675_v0  ;;  %v15677_v4 = vld [vmem:[%s22654_s8 + $0x190] sm:$0xff] }
0x1c68   : > { %v7911_v5 = vsel %vm775_vm4, %v21348_v23, 0.0 }
0x1c69   : > { %7912 = vadd.xlane.f32.xlu0 %v7911_v5  ;;  %v7908_v9 = vsel %vm775_vm4, %v21350_v54, 0.0  ;;  %v15678_v5 = vld [vmem:[%s22654_s8 + $0x198] sm:$0xff] }
0x1c6a   : > { %7909 = vadd.xlane.f32.xlu1 %v7908_v9  ;;  %v19043_v9 = vpack.c.bf16 %v15638_v35, %v15637_v34 }
0x1cf6   : > { %v7913_v7 = vpop.xlane.xlu0 %7912 }
0x1cf7   : > { %v7915_v10 = vmul.f32 0.03125, %v7913_v7  ;;  %v7910_v11 = vpop.xlane.xlu1 %7909  ;;  %v19091_v7 = vpack.c.bf16 %v15678_v5, %v15677_v4 }
0x1cf8   : > { %v7914_v12 = vmul.f32 0.03125, %v7910_v11  ;;  %v15640_v11 = vld [vmem:[%s22702_s6 + $0x1e8] sm:$0xff] }
0x1cf9   : > { %v7917_v60 = vsub.f32 %v21348_v23, %v7915_v10  ;;  %v15639_v10 = vld [vmem:[%s22702_s6 + $0x1e0] sm:$0xff] }
0x1cfa   : > { %v7916_v28 = vsub.f32 %v21350_v54, %v7914_v12  ;;  %v15683_v12 = vld [vmem:[%s22654_s8 + $0x1c0] sm:$0xff] }
0x1cfb   : > { %v7919_v22 = vmul.f32 %v7917_v60, %v7917_v60 }
0x1cfc   : > { %v7918_v37 = vmul.f32 %v7916_v28, %v7916_v28 }
0x1cfd   : > { %v7923_v13 = vsel %vm775_vm4, %v7919_v22, 0.0 }
0x1cfe   : > { %7924 = vadd.xlane.f32.xlu0 %v7923_v13  ;;  %v7920_v14 = vsel %vm775_vm4, %v7918_v37, 0.0  ;;  %v15641_v37 = vld [vmem:[%s22702_s6 + $0x1f0] sm:$0xff]  ;;  %v15642_v13 = vld [vmem:[%s22702_s6 + $0x1f8] sm:$0xff] }
0x1cff   : > { %7921 = vadd.xlane.f32.xlu1 %v7920_v14  ;;  %v15685_v14 = vld [vmem:[%s22654_s8 + $0x1d0] sm:$0xff]  ;;  %v19051_v16 = vpack.c.bf16 %v15642_v13, %v15641_v37 }
0x1d00   : > { %v19107_v19 = vpack.c.bf16 %v15686_v15, %v15685_v14 }
0x1d8b   : > { %v7925_v38 = vpop.xlane.xlu0 %7924 }
0x1d8c   : > { %v7927_v39 = vmul.f32 0.03125, %v7925_v38  ;;  %v7922_v40 = vpop.xlane.xlu1 %7921  ;;  %v15681_v38 = vld [vmem:[%s22654_s8 + $0x1b0] sm:$0xff] }
0x1d8d   : > { %v7926_v41 = vmul.f32 0.03125, %v7922_v40 }
0x1d8e   : > { %v7929_v42 = vadd.f32 1e-05, %v7927_v39  ;;  %v15682_v39 = vld [vmem:[%s22654_s8 + $0x1b8] sm:$0xff] }
0x1d8f   : > { %v7928_v24 = vadd.f32 1e-05, %v7926_v41  ;;  %v19099_v40 = vpack.c.bf16 %v15682_v39, %v15681_v38  ;;  %v15687_v41 = vld [vmem:[%s22654_s8 + $0x1e0] sm:$0xff] }
0x1d90   : > { %19723 = vrsqrt.f32 %v7929_v42  ;;  %v15688_v42 = vld [vmem:[%s22654_s8 + $0x1e8] sm:$0xff] }
0x1d91   : > { %19725 = vrsqrt.f32 %v7928_v24  ;;  %v19111_v24 = vpack.c.bf16 %v15688_v42, %v15687_v41 }
0x1d9a   : > { %v19724_v53 = vpop.eup %19723 }
0x1d9b   : > { %v19726_v45 = vpop.eup %19725  ;;  %v7933_v46 = vmul.f32 %v19724_v53, %v7917_v60  ;;  %v15684_v60 = vld [vmem:[%s22654_s8 + $0x1c8] sm:$0xff]  ;;  %v15689_v53 = vld [vmem:[%s22654_s8 + $0x1f0] sm:$0xff] }
0x1d9c   : > { %v7932_v47 = vmul.f32 %v19726_v45, %v7916_v28  ;;  %v19047_v28 = vpack.c.bf16 %v15640_v11, %v15639_v10  ;;  %v19103_v22 = vpack.c.bf16 %v15684_v60, %v15683_v12 }
0x1d9d   : > { %v7941_v49 = vmul.f32 %v15625_v44, %v7933_v46 }
0x1d9e   : > { %v7940_v50 = vmul.f32 %v15625_v44, %v7932_v47  ;;  %v15690_v44 = vld [vmem:[%s22654_s8 + $0x1f8] sm:$0xff] }
0x1d9f   : > { %v21416_v57 = vadd.f32 %v15626_v48, %v7941_v49  ;;  %v19115_v45 = vpack.c.bf16 %v15690_v44, %v15689_v53 }
0x1da0   : > { %v21414_v56 = vadd.f32 %v15626_v48, %v7940_v50 }
0x1da2   : > { %17714 = vmatprep.mubr.msk.f32.mxu1 %vm775_vm4, %v21414_v56  ;;  %17758 = vmatprep.mubr.msk.f32.mxu0 %vm775_vm4, %v21414_v56 }
0x1da3   : > { %17715 = vmatmul.mubr.msk.f32.vlgmr.msra.gmra.mrb[86].mxu1 %vm775_vm4, %v21416_v57  ;;  %17759 = vmatmul.mubr.msk.f32.vlgmr.msra.gmra.mrb[72].mxu0 %vm775_vm4, %v21416_v57 }
0x1da4   : > { %19034 = vmatpush3.bf16.msra.mxu1 %v19031_v63  ;;  %19074 = vmatpush3.bf16.msra.mxu0 %v19071_v36  ;;  %v15679_v63 = vld [vmem:[%s22654_s8 + $0x1a0] sm:$0xff] }
0x1da5   : > { %17725 = vmatprep.mubr.msk.f32.mxu1 %vm775_vm4, %v21414_v56  ;;  %17780 = vmatprep.mubr.msk.f32.mxu0 %vm775_vm4, %v21414_v56  ;;  %v19095_v36 = vpack.c.bf16 %v15680_v33, %v15679_v63 }
0x1da6   : > { %19036 = vmatprep.subr.bf16.mxu1 %v19035_v59  ;;  %19076 = vmatprep.subr.bf16.mxu0 %v19075_v27 }
0x1da8   : > { %19038 = vmatpush3.bf16.msra.mxu1 %v19035_v59  ;;  %19078 = vmatpush3.bf16.msra.mxu0 %v19075_v27 }
0x1da9   : > { %19040 = vmatprep.subr.bf16.mxu1 %v19039_v2  ;;  %19088 = vmatprep.subr.bf16.mxu0 %v19087_v3 }
0x1dab   : > { %17726 = vmatmul.mubr.msk.f32.vlgmr.msra.gmra.mrb[88].mxu1 %vm775_vm4, %v21416_v57  ;;  %17781 = vmatmul.mubr.msk.f32.vlgmr.msra.gmra.mrb[74].mxu0 %vm775_vm4, %v21416_v57 }
0x1dac   : > { %19042 = vmatpush3.bf16.msra.mxu1 %v19039_v2  ;;  %17736 = vmatprep.mubr.msk.f32.mxu1 %vm775_vm4, %v21414_v56 }
0x1dad   : > { %19090 = vmatpush3.bf16.msra.mxu0 %v19087_v3  ;;  %17802 = vmatprep.mubr.msk.f32.mxu0 %vm775_vm4, %v21414_v56 }
0x1dae   : > { %19044 = vmatprep.subr.bf16.mxu1 %v19043_v9  ;;  %19092 = vmatprep.subr.bf16.mxu0 %v19091_v7 }
0x1db0   : > { %19046 = vmatpush3.bf16.msra.mxu1 %v19043_v9 }
0x1db1   : > { %19094 = vmatpush3.bf16.msra.mxu0 %v19091_v7  ;;  %19048 = vmatprep.subr.bf16.mxu1 %v19047_v28 }
0x1db2   : > { %19104 = vmatprep.subr.bf16.mxu0 %v19103_v22 }
0x1db3   : > { %17737 = vmatmul.mubr.msk.f32.vlgmr.msra.gmra.mrb[90].mxu1 %vm775_vm4, %v21416_v57 }
0x1db4   : > { %17803 = vmatmul.mubr.msk.f32.vlgmr.msra.gmra.mrb[76].mxu0 %vm775_vm4, %v21416_v57  ;;  %19050 = vmatpush3.bf16.msra.mxu1 %v19047_v28 }
0x1db5   : > { %17747 = vmatprep.mubr.msk.f32.mxu1 %vm775_vm4, %v21414_v56  ;;  %19106 = vmatpush3.bf16.msra.mxu0 %v19103_v22 }
0x1db6   : > { %17824 = vmatprep.mubr.msk.f32.mxu0 %vm775_vm4, %v21414_v56  ;;  %19052 = vmatprep.subr.bf16.mxu1 %v19051_v16 }
0x1db7   : > { %19108 = vmatprep.subr.bf16.mxu0 %v19107_v19 }
0x1db8   : > { %19054 = vmatpush3.bf16.msra.mxu1 %v19051_v16 }
0x1db9   : > { %19110 = vmatpush3.bf16.msra.mxu0 %v19107_v19  ;;  %19064 = vmatprep.subr.bf16.mxu1 %v19063_v43  ;;  %v19852_v19 = vld [vmem:[%s22707_s29] sm:$0xff] }
0x1dbb   : > { %17748 = vmatmul.mubr.msk.f32.vlgmr.msra.gmra.mrb[92].mxu1 %vm775_vm4, %v21416_v57 }
0x1dbc   : > { %17825 = vmatmul.mubr.msk.f32.vlgmr.msra.gmra.mrb[78].mxu0 %vm775_vm4, %v21416_v57  ;;  %19066 = vmatpush3.bf16.msra.mxu1 %v19063_v43 }
0x1dbd   : > { %17769 = vmatprep.mubr.msk.f32.mxu1 %vm775_vm4, %v21414_v56  ;;  %19068 = vmatprep.subr.bf16.mxu1 %v19067_v25 }
0x1dc0   : > { %19070 = vmatpush3.bf16.msra.mxu1 %v19067_v25 }
0x1dc1   : > { %19080 = vmatprep.subr.bf16.mxu1 %v19079_v30 }
0x1dc3   : > { %17770 = vmatmul.mubr.msk.f32.vlgmr.msra.gmra.mrb[94].mxu1 %vm775_vm4, %v21416_v57 }
0x1dc4   : > { %19082 = vmatpush3.bf16.msra.mxu1 %v19079_v30  ;;  %17791 = vmatprep.mubr.msk.f32.mxu1 %vm775_vm4, %v21414_v56 }
0x1dc5   : > { %19084 = vmatprep.subr.bf16.mxu1 %v19083_v62 }
0x1dc8   : > { %19086 = vmatpush3.bf16.msra.mxu1 %v19083_v62 }
0x1dc9   : > { %19096 = vmatprep.subr.bf16.mxu1 %v19095_v36 }
0x1dcb   : > { %17792 = vmatmul.mubr.msk.f32.vlgmr.msra.gmra.mrb[96].mxu1 %vm775_vm4, %v21416_v57 }
0x1dcc   : > { %19098 = vmatpush3.bf16.msra.mxu1 %v19095_v36  ;;  %17813 = vmatprep.mubr.msk.f32.mxu1 %vm775_vm4, %v21414_v56 }
0x1dcd   : > { %19100 = vmatprep.subr.bf16.mxu1 %v19099_v40 }
0x1dd0   : > { %19102 = vmatpush3.bf16.msra.mxu1 %v19099_v40 }
0x1dd1   : > { %19112 = vmatprep.subr.bf16.mxu1 %v19111_v24 }
0x1dd3   : > { %17814 = vmatmul.mubr.msk.f32.vlgmr.msra.gmra.mrb[98].mxu1 %vm775_vm4, %v21416_v57 }
0x1dd4   : > { %19114 = vmatpush3.bf16.msra.mxu1 %v19111_v24  ;;  %17835 = vmatprep.mubr.msk.f32.mxu1 %vm775_vm4, %v21414_v56 }
0x1dd5   : > { %19116 = vmatprep.subr.bf16.mxu1 %v19115_v45 }
0x1dd8   : > { %19118 = vmatpush3.bf16.msra.mxu1 %v19115_v45 }
0x1ddb   : > { %17836 = vmatmul.mubr.msk.f32.vlgmr.msra.gmra.mrb[100].mxu1 %vm775_vm4, %v21416_v57 }
0x1e76   : > { %v17716_v46 = vpop.f32.mrb[86].mxu1  ;;  %v17760_v47 = vpop.f32.mrb[72].mxu0 }
0x1e77   : > { %v8039_v48 = vpop.f32.mrb[87].mxu1  ;;  %v8356_v49 = vpop.f32.mrb[73].mxu0 }
0x1e78   : > { %v19119_v50 = vpack.c.bf16 %v17760_v47, %v8356_v49  ;;  %17842 = vmatprep.mubr.msk.f32.mxu0 %vm1773_vm5, %v8039_v48 }
0x1e7a   : > { %19121 = vmatprep.subr.msk.bf16.mxu0 %vm20337_vm6, %v19119_v50 }
0x1e7b   : > { %19124 = vmatpush3.bf16.xpose.msk.msra.mxu0 %vm20337_vm6, %v19119_v50 }
0x1e7e   : > { %v17727_v6 = vpop.f32.mrb[88].mxu1  ;;  %v17782_v51 = vpop.f32.mrb[74].mxu0 }
0x1e7f   : > { %v8114_v52 = vpop.f32.mrb[89].mxu1  ;;  %v8506_v55 = vpop.f32.mrb[75].mxu0 }
0x1e80   : > { %v19131_v56 = vpack.c.bf16 %v17782_v51, %v8506_v55  ;;  %17849 = vmatprep.mubr.msk.f32.mxu1 %vm1773_vm5, %v8114_v52 }
0x1e82   : > { %19133 = vmatprep.subr.msk.bf16.mxu0 %vm20337_vm6, %v19131_v56  ;;  %17843 = vmatmul.mubr.msk.f32.vlgmr.msra.gmra.mrb[80].mxu0 %vm1773_vm5, %v17716_v46 }
0x1e83   : > { %19136 = vmatpush3.bf16.xpose.msk.msra.mxu0 %vm20337_vm6, %v19131_v56 }
0x1e86   : > { %v17738_v57 = vpop.f32.mrb[90].mxu1 }
0x1e87   : > { %v17804_v58 = vpop.f32.mrb[76].mxu0  ;;  %v8189_v59 = vpop.f32.mrb[91].mxu1 }
0x1e88   : > { %v8673_v27 = vpop.f32.mrb[77].mxu0  ;;  %17856 = vmatprep.mubr.msk.f32.mxu0 %vm1773_vm5, %v8189_v59 }
0x1e89   : > { %v19143_v61 = vpack.c.bf16 %v17804_v58, %v8673_v27 }
0x1e8a   : > { %17857 = vmatmul.mubr.msk.f32.vlgmr.msra.gmra.mrb[82].mxu0 %vm1773_vm5, %v17738_v57 }
0x1e8b   : > { %19144 = vmatprep.subr.bf16.mxu0 %v19143_v61 }
0x1e8c   : > { %19146 = vmatpush3.bf16.msra.mxu0 %v19143_v61 }
0x1e8e   : > { %v17749_v0 = vpop.f32.mrb[92].mxu1 }
0x1e8f   : > { %v17826_v1 = vpop.f32.mrb[78].mxu0  ;;  %v8264_v2 = vpop.f32.mrb[93].mxu1 }
0x1e90   : > { %v8823_v3 = vpop.f32.mrb[79].mxu0 }
0x1e91   : > { %v19151_v34 = vpack.c.bf16 %v17826_v1, %v8823_v3 }
0x1e96   : > { %v17771_v35 = vpop.f32.mrb[94].mxu1 }
0x1e97   : > { %v8431_v4 = vpop.f32.mrb[95].mxu1 }
0x1e98   : > { %v19125_v5 = vpack.c.bf16 %v17771_v35, %v8431_v4 }
0x1e9a   : > { %19127 = vmatprep.subr.msk.bf16.mxu1 %vm20337_vm6, %v19125_v5 }
0x1e9b   : > { %19130 = vmatpush3.bf16.xpose.msk.msra.mxu1 %vm20337_vm6, %v19125_v5 }
0x1e9e   : > { %v17793_v9 = vpop.f32.mrb[96].mxu1 }
0x1e9f   : > { %v8581_v7 = vpop.f32.mrb[97].mxu1 }
0x1ea0   : > { %v19137_v10 = vpack.c.bf16 %v17793_v9, %v8581_v7 }
0x1ea2   : > { %17850 = vmatmul.mubr.msk.f32.vlgmr.msra.gmra.mrb[102].mxu1 %vm1773_vm5, %v17727_v6  ;;  %19139 = vmatprep.subr.msk.bf16.mxu1 %vm20337_vm6, %v19137_v10 }
0x1ea3   : > { %19142 = vmatpush3.bf16.xpose.msk.msra.mxu1 %vm20337_vm6, %v19137_v10  ;;  %17863 = vmatprep.mubr.msk.f32.mxu1 %vm1773_vm5, %v8264_v2 }
0x1ea4   : > { %19152 = vmatprep.subr.bf16.mxu1 %v19151_v34 }
0x1ea6   : > { %v17815_v11 = vpop.f32.mrb[98].mxu1 }
0x1ea7   : > { %v8748_v12 = vpop.f32.mrb[99].mxu1 }
0x1ea8   : > { %v21585_v60 = vpack.c.bf16 %v17815_v11, %v8748_v12 }
0x1eaa   : > { %17864 = vmatmul.mubr.msk.f32.vlgmr.msra.gmra.mrb[104].mxu1 %vm1773_vm5, %v17749_v0  ;;  %19148 = vmatprep.subr.bf16.mxu0 %v21585_v60 }
0x1eab   : > { %19154 = vmatpush3.bf16.msra.mxu1 %v19151_v34 }
0x1eae   : > { %v17837_v28 = vpop.f32.mrb[100].mxu1 }
0x1eaf   : > { %v8898_v22 = vpop.f32.mrb[101].mxu1 }
0x1eb0   : > { %v21589_v37 = vpack.c.bf16 %v17837_v28, %v8898_v22 }
0x1f55   : > { %v17844_v13 = vpop.f32.mrb[80].mxu0 }
0x1f56   : > { %v9256_v14 = vmul.f32 0.17677669, %v17844_v13  ;;  %v8985_v15 = vpop.f32.mrb[81].mxu0 }
0x1f57   : > { %v9255_v16 = vmul.f32 0.17677669, %v8985_v15 }
0x1f58   : > { %v9264_v18 = vadd.f32 %v19851_v17, %v9256_v14 }
0x1f59   : > { %v9263_v43 = vadd.f32 %v19852_v19, %v9255_v16 }
0x1f5a   : > { %v9274_v20 = vsel %vm2138_vm7, %v9264_v18, -inf }
0x1f5b   : > { %9275 = vmax.xlane.f32.xlu0 %v9274_v20  ;;  %v9271_v21 = vsel %vm2138_vm7, %v9263_v43, -inf }
0x1f5c   : > { %9272 = vmax.xlane.f32.xlu1 %v9271_v21 }
0x1f5d   : > { %v17858_v25 = vpop.f32.mrb[82].mxu0 }
0x1f5e   : > { %v9260_v26 = vmul.f32 0.17677669, %v17858_v25  ;;  %v9159_v29 = vpop.f32.mrb[83].mxu0 }
0x1f5f   : > { %v9259_v30 = vmul.f32 0.17677669, %v9159_v29 }
0x1f60   : > { %v9268_v31 = vadd.f32 %v19851_v17, %v9260_v26 }
0x1f61   : > { %v9267_v32 = vadd.f32 %v19852_v19, %v9259_v30 }
0x1f62   : > { %v9286_v62 = vsel %vm2138_vm7, %v9268_v31, -inf }
0x1f63   : > { %9287 = vmax.xlane.f32.xlu0 %v9286_v62  ;;  %v9283_v63 = vsel %vm2138_vm7, %v9267_v32, -inf }
0x1f64   : > { %9284 = vmax.xlane.f32.xlu1 %v9283_v63 }
0x1f75   : > { %v17851_v33 = vpop.f32.mrb[102].mxu1 }
0x1f76   : > { %v9258_v36 = vmul.f32 0.17677669, %v17851_v33  ;;  %v9072_v38 = vpop.f32.mrb[103].mxu1 }
0x1f77   : > { %v9257_v39 = vmul.f32 0.17677669, %v9072_v38 }
0x1f78   : > { %v9266_v40 = vadd.f32 %v19851_v17, %v9258_v36 }
0x1f79   : > { %v9265_v41 = vadd.f32 %v19852_v19, %v9257_v39 }
0x1f7a   : > { %v9280_v42 = vsel %vm2138_vm7, %v9266_v40, -inf }
0x1f7b   : > { %9281 = vmax.xlane.f32.xlu0 %v9280_v42  ;;  %v9277_v24 = vsel %vm2138_vm7, %v9265_v41, -inf }
0x1f7c   : > { %9278 = vmax.xlane.f32.xlu1 %v9277_v24 }
0x1f7d   : > { %v17865_v53 = vpop.f32.mrb[104].mxu1 }
0x1f7e   : > { %v9262_v44 = vmul.f32 0.17677669, %v17865_v53  ;;  %v9246_v45 = vpop.f32.mrb[105].mxu1 }
0x1f7f   : > { %v9261_v46 = vmul.f32 0.17677669, %v9246_v45 }
0x1f80   : > { %v9270_v47 = vadd.f32 %v19851_v17, %v9262_v44 }
0x1f81   : > { %v9269_v48 = vadd.f32 %v19852_v19, %v9261_v46 }
0x1f82   : > { %v9292_v49 = vsel %vm2138_vm7, %v9270_v47, -inf }
0x1f83   : > { %9293 = vmax.xlane.f32.xlu0 %v9292_v49  ;;  %v9289_v50 = vsel %vm2138_vm7, %v9269_v48, -inf }
0x1f84   : > { %9290 = vmax.xlane.f32.xlu1 %v9289_v50 }
0x1fe8   : > { %v9276_v6 = vpop.xlane.xlu0 %9275 }
0x1fe9   : > { %v9296_v51 = vsub.f32 %v9264_v18, %v9276_v6  ;;  %v9273_v52 = vpop.xlane.xlu1 %9272 }
0x1fea   : > { %v9295_v55 = vsub.f32 %v9263_v43, %v9273_v52 }
0x1feb   : > { %v9305_v56 = vmul.f32 1.442695, %v9296_v51 }
0x1fec   : > { %v9303_v57 = vmul.f32 1.442695, %v9295_v55 }
0x1fed   : > { %19727 = vpow2.f32 %v9305_v56  ;;  %v15723_v56 = vld [vmem:[%s22655_s9 + $0x60] sm:$0xff] }
0x1fee   : > { %19729 = vpow2.f32 %v9303_v57  ;;  %17894 = vmatprep.subr.mxu1 %v15723_v56  ;;  %v15725_v57 = vld [vmem:[%s22655_s9 + $0x70] sm:$0xff] }
0x1ff0   : > { %v9288_v58 = vpop.xlane.xlu0 %9287 }
0x1ff1   : > { %v9300_v59 = vsub.f32 %v9268_v31, %v9288_v58  ;;  %v9285_v27 = vpop.xlane.xlu1 %9284  ;;  %v15726_v58 = vld [vmem:[%s22655_s9 + $0x78] sm:$0xff] }
0x1ff2   : > { %v9299_v61 = vsub.f32 %v9267_v32, %v9285_v27 }
0x1ff3   : > { %v9313_v0 = vmul.f32 1.442695, %v9300_v59 }
0x1ff4   : > { %v9311_v1 = vmul.f32 1.442695, %v9299_v61 }
0x1ff5   : > { %19731 = vpow2.f32 %v9313_v0 }
0x1ff6   : > { %19733 = vpow2.f32 %v9311_v1 }
0x1ff7   : > { %v19728_v2 = vpop.eup %19727 }
0x1ff8   : > { %v19730_v3 = vpop.eup %19729  ;;  %v9322_v34 = vsel %vm2138_vm7, %v19728_v2, 0.0 }
0x1ff9   : > { %9323 = vadd.xlane.f32.xlu0 %v9322_v34  ;;  %v9319_v35 = vsel %vm2138_vm7, %v19730_v3, 0.0 }
0x1ffa   : > { %9320 = vadd.xlane.f32.xlu1 %v9319_v35 }
0x1fff   : > { %v19732_v4 = vpop.eup %19731 }
0x2000   : > { %v19734_v5 = vpop.eup %19733  ;;  %v9334_v9 = vsel %vm2138_vm7, %v19732_v4, 0.0 }
0x2001   : > { %9335 = vadd.xlane.f32.xlu0 %v9334_v9  ;;  %v9331_v7 = vsel %vm2138_vm7, %v19734_v5, 0.0 }
0x2002   : > { %9332 = vadd.xlane.f32.xlu1 %v9331_v7 }
0x2008   : > { %v9282_v10 = vpop.xlane.xlu0 %9281 }
0x2009   : > { %v9298_v11 = vsub.f32 %v9266_v40, %v9282_v10  ;;  %v9279_v12 = vpop.xlane.xlu1 %9278 }
0x200a   : > { %v9297_v28 = vsub.f32 %v9265_v41, %v9279_v12 }
0x200b   : > { %v9309_v22 = vmul.f32 1.442695, %v9298_v11 }
0x200c   : > { %v9307_v13 = vmul.f32 1.442695, %v9297_v28 }
0x200d   : > { %19735 = vpow2.f32 %v9309_v22 }
0x200e   : > { %19737 = vpow2.f32 %v9307_v13 }
0x2010   : > { %v9294_v14 = vpop.xlane.xlu0 %9293 }
0x2011   : > { %v9302_v15 = vsub.f32 %v9270_v47, %v9294_v14  ;;  %v9291_v16 = vpop.xlane.xlu1 %9290 }
0x2012   : > { %v9301_v17 = vsub.f32 %v9269_v48, %v9291_v16 }
0x2013   : > { %v9317_v18 = vmul.f32 1.442695, %v9302_v15 }
0x2014   : > { %v9315_v19 = vmul.f32 1.442695, %v9301_v17 }
0x2015   : > { %19739 = vpow2.f32 %v9317_v18 }
0x2016   : > { %19741 = vpow2.f32 %v9315_v19 }
0x2017   : > { %v19736_v43 = vpop.eup %19735 }
0x2018   : > { %v19738_v20 = vpop.eup %19737  ;;  %v9328_v21 = vsel %vm2138_vm7, %v19736_v43, 0.0 }
0x2019   : > { %9329 = vadd.xlane.f32.xlu0 %v9328_v21  ;;  %v9325_v25 = vsel %vm2138_vm7, %v19738_v20, 0.0 }
0x201a   : > { %9326 = vadd.xlane.f32.xlu1 %v9325_v25 }
0x201f   : > { %v19740_v26 = vpop.eup %19739 }
0x2020   : > { %v19742_v29 = vpop.eup %19741  ;;  %v9340_v30 = vsel %vm2138_vm7, %v19740_v26, 0.0 }
0x2021   : > { %9341 = vadd.xlane.f32.xlu0 %v9340_v30  ;;  %v9337_v31 = vsel %vm2138_vm7, %v19742_v29, 0.0 }
0x2022   : > { %9338 = vadd.xlane.f32.xlu1 %v9337_v31 }
0x2086   : > { %v9324_v32 = vpop.xlane.xlu0 %9323 }
0x2087   : > { %19743 = vrcp.f32 %v9324_v32  ;;  %v9321_v62 = vpop.xlane.xlu1 %9320 }
0x2088   : > { %19745 = vrcp.f32 %v9321_v62 }
0x208e   : > { %v9336_v63 = vpop.xlane.xlu0 %9335 }
0x208f   : > { %19747 = vrcp.f32 %v9336_v63  ;;  %v9333_v33 = vpop.xlane.xlu1 %9332 }
0x2090   : > { %19749 = vrcp.f32 %v9333_v33 }
0x2091   : > { %v19744_v36 = vpop.eup %19743 }
0x2092   : > { %v19746_v38 = vpop.eup %19745  ;;  %v9352_v40 = vmul.f32 %v19744_v36, %v19728_v2 }
0x2093   : > { %v9351_v39 = vmul.f32 %v19746_v38, %v19730_v3 }
0x2095   : > { %17870 = vmatprep.mubr.msk.f32.mxu0 %vm2138_vm7, %v9351_v39 }
0x2096   : > { %17871 = vmatmul.mubr.msk.f32.vlgmr.msra.gmra.mrb[84].mxu0 %vm2138_vm7, %v9352_v40 }
0x2097   : > { %19150 = vmatpush3.bf16.msra.mxu0 %v21585_v60 }
0x2098   : > { %19156 = vmatprep.subr.bf16.mxu0 %v21589_v37 }
0x2099   : > { %v19748_v41 = vpop.eup %19747 }
0x209a   : > { %v19750_v42 = vpop.eup %19749  ;;  %v9356_v53 = vmul.f32 %v19748_v41, %v19732_v4 }
0x209b   : > { %v9355_v24 = vmul.f32 %v19750_v42, %v19734_v5 }
0x209d   : > { %17884 = vmatprep.mubr.msk.f32.mxu1 %vm2138_vm7, %v9355_v24 }
0x209e   : > { %17885 = vmatmul.mubr.msk.f32.vlgmr.msra.gmra.mrb[106].mxu1 %vm2138_vm7, %v9356_v53 }
0x209f   : > { %17895 = vmatpush3.msra.mxu1 %v15723_v56  ;;  %v15753_v56 = vld [vmem:[%s22661_s15 + $0x1a0] sm:$0xff] }
0x20a0   : > { %17904 = vmatprep.subr.mxu1 %v15725_v57 }
0x20a6   : > { %v9330_v44 = vpop.xlane.xlu0 %9329 }
0x20a7   : > { %19751 = vrcp.f32 %v9330_v44  ;;  %v9327_v45 = vpop.xlane.xlu1 %9326  ;;  %v15741_v44 = vld [vmem:[%s22659_s13 + $0x60] sm:$0xff] }
0x20a8   : > { %19753 = vrcp.f32 %v9327_v45  ;;  %v15742_v45 = vld [vmem:[%s22659_s13 + $0x68] sm:$0xff] }
0x20ae   : > { %v9342_v46 = vpop.xlane.xlu0 %9341 }
0x20af   : > { %19755 = vrcp.f32 %v9342_v46  ;;  %v9339_v47 = vpop.xlane.xlu1 %9338  ;;  %v19159_v46 = vpack.c.bf16 %v15742_v45, %v15741_v44 }
0x20b0   : > { %19757 = vrcp.f32 %v9339_v47  ;;  %v15743_v47 = vld [vmem:[%s22659_s13 + $0x70] sm:$0xff] }
0x20b1   : > { %v19752_v48 = vpop.eup %19751 }
0x20b2   : > { %v19754_v60 = vpop.eup %19753  ;;  %v9354_v50 = vmul.f32 %v19752_v48, %v19736_v43  ;;  %v15744_v48 = vld [vmem:[%s22659_s13 + $0x78] sm:$0xff] }
0x20b3   : > { %v9353_v49 = vmul.f32 %v19754_v60, %v19738_v20  ;;  %v19163_v60 = vpack.c.bf16 %v15744_v48, %v15743_v47 }
0x20b5   : > { %17877 = vmatprep.mubr.msk.f32.mxu0 %vm2138_vm7, %v9353_v49  ;;  %v15749_v49 = vld [vmem:[%s22661_s15 + $0x180] sm:$0xff] }
0x20b6   : > { %17878 = vmatmul.mubr.msk.f32.vlgmr.msra.gmra.mrb[86].mxu0 %vm2138_vm7, %v9354_v50  ;;  %v15750_v50 = vld [vmem:[%s22661_s15 + $0x188] sm:$0xff] }
0x20b7   : > { %19158 = vmatpush3.bf16.msra.mxu0 %v21589_v37  ;;  %v15724_v37 = vld [vmem:[%s22655_s9 + $0x68] sm:$0xff] }
0x20b8   : > { %17899 = vmatprep.subr.mxu0 %v15724_v37 }
0x20b9   : > { %v19756_v6 = vpop.eup %19755 }
0x20ba   : > { %v19758_v51 = vpop.eup %19757  ;;  %v9358_v55 = vmul.f32 %v19756_v6, %v19740_v26  ;;  %v15751_v6 = vld [vmem:[%s22661_s15 + $0x190] sm:$0xff] }
0x20bb   : > { %v9357_v52 = vmul.f32 %v19758_v51, %v19742_v29  ;;  %v15736_v29 = vld [vmem:[%s22656_s10 + $0x3] ss:$0 sm:$0xff]  ;;  %v19167_v51 = vpack.c.bf16 %v15750_v50, %v15749_v49 }
0x20bd   : > { %17891 = vmatprep.mubr.msk.f32.mxu0 %vm2138_vm7, %v9357_v52  ;;  %v15752_v52 = vld [vmem:[%s22661_s15 + $0x198] sm:$0xff] }
0x20be   : > { %17892 = vmatmul.mubr.msk.f32.vlgmr.msra.gmra.mrb[88].mxu0 %vm2138_vm7, %v9358_v55  ;;  %v19171_v55 = vpack.c.bf16 %v15752_v52, %v15751_v6  ;;  %v15772_v52 = vld [vmem:[%s22702_s6 + $0x208] sm:$0xff] }
0x20bf   : > { %17900 = vmatpush3.msra.mxu0 %v15724_v37 }
0x20c0   : > { %17909 = vmatprep.subr.mxu0 %v15726_v58 }
0x2169   : > { %v17872_v59 = vpop.f32.mrb[84].mxu0 }
0x216a   : > { %v9431_v27 = vpop.f32.mrb[85].mxu0 }
0x216b   : > { %17896 = vmatprep.mubr.msk.f32.mxu1 %vm1773_vm5, %v9431_v27 }
0x216c   : > { %17897 = vmatmul.mubr.msk.f32.vlgmr.msra.gmra.mrb[108].mxu1 %vm1773_vm5, %v17872_v59  ;;  %v15756_v59 = vld [vmem:[%s22661_s15 + $0x1b8] sm:$0xff] }
0x216d   : > { %17905 = vmatpush3.msra.mxu1 %v15725_v57  ;;  %v15754_v57 = vld [vmem:[%s22661_s15 + $0x1a8] sm:$0xff] }
0x216e   : > { %19160 = vmatprep.subr.bf16.mxu1 %v19159_v46  ;;  %v19175_v37 = vpack.c.bf16 %v15754_v57, %v15753_v56  ;;  %v15796_v57 = vld [vmem:[%s22653_s7 + $0x208] sm:$0xff] }
0x2171   : > { %v17886_v61 = vpop.f32.mrb[106].mxu1 }
0x2172   : > { %v9593_v0 = vpop.f32.mrb[107].mxu1 }
0x2173   : > { %17906 = vmatprep.mubr.msk.f32.mxu1 %vm1773_vm5, %v9593_v0  ;;  %v15758_v0 = vld [vmem:[%s22661_s15 + $0x1c8] sm:$0xff] }
0x2174   : > { %17907 = vmatmul.mubr.msk.f32.vlgmr.msra.gmra.mrb[110].mxu1 %vm1773_vm5, %v17886_v61  ;;  %v15757_v61 = vld [vmem:[%s22661_s15 + $0x1c0] sm:$0xff] }
0x2175   : > { %19162 = vmatpush3.bf16.msra.mxu1 %v19159_v46 }
0x2176   : > { %19164 = vmatprep.subr.bf16.mxu1 %v19163_v60 }
0x2179   : > { %19166 = vmatpush3.bf16.msra.mxu1 %v19163_v60 }
0x2189   : > { %v17879_v1 = vpop.f32.mrb[86].mxu0 }
0x218a   : > { %v9512_v2 = vpop.f32.mrb[87].mxu0 }
0x218b   : > { %17901 = vmatprep.mubr.msk.f32.mxu0 %vm1773_vm5, %v9512_v2  ;;  %v15759_v2 = vld [vmem:[%s22661_s15 + $0x1d0] sm:$0xff] }
0x218c   : > { %17902 = vmatmul.mubr.msk.f32.vlgmr.msra.gmra.mrb[90].mxu0 %vm1773_vm5, %v17879_v1  ;;  %v19183_v1 = vpack.c.bf16 %v15758_v0, %v15757_v61  ;;  %v15798_v0 = vld [vmem:[%s22653_s7 + $0x218] sm:$0xff] }
0x218d   : > { %17910 = vmatpush3.msra.mxu0 %v15726_v58  ;;  %v15755_v58 = vld [vmem:[%s22661_s15 + $0x1b0] sm:$0xff] }
0x218e   : > { %19168 = vmatprep.subr.bf16.mxu0 %v19167_v51  ;;  %v19179_v27 = vpack.c.bf16 %v15756_v59, %v15755_v58  ;;  %v15773_v58 = vld [vmem:[%s22702_s6 + $0x210] sm:$0xff]  ;;  %v15774_v59 = vld [vmem:[%s22702_s6 + $0x218] sm:$0xff] }
0x218f   : > { %v19203_v61 = vpack.c.bf16 %v15774_v59, %v15773_v58  ;;  %v15801_v58 = vld [vmem:[%s22653_s7 + $0x230] sm:$0xff]  ;;  %v15802_v59 = vld [vmem:[%s22653_s7 + $0x238] sm:$0xff] }
0x2191   : > { %v17893_v3 = vpop.f32.mrb[88].mxu0 }
0x2192   : > { %v9674_v34 = vpop.f32.mrb[89].mxu0 }
0x2193   : > { %17911 = vmatprep.mubr.msk.f32.mxu0 %vm1773_vm5, %v9674_v34 }
0x2194   : > { %17912 = vmatmul.mubr.msk.f32.vlgmr.msra.gmra.mrb[92].mxu0 %vm1773_vm5, %v17893_v3  ;;  %v15760_v3 = vld [vmem:[%s22661_s15 + $0x1d8] sm:$0xff] }
0x2195   : > { %19170 = vmatpush3.bf16.msra.mxu0 %v19167_v51  ;;  %v19187_v34 = vpack.c.bf16 %v15760_v3, %v15759_v2  ;;  %v15771_v51 = vld [vmem:[%s22702_s6 + $0x200] sm:$0xff]  ;;  %v15776_v3 = vld [vmem:[%s22702_s6 + $0x228] sm:$0xff] }
0x2196   : > { %19172 = vmatprep.subr.bf16.mxu0 %v19171_v55  ;;  %v19199_v56 = vpack.c.bf16 %v15772_v52, %v15771_v51  ;;  %v15775_v2 = vld [vmem:[%s22702_s6 + $0x220] sm:$0xff]  ;;  %v15830_v51 = vld [vmem:[%s22654_s8 + $0x258] sm:$0xff] }
0x2198   : > { %19200 = vmatprep.subr.bf16.mxu1 %v19199_v56 }
0x2199   : > { %19174 = vmatpush3.bf16.msra.mxu0 %v19171_v55  ;;  %v15795_v55 = vld [vmem:[%s22653_s7 + $0x200] sm:$0xff] }
0x219a   : > { %19176 = vmatprep.subr.bf16.mxu0 %v19175_v37 }
0x219d   : > { %19178 = vmatpush3.bf16.msra.mxu0 %v19175_v37  ;;  %v19231_v37 = vpack.c.bf16 %v15796_v57, %v15795_v55  ;;  %v15799_v55 = vld [vmem:[%s22653_s7 + $0x220] sm:$0xff] }
0x219e   : > { %19180 = vmatprep.subr.bf16.mxu0 %v19179_v27 }
0x21a1   : > { %19182 = vmatpush3.bf16.msra.mxu0 %v19179_v27  ;;  %v15797_v27 = vld [vmem:[%s22653_s7 + $0x210] sm:$0xff] }
0x21a2   : > { %19184 = vmatprep.subr.bf16.mxu0 %v19183_v1 }
0x21a5   : > { %19186 = vmatpush3.bf16.msra.mxu0 %v19183_v1  ;;  %v19235_v1 = vpack.c.bf16 %v15798_v0, %v15797_v27  ;;  %v19243_v27 = vpack.c.bf16 %v15802_v59, %v15801_v58  ;;  %v15808_v0 = vld [vmem:[%s22653_s7 + $0x268] sm:$0xff] }
0x21a6   : > { %19188 = vmatprep.subr.bf16.mxu0 %v19187_v34 }
0x21a9   : > { %19190 = vmatpush3.bf16.msra.mxu0 %v19187_v34  ;;  %v15803_v34 = vld [vmem:[%s22653_s7 + $0x240] sm:$0xff] }
0x223f   : > { %v17898_v35 = vpop.f32.mrb[108].mxu1 }
0x2240   : > { %v9760_v4 = vpop.f32.mrb[109].mxu1  ;;  %v10019_v10 = vsel %vm775_vm4, %v17898_v35, 0.0  ;;  %v15761_v35 = vld [vmem:[%s22661_s15 + $0x1e0] sm:$0xff] }
0x2241   : > { %v10012_v28 = vsel %vm775_vm4, %v9760_v4, 0.0  ;;  %v15762_v4 = vld [vmem:[%s22661_s15 + $0x1e8] sm:$0xff] }
0x2247   : > { %v17908_v5 = vpop.f32.mrb[110].mxu1 }
0x2248   : > { %v9922_v9 = vpop.f32.mrb[111].mxu1  ;;  %v10022_v14 = vsel %vm775_vm4, %v17908_v5, 0.0  ;;  %v19191_v5 = vpack.c.bf16 %v15762_v4, %v15761_v35  ;;  %v19207_v35 = vpack.c.bf16 %v15776_v3, %v15775_v2  ;;  %v15804_v4 = vld [vmem:[%s22653_s7 + $0x248] sm:$0xff]  ;;  %v15809_v2 = vld [vmem:[%s22653_s7 + $0x270] sm:$0xff]  ;;  %v15810_v3 = vld [vmem:[%s22653_s7 + $0x278] sm:$0xff] }
0x2249   : > { %v10015_v16 = vsel %vm775_vm4, %v9922_v9, 0.0 }
0x224a   : > { %19192 = vmatprep.subr.bf16.mxu0 %v19191_v5 }
0x224b   : > { %19194 = vmatpush3.bf16.msra.mxu0 %v19191_v5  ;;  %v19247_v5 = vpack.c.bf16 %v15804_v4, %v15803_v34  ;;  %v19259_v34 = vpack.c.bf16 %v15810_v3, %v15809_v2  ;;  %v15824_v4 = vld [vmem:[%s22654_s8 + $0x228] sm:$0xff] }
0x225f   : > { %v17903_v7 = vpop.f32.mrb[90].mxu0 }
0x2260   : > { %v10020_v11 = vsel %vm775_vm4, %v17903_v7, 0.0  ;;  %v9841_v12 = vpop.f32.mrb[91].mxu0 }
0x2261   : > { %v10021_v22 = vadd.f32 %v10020_v11, %v10019_v10  ;;  %v10013_v13 = vsel %vm775_vm4, %v9841_v12, 0.0 }
0x2262   : > { %v10014_v15 = vadd.f32 %v10013_v13, %v10012_v28  ;;  %v15739_v13 = vld [vmem:[%s22657_s11 + $0x3] ss:$0 sm:$0xff] }
0x2263   : > { %v10023_v17 = vadd.f32 %v10022_v14, %v10021_v22 }
0x2264   : > { %v10016_v18 = vadd.f32 %v10015_v16, %v10014_v15 }
0x2267   : > { %v17913_v19 = vpop.f32.mrb[92].mxu0 }
0x2268   : > { %v10024_v43 = vsel %vm775_vm4, %v17913_v19, 0.0  ;;  %v10003_v20 = vpop.f32.mrb[93].mxu0 }
0x2269   : > { %v10025_v21 = vadd.f32 %v10024_v43, %v10023_v17  ;;  %v10017_v25 = vsel %vm775_vm4, %v10003_v20, 0.0  ;;  %v15740_v17 = vld [vmem:[%s22658_s12 + $0x3] ss:$0 sm:$0xff] }
0x226a   : > { %v10018_v26 = vadd.f32 %v10017_v25, %v10016_v18  ;;  %v15764_v25 = vld [vmem:[%s22661_s15 + $0x1f8] sm:$0xff] }
0x226b   : > { %v10027_v30 = vadd.f32 %v10025_v21, %v21348_v23  ;;  %v15763_v21 = vld [vmem:[%s22661_s15 + $0x1f0] sm:$0xff] }
0x226c   : > { %v10026_v31 = vadd.f32 %v10018_v26, %v21350_v54  ;;  %v19195_v26 = vpack.c.bf16 %v15764_v25, %v15763_v21  ;;  %v15805_v21 = vld [vmem:[%s22653_s7 + $0x250] sm:$0xff]  ;;  %v15806_v25 = vld [vmem:[%s22653_s7 + $0x258] sm:$0xff] }
0x226d   : > { %v21657_v32 = vadd.f32 %v15736_v29, %v10027_v30 }
0x226e   : > { %v21659_v62 = vadd.f32 %v15736_v29, %v10026_v31  ;;  %19196 = vmatprep.subr.bf16.mxu0 %v19195_v26  ;;  %v15746_v29 = vld [vmem:[%s22660_s14 + $0x3] ss:$0 sm:$0xff] }
0x226f   : > { %v10045_v63 = vsel %vm775_vm4, %v21657_v32, 0.0  ;;  %19198 = vmatpush3.bf16.msra.mxu0 %v19195_v26 }
0x2270   : > { %10046 = vadd.xlane.f32.xlu0 %v10045_v63  ;;  %v10042_v33 = vsel %vm775_vm4, %v21659_v62, 0.0  ;;  %19232 = vmatprep.subr.bf16.mxu0 %v19231_v37 }
0x2271   : > { %10043 = vadd.xlane.f32.xlu1 %v10042_v33 }
0x22fd   : > { %v10047_v36 = vpop.xlane.xlu0 %10046 }
0x22fe   : > { %v10049_v38 = vmul.f32 0.03125, %v10047_v36  ;;  %v10044_v39 = vpop.xlane.xlu1 %10043 }
0x22ff   : > { %v10048_v40 = vmul.f32 0.03125, %v10044_v39 }
0x2300   : > { %v21666_v23 = vsub.f32 %v21657_v32, %v10049_v38 }
0x2301   : > { %v21669_v54 = vsub.f32 %v21659_v62, %v10048_v40  ;;  %v15766_v40 = vld [vmem:[%s22662_s16 + $0x3] ss:$0 sm:$0xff] }
0x2302   : > { %v10053_v41 = vmul.f32 %v21666_v23, %v21666_v23 }
0x2303   : > { %v10052_v42 = vmul.f32 %v21669_v54, %v21669_v54 }
0x2304   : > { %v10057_v24 = vsel %vm775_vm4, %v10053_v41, 0.0 }
0x2305   : > { %10058 = vadd.xlane.f32.xlu0 %v10057_v24  ;;  %v10054_v53 = vsel %vm775_vm4, %v10052_v42, 0.0 }
0x2306   : > { %10055 = vadd.xlane.f32.xlu1 %v10054_v53 }
0x2392   : > { %v10059_v9 = vpop.xlane.xlu0 %10058 }
0x2393   : > { %v10061_v7 = vmul.f32 0.03125, %v10059_v9  ;;  %v10056_v10 = vpop.xlane.xlu1 %10055 }
0x2394   : > { %v10060_v11 = vmul.f32 0.03125, %v10056_v10 }
0x2395   : > { %v10063_v12 = vadd.f32 1e-05, %v10061_v7 }
0x2396   : > { %v10062_v28 = vadd.f32 1e-05, %v10060_v11 }
0x2397   : > { %19759 = vrsqrt.f32 %v10063_v12 }
0x2398   : > { %19761 = vrsqrt.f32 %v10062_v28 }
0x23a1   : > { %v19760_v22 = vpop.eup %19759 }
0x23a2   : > { %v19762_v14 = vpop.eup %19761  ;;  %v10067_v15 = vmul.f32 %v19760_v22, %v21666_v23 }
0x23a3   : > { %v10066_v16 = vmul.f32 %v19762_v14, %v21669_v54 }
0x23a4   : > { %v10075_v18 = vmul.f32 %v15739_v13, %v10067_v15 }
0x23a5   : > { %v10074_v19 = vmul.f32 %v15739_v13, %v10066_v16  ;;  %v15769_v13 = vld [vmem:[%s22703_s1 + $0x4] ss:$0 sm:$0xff] }
0x23a6   : > { %v10083_v20 = vadd.f32 %v15740_v17, %v10075_v18 }
0x23a7   : > { %v10082_v43 = vadd.f32 %v15740_v17, %v10074_v19  ;;  %v15770_v17 = vld [vmem:[%s22704_s21 + $0x4] ss:$0 sm:$0xff] }
0x23a9   : > { %17922 = vmatprep.mubr.msk.f32.mxu1 %vm775_vm4, %v10082_v43  ;;  %v15777_v43 = vld [vmem:[%s22702_s6 + $0x230] sm:$0xff] }
0x23aa   : > { %17923 = vmatmul.mubr.msk.f32.vlgmr.msra.gmra.mrb[112].mxu1 %vm775_vm4, %v10083_v20  ;;  %v15778_v20 = vld [vmem:[%s22702_s6 + $0x238] sm:$0xff] }
0x23ab   : > { %19202 = vmatpush3.bf16.msra.mxu1 %v19199_v56  ;;  %v15800_v56 = vld [vmem:[%s22653_s7 + $0x228] sm:$0xff] }
0x23ac   : > { %19204 = vmatprep.subr.bf16.mxu1 %v19203_v61 }
0x23af   : > { %19206 = vmatpush3.bf16.msra.mxu1 %v19203_v61  ;;  %v15807_v61 = vld [vmem:[%s22653_s7 + $0x260] sm:$0xff] }
0x23b0   : > { %19208 = vmatprep.subr.bf16.mxu1 %v19207_v35 }
0x247d   : > { %v17924_v30 = vpop.f32.mrb[112].mxu1 }
0x247e   : > { %v10175_v31 = vadd.f32 %v17924_v30, %v15746_v29  ;;  %v10169_v63 = vpop.f32.mrb[113].mxu1  ;;  %v15779_v30 = vld [vmem:[%s22702_s6 + $0x240] sm:$0xff] }
0x247f   : > { %v10170_v33 = vadd.f32 %v15746_v29, %v10169_v63  ;;  %v19251_v63 = vpack.c.bf16 %v15806_v25, %v15805_v21 }
0x2480   : > { %v10179_v38 = vmax.f32 %v10175_v31, 0.0  ;;  %v19211_v31 = vpack.c.bf16 %v15778_v20, %v15777_v43 }
0x2481   : > { %v10178_v36 = vmax.f32 %v10170_v33, 0.0  ;;  %v15780_v33 = vld [vmem:[%s22702_s6 + $0x248] sm:$0xff] }
0x2483   : > { %17957 = vmatprep.mubr.f32.mxu0 %v10178_v36  ;;  %v15819_v36 = vld [vmem:[%s22654_s8 + $0x200] sm:$0xff] }
0x2484   : > { %17958 = vmatmul.mubr.f32.vlgmr.msra.gmra.mrb[94].mxu0 %v10179_v38  ;;  %v15820_v38 = vld [vmem:[%s22654_s8 + $0x208] sm:$0xff] }
0x2485   : > { %19234 = vmatpush3.bf16.msra.mxu0 %v19231_v37  ;;  %v19239_v37 = vpack.c.bf16 %v15800_v56, %v15799_v55  ;;  %v19853_v55 = vld [vmem:[%s22707_s29 + $0x8] sm:$0xff] }
0x2486   : > { %19236 = vmatprep.subr.bf16.mxu0 %v19235_v1 }
0x2489   : > { %19238 = vmatpush3.bf16.msra.mxu0 %v19235_v1  ;;  %v19255_v1 = vpack.c.bf16 %v15808_v0, %v15807_v61 }
0x248a   : > { %19248 = vmatprep.subr.bf16.mxu0 %v19247_v5 }
0x2557   : > { %v17959_v39 = vpop.f32.mrb[94].mxu0 }
0x2558   : > { %v10273_v23 = vadd.f32 %v17959_v39, %v21657_v32  ;;  %v10263_v54 = vpop.f32.mrb[95].mxu0  ;;  %v19215_v39 = vpack.c.bf16 %v15780_v33, %v15779_v30 }
0x2559   : > { %v10272_v41 = vadd.f32 %v10263_v54, %v21659_v62  ;;  %v15782_v54 = vld [vmem:[%s22702_s6 + $0x258] sm:$0xff] }
0x255a   : > { %v21755_v42 = vadd.f32 %v15766_v40, %v10273_v23  ;;  %v15781_v23 = vld [vmem:[%s22702_s6 + $0x250] sm:$0xff] }
0x255b   : > { %v21757_v24 = vadd.f32 %v15766_v40, %v10272_v41  ;;  %v19263_v40 = vpack.c.bf16 %v15820_v38, %v15819_v36  ;;  %v15821_v41 = vld [vmem:[%s22654_s8 + $0x210] sm:$0xff] }
0x255c   : > { %v10291_v53 = vsel %vm775_vm4, %v21755_v42, 0.0 }
0x255d   : > { %10292 = vadd.xlane.f32.xlu0 %v10291_v53  ;;  %v10288_v44 = vsel %vm775_vm4, %v21757_v24, 0.0  ;;  %v15822_v53 = vld [vmem:[%s22654_s8 + $0x218] sm:$0xff] }
0x255e   : > { %10289 = vadd.xlane.f32.xlu1 %v10288_v44  ;;  %v19219_v44 = vpack.c.bf16 %v15782_v54, %v15781_v23 }
0x25ea   : > { %v10293_v45 = vpop.xlane.xlu0 %10292 }
0x25eb   : > { %v10295_v46 = vmul.f32 0.03125, %v10293_v45  ;;  %v10290_v47 = vpop.xlane.xlu1 %10289  ;;  %v19267_v45 = vpack.c.bf16 %v15822_v53, %v15821_v41 }
0x25ec   : > { %v10294_v48 = vmul.f32 0.03125, %v10290_v47  ;;  %v15784_v47 = vld [vmem:[%s22702_s6 + $0x268] sm:$0xff] }
0x25ed   : > { %v10297_v32 = vsub.f32 %v21755_v42, %v10295_v46  ;;  %v15783_v46 = vld [vmem:[%s22702_s6 + $0x260] sm:$0xff] }
0x25ee   : > { %v10296_v62 = vsub.f32 %v21757_v24, %v10294_v48  ;;  %v15827_v48 = vld [vmem:[%s22654_s8 + $0x240] sm:$0xff] }
0x25ef   : > { %v10299_v60 = vmul.f32 %v10297_v32, %v10297_v32 }
0x25f0   : > { %v10298_v49 = vmul.f32 %v10296_v62, %v10296_v62 }
0x25f1   : > { %v10303_v50 = vsel %vm775_vm4, %v10299_v60, 0.0 }
0x25f2   : > { %10304 = vadd.xlane.f32.xlu0 %v10303_v50  ;;  %v10300_v6 = vsel %vm775_vm4, %v10298_v49, 0.0  ;;  %v15785_v49 = vld [vmem:[%s22702_s6 + $0x270] sm:$0xff]  ;;  %v15786_v50 = vld [vmem:[%s22702_s6 + $0x278] sm:$0xff] }
0x25f3   : > { %10301 = vadd.xlane.f32.xlu1 %v10300_v6  ;;  %v15829_v6 = vld [vmem:[%s22654_s8 + $0x250] sm:$0xff]  ;;  %v19227_v52 = vpack.c.bf16 %v15786_v50, %v15785_v49 }
0x25f4   : > { %v19283_v57 = vpack.c.bf16 %v15830_v51, %v15829_v6 }
0x267f   : > { %v10305_v9 = vpop.xlane.xlu0 %10304 }
0x2680   : > { %v10307_v7 = vmul.f32 0.03125, %v10305_v9  ;;  %v10302_v10 = vpop.xlane.xlu1 %10301  ;;  %v15825_v9 = vld [vmem:[%s22654_s8 + $0x230] sm:$0xff] }
0x2681   : > { %v10306_v11 = vmul.f32 0.03125, %v10302_v10 }
0x2682   : > { %v10309_v12 = vadd.f32 1e-05, %v10307_v7  ;;  %v15826_v7 = vld [vmem:[%s22654_s8 + $0x238] sm:$0xff] }
0x2683   : > { %v10308_v28 = vadd.f32 1e-05, %v10306_v11  ;;  %v19275_v10 = vpack.c.bf16 %v15826_v7, %v15825_v9  ;;  %v15831_v11 = vld [vmem:[%s22654_s8 + $0x260] sm:$0xff] }
0x2684   : > { %19763 = vrsqrt.f32 %v10309_v12  ;;  %v15832_v12 = vld [vmem:[%s22654_s8 + $0x268] sm:$0xff] }
0x2685   : > { %19765 = vrsqrt.f32 %v10308_v28  ;;  %v19287_v28 = vpack.c.bf16 %v15832_v12, %v15831_v11 }
0x268e   : > { %v19764_v22 = vpop.eup %19763 }
0x268f   : > { %v19766_v14 = vpop.eup %19765  ;;  %v10313_v15 = vmul.f32 %v19764_v22, %v10297_v32  ;;  %v15828_v32 = vld [vmem:[%s22654_s8 + $0x248] sm:$0xff]  ;;  %v15833_v22 = vld [vmem:[%s22654_s8 + $0x270] sm:$0xff] }
0x2690   : > { %v10312_v16 = vmul.f32 %v19766_v14, %v10296_v62  ;;  %v19223_v62 = vpack.c.bf16 %v15784_v47, %v15783_v46  ;;  %v19279_v60 = vpack.c.bf16 %v15828_v32, %v15827_v48 }
0x2691   : > { %v10321_v18 = vmul.f32 %v15769_v13, %v10313_v15 }
0x2692   : > { %v10320_v19 = vmul.f32 %v15769_v13, %v10312_v16  ;;  %v15834_v13 = vld [vmem:[%s22654_s8 + $0x278] sm:$0xff] }
0x2693   : > { %v21823_v29 = vadd.f32 %v15770_v17, %v10321_v18  ;;  %v19291_v14 = vpack.c.bf16 %v15834_v13, %v15833_v22 }
0x2694   : > { %v21821_v26 = vadd.f32 %v15770_v17, %v10320_v19 }
0x2696   : > { %17968 = vmatprep.mubr.msk.f32.mxu1 %vm775_vm4, %v21821_v26  ;;  %18012 = vmatprep.mubr.msk.f32.mxu0 %vm775_vm4, %v21821_v26 }
0x2697   : > { %17969 = vmatmul.mubr.msk.f32.vlgmr.msra.gmra.mrb[114].mxu1 %vm775_vm4, %v21823_v29  ;;  %18013 = vmatmul.mubr.msk.f32.vlgmr.msra.gmra.mrb[96].mxu0 %vm775_vm4, %v21823_v29 }
0x2698   : > { %19210 = vmatpush3.bf16.msra.mxu1 %v19207_v35  ;;  %19250 = vmatpush3.bf16.msra.mxu0 %v19247_v5  ;;  %v15823_v35 = vld [vmem:[%s22654_s8 + $0x220] sm:$0xff] }
0x2699   : > { %17979 = vmatprep.mubr.msk.f32.mxu1 %vm775_vm4, %v21821_v26  ;;  %18034 = vmatprep.mubr.msk.f32.mxu0 %vm775_vm4, %v21821_v26  ;;  %v19271_v5 = vpack.c.bf16 %v15824_v4, %v15823_v35 }
0x269a   : > { %19212 = vmatprep.subr.bf16.mxu1 %v19211_v31  ;;  %19252 = vmatprep.subr.bf16.mxu0 %v19251_v63 }
0x269c   : > { %19214 = vmatpush3.bf16.msra.mxu1 %v19211_v31  ;;  %19254 = vmatpush3.bf16.msra.mxu0 %v19251_v63 }
0x269d   : > { %19216 = vmatprep.subr.bf16.mxu1 %v19215_v39  ;;  %19264 = vmatprep.subr.bf16.mxu0 %v19263_v40 }
0x269f   : > { %17980 = vmatmul.mubr.msk.f32.vlgmr.msra.gmra.mrb[116].mxu1 %vm775_vm4, %v21823_v29  ;;  %18035 = vmatmul.mubr.msk.f32.vlgmr.msra.gmra.mrb[98].mxu0 %vm775_vm4, %v21823_v29 }
0x26a0   : > { %19218 = vmatpush3.bf16.msra.mxu1 %v19215_v39  ;;  %17990 = vmatprep.mubr.msk.f32.mxu1 %vm775_vm4, %v21821_v26 }
0x26a1   : > { %19266 = vmatpush3.bf16.msra.mxu0 %v19263_v40  ;;  %18056 = vmatprep.mubr.msk.f32.mxu0 %vm775_vm4, %v21821_v26 }
0x26a2   : > { %19220 = vmatprep.subr.bf16.mxu1 %v19219_v44  ;;  %19268 = vmatprep.subr.bf16.mxu0 %v19267_v45 }
0x26a4   : > { %19222 = vmatpush3.bf16.msra.mxu1 %v19219_v44 }
0x26a5   : > { %19270 = vmatpush3.bf16.msra.mxu0 %v19267_v45  ;;  %19224 = vmatprep.subr.bf16.mxu1 %v19223_v62 }
0x26a6   : > { %19280 = vmatprep.subr.bf16.mxu0 %v19279_v60 }
0x26a7   : > { %17991 = vmatmul.mubr.msk.f32.vlgmr.msra.gmra.mrb[118].mxu1 %vm775_vm4, %v21823_v29 }
0x26a8   : > { %18057 = vmatmul.mubr.msk.f32.vlgmr.msra.gmra.mrb[100].mxu0 %vm775_vm4, %v21823_v29  ;;  %19226 = vmatpush3.bf16.msra.mxu1 %v19223_v62 }
0x26a9   : > { %18001 = vmatprep.mubr.msk.f32.mxu1 %vm775_vm4, %v21821_v26  ;;  %19282 = vmatpush3.bf16.msra.mxu0 %v19279_v60 }
0x26aa   : > { %18078 = vmatprep.mubr.msk.f32.mxu0 %vm775_vm4, %v21821_v26  ;;  %19228 = vmatprep.subr.bf16.mxu1 %v19227_v52 }
0x26ab   : > { %19284 = vmatprep.subr.bf16.mxu0 %v19283_v57 }
0x26ac   : > { %19230 = vmatpush3.bf16.msra.mxu1 %v19227_v52 }
0x26ad   : > { %19286 = vmatpush3.bf16.msra.mxu0 %v19283_v57  ;;  %19240 = vmatprep.subr.bf16.mxu1 %v19239_v37  ;;  %v19854_v57 = vld [vmem:[%s22707_s29] sm:$0xff] }
0x26af   : > { %18002 = vmatmul.mubr.msk.f32.vlgmr.msra.gmra.mrb[120].mxu1 %vm775_vm4, %v21823_v29 }
0x26b0   : > { %18079 = vmatmul.mubr.msk.f32.vlgmr.msra.gmra.mrb[102].mxu0 %vm775_vm4, %v21823_v29  ;;  %19242 = vmatpush3.bf16.msra.mxu1 %v19239_v37 }
0x26b1   : > { %18023 = vmatprep.mubr.msk.f32.mxu1 %vm775_vm4, %v21821_v26  ;;  %19244 = vmatprep.subr.bf16.mxu1 %v19243_v27 }
0x26b4   : > { %19246 = vmatpush3.bf16.msra.mxu1 %v19243_v27 }
0x26b5   : > { %19256 = vmatprep.subr.bf16.mxu1 %v19255_v1 }
0x26b7   : > { %18024 = vmatmul.mubr.msk.f32.vlgmr.msra.gmra.mrb[122].mxu1 %vm775_vm4, %v21823_v29 }
0x26b8   : > { %19258 = vmatpush3.bf16.msra.mxu1 %v19255_v1  ;;  %18045 = vmatprep.mubr.msk.f32.mxu1 %vm775_vm4, %v21821_v26 }
0x26b9   : > { %19260 = vmatprep.subr.bf16.mxu1 %v19259_v34 }
0x26bc   : > { %19262 = vmatpush3.bf16.msra.mxu1 %v19259_v34 }
0x26bd   : > { %19272 = vmatprep.subr.bf16.mxu1 %v19271_v5 }
0x26bf   : > { %18046 = vmatmul.mubr.msk.f32.vlgmr.msra.gmra.mrb[124].mxu1 %vm775_vm4, %v21823_v29 }
0x26c0   : > { %19274 = vmatpush3.bf16.msra.mxu1 %v19271_v5  ;;  %18067 = vmatprep.mubr.msk.f32.mxu1 %vm775_vm4, %v21821_v26 }
0x26c1   : > { %19276 = vmatprep.subr.bf16.mxu1 %v19275_v10 }
0x26c4   : > { %19278 = vmatpush3.bf16.msra.mxu1 %v19275_v10 }
0x26c5   : > { %19288 = vmatprep.subr.bf16.mxu1 %v19287_v28 }
0x26c7   : > { %18068 = vmatmul.mubr.msk.f32.vlgmr.msra.gmra.mrb[126].mxu1 %vm775_vm4, %v21823_v29 }
0x26c8   : > { %19290 = vmatpush3.bf16.msra.mxu1 %v19287_v28  ;;  %18089 = vmatprep.mubr.msk.f32.mxu1 %vm775_vm4, %v21821_v26 }
0x26c9   : > { %19292 = vmatprep.subr.bf16.mxu1 %v19291_v14 }
0x26cc   : > { %19294 = vmatpush3.bf16.msra.mxu1 %v19291_v14 }
0x26cf   : > { %18090 = vmatmul.mubr.msk.f32.vlgmr.msra.gmra.mrb[128].mxu1 %vm775_vm4, %v21823_v29 }
0x276a   : > { %v17970_v15 = vpop.f32.mrb[114].mxu1  ;;  %v18014_v16 = vpop.f32.mrb[96].mxu0 }
0x276b   : > { %v10419_v17 = vpop.f32.mrb[115].mxu1  ;;  %v10736_v18 = vpop.f32.mrb[97].mxu0 }
0x276c   : > { %v19295_v19 = vpack.c.bf16 %v18014_v16, %v10736_v18  ;;  %18096 = vmatprep.mubr.msk.f32.mxu0 %vm1773_vm5, %v10419_v17 }
0x276e   : > { %19297 = vmatprep.subr.msk.bf16.mxu0 %vm20337_vm6, %v19295_v19 }
0x276f   : > { %19300 = vmatpush3.bf16.xpose.msk.msra.mxu0 %vm20337_vm6, %v19295_v19 }
0x2772   : > { %v17981_v43 = vpop.f32.mrb[116].mxu1  ;;  %v18036_v20 = vpop.f32.mrb[98].mxu0 }
0x2773   : > { %v10494_v21 = vpop.f32.mrb[117].mxu1  ;;  %v10886_v25 = vpop.f32.mrb[99].mxu0 }
0x2774   : > { %v19307_v26 = vpack.c.bf16 %v18036_v20, %v10886_v25  ;;  %18103 = vmatprep.mubr.msk.f32.mxu1 %vm1773_vm5, %v10494_v21 }
0x2776   : > { %19309 = vmatprep.subr.msk.bf16.mxu0 %vm20337_vm6, %v19307_v26  ;;  %18097 = vmatmul.mubr.msk.f32.vlgmr.msra.gmra.mrb[104].mxu0 %vm1773_vm5, %v17970_v15 }
0x2777   : > { %19312 = vmatpush3.bf16.xpose.msk.msra.mxu0 %vm20337_vm6, %v19307_v26 }
0x277a   : > { %v17992_v29 = vpop.f32.mrb[118].mxu1 }
0x277b   : > { %v18058_v30 = vpop.f32.mrb[100].mxu0  ;;  %v10569_v31 = vpop.f32.mrb[119].mxu1 }
0x277c   : > { %v11053_v63 = vpop.f32.mrb[101].mxu0  ;;  %18110 = vmatprep.mubr.msk.f32.mxu0 %vm1773_vm5, %v10569_v31 }
0x277d   : > { %v19319_v33 = vpack.c.bf16 %v18058_v30, %v11053_v63 }
0x277e   : > { %18111 = vmatmul.mubr.msk.f32.vlgmr.msra.gmra.mrb[106].mxu0 %vm1773_vm5, %v17992_v29 }
0x277f   : > { %19320 = vmatprep.subr.bf16.mxu0 %v19319_v33 }
0x2780   : > { %19322 = vmatpush3.bf16.msra.mxu0 %v19319_v33 }
0x2782   : > { %v18003_v36 = vpop.f32.mrb[120].mxu1 }
0x2783   : > { %v18080_v38 = vpop.f32.mrb[102].mxu0  ;;  %v10644_v39 = vpop.f32.mrb[121].mxu1 }
0x2784   : > { %v11203_v40 = vpop.f32.mrb[103].mxu0 }
0x2785   : > { %v19327_v23 = vpack.c.bf16 %v18080_v38, %v11203_v40 }
0x278a   : > { %v18025_v54 = vpop.f32.mrb[122].mxu1 }
0x278b   : > { %v10811_v41 = vpop.f32.mrb[123].mxu1 }
0x278c   : > { %v19301_v53 = vpack.c.bf16 %v18025_v54, %v10811_v41 }
0x278e   : > { %19303 = vmatprep.subr.msk.bf16.mxu1 %vm20337_vm6, %v19301_v53 }
0x278f   : > { %19306 = vmatpush3.bf16.xpose.msk.msra.mxu1 %vm20337_vm6, %v19301_v53 }
0x2792   : > { %v18047_v44 = vpop.f32.mrb[124].mxu1 }
0x2793   : > { %v10961_v45 = vpop.f32.mrb[125].mxu1 }
0x2794   : > { %v19313_v46 = vpack.c.bf16 %v18047_v44, %v10961_v45 }
0x2796   : > { %18104 = vmatmul.mubr.msk.f32.vlgmr.msra.gmra.mrb[130].mxu1 %vm1773_vm5, %v17981_v43  ;;  %19315 = vmatprep.subr.msk.bf16.mxu1 %vm20337_vm6, %v19313_v46 }
0x2797   : > { %19318 = vmatpush3.bf16.xpose.msk.msra.mxu1 %vm20337_vm6, %v19313_v46  ;;  %18117 = vmatprep.mubr.msk.f32.mxu1 %vm1773_vm5, %v10644_v39 }
0x2798   : > { %19328 = vmatprep.subr.bf16.mxu1 %v19327_v23 }
0x279a   : > { %v18069_v47 = vpop.f32.mrb[126].mxu1 }
0x279b   : > { %v11128_v48 = vpop.f32.mrb[127].mxu1 }
0x279c   : > { %v21992_v32 = vpack.c.bf16 %v18069_v47, %v11128_v48 }
0x279e   : > { %18118 = vmatmul.mubr.msk.f32.vlgmr.msra.gmra.mrb[132].mxu1 %vm1773_vm5, %v18003_v36  ;;  %19324 = vmatprep.subr.bf16.mxu0 %v21992_v32 }
0x279f   : > { %19330 = vmatpush3.bf16.msra.mxu1 %v19327_v23 }
0x27a2   : > { %v18091_v62 = vpop.f32.mrb[128].mxu1 }
0x27a3   : > { %v11278_v60 = vpop.f32.mrb[129].mxu1 }
0x27a4   : > { %v21996_v49 = vpack.c.bf16 %v18091_v62, %v11278_v60 }
0x2849   : > { %v18098_v50 = vpop.f32.mrb[104].mxu0 }
0x284a   : > { %v11636_v6 = vmul.f32 0.17677669, %v18098_v50  ;;  %v11365_v51 = vpop.f32.mrb[105].mxu0 }
0x284b   : > { %v11635_v52 = vmul.f32 0.17677669, %v11365_v51 }
0x284c   : > { %v11644_v56 = vadd.f32 %v19853_v55, %v11636_v6 }
0x284d   : > { %v11643_v37 = vadd.f32 %v19854_v57, %v11635_v52 }
0x284e   : > { %v11654_v58 = vsel %vm2138_vm7, %v11644_v56, -inf }
0x284f   : > { %11655 = vmax.xlane.f32.xlu0 %v11654_v58  ;;  %v11651_v59 = vsel %vm2138_vm7, %v11643_v37, -inf }
0x2850   : > { %11652 = vmax.xlane.f32.xlu1 %v11651_v59 }
0x2851   : > { %v18112_v27 = vpop.f32.mrb[106].mxu0 }
0x2852   : > { %v11640_v61 = vmul.f32 0.17677669, %v18112_v27  ;;  %v11539_v0 = vpop.f32.mrb[107].mxu0 }
0x2853   : > { %v11639_v1 = vmul.f32 0.17677669, %v11539_v0 }
0x2854   : > { %v11648_v2 = vadd.f32 %v19853_v55, %v11640_v61 }
0x2855   : > { %v11647_v3 = vadd.f32 %v19854_v57, %v11639_v1 }
0x2856   : > { %v11666_v34 = vsel %vm2138_vm7, %v11648_v2, -inf }
0x2857   : > { %11667 = vmax.xlane.f32.xlu0 %v11666_v34  ;;  %v11663_v35 = vsel %vm2138_vm7, %v11647_v3, -inf }
0x2858   : > { %11664 = vmax.xlane.f32.xlu1 %v11663_v35 }
0x2869   : > { %v18105_v4 = vpop.f32.mrb[130].mxu1 }
0x286a   : > { %v11638_v5 = vmul.f32 0.17677669, %v18105_v4  ;;  %v11452_v9 = vpop.f32.mrb[131].mxu1 }
0x286b   : > { %v11637_v7 = vmul.f32 0.17677669, %v11452_v9 }
0x286c   : > { %v11646_v10 = vadd.f32 %v19853_v55, %v11638_v5 }
0x286d   : > { %v11645_v11 = vadd.f32 %v19854_v57, %v11637_v7 }
0x286e   : > { %v11660_v12 = vsel %vm2138_vm7, %v11646_v10, -inf }
0x286f   : > { %11661 = vmax.xlane.f32.xlu0 %v11660_v12  ;;  %v11657_v28 = vsel %vm2138_vm7, %v11645_v11, -inf }
0x2870   : > { %11658 = vmax.xlane.f32.xlu1 %v11657_v28 }
0x2871   : > { %v18119_v22 = vpop.f32.mrb[132].mxu1 }
0x2872   : > { %v11642_v13 = vmul.f32 0.17677669, %v18119_v22  ;;  %v11626_v14 = vpop.f32.mrb[133].mxu1 }
0x2873   : > { %v11641_v15 = vmul.f32 0.17677669, %v11626_v14 }
0x2874   : > { %v11650_v16 = vadd.f32 %v19853_v55, %v11642_v13 }
0x2875   : > { %v11649_v17 = vadd.f32 %v19854_v57, %v11641_v15 }
0x2876   : > { %v11672_v18 = vsel %vm2138_vm7, %v11650_v16, -inf }
0x2877   : > { %11673 = vmax.xlane.f32.xlu0 %v11672_v18  ;;  %v11669_v19 = vsel %vm2138_vm7, %v11649_v17, -inf }
0x2878   : > { %11670 = vmax.xlane.f32.xlu1 %v11669_v19 }
0x28dc   : > { %v11656_v43 = vpop.xlane.xlu0 %11655 }
0x28dd   : > { %v11676_v20 = vsub.f32 %v11644_v56, %v11656_v43  ;;  %v11653_v21 = vpop.xlane.xlu1 %11652 }
0x28de   : > { %v11675_v25 = vsub.f32 %v11643_v37, %v11653_v21 }
0x28df   : > { %v11685_v26 = vmul.f32 1.442695, %v11676_v20 }
0x28e0   : > { %v11683_v29 = vmul.f32 1.442695, %v11675_v25 }
0x28e1   : > { %19767 = vpow2.f32 %v11685_v26  ;;  %v15867_v26 = vld [vmem:[%s22655_s9 + $0x80] sm:$0xff] }
0x28e2   : > { %19769 = vpow2.f32 %v11683_v29  ;;  %18148 = vmatprep.subr.mxu1 %v15867_v26  ;;  %v15869_v29 = vld [vmem:[%s22655_s9 + $0x90] sm:$0xff] }
0x28e4   : > { %v11668_v30 = vpop.xlane.xlu0 %11667 }
0x28e5   : > { %v11680_v31 = vsub.f32 %v11648_v2, %v11668_v30  ;;  %v11665_v63 = vpop.xlane.xlu1 %11664  ;;  %v15870_v30 = vld [vmem:[%s22655_s9 + $0x98] sm:$0xff] }
0x28e6   : > { %v11679_v33 = vsub.f32 %v11647_v3, %v11665_v63 }
0x28e7   : > { %v11693_v36 = vmul.f32 1.442695, %v11680_v31 }
0x28e8   : > { %v11691_v38 = vmul.f32 1.442695, %v11679_v33 }
0x28e9   : > { %19771 = vpow2.f32 %v11693_v36 }
0x28ea   : > { %19773 = vpow2.f32 %v11691_v38 }
0x28eb   : > { %v19768_v39 = vpop.eup %19767 }
0x28ec   : > { %v19770_v40 = vpop.eup %19769  ;;  %v11702_v23 = vsel %vm2138_vm7, %v19768_v39, 0.0 }
0x28ed   : > { %11703 = vadd.xlane.f32.xlu0 %v11702_v23  ;;  %v11699_v54 = vsel %vm2138_vm7, %v19770_v40, 0.0 }
0x28ee   : > { %11700 = vadd.xlane.f32.xlu1 %v11699_v54 }
0x28f3   : > { %v19772_v41 = vpop.eup %19771 }
0x28f4   : > { %v19774_v53 = vpop.eup %19773  ;;  %v11714_v44 = vsel %vm2138_vm7, %v19772_v41, 0.0 }
0x28f5   : > { %11715 = vadd.xlane.f32.xlu0 %v11714_v44  ;;  %v11711_v45 = vsel %vm2138_vm7, %v19774_v53, 0.0 }
0x28f6   : > { %11712 = vadd.xlane.f32.xlu1 %v11711_v45 }
0x28fc   : > { %v11662_v46 = vpop.xlane.xlu0 %11661 }
0x28fd   : > { %v11678_v47 = vsub.f32 %v11646_v10, %v11662_v46  ;;  %v11659_v48 = vpop.xlane.xlu1 %11658 }
0x28fe   : > { %v11677_v62 = vsub.f32 %v11645_v11, %v11659_v48 }
0x28ff   : > { %v11689_v60 = vmul.f32 1.442695, %v11678_v47 }
0x2900   : > { %v11687_v50 = vmul.f32 1.442695, %v11677_v62 }
0x2901   : > { %19775 = vpow2.f32 %v11689_v60 }
0x2902   : > { %19777 = vpow2.f32 %v11687_v50 }
0x2904   : > { %v11674_v6 = vpop.xlane.xlu0 %11673 }
0x2905   : > { %v11682_v51 = vsub.f32 %v11650_v16, %v11674_v6  ;;  %v11671_v52 = vpop.xlane.xlu1 %11670 }
0x2906   : > { %v11681_v55 = vsub.f32 %v11649_v17, %v11671_v52 }
0x2907   : > { %v11697_v56 = vmul.f32 1.442695, %v11682_v51 }
0x2908   : > { %v11695_v57 = vmul.f32 1.442695, %v11681_v55 }
0x2909   : > { %19779 = vpow2.f32 %v11697_v56 }
0x290a   : > { %19781 = vpow2.f32 %v11695_v57 }
0x290b   : > { %v19776_v37 = vpop.eup %19775 }
0x290c   : > { %v19778_v58 = vpop.eup %19777  ;;  %v11708_v59 = vsel %vm2138_vm7, %v19776_v37, 0.0 }
0x290d   : > { %11709 = vadd.xlane.f32.xlu0 %v11708_v59  ;;  %v11705_v27 = vsel %vm2138_vm7, %v19778_v58, 0.0 }
0x290e   : > { %11706 = vadd.xlane.f32.xlu1 %v11705_v27 }
0x2913   : > { %v19780_v61 = vpop.eup %19779 }
0x2914   : > { %v19782_v0 = vpop.eup %19781  ;;  %v11720_v1 = vsel %vm2138_vm7, %v19780_v61, 0.0 }
0x2915   : > { %11721 = vadd.xlane.f32.xlu0 %v11720_v1  ;;  %v11717_v2 = vsel %vm2138_vm7, %v19782_v0, 0.0 }
0x2916   : > { %11718 = vadd.xlane.f32.xlu1 %v11717_v2 }
0x297a   : > { %v11704_v3 = vpop.xlane.xlu0 %11703 }
0x297b   : > { %19783 = vrcp.f32 %v11704_v3  ;;  %v11701_v34 = vpop.xlane.xlu1 %11700 }
0x297c   : > { %19785 = vrcp.f32 %v11701_v34 }
0x2982   : > { %v11716_v35 = vpop.xlane.xlu0 %11715 }
0x2983   : > { %19787 = vrcp.f32 %v11716_v35  ;;  %v11713_v4 = vpop.xlane.xlu1 %11712 }
0x2984   : > { %19789 = vrcp.f32 %v11713_v4 }
0x2985   : > { %v19784_v5 = vpop.eup %19783 }
0x2986   : > { %v19786_v9 = vpop.eup %19785  ;;  %v11732_v10 = vmul.f32 %v19784_v5, %v19768_v39 }
0x2987   : > { %v11731_v7 = vmul.f32 %v19786_v9, %v19770_v40 }
0x2989   : > { %18124 = vmatprep.mubr.msk.f32.mxu0 %vm2138_vm7, %v11731_v7 }
0x298a   : > { %18125 = vmatmul.mubr.msk.f32.vlgmr.msra.gmra.mrb[108].mxu0 %vm2138_vm7, %v11732_v10 }
0x298b   : > { %19326 = vmatpush3.bf16.msra.mxu0 %v21992_v32 }
0x298c   : > { %19332 = vmatprep.subr.bf16.mxu0 %v21996_v49 }
0x298d   : > { %v19788_v11 = vpop.eup %19787 }
0x298e   : > { %v19790_v12 = vpop.eup %19789  ;;  %v11736_v22 = vmul.f32 %v19788_v11, %v19772_v41 }
0x298f   : > { %v11735_v28 = vmul.f32 %v19790_v12, %v19774_v53 }
0x2991   : > { %18138 = vmatprep.mubr.msk.f32.mxu1 %vm2138_vm7, %v11735_v28 }
0x2992   : > { %18139 = vmatmul.mubr.msk.f32.vlgmr.msra.gmra.mrb[134].mxu1 %vm2138_vm7, %v11736_v22 }
0x2993   : > { %18149 = vmatpush3.msra.mxu1 %v15867_v26  ;;  %v15897_v26 = vld [vmem:[%s22661_s15 + $0x220] sm:$0xff] }
0x2994   : > { %18158 = vmatprep.subr.mxu1 %v15869_v29 }
0x299a   : > { %v11710_v13 = vpop.xlane.xlu0 %11709 }
0x299b   : > { %19791 = vrcp.f32 %v11710_v13  ;;  %v11707_v14 = vpop.xlane.xlu1 %11706  ;;  %v15885_v13 = vld [vmem:[%s22659_s13 + $0x80] sm:$0xff] }
0x299c   : > { %19793 = vrcp.f32 %v11707_v14  ;;  %v15886_v14 = vld [vmem:[%s22659_s13 + $0x88] sm:$0xff] }
0x29a2   : > { %v11722_v15 = vpop.xlane.xlu0 %11721 }
0x29a3   : > { %19795 = vrcp.f32 %v11722_v15  ;;  %v11719_v16 = vpop.xlane.xlu1 %11718  ;;  %v19335_v15 = vpack.c.bf16 %v15886_v14, %v15885_v13 }
0x29a4   : > { %19797 = vrcp.f32 %v11719_v16  ;;  %v15887_v16 = vld [vmem:[%s22659_s13 + $0x90] sm:$0xff] }
0x29a5   : > { %v19792_v17 = vpop.eup %19791 }
0x29a6   : > { %v19794_v32 = vpop.eup %19793  ;;  %v11734_v19 = vmul.f32 %v19792_v17, %v19776_v37  ;;  %v15888_v17 = vld [vmem:[%s22659_s13 + $0x98] sm:$0xff] }
0x29a7   : > { %v11733_v18 = vmul.f32 %v19794_v32, %v19778_v58  ;;  %v19339_v32 = vpack.c.bf16 %v15888_v17, %v15887_v16 }
0x29a9   : > { %18131 = vmatprep.mubr.msk.f32.mxu0 %vm2138_vm7, %v11733_v18  ;;  %v15893_v18 = vld [vmem:[%s22661_s15 + $0x200] sm:$0xff] }
0x29aa   : > { %18132 = vmatmul.mubr.msk.f32.vlgmr.msra.gmra.mrb[110].mxu0 %vm2138_vm7, %v11734_v19  ;;  %v15894_v19 = vld [vmem:[%s22661_s15 + $0x208] sm:$0xff] }
0x29ab   : > { %19334 = vmatpush3.bf16.msra.mxu0 %v21996_v49  ;;  %v15868_v49 = vld [vmem:[%s22655_s9 + $0x88] sm:$0xff] }
0x29ac   : > { %18153 = vmatprep.subr.mxu0 %v15868_v49 }
0x29ad   : > { %v19796_v43 = vpop.eup %19795 }
0x29ae   : > { %v19798_v20 = vpop.eup %19797  ;;  %v11738_v25 = vmul.f32 %v19796_v43, %v19780_v61  ;;  %v15880_v61 = vld [vmem:[%s22656_s10 + $0x4] ss:$0 sm:$0xff]  ;;  %v15895_v43 = vld [vmem:[%s22661_s15 + $0x210] sm:$0xff] }
0x29af   : > { %v11737_v21 = vmul.f32 %v19798_v20, %v19782_v0  ;;  %v19343_v20 = vpack.c.bf16 %v15894_v19, %v15893_v18 }
0x29b1   : > { %18145 = vmatprep.mubr.msk.f32.mxu0 %vm2138_vm7, %v11737_v21  ;;  %v15896_v21 = vld [vmem:[%s22661_s15 + $0x218] sm:$0xff] }
0x29b2   : > { %18146 = vmatmul.mubr.msk.f32.vlgmr.msra.gmra.mrb[112].mxu0 %vm2138_vm7, %v11738_v25  ;;  %v19347_v25 = vpack.c.bf16 %v15896_v21, %v15895_v43  ;;  %v15916_v21 = vld [vmem:[%s22702_s6 + $0x288] sm:$0xff] }
0x29b3   : > { %18154 = vmatpush3.msra.mxu0 %v15868_v49 }
0x29b4   : > { %18163 = vmatprep.subr.mxu0 %v15870_v30 }
0x2a5d   : > { %v18126_v31 = vpop.f32.mrb[108].mxu0 }
0x2a5e   : > { %v11811_v63 = vpop.f32.mrb[109].mxu0 }
0x2a5f   : > { %18150 = vmatprep.mubr.msk.f32.mxu1 %vm1773_vm5, %v11811_v63 }
0x2a60   : > { %18151 = vmatmul.mubr.msk.f32.vlgmr.msra.gmra.mrb[136].mxu1 %vm1773_vm5, %v18126_v31  ;;  %v15900_v31 = vld [vmem:[%s22661_s15 + $0x238] sm:$0xff] }
0x2a61   : > { %18159 = vmatpush3.msra.mxu1 %v15869_v29  ;;  %v15898_v29 = vld [vmem:[%s22661_s15 + $0x228] sm:$0xff] }
0x2a62   : > { %19336 = vmatprep.subr.bf16.mxu1 %v19335_v15  ;;  %v19351_v49 = vpack.c.bf16 %v15898_v29, %v15897_v26  ;;  %v15940_v29 = vld [vmem:[%s22653_s7 + $0x288] sm:$0xff] }
0x2a65   : > { %v18140_v33 = vpop.f32.mrb[134].mxu1 }
0x2a66   : > { %v11973_v36 = vpop.f32.mrb[135].mxu1 }
0x2a67   : > { %18160 = vmatprep.mubr.msk.f32.mxu1 %vm1773_vm5, %v11973_v36  ;;  %v15902_v36 = vld [vmem:[%s22661_s15 + $0x248] sm:$0xff] }
0x2a68   : > { %18161 = vmatmul.mubr.msk.f32.vlgmr.msra.gmra.mrb[138].mxu1 %vm1773_vm5, %v18140_v33  ;;  %v15901_v33 = vld [vmem:[%s22661_s15 + $0x240] sm:$0xff] }
0x2a69   : > { %19338 = vmatpush3.bf16.msra.mxu1 %v19335_v15 }
0x2a6a   : > { %19340 = vmatprep.subr.bf16.mxu1 %v19339_v32 }
0x2a6d   : > { %19342 = vmatpush3.bf16.msra.mxu1 %v19339_v32 }
0x2a7d   : > { %v18133_v38 = vpop.f32.mrb[110].mxu0 }
0x2a7e   : > { %v11892_v39 = vpop.f32.mrb[111].mxu0 }
0x2a7f   : > { %18155 = vmatprep.mubr.msk.f32.mxu0 %vm1773_vm5, %v11892_v39  ;;  %v15903_v39 = vld [vmem:[%s22661_s15 + $0x250] sm:$0xff] }
0x2a80   : > { %18156 = vmatmul.mubr.msk.f32.vlgmr.msra.gmra.mrb[114].mxu0 %vm1773_vm5, %v18133_v38  ;;  %v19359_v38 = vpack.c.bf16 %v15902_v36, %v15901_v33  ;;  %v15942_v36 = vld [vmem:[%s22653_s7 + $0x298] sm:$0xff] }
0x2a81   : > { %18164 = vmatpush3.msra.mxu0 %v15870_v30  ;;  %v15899_v30 = vld [vmem:[%s22661_s15 + $0x230] sm:$0xff] }
0x2a82   : > { %19344 = vmatprep.subr.bf16.mxu0 %v19343_v20  ;;  %v19355_v63 = vpack.c.bf16 %v15900_v31, %v15899_v30  ;;  %v15917_v30 = vld [vmem:[%s22702_s6 + $0x290] sm:$0xff]  ;;  %v15918_v31 = vld [vmem:[%s22702_s6 + $0x298] sm:$0xff] }
0x2a83   : > { %v19379_v33 = vpack.c.bf16 %v15918_v31, %v15917_v30  ;;  %v15945_v30 = vld [vmem:[%s22653_s7 + $0x2b0] sm:$0xff]  ;;  %v15946_v31 = vld [vmem:[%s22653_s7 + $0x2b8] sm:$0xff] }
0x2a85   : > { %v18147_v40 = vpop.f32.mrb[112].mxu0 }
0x2a86   : > { %v12054_v23 = vpop.f32.mrb[113].mxu0 }
0x2a87   : > { %18165 = vmatprep.mubr.msk.f32.mxu0 %vm1773_vm5, %v12054_v23 }
0x2a88   : > { %18166 = vmatmul.mubr.msk.f32.vlgmr.msra.gmra.mrb[116].mxu0 %vm1773_vm5, %v18147_v40  ;;  %v15904_v40 = vld [vmem:[%s22661_s15 + $0x258] sm:$0xff] }
0x2a89   : > { %19346 = vmatpush3.bf16.msra.mxu0 %v19343_v20  ;;  %v19363_v23 = vpack.c.bf16 %v15904_v40, %v15903_v39  ;;  %v15915_v20 = vld [vmem:[%s22702_s6 + $0x280] sm:$0xff]  ;;  %v15920_v40 = vld [vmem:[%s22702_s6 + $0x2a8] sm:$0xff] }
0x2a8a   : > { %19348 = vmatprep.subr.bf16.mxu0 %v19347_v25  ;;  %v19375_v26 = vpack.c.bf16 %v15916_v21, %v15915_v20  ;;  %v15919_v39 = vld [vmem:[%s22702_s6 + $0x2a0] sm:$0xff]  ;;  %v15974_v20 = vld [vmem:[%s22654_s8 + $0x2d8] sm:$0xff] }
0x2a8c   : > { %19376 = vmatprep.subr.bf16.mxu1 %v19375_v26 }
0x2a8d   : > { %19350 = vmatpush3.bf16.msra.mxu0 %v19347_v25  ;;  %v15939_v25 = vld [vmem:[%s22653_s7 + $0x280] sm:$0xff] }
0x2a8e   : > { %19352 = vmatprep.subr.bf16.mxu0 %v19351_v49 }
0x2a91   : > { %19354 = vmatpush3.bf16.msra.mxu0 %v19351_v49  ;;  %v19407_v49 = vpack.c.bf16 %v15940_v29, %v15939_v25  ;;  %v15943_v25 = vld [vmem:[%s22653_s7 + $0x2a0] sm:$0xff] }
0x2a92   : > { %19356 = vmatprep.subr.bf16.mxu0 %v19355_v63 }
0x2a95   : > { %19358 = vmatpush3.bf16.msra.mxu0 %v19355_v63  ;;  %v15941_v63 = vld [vmem:[%s22653_s7 + $0x290] sm:$0xff] }
0x2a96   : > { %19360 = vmatprep.subr.bf16.mxu0 %v19359_v38 }
0x2a99   : > { %19362 = vmatpush3.bf16.msra.mxu0 %v19359_v38  ;;  %v19411_v38 = vpack.c.bf16 %v15942_v36, %v15941_v63  ;;  %v19419_v63 = vpack.c.bf16 %v15946_v31, %v15945_v30  ;;  %v15952_v36 = vld [vmem:[%s22653_s7 + $0x2e8] sm:$0xff] }
0x2a9a   : > { %19364 = vmatprep.subr.bf16.mxu0 %v19363_v23 }
0x2a9d   : > { %19366 = vmatpush3.bf16.msra.mxu0 %v19363_v23  ;;  %v15947_v23 = vld [vmem:[%s22653_s7 + $0x2c0] sm:$0xff] }
0x2b33   : > { %v18152_v54 = vpop.f32.mrb[136].mxu1 }
0x2b34   : > { %v12140_v41 = vpop.f32.mrb[137].mxu1  ;;  %v12399_v46 = vsel %vm775_vm4, %v18152_v54, 0.0  ;;  %v15905_v54 = vld [vmem:[%s22661_s15 + $0x260] sm:$0xff] }
0x2b35   : > { %v12392_v62 = vsel %vm775_vm4, %v12140_v41, 0.0  ;;  %v15906_v41 = vld [vmem:[%s22661_s15 + $0x268] sm:$0xff] }
0x2b3b   : > { %v18162_v53 = vpop.f32.mrb[138].mxu1 }
0x2b3c   : > { %v12302_v44 = vpop.f32.mrb[139].mxu1  ;;  %v12402_v6 = vsel %vm775_vm4, %v18162_v53, 0.0  ;;  %v19367_v53 = vpack.c.bf16 %v15906_v41, %v15905_v54  ;;  %v19383_v54 = vpack.c.bf16 %v15920_v40, %v15919_v39  ;;  %v15948_v41 = vld [vmem:[%s22653_s7 + $0x2c8] sm:$0xff]  ;;  %v15953_v39 = vld [vmem:[%s22653_s7 + $0x2f0] sm:$0xff]  ;;  %v15954_v40 = vld [vmem:[%s22653_s7 + $0x2f8] sm:$0xff] }
0x2b3d   : > { %v12395_v52 = vsel %vm775_vm4, %v12302_v44, 0.0 }
0x2b3e   : > { %19368 = vmatprep.subr.bf16.mxu0 %v19367_v53 }
0x2b3f   : > { %19370 = vmatpush3.bf16.msra.mxu0 %v19367_v53  ;;  %v19423_v53 = vpack.c.bf16 %v15948_v41, %v15947_v23  ;;  %v19435_v23 = vpack.c.bf16 %v15954_v40, %v15953_v39  ;;  %v15968_v41 = vld [vmem:[%s22654_s8 + $0x2a8] sm:$0xff] }
0x2b53   : > { %v18157_v45 = vpop.f32.mrb[114].mxu0 }
0x2b54   : > { %v12400_v47 = vsel %vm775_vm4, %v18157_v45, 0.0  ;;  %v12221_v48 = vpop.f32.mrb[115].mxu0 }
0x2b55   : > { %v12401_v60 = vadd.f32 %v12400_v47, %v12399_v46  ;;  %v12393_v50 = vsel %vm775_vm4, %v12221_v48, 0.0 }
0x2b56   : > { %v12394_v51 = vadd.f32 %v12393_v50, %v12392_v62  ;;  %v15883_v50 = vld [vmem:[%s22657_s11 + $0x4] ss:$0 sm:$0xff] }
0x2b57   : > { %v12403_v55 = vadd.f32 %v12402_v6, %v12401_v60 }
0x2b58   : > { %v12396_v56 = vadd.f32 %v12395_v52, %v12394_v51 }
0x2b5b   : > { %v18167_v57 = vpop.f32.mrb[116].mxu0 }
0x2b5c   : > { %v12404_v37 = vsel %vm775_vm4, %v18167_v57, 0.0  ;;  %v12383_v58 = vpop.f32.mrb[117].mxu0 }
0x2b5d   : > { %v12405_v59 = vadd.f32 %v12404_v37, %v12403_v55  ;;  %v12397_v27 = vsel %vm775_vm4, %v12383_v58, 0.0  ;;  %v15884_v55 = vld [vmem:[%s22658_s12 + $0x4] ss:$0 sm:$0xff] }
0x2b5e   : > { %v12398_v0 = vadd.f32 %v12397_v27, %v12396_v56  ;;  %v15908_v27 = vld [vmem:[%s22661_s15 + $0x278] sm:$0xff] }
0x2b5f   : > { %v12407_v1 = vadd.f32 %v12405_v59, %v21755_v42  ;;  %v15907_v59 = vld [vmem:[%s22661_s15 + $0x270] sm:$0xff] }
0x2b60   : > { %v12406_v2 = vadd.f32 %v12398_v0, %v21757_v24  ;;  %v15890_v0 = vld [vmem:[%s22660_s14 + $0x4] ss:$0 sm:$0xff] }
0x2b61   : > { %v22064_v3 = vadd.f32 %v15880_v61, %v12407_v1 }
0x2b62   : > { %v22066_v34 = vadd.f32 %v15880_v61, %v12406_v2  ;;  %v19371_v61 = vpack.c.bf16 %v15908_v27, %v15907_v59  ;;  %v15949_v59 = vld [vmem:[%s22653_s7 + $0x2d0] sm:$0xff]  ;;  %v15950_v27 = vld [vmem:[%s22653_s7 + $0x2d8] sm:$0xff] }
0x2b63   : > { %v12425_v35 = vsel %vm775_vm4, %v22064_v3, 0.0 }
0x2b64   : > { %12426 = vadd.xlane.f32.xlu0 %v12425_v35  ;;  %v12422_v4 = vsel %vm775_vm4, %v22066_v34, 0.0  ;;  %19372 = vmatprep.subr.bf16.mxu0 %v19371_v61 }
0x2b65   : > { %12423 = vadd.xlane.f32.xlu1 %v12422_v4  ;;  %19374 = vmatpush3.bf16.msra.mxu0 %v19371_v61 }
0x2b66   : > { %19408 = vmatprep.subr.bf16.mxu0 %v19407_v49 }
0x2bf1   : > { %v12427_v5 = vpop.xlane.xlu0 %12426 }
0x2bf2   : > { %v12429_v9 = vmul.f32 0.03125, %v12427_v5  ;;  %v12424_v7 = vpop.xlane.xlu1 %12423 }
0x2bf3   : > { %v12428_v10 = vmul.f32 0.03125, %v12424_v7 }
0x2bf4   : > { %v22073_v42 = vsub.f32 %v22064_v3, %v12429_v9 }
0x2bf5   : > { %v22076_v24 = vsub.f32 %v22066_v34, %v12428_v10  ;;  %v15910_v10 = vld [vmem:[%s22662_s16 + $0x4] ss:$0 sm:$0xff] }
0x2bf6   : > { %v12433_v11 = vmul.f32 %v22073_v42, %v22073_v42 }
0x2bf7   : > { %v12432_v12 = vmul.f32 %v22076_v24, %v22076_v24 }
0x2bf8   : > { %v12437_v28 = vsel %vm775_vm4, %v12433_v11, 0.0 }
0x2bf9   : > { %12438 = vadd.xlane.f32.xlu0 %v12437_v28  ;;  %v12434_v22 = vsel %vm775_vm4, %v12432_v12, 0.0 }
0x2bfa   : > { %12435 = vadd.xlane.f32.xlu1 %v12434_v22 }
0x2c86   : > { %v12439_v44 = vpop.xlane.xlu0 %12438 }
0x2c87   : > { %v12441_v45 = vmul.f32 0.03125, %v12439_v44  ;;  %v12436_v46 = vpop.xlane.xlu1 %12435 }
0x2c88   : > { %v12440_v47 = vmul.f32 0.03125, %v12436_v46 }
0x2c89   : > { %v12443_v48 = vadd.f32 1e-05, %v12441_v45 }
0x2c8a   : > { %v12442_v62 = vadd.f32 1e-05, %v12440_v47 }
0x2c8b   : > { %19799 = vrsqrt.f32 %v12443_v48 }
0x2c8c   : > { %19801 = vrsqrt.f32 %v12442_v62 }
0x2c95   : > { %v19800_v60 = vpop.eup %19799 }
0x2c96   : > { %v19802_v6 = vpop.eup %19801  ;;  %v12447_v51 = vmul.f32 %v19800_v60, %v22073_v42 }
0x2c97   : > { %v12446_v52 = vmul.f32 %v19802_v6, %v22076_v24 }
0x2c98   : > { %v12455_v56 = vmul.f32 %v15883_v50, %v12447_v51 }
0x2c99   : > { %v12454_v57 = vmul.f32 %v15883_v50, %v12446_v52  ;;  %v15913_v50 = vld [vmem:[%s22703_s1 + $0x5] ss:$0 sm:$0xff]  ;;  %s22603_s1 = scalar_lea.hbm %s22708_s23, %s16065_s22 }
0x2c9a   : > { %v12463_v58 = vadd.f32 %v15884_v55, %v12455_v56 }
0x2c9b   : > { %v12462_v37 = vadd.f32 %v15884_v55, %v12454_v57  ;;  %v15914_v55 = vld [vmem:[%s22704_s21 + $0x5] ss:$0 sm:$0xff] }
0x2c9d   : > { %18176 = vmatprep.mubr.msk.f32.mxu1 %vm775_vm4, %v12462_v37  ;;  %v15921_v37 = vld [vmem:[%s22702_s6 + $0x2b0] sm:$0xff] }
0x2c9e   : > { %18177 = vmatmul.mubr.msk.f32.vlgmr.msra.gmra.mrb[140].mxu1 %vm775_vm4, %v12463_v58  ;;  %v15922_v58 = vld [vmem:[%s22702_s6 + $0x2b8] sm:$0xff] }
0x2c9f   : > { %19378 = vmatpush3.bf16.msra.mxu1 %v19375_v26  ;;  %v15944_v26 = vld [vmem:[%s22653_s7 + $0x2a8] sm:$0xff] }
0x2ca0   : > { %19380 = vmatprep.subr.bf16.mxu1 %v19379_v33 }
0x2ca3   : > { %19382 = vmatpush3.bf16.msra.mxu1 %v19379_v33  ;;  %v15951_v33 = vld [vmem:[%s22653_s7 + $0x2e0] sm:$0xff] }
0x2ca4   : > { %19384 = vmatprep.subr.bf16.mxu1 %v19383_v54 }
0x2d71   : > { %v18178_v1 = vpop.f32.mrb[140].mxu1 }
0x2d72   : > { %v12555_v2 = vadd.f32 %v18178_v1, %v15890_v0  ;;  %v12549_v35 = vpop.f32.mrb[141].mxu1  ;;  %v15923_v1 = vld [vmem:[%s22702_s6 + $0x2c0] sm:$0xff] }
0x2d73   : > { %v12550_v4 = vadd.f32 %v15890_v0, %v12549_v35  ;;  %v19427_v35 = vpack.c.bf16 %v15950_v27, %v15949_v59 }
0x2d74   : > { %v12559_v9 = vmax.f32 %v12555_v2, 0.0  ;;  %v19387_v2 = vpack.c.bf16 %v15922_v58, %v15921_v37 }
0x2d75   : > { %v12558_v5 = vmax.f32 %v12550_v4, 0.0  ;;  %v15924_v4 = vld [vmem:[%s22702_s6 + $0x2c8] sm:$0xff] }
0x2d77   : > { %18211 = vmatprep.mubr.f32.mxu0 %v12558_v5  ;;  %v15963_v5 = vld [vmem:[%s22654_s8 + $0x280] sm:$0xff] }
0x2d78   : > { %18212 = vmatmul.mubr.f32.vlgmr.msra.gmra.mrb[118].mxu0 %v12559_v9  ;;  %v15964_v9 = vld [vmem:[%s22654_s8 + $0x288] sm:$0xff] }
0x2d79   : > { %19410 = vmatpush3.bf16.msra.mxu0 %v19407_v49  ;;  %v19415_v49 = vpack.c.bf16 %v15944_v26, %v15943_v25  ;;  %v19856_v26 = vld [vmem:[%s22707_s29] sm:$0xff] }
0x2d7a   : > { %19412 = vmatprep.subr.bf16.mxu0 %v19411_v38 }
0x2d7d   : > { %19414 = vmatpush3.bf16.msra.mxu0 %v19411_v38  ;;  %v19431_v38 = vpack.c.bf16 %v15952_v36, %v15951_v33 }
0x2d7e   : > { %19424 = vmatprep.subr.bf16.mxu0 %v19423_v53 }
0x2e4b   : > { %v18213_v7 = vpop.f32.mrb[118].mxu0 }
0x2e4c   : > { %v12653_v42 = vadd.f32 %v18213_v7, %v22064_v3  ;;  %v12643_v24 = vpop.f32.mrb[119].mxu0  ;;  %v19391_v7 = vpack.c.bf16 %v15924_v4, %v15923_v1 }
0x2e4d   : > { %v12652_v11 = vadd.f32 %v12643_v24, %v22066_v34  ;;  %v15926_v24 = vld [vmem:[%s22702_s6 + $0x2d8] sm:$0xff] }
0x2e4e   : > { %v22162_v12 = vadd.f32 %v15910_v10, %v12653_v42  ;;  %v15925_v42 = vld [vmem:[%s22702_s6 + $0x2d0] sm:$0xff] }
0x2e4f   : > { %v22164_v28 = vadd.f32 %v15910_v10, %v12652_v11  ;;  %v19439_v10 = vpack.c.bf16 %v15964_v9, %v15963_v5  ;;  %v15965_v11 = vld [vmem:[%s22654_s8 + $0x290] sm:$0xff] }
0x2e50   : > { %v12671_v22 = vsel %vm775_vm4, %v22162_v12, 0.0 }
0x2e51   : > { %12672 = vadd.xlane.f32.xlu0 %v12671_v22  ;;  %v12668_v13 = vsel %vm775_vm4, %v22164_v28, 0.0  ;;  %v15966_v22 = vld [vmem:[%s22654_s8 + $0x298] sm:$0xff] }
0x2e52   : > { %12669 = vadd.xlane.f32.xlu1 %v12668_v13  ;;  %v19395_v13 = vpack.c.bf16 %v15926_v24, %v15925_v42 }
0x2ede   : > { %v12673_v14 = vpop.xlane.xlu0 %12672 }
0x2edf   : > { %v12675_v15 = vmul.f32 0.03125, %v12673_v14  ;;  %v12670_v16 = vpop.xlane.xlu1 %12669  ;;  %v19443_v14 = vpack.c.bf16 %v15966_v22, %v15965_v11 }
0x2ee0   : > { %v12674_v17 = vmul.f32 0.03125, %v12670_v16  ;;  %v15928_v16 = vld [vmem:[%s22702_s6 + $0x2e8] sm:$0xff] }
0x2ee1   : > { %v12677_v3 = vsub.f32 %v22162_v12, %v12675_v15  ;;  %v15927_v15 = vld [vmem:[%s22702_s6 + $0x2e0] sm:$0xff] }
0x2ee2   : > { %v12676_v34 = vsub.f32 %v22164_v28, %v12674_v17  ;;  %v15971_v17 = vld [vmem:[%s22654_s8 + $0x2c0] sm:$0xff] }
0x2ee3   : > { %v12679_v32 = vmul.f32 %v12677_v3, %v12677_v3 }
0x2ee4   : > { %v12678_v18 = vmul.f32 %v12676_v34, %v12676_v34 }
0x2ee5   : > { %v12683_v19 = vsel %vm775_vm4, %v12679_v32, 0.0 }
0x2ee6   : > { %12684 = vadd.xlane.f32.xlu0 %v12683_v19  ;;  %v12680_v43 = vsel %vm775_vm4, %v12678_v18, 0.0  ;;  %v15929_v18 = vld [vmem:[%s22702_s6 + $0x2f0] sm:$0xff]  ;;  %v15930_v19 = vld [vmem:[%s22702_s6 + $0x2f8] sm:$0xff]  ;;  %s19863_s6 = scalar_lea.vmem %s19862_s30, 512 }
0x2ee7   : > { %12681 = vadd.xlane.f32.xlu1 %v12680_v43  ;;  %v15973_v43 = vld [vmem:[%s22654_s8 + $0x2d0] sm:$0xff]  ;;  %v19403_v21 = vpack.c.bf16 %v15930_v19, %v15929_v18  ;;  %p19865_p1 = scmp.lt.s32.totalorder %s19863_s6, %s19857_s27 }
0x2ee8   : > { %v19459_v29 = vpack.c.bf16 %v15974_v20, %v15973_v43 }
0x2ee9   : > { %p19866_p2 = por %p19865_p1, %p19864_p0 }
0x2eeb   : > { %p19867_p3 = pnand %p19866_p2, %p19860_p13 }
0x2f73   : > { %v12685_v44 = vpop.xlane.xlu0 %12684 }
0x2f74   : > { %v12687_v45 = vmul.f32 0.03125, %v12685_v44  ;;  %v12682_v46 = vpop.xlane.xlu1 %12681  ;;  %v15969_v44 = vld [vmem:[%s22654_s8 + $0x2b0] sm:$0xff] }
0x2f75   : > { %v12686_v47 = vmul.f32 0.03125, %v12682_v46 }
0x2f76   : > { %v12689_v48 = vadd.f32 1e-05, %v12687_v45  ;;  %v15970_v45 = vld [vmem:[%s22654_s8 + $0x2b8] sm:$0xff] }
0x2f77   : > { %v12688_v62 = vadd.f32 1e-05, %v12686_v47  ;;  %v19451_v46 = vpack.c.bf16 %v15970_v45, %v15969_v44  ;;  %v15975_v47 = vld [vmem:[%s22654_s8 + $0x2e0] sm:$0xff] }
0x2f78   : > { %19803 = vrsqrt.f32 %v12689_v48  ;;  %v15976_v48 = vld [vmem:[%s22654_s8 + $0x2e8] sm:$0xff] }
0x2f79   : > { %19805 = vrsqrt.f32 %v12688_v62  ;;  %v19463_v62 = vpack.c.bf16 %v15976_v48, %v15975_v47 }
0x2f82   : > { %v19804_v60 = vpop.eup %19803 }
0x2f83   : > { %v19806_v6 = vpop.eup %19805  ;;  %v12693_v51 = vmul.f32 %v19804_v60, %v12677_v3  ;;  %v15972_v3 = vld [vmem:[%s22654_s8 + $0x2c8] sm:$0xff]  ;;  %v15977_v60 = vld [vmem:[%s22654_s8 + $0x2f0] sm:$0xff] }
0x2f84   : > { %v12692_v52 = vmul.f32 %v19806_v6, %v12676_v34  ;;  %v19399_v34 = vpack.c.bf16 %v15928_v16, %v15927_v15  ;;  %v19455_v32 = vpack.c.bf16 %v15972_v3, %v15971_v17 }
0x2f85   : > { %v12701_v56 = vmul.f32 %v15913_v50, %v12693_v51 }
0x2f86   : > { %v12700_v57 = vmul.f32 %v15913_v50, %v12692_v52  ;;  %v15978_v50 = vld [vmem:[%s22654_s8 + $0x2f8] sm:$0xff] }
0x2f87   : > { %v22230_v0 = vadd.f32 %v15914_v55, %v12701_v56  ;;  %v19467_v6 = vpack.c.bf16 %v15978_v50, %v15977_v60 }
0x2f88   : > { %v22228_v61 = vadd.f32 %v15914_v55, %v12700_v57 }
0x2f8a   : > { %18222 = vmatprep.mubr.msk.f32.mxu1 %vm775_vm4, %v22228_v61  ;;  %18266 = vmatprep.mubr.msk.f32.mxu0 %vm775_vm4, %v22228_v61 }
0x2f8b   : > { %18223 = vmatmul.mubr.msk.f32.vlgmr.msra.gmra.mrb[142].mxu1 %vm775_vm4, %v22230_v0  ;;  %18267 = vmatmul.mubr.msk.f32.vlgmr.msra.gmra.mrb[120].mxu0 %vm775_vm4, %v22230_v0 }
0x2f8c   : > { %19386 = vmatpush3.bf16.msra.mxu1 %v19383_v54  ;;  %19426 = vmatpush3.bf16.msra.mxu0 %v19423_v53  ;;  %v15967_v54 = vld [vmem:[%s22654_s8 + $0x2a0] sm:$0xff] }
0x2f8d   : > { %18233 = vmatprep.mubr.msk.f32.mxu1 %vm775_vm4, %v22228_v61  ;;  %18288 = vmatprep.mubr.msk.f32.mxu0 %vm775_vm4, %v22228_v61  ;;  %v19447_v53 = vpack.c.bf16 %v15968_v41, %v15967_v54 }
0x2f8e   : > { %19388 = vmatprep.subr.bf16.mxu1 %v19387_v2  ;;  %19428 = vmatprep.subr.bf16.mxu0 %v19427_v35 }
0x2f90   : > { %19390 = vmatpush3.bf16.msra.mxu1 %v19387_v2  ;;  %19430 = vmatpush3.bf16.msra.mxu0 %v19427_v35 }
0x2f91   : > { %19392 = vmatprep.subr.bf16.mxu1 %v19391_v7  ;;  %19440 = vmatprep.subr.bf16.mxu0 %v19439_v10 }
0x2f93   : > { %18234 = vmatmul.mubr.msk.f32.vlgmr.msra.gmra.mrb[144].mxu1 %vm775_vm4, %v22230_v0  ;;  %18289 = vmatmul.mubr.msk.f32.vlgmr.msra.gmra.mrb[122].mxu0 %vm775_vm4, %v22230_v0 }
0x2f94   : > { %19394 = vmatpush3.bf16.msra.mxu1 %v19391_v7  ;;  %18244 = vmatprep.mubr.msk.f32.mxu1 %vm775_vm4, %v22228_v61 }
0x2f95   : > { %19442 = vmatpush3.bf16.msra.mxu0 %v19439_v10  ;;  %18310 = vmatprep.mubr.msk.f32.mxu0 %vm775_vm4, %v22228_v61 }
0x2f96   : > { %19396 = vmatprep.subr.bf16.mxu1 %v19395_v13  ;;  %19444 = vmatprep.subr.bf16.mxu0 %v19443_v14 }
0x2f98   : > { %19398 = vmatpush3.bf16.msra.mxu1 %v19395_v13 }
0x2f99   : > { %19446 = vmatpush3.bf16.msra.mxu0 %v19443_v14  ;;  %19400 = vmatprep.subr.bf16.mxu1 %v19399_v34 }
0x2f9a   : > { %19456 = vmatprep.subr.bf16.mxu0 %v19455_v32 }
0x2f9b   : > { %18245 = vmatmul.mubr.msk.f32.vlgmr.msra.gmra.mrb[146].mxu1 %vm775_vm4, %v22230_v0 }
0x2f9c   : > { %18311 = vmatmul.mubr.msk.f32.vlgmr.msra.gmra.mrb[124].mxu0 %vm775_vm4, %v22230_v0  ;;  %19402 = vmatpush3.bf16.msra.mxu1 %v19399_v34 }
0x2f9d   : > { %18255 = vmatprep.mubr.msk.f32.mxu1 %vm775_vm4, %v22228_v61  ;;  %19458 = vmatpush3.bf16.msra.mxu0 %v19455_v32 }
0x2f9e   : > { %18332 = vmatprep.mubr.msk.f32.mxu0 %vm775_vm4, %v22228_v61  ;;  %19404 = vmatprep.subr.bf16.mxu1 %v19403_v21 }
0x2f9f   : > { %19460 = vmatprep.subr.bf16.mxu0 %v19459_v29 }
0x2fa0   : > { %19406 = vmatpush3.bf16.msra.mxu1 %v19403_v21  ;;  %v19855_v21 = vld [vmem:[%s22707_s29 + $0x8] sm:$0xff] }
0x2fa1   : > { %19462 = vmatpush3.bf16.msra.mxu0 %v19459_v29  ;;  %19416 = vmatprep.subr.bf16.mxu1 %v19415_v49 }
0x2fa3   : > { %18256 = vmatmul.mubr.msk.f32.vlgmr.msra.gmra.mrb[148].mxu1 %vm775_vm4, %v22230_v0 }
0x2fa4   : > { %18333 = vmatmul.mubr.msk.f32.vlgmr.msra.gmra.mrb[126].mxu0 %vm775_vm4, %v22230_v0  ;;  %19418 = vmatpush3.bf16.msra.mxu1 %v19415_v49 }
0x2fa5   : > { %18277 = vmatprep.mubr.msk.f32.mxu1 %vm775_vm4, %v22228_v61  ;;  %19420 = vmatprep.subr.bf16.mxu1 %v19419_v63 }
0x2fa8   : > { %19422 = vmatpush3.bf16.msra.mxu1 %v19419_v63 }
0x2fa9   : > { %19432 = vmatprep.subr.bf16.mxu1 %v19431_v38 }
0x2fab   : > { %18278 = vmatmul.mubr.msk.f32.vlgmr.msra.gmra.mrb[150].mxu1 %vm775_vm4, %v22230_v0 }
0x2fac   : > { %19434 = vmatpush3.bf16.msra.mxu1 %v19431_v38  ;;  %18299 = vmatprep.mubr.msk.f32.mxu1 %vm775_vm4, %v22228_v61 }
0x2fad   : > { %19436 = vmatprep.subr.bf16.mxu1 %v19435_v23 }
0x2fb0   : > { %19438 = vmatpush3.bf16.msra.mxu1 %v19435_v23 }
0x2fb1   : > { %19448 = vmatprep.subr.bf16.mxu1 %v19447_v53 }
0x2fb3   : > { %18300 = vmatmul.mubr.msk.f32.vlgmr.msra.gmra.mrb[152].mxu1 %vm775_vm4, %v22230_v0 }
0x2fb4   : > { %19450 = vmatpush3.bf16.msra.mxu1 %v19447_v53  ;;  %18321 = vmatprep.mubr.msk.f32.mxu1 %vm775_vm4, %v22228_v61 }
0x2fb5   : > { %19452 = vmatprep.subr.bf16.mxu1 %v19451_v46 }
0x2fb8   : > { %19454 = vmatpush3.bf16.msra.mxu1 %v19451_v46 }
0x2fb9   : > { %19464 = vmatprep.subr.bf16.mxu1 %v19463_v62 }
0x2fbb   : > { %18322 = vmatmul.mubr.msk.f32.vlgmr.msra.gmra.mrb[154].mxu1 %vm775_vm4, %v22230_v0 }
0x2fbc   : > { %19466 = vmatpush3.bf16.msra.mxu1 %v19463_v62  ;;  %18343 = vmatprep.mubr.msk.f32.mxu1 %vm775_vm4, %v22228_v61 }
0x2fbd   : > { %19468 = vmatprep.subr.bf16.mxu1 %v19467_v6 }
0x2fc0   : > { %19470 = vmatpush3.bf16.msra.mxu1 %v19467_v6 }
0x2fc3   : > { %18344 = vmatmul.mubr.msk.f32.vlgmr.msra.gmra.mrb[156].mxu1 %vm775_vm4, %v22230_v0 }
0x305e   : > { %v18224_v51 = vpop.f32.mrb[142].mxu1  ;;  %v18268_v52 = vpop.f32.mrb[120].mxu0 }
0x305f   : > { %v12799_v55 = vpop.f32.mrb[143].mxu1  ;;  %v13116_v56 = vpop.f32.mrb[121].mxu0 }
0x3060   : > { %v19471_v57 = vpack.c.bf16 %v18268_v52, %v13116_v56  ;;  %18350 = vmatprep.mubr.msk.f32.mxu0 %vm1773_vm5, %v12799_v55 }
0x3062   : > { %19473 = vmatprep.subr.msk.bf16.mxu0 %vm20337_vm6, %v19471_v57 }
0x3063   : > { %19476 = vmatpush3.bf16.xpose.msk.msra.mxu0 %vm20337_vm6, %v19471_v57 }
0x3066   : > { %v18235_v37 = vpop.f32.mrb[144].mxu1  ;;  %v18290_v58 = vpop.f32.mrb[122].mxu0 }
0x3067   : > { %v12874_v59 = vpop.f32.mrb[145].mxu1  ;;  %v13266_v27 = vpop.f32.mrb[123].mxu0 }
0x3068   : > { %v19483_v61 = vpack.c.bf16 %v18290_v58, %v13266_v27  ;;  %18357 = vmatprep.mubr.msk.f32.mxu1 %vm1773_vm5, %v12874_v59 }
0x306a   : > { %19485 = vmatprep.subr.msk.bf16.mxu0 %vm20337_vm6, %v19483_v61  ;;  %18351 = vmatmul.mubr.msk.f32.vlgmr.msra.gmra.mrb[128].mxu0 %vm1773_vm5, %v18224_v51 }
0x306b   : > { %19488 = vmatpush3.bf16.xpose.msk.msra.mxu0 %vm20337_vm6, %v19483_v61 }
0x306e   : > { %v18246_v0 = vpop.f32.mrb[146].mxu1 }
0x306f   : > { %v18312_v1 = vpop.f32.mrb[124].mxu0  ;;  %v12949_v2 = vpop.f32.mrb[147].mxu1 }
0x3070   : > { %v13433_v35 = vpop.f32.mrb[125].mxu0  ;;  %18364 = vmatprep.mubr.msk.f32.mxu0 %vm1773_vm5, %v12949_v2 }
0x3071   : > { %v19495_v4 = vpack.c.bf16 %v18312_v1, %v13433_v35 }
0x3072   : > { %18365 = vmatmul.mubr.msk.f32.vlgmr.msra.gmra.mrb[130].mxu0 %vm1773_vm5, %v18246_v0 }
0x3073   : > { %19496 = vmatprep.subr.bf16.mxu0 %v19495_v4 }
0x3074   : > { %19498 = vmatpush3.bf16.msra.mxu0 %v19495_v4 }
0x3076   : > { %v18257_v5 = vpop.f32.mrb[148].mxu1 }
0x3077   : > { %v18334_v9 = vpop.f32.mrb[126].mxu0  ;;  %v13024_v7 = vpop.f32.mrb[149].mxu1 }
0x3078   : > { %v13583_v10 = vpop.f32.mrb[127].mxu0 }
0x3079   : > { %v19503_v42 = vpack.c.bf16 %v18334_v9, %v13583_v10 }
0x307e   : > { %v18279_v24 = vpop.f32.mrb[150].mxu1 }
0x307f   : > { %v13191_v11 = vpop.f32.mrb[151].mxu1 }
0x3080   : > { %v19477_v22 = vpack.c.bf16 %v18279_v24, %v13191_v11 }
0x3082   : > { %19479 = vmatprep.subr.msk.bf16.mxu1 %vm20337_vm6, %v19477_v22 }
0x3083   : > { %19482 = vmatpush3.bf16.xpose.msk.msra.mxu1 %vm20337_vm6, %v19477_v22 }
0x3086   : > { %v18301_v13 = vpop.f32.mrb[152].mxu1 }
0x3087   : > { %v13341_v14 = vpop.f32.mrb[153].mxu1 }
0x3088   : > { %v19489_v15 = vpack.c.bf16 %v18301_v13, %v13341_v14 }
0x308a   : > { %18358 = vmatmul.mubr.msk.f32.vlgmr.msra.gmra.mrb[158].mxu1 %vm1773_vm5, %v18235_v37  ;;  %19491 = vmatprep.subr.msk.bf16.mxu1 %vm20337_vm6, %v19489_v15 }
0x308b   : > { %19494 = vmatpush3.bf16.xpose.msk.msra.mxu1 %vm20337_vm6, %v19489_v15  ;;  %18371 = vmatprep.mubr.msk.f32.mxu1 %vm1773_vm5, %v13024_v7 }
0x308c   : > { %19504 = vmatprep.subr.bf16.mxu1 %v19503_v42 }
0x308e   : > { %v18323_v16 = vpop.f32.mrb[154].mxu1 }
0x308f   : > { %v13508_v17 = vpop.f32.mrb[155].mxu1 }
0x3090   : > { %v22399_v3 = vpack.c.bf16 %v18323_v16, %v13508_v17 }
0x3092   : > { %18372 = vmatmul.mubr.msk.f32.vlgmr.msra.gmra.mrb[160].mxu1 %vm1773_vm5, %v18257_v5  ;;  %19500 = vmatprep.subr.bf16.mxu0 %v22399_v3 }
0x3093   : > { %19506 = vmatpush3.bf16.msra.mxu1 %v19503_v42 }
0x3096   : > { %v18345_v34 = vpop.f32.mrb[156].mxu1 }
0x3097   : > { %v13658_v32 = vpop.f32.mrb[157].mxu1 }
0x3098   : > { %v22403_v18 = vpack.c.bf16 %v18345_v34, %v13658_v32 }
0x313d   : > { %v18352_v19 = vpop.f32.mrb[128].mxu0 }
0x313e   : > { %v14016_v43 = vmul.f32 0.17677669, %v18352_v19  ;;  %v13745_v8 = vpop.f32.mrb[129].mxu0 }
0x313f   : > { %v14015_v20 = vmul.f32 0.17677669, %v13745_v8 }
0x3140   : > { %v14024_v25 = vadd.f32 %v19855_v21, %v14016_v43 }
0x3141   : > { %v14023_v29 = vadd.f32 %v19856_v26, %v14015_v20 }
0x3142   : > { %v14034_v49 = vsel %vm2138_vm7, %v14024_v25, -inf }
0x3143   : > { %14035 = vmax.xlane.f32.xlu0 %v14034_v49  ;;  %v14031_v30 = vsel %vm2138_vm7, %v14023_v29, -inf }
0x3144   : > { %14032 = vmax.xlane.f32.xlu1 %v14031_v30 }
0x3145   : > { %v18366_v31 = vpop.f32.mrb[130].mxu0 }
0x3146   : > { %v14020_v63 = vmul.f32 0.17677669, %v18366_v31  ;;  %v13919_v33 = vpop.f32.mrb[131].mxu0 }
0x3147   : > { %v14019_v36 = vmul.f32 0.17677669, %v13919_v33 }
0x3148   : > { %v14028_v38 = vadd.f32 %v19855_v21, %v14020_v63 }
0x3149   : > { %v14027_v39 = vadd.f32 %v19856_v26, %v14019_v36 }
0x314a   : > { %v14046_v40 = vsel %vm2138_vm7, %v14028_v38, -inf }
0x314b   : > { %14047 = vmax.xlane.f32.xlu0 %v14046_v40  ;;  %v14043_v23 = vsel %vm2138_vm7, %v14027_v39, -inf }
0x314c   : > { %14044 = vmax.xlane.f32.xlu1 %v14043_v23 }
0x315d   : > { %v18359_v54 = vpop.f32.mrb[158].mxu1 }
0x315e   : > { %v14018_v41 = vmul.f32 0.17677669, %v18359_v54  ;;  %v13832_v53 = vpop.f32.mrb[159].mxu1 }
0x315f   : > { %v14017_v44 = vmul.f32 0.17677669, %v13832_v53 }
0x3160   : > { %v14026_v45 = vadd.f32 %v19855_v21, %v14018_v41 }
0x3161   : > { %v14025_v46 = vadd.f32 %v19856_v26, %v14017_v44 }
0x3162   : > { %v14040_v47 = vsel %vm2138_vm7, %v14026_v45, -inf }
0x3163   : > { %14041 = vmax.xlane.f32.xlu0 %v14040_v47  ;;  %v14037_v48 = vsel %vm2138_vm7, %v14025_v46, -inf }
0x3164   : > { %14038 = vmax.xlane.f32.xlu1 %v14037_v48 }
0x3165   : > { %v18373_v62 = vpop.f32.mrb[160].mxu1 }
0x3166   : > { %v14022_v60 = vmul.f32 0.17677669, %v18373_v62  ;;  %v14006_v50 = vpop.f32.mrb[161].mxu1 }
0x3167   : > { %v14021_v6 = vmul.f32 0.17677669, %v14006_v50 }
0x3168   : > { %v14030_v51 = vadd.f32 %v19855_v21, %v14022_v60 }
0x3169   : > { %v14029_v52 = vadd.f32 %v19856_v26, %v14021_v6 }
0x316a   : > { %v14052_v55 = vsel %vm2138_vm7, %v14030_v51, -inf }
0x316b   : > { %14053 = vmax.xlane.f32.xlu0 %v14052_v55  ;;  %v14049_v56 = vsel %vm2138_vm7, %v14029_v52, -inf }
0x316c   : > { %14050 = vmax.xlane.f32.xlu1 %v14049_v56 }
0x31d0   : > { %v14036_v57 = vpop.xlane.xlu0 %14035 }
0x31d1   : > { %v14056_v37 = vsub.f32 %v14024_v25, %v14036_v57  ;;  %v14033_v58 = vpop.xlane.xlu1 %14032 }
0x31d2   : > { %v14055_v59 = vsub.f32 %v14023_v29, %v14033_v58 }
0x31d3   : > { %v14065_v27 = vmul.f32 1.442695, %v14056_v37 }
0x31d4   : > { %v14063_v61 = vmul.f32 1.442695, %v14055_v59  ;;  %v16011_v59 = vld [vmem:[%s22655_s9 + $0xa0] sm:$0xff] }
0x31d5   : > { %19807 = vpow2.f32 %v14065_v27  ;;  %18402 = vmatprep.subr.mxu1 %v16011_v59  ;;  %v16013_v27 = vld [vmem:[%s22655_s9 + $0xb0] sm:$0xff] }
0x31d6   : > { %19809 = vpow2.f32 %v14063_v61  ;;  %v16014_v61 = vld [vmem:[%s22655_s9 + $0xb8] sm:$0xff] }
0x31d8   : > { %v14048_v0 = vpop.xlane.xlu0 %14047 }
0x31d9   : > { %v14060_v1 = vsub.f32 %v14028_v38, %v14048_v0  ;;  %v14045_v2 = vpop.xlane.xlu1 %14044 }
0x31da   : > { %v14059_v35 = vsub.f32 %v14027_v39, %v14045_v2 }
0x31db   : > { %v14073_v4 = vmul.f32 1.442695, %v14060_v1 }
0x31dc   : > { %v14071_v5 = vmul.f32 1.442695, %v14059_v35 }
0x31dd   : > { %19811 = vpow2.f32 %v14073_v4 }
0x31de   : > { %19813 = vpow2.f32 %v14071_v5 }
0x31df   : > { %v19808_v9 = vpop.eup %19807 }
0x31e0   : > { %v19810_v7 = vpop.eup %19809  ;;  %v14082_v10 = vsel %vm2138_vm7, %v19808_v9, 0.0 }
0x31e1   : > { %14083 = vadd.xlane.f32.xlu0 %v14082_v10  ;;  %v14079_v42 = vsel %vm2138_vm7, %v19810_v7, 0.0 }
0x31e2   : > { %14080 = vadd.xlane.f32.xlu1 %v14079_v42 }
0x31e7   : > { %v19812_v24 = vpop.eup %19811 }
0x31e8   : > { %v19814_v11 = vpop.eup %19813  ;;  %v14094_v22 = vsel %vm2138_vm7, %v19812_v24, 0.0 }
0x31e9   : > { %14095 = vadd.xlane.f32.xlu0 %v14094_v22  ;;  %v14091_v13 = vsel %vm2138_vm7, %v19814_v11, 0.0 }
0x31ea   : > { %14092 = vadd.xlane.f32.xlu1 %v14091_v13 }
0x31f0   : > { %v14042_v14 = vpop.xlane.xlu0 %14041 }
0x31f1   : > { %v14058_v15 = vsub.f32 %v14026_v45, %v14042_v14  ;;  %v14039_v16 = vpop.xlane.xlu1 %14038 }
0x31f2   : > { %v14057_v17 = vsub.f32 %v14025_v46, %v14039_v16 }
0x31f3   : > { %v14069_v34 = vmul.f32 1.442695, %v14058_v15 }
0x31f4   : > { %v14067_v32 = vmul.f32 1.442695, %v14057_v17 }
0x31f5   : > { %19815 = vpow2.f32 %v14069_v34 }
0x31f6   : > { %19817 = vpow2.f32 %v14067_v32 }
0x31f8   : > { %v14054_v19 = vpop.xlane.xlu0 %14053 }
0x31f9   : > { %v14062_v43 = vsub.f32 %v14030_v51, %v14054_v19  ;;  %v14051_v8 = vpop.xlane.xlu1 %14050 }
0x31fa   : > { %v14061_v20 = vsub.f32 %v14029_v52, %v14051_v8 }
0x31fb   : > { %v14077_v21 = vmul.f32 1.442695, %v14062_v43 }
0x31fc   : > { %v14075_v25 = vmul.f32 1.442695, %v14061_v20 }
0x31fd   : > { %19819 = vpow2.f32 %v14077_v21 }
0x31fe   : > { %19821 = vpow2.f32 %v14075_v25 }
0x31ff   : > { %v19816_v26 = vpop.eup %19815 }
0x3200   : > { %v19818_v29 = vpop.eup %19817  ;;  %v14088_v49 = vsel %vm2138_vm7, %v19816_v26, 0.0 }
0x3201   : > { %14089 = vadd.xlane.f32.xlu0 %v14088_v49  ;;  %v14085_v30 = vsel %vm2138_vm7, %v19818_v29, 0.0 }
0x3202   : > { %14086 = vadd.xlane.f32.xlu1 %v14085_v30  ;;  %v16024_v30 = vld [vmem:[%s22656_s10 + $0x5] ss:$0 sm:$0xff] }
0x3207   : > { %v19820_v31 = vpop.eup %19819 }
0x3208   : > { %v19822_v63 = vpop.eup %19821  ;;  %v14100_v33 = vsel %vm2138_vm7, %v19820_v31, 0.0 }
0x3209   : > { %14101 = vadd.xlane.f32.xlu0 %v14100_v33  ;;  %v14097_v36 = vsel %vm2138_vm7, %v19822_v63, 0.0 }
0x320a   : > { %14098 = vadd.xlane.f32.xlu1 %v14097_v36 }
0x326e   : > { %v14084_v38 = vpop.xlane.xlu0 %14083 }
0x326f   : > { %19823 = vrcp.f32 %v14084_v38  ;;  %v14081_v39 = vpop.xlane.xlu1 %14080 }
0x3270   : > { %19825 = vrcp.f32 %v14081_v39 }
0x3276   : > { %v14096_v40 = vpop.xlane.xlu0 %14095 }
0x3277   : > { %19827 = vrcp.f32 %v14096_v40  ;;  %v14093_v23 = vpop.xlane.xlu1 %14092 }
0x3278   : > { %19829 = vrcp.f32 %v14093_v23 }
0x3279   : > { %v19824_v54 = vpop.eup %19823 }
0x327a   : > { %v19826_v41 = vpop.eup %19825  ;;  %v14112_v44 = vmul.f32 %v19824_v54, %v19808_v9 }
0x327b   : > { %v14111_v53 = vmul.f32 %v19826_v41, %v19810_v7 }
0x327d   : > { %18378 = vmatprep.mubr.msk.f32.mxu0 %vm2138_vm7, %v14111_v53 }
0x327e   : > { %18379 = vmatmul.mubr.msk.f32.vlgmr.msra.gmra.mrb[132].mxu0 %vm2138_vm7, %v14112_v44 }
0x327f   : > { %19502 = vmatpush3.bf16.msra.mxu0 %v22399_v3 }
0x3280   : > { %19508 = vmatprep.subr.bf16.mxu0 %v22403_v18 }
0x3281   : > { %v19828_v45 = vpop.eup %19827 }
0x3282   : > { %v19830_v46 = vpop.eup %19829  ;;  %v14116_v48 = vmul.f32 %v19828_v45, %v19812_v24 }
0x3283   : > { %v14115_v47 = vmul.f32 %v19830_v46, %v19814_v11 }
0x3285   : > { %18392 = vmatprep.mubr.msk.f32.mxu1 %vm2138_vm7, %v14115_v47 }
0x3286   : > { %18393 = vmatmul.mubr.msk.f32.vlgmr.msra.gmra.mrb[162].mxu1 %vm2138_vm7, %v14116_v48  ;;  %v16029_v48 = vld [vmem:[%s22659_s13 + $0xa0] sm:$0xff] }
0x3287   : > { %18403 = vmatpush3.msra.mxu1 %v16011_v59  ;;  %v16042_v59 = vld [vmem:[%s22661_s15 + $0x2a8] sm:$0xff] }
0x3288   : > { %18412 = vmatprep.subr.mxu1 %v16013_v27 }
0x328e   : > { %v14090_v62 = vpop.xlane.xlu0 %14089 }
0x328f   : > { %19831 = vrcp.f32 %v14090_v62  ;;  %v14087_v60 = vpop.xlane.xlu1 %14086  ;;  %v16030_v62 = vld [vmem:[%s22659_s13 + $0xa8] sm:$0xff] }
0x3290   : > { %19833 = vrcp.f32 %v14087_v60  ;;  %v19511_v60 = vpack.c.bf16 %v16030_v62, %v16029_v48 }
0x3296   : > { %v14102_v50 = vpop.xlane.xlu0 %14101 }
0x3297   : > { %19835 = vrcp.f32 %v14102_v50  ;;  %v14099_v6 = vpop.xlane.xlu1 %14098  ;;  %v16031_v50 = vld [vmem:[%s22659_s13 + $0xb0] sm:$0xff] }
0x3298   : > { %19837 = vrcp.f32 %v14099_v6  ;;  %v16032_v6 = vld [vmem:[%s22659_s13 + $0xb8] sm:$0xff] }
0x3299   : > { %v19832_v51 = vpop.eup %19831 }
0x329a   : > { %v19834_v3 = vpop.eup %19833  ;;  %v14114_v55 = vmul.f32 %v19832_v51, %v19816_v26  ;;  %v19515_v51 = vpack.c.bf16 %v16032_v6, %v16031_v50 }
0x329b   : > { %v14113_v52 = vmul.f32 %v19834_v3, %v19818_v29  ;;  %v16037_v3 = vld [vmem:[%s22661_s15 + $0x280] sm:$0xff] }
0x329d   : > { %18385 = vmatprep.mubr.msk.f32.mxu0 %vm2138_vm7, %v14113_v52  ;;  %v16038_v52 = vld [vmem:[%s22661_s15 + $0x288] sm:$0xff] }
0x329e   : > { %18386 = vmatmul.mubr.msk.f32.vlgmr.msra.gmra.mrb[134].mxu0 %vm2138_vm7, %v14114_v55  ;;  %v16039_v55 = vld [vmem:[%s22661_s15 + $0x290] sm:$0xff] }
0x329f   : > { %19510 = vmatpush3.bf16.msra.mxu0 %v22403_v18  ;;  %v16012_v18 = vld [vmem:[%s22655_s9 + $0xa8] sm:$0xff] }
0x32a0   : > { %18407 = vmatprep.subr.mxu0 %v16012_v18 }
0x32a1   : > { %v19836_v56 = vpop.eup %19835 }
0x32a2   : > { %v19838_v57 = vpop.eup %19837  ;;  %v14118_v58 = vmul.f32 %v19836_v56, %v19820_v31  ;;  %v19519_v56 = vpack.c.bf16 %v16038_v52, %v16037_v3 }
0x32a3   : > { %v14117_v37 = vmul.f32 %v19838_v57, %v19822_v63  ;;  %v16040_v57 = vld [vmem:[%s22661_s15 + $0x298] sm:$0xff] }
0x32a5   : > { %18399 = vmatprep.mubr.msk.f32.mxu0 %vm2138_vm7, %v14117_v37  ;;  %v19523_v37 = vpack.c.bf16 %v16040_v57, %v16039_v55  ;;  %v15088_v55 = vld [vmem:[%s22665_s19] sm:$0xff] }
0x32a6   : > { %18400 = vmatmul.mubr.msk.f32.vlgmr.msra.gmra.mrb[136].mxu0 %vm2138_vm7, %v14118_v58  ;;  %v16041_v58 = vld [vmem:[%s22661_s15 + $0x2a0] sm:$0xff] }
0x32a7   : > { %18408 = vmatpush3.msra.mxu0 %v16012_v18  ;;  %v16043_v18 = vld [vmem:[%s22661_s15 + $0x2b0] sm:$0xff] }
0x32a8   : > { %18417 = vmatprep.subr.mxu0 %v16014_v61 }
0x3351   : > { %v18380_v0 = vpop.f32.mrb[132].mxu0 }
0x3352   : > { %v14191_v1 = vpop.f32.mrb[133].mxu0 }
0x3353   : > { %18404 = vmatprep.mubr.msk.f32.mxu1 %vm1773_vm5, %v14191_v1  ;;  %v16045_v1 = vld [vmem:[%s22661_s15 + $0x2c0] sm:$0xff] }
0x3354   : > { %18405 = vmatmul.mubr.msk.f32.vlgmr.msra.gmra.mrb[164].mxu1 %vm1773_vm5, %v18380_v0 }
0x3355   : > { %18413 = vmatpush3.msra.mxu1 %v16013_v27  ;;  %v19527_v27 = vpack.c.bf16 %v16042_v59, %v16041_v58  ;;  %v15091_v58 = vld [vmem:[%s22665_s19 + $0x18] sm:$0xff] }
0x3356   : > { %19512 = vmatprep.subr.bf16.mxu1 %v19511_v60 }
0x3359   : > { %v18394_v2 = vpop.f32.mrb[162].mxu1 }
0x335a   : > { %v14353_v35 = vpop.f32.mrb[163].mxu1 }
0x335b   : > { %18414 = vmatprep.mubr.msk.f32.mxu1 %vm1773_vm5, %v14353_v35 }
0x335c   : > { %18415 = vmatmul.mubr.msk.f32.vlgmr.msra.gmra.mrb[166].mxu1 %vm1773_vm5, %v18394_v2  ;;  %v16046_v2 = vld [vmem:[%s22661_s15 + $0x2c8] sm:$0xff] }
0x335d   : > { %19514 = vmatpush3.bf16.msra.mxu1 %v19511_v60  ;;  %v19535_v35 = vpack.c.bf16 %v16046_v2, %v16045_v1 }
0x335e   : > { %19516 = vmatprep.subr.bf16.mxu1 %v19515_v51 }
0x3361   : > { %19518 = vmatpush3.bf16.msra.mxu1 %v19515_v51 }
0x3371   : > { %v18387_v4 = vpop.f32.mrb[134].mxu0 }
0x3372   : > { %v14272_v5 = vpop.f32.mrb[135].mxu0 }
0x3373   : > { %18409 = vmatprep.mubr.msk.f32.mxu0 %vm1773_vm5, %v14272_v5  ;;  %v16048_v5 = vld [vmem:[%s22661_s15 + $0x2d8] sm:$0xff] }
0x3374   : > { %18410 = vmatmul.mubr.msk.f32.vlgmr.msra.gmra.mrb[138].mxu0 %vm1773_vm5, %v18387_v4  ;;  %v16047_v4 = vld [vmem:[%s22661_s15 + $0x2d0] sm:$0xff] }
0x3375   : > { %18418 = vmatpush3.msra.mxu0 %v16014_v61  ;;  %v16044_v61 = vld [vmem:[%s22661_s15 + $0x2b8] sm:$0xff] }
0x3376   : > { %19520 = vmatprep.subr.bf16.mxu0 %v19519_v56  ;;  %v19531_v0 = vpack.c.bf16 %v16044_v61, %v16043_v18 }
0x3379   : > { %v18401_v9 = vpop.f32.mrb[136].mxu0 }
0x337a   : > { %v14434_v7 = vpop.f32.mrb[137].mxu0 }
0x337b   : > { %18419 = vmatprep.mubr.msk.f32.mxu0 %vm1773_vm5, %v14434_v7  ;;  %v16049_v7 = vld [vmem:[%s22661_s15 + $0x2e0] sm:$0xff] }
0x337c   : > { %18420 = vmatmul.mubr.msk.f32.vlgmr.msra.gmra.mrb[140].mxu0 %vm1773_vm5, %v18401_v9  ;;  %v19539_v9 = vpack.c.bf16 %v16048_v5, %v16047_v4  ;;  %v16055_v4 = vld [vmem:[%s22663_s17] ss:$0 sm:$0xff] }
0x337d   : > { %19522 = vmatpush3.bf16.msra.mxu0 %v19519_v56  ;;  %v15089_v56 = vld [vmem:[%s22665_s19 + $0x8] sm:$0xff] }
0x337e   : > { %19524 = vmatprep.subr.bf16.mxu0 %v19523_v37  ;;  %v19551_v57 = vpack.c.bf16 %v15089_v56, %v15088_v55 }
0x3380   : > { %19552 = vmatprep.subr.bf16.mxu1 %v19551_v57 }
0x3381   : > { %19526 = vmatpush3.bf16.msra.mxu0 %v19523_v37  ;;  %v15090_v37 = vld [vmem:[%s22665_s19 + $0x10] sm:$0xff] }
0x3382   : > { %19528 = vmatprep.subr.bf16.mxu0 %v19527_v27  ;;  %v19555_v59 = vpack.c.bf16 %v15091_v58, %v15090_v37 }
0x3385   : > { %19530 = vmatpush3.bf16.msra.mxu0 %v19527_v27 }
0x3386   : > { %19532 = vmatprep.subr.bf16.mxu0 %v19531_v0 }
0x3389   : > { %19534 = vmatpush3.bf16.msra.mxu0 %v19531_v0 }
0x338a   : > { %19536 = vmatprep.subr.bf16.mxu0 %v19535_v35 }
0x338d   : > { %19538 = vmatpush3.bf16.msra.mxu0 %v19535_v35 }
0x338e   : > { %19540 = vmatprep.subr.bf16.mxu0 %v19539_v9 }
0x3391   : > { %19542 = vmatpush3.bf16.msra.mxu0 %v19539_v9 }
0x3427   : > { %v18406_v10 = vpop.f32.mrb[164].mxu1 }
0x3428   : > { %v14520_v42 = vpop.f32.mrb[165].mxu1  ;;  %v14779_v13 = vsel %vm775_vm4, %v18406_v10, 0.0  ;;  %v16050_v10 = vld [vmem:[%s22661_s15 + $0x2e8] sm:$0xff] }
0x3429   : > { %v14772_v16 = vsel %vm775_vm4, %v14520_v42, 0.0  ;;  %v19543_v42 = vpack.c.bf16 %v16050_v10, %v16049_v7  ;;  %v16056_v10 = vld [vmem:[%s22664_s18] ss:$0 sm:$0xff] }
0x342b   : > { %19544 = vmatprep.subr.bf16.mxu0 %v19543_v42 }
0x342c   : > { %19546 = vmatpush3.bf16.msra.mxu0 %v19543_v42 }
0x342f   : > { %v18416_v24 = vpop.f32.mrb[166].mxu1 }
0x3430   : > { %v14682_v11 = vpop.f32.mrb[167].mxu1  ;;  %v14782_v32 = vsel %vm775_vm4, %v18416_v24, 0.0 }
0x3431   : > { %v14775_v43 = vsel %vm775_vm4, %v14682_v11, 0.0 }
0x3447   : > { %v18411_v22 = vpop.f32.mrb[138].mxu0 }
0x3448   : > { %v14780_v14 = vsel %vm775_vm4, %v18411_v22, 0.0  ;;  %v14601_v15 = vpop.f32.mrb[139].mxu0 }
0x3449   : > { %v14781_v17 = vadd.f32 %v14780_v14, %v14779_v13  ;;  %v14773_v34 = vsel %vm775_vm4, %v14601_v15, 0.0 }
0x344a   : > { %v14774_v19 = vadd.f32 %v14773_v34, %v14772_v16 }
0x344b   : > { %v14783_v8 = vadd.f32 %v14782_v32, %v14781_v17  ;;  %v16027_v17 = vld [vmem:[%s22657_s11 + $0x5] ss:$0 sm:$0xff] }
0x344c   : > { %v14776_v20 = vadd.f32 %v14775_v43, %v14774_v19  ;;  %v16028_v43 = vld [vmem:[%s22658_s12 + $0x5] ss:$0 sm:$0xff] }
0x344f   : > { %v18421_v21 = vpop.f32.mrb[140].mxu0 }
0x3450   : > { %v14784_v25 = vsel %vm775_vm4, %v18421_v21, 0.0  ;;  %v14763_v26 = vpop.f32.mrb[141].mxu0 }
0x3451   : > { %v14785_v29 = vadd.f32 %v14784_v25, %v14783_v8  ;;  %v14777_v49 = vsel %vm775_vm4, %v14763_v26, 0.0  ;;  %v16051_v26 = vld [vmem:[%s22661_s15 + $0x2f0] sm:$0xff] }
0x3452   : > { %v14778_v31 = vadd.f32 %v14777_v49, %v14776_v20 }
0x3453   : > { %v14787_v63 = vadd.f32 %v14785_v29, %v22162_v12  ;;  %v16052_v29 = vld [vmem:[%s22661_s15 + $0x2f8] sm:$0xff] }
0x3454   : > { %v14786_v33 = vadd.f32 %v14778_v31, %v22164_v28  ;;  %v19547_v49 = vpack.c.bf16 %v16052_v29, %v16051_v26 }
0x3455   : > { %v22471_v36 = vadd.f32 %v16024_v30, %v14787_v63 }
0x3456   : > { %v22473_v38 = vadd.f32 %v16024_v30, %v14786_v33  ;;  %19548 = vmatprep.subr.bf16.mxu0 %v19547_v49  ;;  %v16034_v30 = vld [vmem:[%s22660_s14 + $0x5] ss:$0 sm:$0xff] }
0x3457   : > { %v14805_v39 = vsel %vm775_vm4, %v22471_v36, 0.0  ;;  %19550 = vmatpush3.bf16.msra.mxu0 %v19547_v49 }
0x3458   : > { %14806 = vadd.xlane.f32.xlu0 %v14805_v39  ;;  %v14802_v40 = vsel %vm775_vm4, %v22473_v38, 0.0 }
0x3459   : > { %14803 = vadd.xlane.f32.xlu1 %v14802_v40 }
0x34e5   : > { %v14807_v23 = vpop.xlane.xlu0 %14806 }
0x34e6   : > { %v14809_v54 = vmul.f32 0.03125, %v14807_v23  ;;  %v14804_v41 = vpop.xlane.xlu1 %14803 }
0x34e7   : > { %v14808_v53 = vmul.f32 0.03125, %v14804_v41  ;;  %v16054_v41 = vld [vmem:[%s22662_s16 + $0x5] ss:$0 sm:$0xff] }
0x34e8   : > { %v22480_v12 = vsub.f32 %v22471_v36, %v14809_v54 }
0x34e9   : > { %v22483_v28 = vsub.f32 %v22473_v38, %v14808_v53 }
0x34ea   : > { %v14813_v44 = vmul.f32 %v22480_v12, %v22480_v12 }
0x34eb   : > { %v14812_v45 = vmul.f32 %v22483_v28, %v22483_v28 }
0x34ec   : > { %v14817_v46 = vsel %vm775_vm4, %v14813_v44, 0.0 }
0x34ed   : > { %14818 = vadd.xlane.f32.xlu0 %v14817_v46  ;;  %v14814_v47 = vsel %vm775_vm4, %v14812_v45, 0.0 }
0x34ee   : > { %14815 = vadd.xlane.f32.xlu1 %v14814_v47 }
0x357a   : > { %v14819_v24 = vpop.xlane.xlu0 %14818 }
0x357b   : > { %v14821_v11 = vmul.f32 0.03125, %v14819_v24  ;;  %v14816_v22 = vpop.xlane.xlu1 %14815 }
0x357c   : > { %v14820_v13 = vmul.f32 0.03125, %v14816_v22 }
0x357d   : > { %v14823_v14 = vadd.f32 1e-05, %v14821_v11 }
0x357e   : > { %v14822_v15 = vadd.f32 1e-05, %v14820_v13  ;;  %v16057_v13 = vld [vmem:[%s22666_s20] ss:$0 sm:$0xff] }
0x357f   : > { %19839 = vrsqrt.f32 %v14823_v14 }
0x3580   : > { %19841 = vrsqrt.f32 %v14822_v15 }
0x3589   : > { %v19840_v16 = vpop.eup %19839 }
0x358a   : > { %v19842_v34 = vpop.eup %19841  ;;  %v14827_v32 = vmul.f32 %v19840_v16, %v22480_v12 }
0x358b   : > { %v14826_v19 = vmul.f32 %v19842_v34, %v22483_v28 }
0x358c   : > { %v14835_v8 = vmul.f32 %v16027_v17, %v14827_v32 }
0x358d   : > { %v14834_v20 = vmul.f32 %v16027_v17, %v14826_v19 }
0x358e   : > { %v14843_v25 = vadd.f32 %v16028_v43, %v14835_v8 }
0x358f   : > { %v14842_v21 = vadd.f32 %v16028_v43, %v14834_v20 }
0x3591   : > { %18430 = vmatprep.mubr.msk.f32.mxu1 %vm775_vm4, %v14842_v21 }
0x3592   : > { %18431 = vmatmul.mubr.msk.f32.vlgmr.msra.gmra.mrb[168].mxu1 %vm775_vm4, %v14843_v25 }
0x3593   : > { %19554 = vmatpush3.bf16.msra.mxu1 %v19551_v57 }
0x3594   : > { %19556 = vmatprep.subr.bf16.mxu1 %v19555_v59 }
0x3597   : > { %19558 = vmatpush3.bf16.msra.mxu1 %v19555_v59 }
0x3665   : > { %v18432_v31 = vpop.f32.mrb[168].mxu1 }
0x3666   : > { %v14935_v63 = vadd.f32 %v18432_v31, %v16034_v30  ;;  %v14929_v33 = vpop.f32.mrb[169].mxu1 }
0x3667   : > { %v14930_v39 = vadd.f32 %v16034_v30, %v14929_v33 }
0x3668   : > { %v14939_v23 = vmax.f32 %v14935_v63, 0.0 }
0x3669   : > { %v14938_v40 = vmax.f32 %v14930_v39, 0.0 }
0x366b   : > { %18465 = vmatprep.mubr.f32.mxu0 %v14938_v40 }
0x366c   : > { %18466 = vmatmul.mubr.f32.vlgmr.msra.gmra.mrb[142].mxu0 %v14939_v23 }
0x373f   : > { %v18467_v54 = vpop.f32.mrb[142].mxu0 }
0x3740   : > { %v15033_v53 = vadd.f32 %v18467_v54, %v22471_v36  ;;  %v15023_v12 = vpop.f32.mrb[143].mxu0 }
0x3741   : > { %v15032_v28 = vadd.f32 %v15023_v12, %v22473_v38 }
0x3742   : > { %v15043_v44 = vadd.f32 %v16054_v41, %v15033_v53 }
0x3743   : > { %v15042_v45 = vadd.f32 %v16054_v41, %v15032_v28 }
0x3744   : > { %v15049_v46 = vsel %vm775_vm4, %v15043_v44, 0.0 }
0x3745   : > { %15050 = vadd.xlane.f32.xlu0 %v15049_v46  ;;  %v15046_v47 = vsel %vm775_vm4, %v15042_v45, 0.0 }
0x3746   : > { %15047 = vadd.xlane.f32.xlu1 %v15046_v47 }
0x37d2   : > { %v15051_v48 = vpop.xlane.xlu0 %15050 }
0x37d3   : > { %v15053_v62 = vmul.f32 0.03125, %v15051_v48  ;;  %v15048_v60 = vpop.xlane.xlu1 %15047 }
0x37d4   : > { %v15052_v50 = vmul.f32 0.03125, %v15048_v60 }
0x37d5   : > { %v15055_v6 = vsub.f32 %v15043_v44, %v15053_v62 }
0x37d6   : > { %v15054_v51 = vsub.f32 %v15042_v45, %v15052_v50 }
0x37d7   : > { %v15057_v3 = vmul.f32 %v15055_v6, %v15055_v6 }
0x37d8   : > { %v15056_v52 = vmul.f32 %v15054_v51, %v15054_v51 }
0x37d9   : > { %v15061_v36 = vsel %vm775_vm4, %v15057_v3, 0.0 }
0x37da   : > { %15062 = vadd.xlane.f32.xlu0 %v15061_v36  ;;  %v15058_v38 = vsel %vm775_vm4, %v15056_v52, 0.0 }
0x37db   : > { %15059 = vadd.xlane.f32.xlu1 %v15058_v38 }
0x3867   : > { %v15063_v27 = vpop.xlane.xlu0 %15062 }
0x3868   : > { %v15065_v18 = vmul.f32 0.03125, %v15063_v27  ;;  %v15060_v61 = vpop.xlane.xlu1 %15059 }
0x3869   : > { %v15064_v0 = vmul.f32 0.03125, %v15060_v61 }
0x386a   : > { %v15067_v1 = vadd.f32 1e-05, %v15065_v18 }
0x386b   : > { %v15066_v2 = vadd.f32 1e-05, %v15064_v0 }
0x386c   : > { %19843 = vrsqrt.f32 %v15067_v1 }
0x386d   : > { %19845 = vrsqrt.f32 %v15066_v2 }
0x3876   : > { %v19844_v35 = vpop.eup %19843 }
0x3877   : > { %v19846_v5 = vpop.eup %19845  ;;  %v15071_v9 = vmul.f32 %v19844_v35, %v15055_v6 }
0x3878   : > { %v15070_v7 = vmul.f32 %v19846_v5, %v15054_v51 }
0x3879   : > { %v15079_v42 = vmul.f32 %v16055_v4, %v15071_v9 }
0x387a   : > { %v15078_v24 = vmul.f32 %v16055_v4, %v15070_v7 }
0x387b   : > { %v15087_v22 = vadd.f32 %v16056_v10, %v15079_v42 }
0x387c   : > { %v15086_v11 = vadd.f32 %v16056_v10, %v15078_v24 }
0x387e   : > { %18476 = vmatprep.mubr.msk.f32.mxu1 %vm775_vm4, %v15086_v11 }
0x387f   : > { %18477 = vmatmul.mubr.msk.f32.vlgmr.msra.gmra.mrb[170].mxu1 %vm775_vm4, %v15087_v22 }
0x3952   : > { %v18478_v14 = vpop.f32.mrb[170].mxu1 }
0x3953   : > { %v15177_v15 = vadd.f32 %v18478_v14, %v16057_v13  ;;  %v15171_v16 = vpop.f32.mrb[171].mxu1 }
0x3954   : > { %v15172_v17 = vadd.f32 %v16057_v13, %v15171_v16 }
0x3955   : > { %15181 = vst [vmem:[%s650_s28 + $0x8] sm:$0xff] %v15177_v15 }
0x3956   : > { %15180 = vst [vmem:[%s650_s28] sm:$0xff] %v15172_v17 }
0x3957   : > { %19870 = shalt.err (!%p19867_p3)
}
0x3958   : > { %s19871_s24 = scalar_lea.hbm %s22603_s1, 256  ;;  %s19875_s4 = scalar_lea.hbm %s22708_s23, 512 }
0x3959   : > { %p19872_p4 = scmp.ne.s32.totalorder %s22603_s1, %s19871_s24  ;;  %p19876_p9 = scmp.lt.u32.totalorder %s22603_s1, %s22708_s23 }
0x395a   : > { %p19877_p10 = scmp.lt.u32.totalorder %s19875_s4, %s19871_s24  ;;  %p19879_p12 = scmp.lt.u32.totalorder %s19871_s24, %s22603_s1 }
0x395b   : > { %p19873_p7 = pnand %p19872_p4, %p20074_p5 }
0x395c   : > { %p19878_p11 = por %p19877_p10, %p19876_p9 }
0x395d   : > { %p19874_p8 = pneg %p19873_p7 }
0x395e   : > { %p19880_p13 = por %p19879_p12, %p19878_p11 }
0x3960   : > { %p19881_p0 = pnand %p19880_p13, %p19874_p8 }
0x3962   : > { %19884 = shalt.err (!%p19881_p0)
}
0x3963   : > { %s19924_s6 = smov 128   ;;  %s19925_s27 = smov 8  }
0x3964   : > { %19559 = dma.vmem_to_hbm [thread:$0]  (%p20074_p5), %s22598_s0, 256, %s22603_s1, %s22605_s26, %s19924_s6, %s19924_s6, %s19925_s27  }
0x3965 PF: > { %s22709_s30 = sld [smem:[#allocation7_spill]]  ;;  %s22710_s28 = sld [smem:[#allocation5_spill]] }
0x396b   : > { %p19565_p1 = scmp.ge.s32.totalorder %s22709_s30, 2  ;;  %s15211_s2 = sand.u32 1, %s22710_s28  }
0x396c   : > { %s15212_s24 = scalar_lea.sflag [#allocation3], %s15211_s2 }
0x396d   : > { %p19562_p2 = pnand %p19565_p1, %p20078_p6 }
0x396f   : > { %19902 = dma.done.wait (!%p19562_p2), %s15212_s24, 256  }
0x3970   : > { %19904 = vsyncadd (!%p19562_p2), %s15212_s24, 4294967040  ;;  %s22712_s27 = sld [smem:[#allocation8_spill]]  ;;  %s22713_s4 = sld [smem:[#allocation6_spill]] }
0x3971   : > { %s22714_s26 = sld [smem:[#allocation9_spill]]  ;;  %s22715_s2 = smov %s19911_s25 }
0x3976   : > { %p31_p3 = scmp.ge.s32.totalorder %s22712_s27, 4   ;;  %s22716_s25 = smov %s22713_s4 }
0x3978   :  { %33 = sbr.rel (!%p31_p3) target bundleno = 12 (0xc), region = 204 }
0x397f   :  { %15217 = vsyncpa [#allocation3], 1 }
0x3980   :  { %15219 = vsyncpa [#allocation3 + $0x1], 1 }

</bundles_post_ra>
